<compile_context>
chip_gen: v7x
topology: tpu7x:2x2x1
jax: 0.10.0
libtpu: 0.0.40
codegen_flags: <defaults>
</compile_context>

<pallas_src>
import numpy as np
import jax
import jax.numpy as jnp
from jax.experimental import pallas as pl
from jax.experimental.pallas import tpu as pltpu

LANES = 128  # channel padding target = vreg lane width


# ----------------------------------------------------------------------------
# geometry helpers (per image)
# ----------------------------------------------------------------------------
def _geometry(H, W):
    Hf, Wf = H + 1, W + 1          # frame incl. shared zero pad row/col
    R = Hf * Wf                    # frame rows per image
    E = Wf + 1                     # zero extension rows needed for conv reads
    return dict(H=H, W=W, Hf=Hf, Wf=Wf, R=R, E=E)


# ----------------------------------------------------------------------------
# fused encoder kernel (one image per grid step)
# ----------------------------------------------------------------------------
def _make_encoder_kernel(H, W, L):
    """L = len(channels).  Spatial levels 0..L (level L = final pool only)."""
    geoms = [_geometry(H >> s, W >> s) for s in range(L + 1)]

    def kernel(x_ref, w_ref, b_ref, *rest):
        mask_refs = rest[:L - 1]
        out_refs = rest[L - 1:2 * L]
        scratch = rest[2 * L:]
        buf_refs = scratch[:L - 1]
        im_ref = scratch[L - 1]                      # bf16 im2col LHS scratch

        def conv3x3_bias_relu(src_ref, g, widx):
            # 3x3 same-conv + bias + ReLU.  Nine shifted slices become bf16
            # lane-blocks of the im2col LHS; ONE MXU matmul with K=9*128 and
            # f32 accumulation does the whole conv.
            R, Wf, E = g['R'], g['Wf'], g['E']
            for t in range(9):
                dy, dx = t // 3 - 1, t % 3 - 1
                start = E + dy * Wf + dx
                im_ref[0:R, t * LANES:(t + 1) * LANES] = (
                    src_ref[pl.ds(start, R), :].astype(jnp.bfloat16))
            wt = w_ref[widx * 9 * LANES:(widx + 1) * 9 * LANES, :]   # (1152,128) bf16
            acc = jnp.dot(im_ref[0:R, :], wt,
                          preferred_element_type=jnp.float32)
            acc = acc + b_ref[widx:widx + 1, :]
            return jnp.maximum(acc, 0.0)

        def maxpool2x2(src_ref, g_in, dst_ref, dst_base, g_out):
            # 2x2/2 max-pool from the source frame straight into the
            # destination interior: four stride-2 reads + three maxes per
            # output image row, values never leave vregs (no pool scratch).
            Wf_in = g_in['Wf']
            Ho, Wo, Wf_out = g_out['H'], g_out['W'], g_out['Wf']
            for yo in range(Ho):
                r0 = (2 * yo) * Wf_in
                r1 = (2 * yo + 1) * Wf_in
                t00 = src_ref[pl.ds(r0, Wo, stride=2), :]
                t01 = src_ref[pl.ds(r0 + 1, Wo, stride=2), :]
                t10 = src_ref[pl.ds(r1, Wo, stride=2), :]
                t11 = src_ref[pl.ds(r1 + 1, Wo, stride=2), :]
                row = jnp.maximum(jnp.maximum(t00, t01), jnp.maximum(t10, t11))
                dst_ref[pl.ds(dst_base + yo * Wf_out, Wo), :] = row

        # stage 0: conv + relu on the (already zero-padded) input frame
        out_refs[0][...] = conv3x3_bias_relu(x_ref, geoms[0], 0)

        # stages 1..L-1: maxpool -> conv+relu -> conv+relu
        widx = 1
        for s in range(1, L):
            g_prev, g = geoms[s - 1], geoms[s]
            buf = buf_refs[s - 1]
            # pad/extension rows of buf must be zero for the "same"-conv
            # reads; the interior is overwritten right below.  Zeroed per
            # grid step so batch steps stay independent (megacore-safe).
            buf[...] = jnp.zeros_like(buf)
            maxpool2x2(out_refs[s - 1], g_prev, buf, g['E'], g)
            c1 = conv3x3_bias_relu(buf, g, widx) * mask_refs[s - 1][...]
            buf[pl.ds(g['E'], g['R']), :] = c1        # mask re-zeroes pad rows
            out_refs[s][...] = conv3x3_bias_relu(buf, g, widx + 1)
            widx += 2

        # final stage: maxpool only (pad rows of out_refs[L] are never read)
        maxpool2x2(out_refs[L - 1], geoms[L - 1], out_refs[L], 0, geoms[L])

    return kernel, geoms


# ----------------------------------------------------------------------------
# wrapper: layout prep (tiny, one-shot XLA glue) + pallas_call + un-pack
# ----------------------------------------------------------------------------
def _pack_conv_params(params):
    ws, bs = [], []
    for stage in params:
        for (w, b) in stage:
            cout, cin = w.shape[0], w.shape[1]
            wt = jnp.transpose(w, (2, 3, 1, 0)).reshape(9, cin, cout)   # tap-major
            wp = jnp.zeros((9, LANES, LANES), jnp.float32).at[:, :cin, :cout].set(wt)
            ws.append(wp.reshape(9 * LANES, LANES))
            bs.append(jnp.zeros((LANES,), jnp.float32).at[:cout].set(b))
    w_all = jnp.concatenate(ws, axis=0).astype(jnp.bfloat16)   # bf16 MXU operands
    return w_all, jnp.stack(bs, axis=0)


def _build_input_frames(x_nchw, g):
    N, Cin, _, _ = x_nchw.shape
    x = jnp.transpose(x_nchw, (0, 2, 3, 1))                            # NHWC
    x = jnp.pad(x, ((0, 0), (0, 1), (0, 1), (0, LANES - Cin)))         # frame+chan pad
    x = x.reshape(N, g['R'], LANES)
    return jnp.pad(x, ((0, 0), (g['E'], g['E']), (0, 0)))              # extensions


def _interior_mask(g):
    m = np.zeros((g['Hf'], g['Wf']), np.float32)
    m[:g['H'], :g['W']] = 1.0
    return jnp.asarray(m.reshape(g['R'], 1))


def ynet_encoder_forward(x_nchw, params):
    """x_nchw: (N, Cin, H, W) -> list of NCHW features (one per stage)."""
    N, Cin, H, W = x_nchw.shape
    channels = [stage[-1][1].shape[0] for stage in params]
    L = len(channels)
    assert Cin <= LANES and max(channels) <= LANES
    assert H % (1 << L) == 0 and W % (1 << L) == 0

    kernel, geoms = _make_encoder_kernel(H, W, L)
    g0 = geoms[0]
    rows_in = g0['R'] + 2 * g0['E']
    n_convs = 1 + 2 * (L - 1)

    x_buf = _build_input_frames(x_nchw, g0)                 # (N, rows_in, 128)
    w_all, b_all = _pack_conv_params(params)
    masks = [_interior_mask(geoms[s]) for s in range(1, L)]

    in_specs = [
        pl.BlockSpec((None, rows_in, LANES), lambda n: (n, 0, 0)),       # x (per image)
        pl.BlockSpec((n_convs * 9 * LANES, LANES), lambda n: (0, 0)),    # weights (resident)
        pl.BlockSpec((n_convs, LANES), lambda n: (0, 0)),                # biases
    ] + [pl.BlockSpec((geoms[s]['R'], 1), lambda n: (0, 0))              # interior masks
         for s in range(1, L)]

    out_shape = tuple(jax.ShapeDtypeStruct((N, geoms[s]['R'], LANES), jnp.float32)
                      for s in range(L + 1))
    out_specs = tuple(pl.BlockSpec((None, geoms[s]['R'], LANES), lambda n: (n, 0, 0))
                      for s in range(L + 1))

    scratch = [pltpu.VMEM((geoms[s]['R'] + 2 * geoms[s]['E'], LANES), jnp.float32)
               for s in range(1, L)]
    scratch.append(pltpu.VMEM((g0['R'], 9 * LANES), jnp.bfloat16))       # im2col LHS

    outs = pl.pallas_call(
        kernel,
        grid=(N,),
        in_specs=in_specs,
        out_specs=out_specs,
        out_shape=out_shape,
        scratch_shapes=scratch,
        compiler_params=pltpu.CompilerParams(
            dimension_semantics=("parallel",),          # batch-parallel (2 TCs on v7x)
            vmem_limit_bytes=32 * 1024 * 1024),         # actual footprint ~6 MiB/step
    )(x_buf, w_all, b_all, *masks)

    feats = []
    for s in range(L + 1):
        g = geoms[s]
        c = channels[min(s, L - 1)]
        f = outs[s].reshape(N, g['Hf'], g['Wf'], LANES)[:, :g['H'], :g['W'], :c]
        feats.append(jnp.transpose(f, (0, 3, 1, 2)))                     # back to NCHW
    return feats


# ----------------------------------------------------------------------------
# params (match nn.Conv2d(k=3, pad=1, bias=True) init ranges)
# ----------------------------------------------------------------------------
def init_encoder_params(key, in_channels, channels):
    def conv_init(k, cin, cout):
        kw, kb = jax.random.split(k)
        bound = 1.0 / np.sqrt(cin * 9)
        w = jax.random.uniform(kw, (cout, cin, 3, 3), jnp.float32, -bound, bound)
        b = jax.random.uniform(kb, (cout,), jnp.float32, -bound, bound)
        return (w, b)

    n_convs = 1 + 2 * (len(channels) - 1)
    keys = list(jax.random.split(key, n_convs))
    params = [[conv_init(keys.pop(0), in_channels, channels[0])]]
    for i in range(len(channels) - 1):
        params.append([
            conv_init(keys.pop(0), channels[i], channels[i + 1]),
            conv_init(keys.pop(0), channels[i + 1], channels[i + 1]),
        ])
    return params


# ----------------------------------------------------------------------------
# pure-JAX reference (correctness check only, f32)
# ----------------------------------------------------------------------------
def ynet_encoder_reference(x_nchw, params):
    def conv_ref(h, w, b):  # h NHWC
        w_hwio = jnp.transpose(w, (2, 3, 1, 0))
        out = jax.lax.conv_general_dilated(
            h, w_hwio, window_strides=(1, 1), padding=((1, 1), (1, 1)),
            dimension_numbers=("NHWC", "HWIO", "NHWC"))
        return jax.nn.relu(out + b)

    def pool_ref(h):
        return jax.lax.reduce_window(h, -jnp.inf, jax.lax.max,
                                     (1, 2, 2, 1), (1, 2, 2, 1), "VALID")

    feats = []
    h = jnp.transpose(x_nchw, (0, 2, 3, 1))
    w, b = params[0][0]
    h = conv_ref(h, w, b)
    feats.append(h)
    for stage_params in params[1:]:
        h = pool_ref(h)
        for (w, b) in stage_params:
            h = conv_ref(h, w, b)
        feats.append(h)
    h = pool_ref(h)
    feats.append(h)
    return [jnp.transpose(f, (0, 3, 1, 2)) for f in feats]


# ----------------------------------------------------------------------------
if __name__ == "__main__":
    key = jax.random.PRNGKey(0)
    k_x, k_p = jax.random.split(key)

    N, Cin, H, W = 2, 4, 16, 16
    channels = (8, 16, 32, 32)

    x = jax.random.normal(k_x, (N, Cin, H, W), jnp.float32)
    params = init_encoder_params(k_p, Cin, channels)

    fwd = jax.jit(ynet_encoder_forward)
    feats = jax.block_until_ready(fwd(x, params))

    expected_shapes = [
        (N, channels[0], 16, 16),
        (N, channels[1], 8, 8),
        (N, channels[2], 4, 4),
        (N, channels[3], 2, 2),
        (N, channels[3], 1, 1),
    ]
    assert [tuple(f.shape) for f in feats] == expected_shapes

    ref_feats = ynet_encoder_reference(x, params)
    for f, r in zip(feats, ref_feats):
        # bf16 MXU operands with f32 accumulation -> loosened tolerance.
        np.testing.assert_allclose(np.asarray(f), np.asarray(r),
                                   rtol=3e-2, atol=3e-2)

    print("KERNEL_OK")
</pallas_src>

<mosaic_0001>
module attributes {stable_mosaic.version = 11 : i64} {
  func.func @kernel(%arg0: i32, %arg1: memref<1x325x128xf32, #tpu.memory_space<vmem>>, %arg2: memref<8064x128xbf16, #tpu.memory_space<vmem>>, %arg3: memref<7x128xf32, #tpu.memory_space<vmem>>, %arg4: memref<81x1xf32, #tpu.memory_space<vmem>>, %arg5: memref<25x1xf32, #tpu.memory_space<vmem>>, %arg6: memref<9x1xf32, #tpu.memory_space<vmem>>, %arg7: memref<1x289x128xf32, #tpu.memory_space<vmem>>, %arg8: memref<1x81x128xf32, #tpu.memory_space<vmem>>, %arg9: memref<1x25x128xf32, #tpu.memory_space<vmem>>, %arg10: memref<1x9x128xf32, #tpu.memory_space<vmem>>, %arg11: memref<1x4x128xf32, #tpu.memory_space<vmem>>, %arg12: memref<101x128xf32, #tpu.memory_space<vmem>>, %arg13: memref<37x128xf32, #tpu.memory_space<vmem>>, %arg14: memref<17x128xf32, #tpu.memory_space<vmem>>, %arg15: memref<289x1152xbf16, #tpu.memory_space<vmem>>) attributes {dimension_semantics = [#tpu.dimension_semantics<parallel>], iteration_bounds = array<i64: 2>, scalar_prefetch = 0 : i64, scratch_operands = 4 : i64, tpu.core_type = #tpu.core_type<tc>, window_params = [{transform_indices = @transform_0, window_bounds = array<i64: 1, 325, 128>}, {pipeline_mode = #tpu.pipeline_mode<synchronous>, transform_indices = @transform_1, window_bounds = array<i64: 8064, 128>}, {pipeline_mode = #tpu.pipeline_mode<synchronous>, transform_indices = @transform_2, window_bounds = array<i64: 7, 128>}, {pipeline_mode = #tpu.pipeline_mode<synchronous>, transform_indices = @transform_3, window_bounds = array<i64: 81, 1>}, {pipeline_mode = #tpu.pipeline_mode<synchronous>, transform_indices = @transform_4, window_bounds = array<i64: 25, 1>}, {pipeline_mode = #tpu.pipeline_mode<synchronous>, transform_indices = @transform_5, window_bounds = array<i64: 9, 1>}, {transform_indices = @transform_6, window_bounds = array<i64: 1, 289, 128>}, {transform_indices = @transform_7, window_bounds = array<i64: 1, 81, 128>}, {transform_indices = @transform_8, window_bounds = array<i64: 1, 25, 128>}, {transform_indices = @transform_9, window_bounds = array<i64: 1, 9, 128>}, {transform_indices = @transform_10, window_bounds = array<i64: 1, 4, 128>}]} {
    %c0 = arith.constant 0 : index
    %c0_0 = arith.constant 0 : index
    %c0_1 = arith.constant 0 : index
    %0 = vector.load %arg1[%c0, %c0_0, %c0_1] : memref<1x325x128xf32, #tpu.memory_space<vmem>>, vector<1x289x128xf32>
    %1 = vector.shape_cast %0 : vector<1x289x128xf32> to vector<289x128xf32>
    %2 = arith.truncf %1 : vector<289x128xf32> to vector<289x128xbf16>
    %c0_2 = arith.constant 0 : index
    %c0_3 = arith.constant 0 : index
    %3 = vector.load %arg15[%c0_2, %c0_3] : memref<289x1152xbf16, #tpu.memory_space<vmem>>, vector<289x128xbf16>
    tpu.vector_store %arg15[%c0_2, %c0_3], %2 {strides = array<i32>} : memref<289x1152xbf16, #tpu.memory_space<vmem>>, vector<289x128xbf16>,
    %c0_4 = arith.constant 0 : index
    %c1 = arith.constant 1 : index
    %c0_5 = arith.constant 0 : index
    %4 = vector.load %arg1[%c0_4, %c1, %c0_5] : memref<1x325x128xf32, #tpu.memory_space<vmem>>, vector<1x289x128xf32>
    %5 = vector.shape_cast %4 : vector<1x289x128xf32> to vector<289x128xf32>
    %6 = arith.truncf %5 : vector<289x128xf32> to vector<289x128xbf16>
    %c0_6 = arith.constant 0 : index
    %c128 = arith.constant 128 : index
    %7 = vector.load %arg15[%c0_6, %c128] : memref<289x1152xbf16, #tpu.memory_space<vmem>>, vector<289x128xbf16>
    tpu.vector_store %arg15[%c0_6, %c128], %6 {strides = array<i32>} : memref<289x1152xbf16, #tpu.memory_space<vmem>>, vector<289x128xbf16>,
    %c0_7 = arith.constant 0 : index
    %c2 = arith.constant 2 : index
    %c0_8 = arith.constant 0 : index
    %8 = vector.load %arg1[%c0_7, %c2, %c0_8] : memref<1x325x128xf32, #tpu.memory_space<vmem>>, vector<1x289x128xf32>
    %9 = vector.shape_cast %8 : vector<1x289x128xf32> to vector<289x128xf32>
    %10 = arith.truncf %9 : vector<289x128xf32> to vector<289x128xbf16>
    %c0_9 = arith.constant 0 : index
    %c256 = arith.constant 256 : index
    %11 = vector.load %arg15[%c0_9, %c256] : memref<289x1152xbf16, #tpu.memory_space<vmem>>, vector<289x128xbf16>
    tpu.vector_store %arg15[%c0_9, %c256], %10 {strides = array<i32>} : memref<289x1152xbf16, #tpu.memory_space<vmem>>, vector<289x128xbf16>,
    %c0_10 = arith.constant 0 : index
    %c17 = arith.constant 17 : index
    %c0_11 = arith.constant 0 : index
    %12 = vector.load %arg1[%c0_10, %c17, %c0_11] : memref<1x325x128xf32, #tpu.memory_space<vmem>>, vector<1x289x128xf32>
    %13 = vector.shape_cast %12 : vector<1x289x128xf32> to vector<289x128xf32>
    %14 = arith.truncf %13 : vector<289x128xf32> to vector<289x128xbf16>
    %c0_12 = arith.constant 0 : index
    %c384 = arith.constant 384 : index
    %15 = vector.load %arg15[%c0_12, %c384] : memref<289x1152xbf16, #tpu.memory_space<vmem>>, vector<289x128xbf16>
    tpu.vector_store %arg15[%c0_12, %c384], %14 {strides = array<i32>} : memref<289x1152xbf16, #tpu.memory_space<vmem>>, vector<289x128xbf16>,
    %c0_13 = arith.constant 0 : index
    %c18 = arith.constant 18 : index
    %c0_14 = arith.constant 0 : index
    %16 = vector.load %arg1[%c0_13, %c18, %c0_14] : memref<1x325x128xf32, #tpu.memory_space<vmem>>, vector<1x289x128xf32>
    %17 = vector.shape_cast %16 : vector<1x289x128xf32> to vector<289x128xf32>
    %18 = arith.truncf %17 : vector<289x128xf32> to vector<289x128xbf16>
    %c0_15 = arith.constant 0 : index
    %c512 = arith.constant 512 : index
    %19 = vector.load %arg15[%c0_15, %c512] : memref<289x1152xbf16, #tpu.memory_space<vmem>>, vector<289x128xbf16>
    tpu.vector_store %arg15[%c0_15, %c512], %18 {strides = array<i32>} : memref<289x1152xbf16, #tpu.memory_space<vmem>>, vector<289x128xbf16>,
    %c0_16 = arith.constant 0 : index
    %c19 = arith.constant 19 : index
    %c0_17 = arith.constant 0 : index
    %20 = vector.load %arg1[%c0_16, %c19, %c0_17] : memref<1x325x128xf32, #tpu.memory_space<vmem>>, vector<1x289x128xf32>
    %21 = vector.shape_cast %20 : vector<1x289x128xf32> to vector<289x128xf32>
    %22 = arith.truncf %21 : vector<289x128xf32> to vector<289x128xbf16>
    %c0_18 = arith.constant 0 : index
    %c640 = arith.constant 640 : index
    %23 = vector.load %arg15[%c0_18, %c640] : memref<289x1152xbf16, #tpu.memory_space<vmem>>, vector<289x128xbf16>
    tpu.vector_store %arg15[%c0_18, %c640], %22 {strides = array<i32>} : memref<289x1152xbf16, #tpu.memory_space<vmem>>, vector<289x128xbf16>,
    %c0_19 = arith.constant 0 : index
    %c34 = arith.constant 34 : index
    %c0_20 = arith.constant 0 : index
    %24 = vector.load %arg1[%c0_19, %c34, %c0_20] : memref<1x325x128xf32, #tpu.memory_space<vmem>>, vector<1x289x128xf32>
    %25 = vector.shape_cast %24 : vector<1x289x128xf32> to vector<289x128xf32>
    %26 = arith.truncf %25 : vector<289x128xf32> to vector<289x128xbf16>
    %c0_21 = arith.constant 0 : index
    %c768 = arith.constant 768 : index
    %27 = vector.load %arg15[%c0_21, %c768] : memref<289x1152xbf16, #tpu.memory_space<vmem>>, vector<289x128xbf16>
    tpu.vector_store %arg15[%c0_21, %c768], %26 {strides = array<i32>} : memref<289x1152xbf16, #tpu.memory_space<vmem>>, vector<289x128xbf16>,
    %c0_22 = arith.constant 0 : index
    %c35 = arith.constant 35 : index
    %c0_23 = arith.constant 0 : index
    %28 = vector.load %arg1[%c0_22, %c35, %c0_23] : memref<1x325x128xf32, #tpu.memory_space<vmem>>, vector<1x289x128xf32>
    %29 = vector.shape_cast %28 : vector<1x289x128xf32> to vector<289x128xf32>
    %30 = arith.truncf %29 : vector<289x128xf32> to vector<289x128xbf16>
    %c0_24 = arith.constant 0 : index
    %c896 = arith.constant 896 : index
    %31 = vector.load %arg15[%c0_24, %c896] : memref<289x1152xbf16, #tpu.memory_space<vmem>>, vector<289x128xbf16>
    tpu.vector_store %arg15[%c0_24, %c896], %30 {strides = array<i32>} : memref<289x1152xbf16, #tpu.memory_space<vmem>>, vector<289x128xbf16>,
    %c0_25 = arith.constant 0 : index
    %c36 = arith.constant 36 : index
    %c0_26 = arith.constant 0 : index
    %32 = vector.load %arg1[%c0_25, %c36, %c0_26] : memref<1x325x128xf32, #tpu.memory_space<vmem>>, vector<1x289x128xf32>
    %33 = vector.shape_cast %32 : vector<1x289x128xf32> to vector<289x128xf32>
    %34 = arith.truncf %33 : vector<289x128xf32> to vector<289x128xbf16>
    %c0_27 = arith.constant 0 : index
    %c1024 = arith.constant 1024 : index
    %35 = vector.load %arg15[%c0_27, %c1024] : memref<289x1152xbf16, #tpu.memory_space<vmem>>, vector<289x128xbf16>
    tpu.vector_store %arg15[%c0_27, %c1024], %34 {strides = array<i32>} : memref<289x1152xbf16, #tpu.memory_space<vmem>>, vector<289x128xbf16>,
    %c0_28 = arith.constant 0 : index
    %c0_29 = arith.constant 0 : index
    %36 = vector.load %arg2[%c0_28, %c0_29] : memref<8064x128xbf16, #tpu.memory_space<vmem>>, vector<1152x128xbf16>
    %c0_30 = arith.constant 0 : index
    %c0_31 = arith.constant 0 : index
    %37 = vector.load %arg15[%c0_30, %c0_31] : memref<289x1152xbf16, #tpu.memory_space<vmem>>, vector<289x1152xbf16>
    %cst = arith.constant dense<0.000000e+00> : vector<289x128xf32>
    %38 = tpu.matmul %37, %36, %cst {dimension_numbers = #tpu.dot_dimension_numbers<[1], [0], [0], [1], [0, 0, 1, 1], [], []>} : vector<289x1152xbf16>, vector<1152x128xbf16>, vector<289x128xf32> -> vector<289x128xf32>
    %c0_32 = arith.constant 0 : index
    %c0_33 = arith.constant 0 : index
    %39 = vector.load %arg3[%c0_32, %c0_33] : memref<7x128xf32, #tpu.memory_space<vmem>>, vector<1x128xf32>
    %40 = vector.broadcast %39 : vector<1x128xf32> to vector<289x128xf32>
    %41 = arith.addf %38, %40 : vector<289x128xf32>
    %cst_34 = arith.constant 0.000000e+00 : f32
    %42 = vector.broadcast %cst_34 : f32 to vector<289x128xf32>
    %43 = arith.maximumf %41, %42 : vector<289x128xf32>
    %c0_35 = arith.constant 0 : index
    %c0_36 = arith.constant 0 : index
    %c0_37 = arith.constant 0 : index
    %44 = vector.load %arg7[%c0_35, %c0_36, %c0_37] : memref<1x289x128xf32, #tpu.memory_space<vmem>>, vector<1x289x128xf32>
    %45 = vector.shape_cast %44 : vector<1x289x128xf32> to vector<289x128xf32>
    %46 = vector.shape_cast %43 : vector<289x128xf32> to vector<1x289x128xf32>
    tpu.vector_store %arg7[%c0_35, %c0_36, %c0_37], %46 {strides = array<i32>} : memref<1x289x128xf32, #tpu.memory_space<vmem>>, vector<1x289x128xf32>,
    %cst_38 = arith.constant 0.000000e+00 : f32
    %47 = vector.broadcast %cst_38 : f32 to vector<101x128xf32>
    %c0_39 = arith.constant 0 : index
    %c0_40 = arith.constant 0 : index
    %48 = vector.load %arg12[%c0_39, %c0_40] : memref<101x128xf32, #tpu.memory_space<vmem>>, vector<101x128xf32>
    tpu.vector_store %arg12[%c0_39, %c0_40], %47 {strides = array<i32>} : memref<101x128xf32, #tpu.memory_space<vmem>>, vector<101x128xf32>,
    %c0_41 = arith.constant 0 : index
    %c0_42 = arith.constant 0 : index
    %c0_43 = arith.constant 0 : index
    %49 = tpu.strided_load %arg7[%c0_41, %c0_42, %c0_43] {strides = array<i32: 1, 2, 1>} : memref<1x289x128xf32, #tpu.memory_space<vmem>>, vector<1x8x128xf32>
    %50 = vector.shape_cast %49 : vector<1x8x128xf32> to vector<8x128xf32>
    %c0_44 = arith.constant 0 : index
    %c1_45 = arith.constant 1 : index
    %c0_46 = arith.constant 0 : index
    %51 = tpu.strided_load %arg7[%c0_44, %c1_45, %c0_46] {strides = array<i32: 1, 2, 1>} : memref<1x289x128xf32, #tpu.memory_space<vmem>>, vector<1x8x128xf32>
    %52 = vector.shape_cast %51 : vector<1x8x128xf32> to vector<8x128xf32>
    %c0_47 = arith.constant 0 : index
    %c17_48 = arith.constant 17 : index
    %c0_49 = arith.constant 0 : index
    %53 = tpu.strided_load %arg7[%c0_47, %c17_48, %c0_49] {strides = array<i32: 1, 2, 1>} : memref<1x289x128xf32, #tpu.memory_space<vmem>>, vector<1x8x128xf32>
    %54 = vector.shape_cast %53 : vector<1x8x128xf32> to vector<8x128xf32>
    %c0_50 = arith.constant 0 : index
    %c18_51 = arith.constant 18 : index
    %c0_52 = arith.constant 0 : index
    %55 = tpu.strided_load %arg7[%c0_50, %c18_51, %c0_52] {strides = array<i32: 1, 2, 1>} : memref<1x289x128xf32, #tpu.memory_space<vmem>>, vector<1x8x128xf32>
    %56 = vector.shape_cast %55 : vector<1x8x128xf32> to vector<8x128xf32>
    %57 = arith.maximumf %50, %52 : vector<8x128xf32>
    %58 = arith.maximumf %54, %56 : vector<8x128xf32>
    %59 = arith.maximumf %57, %58 : vector<8x128xf32>
    %c10 = arith.constant 10 : index
    %c0_53 = arith.constant 0 : index
    %60 = vector.load %arg12[%c10, %c0_53] : memref<101x128xf32, #tpu.memory_space<vmem>>, vector<8x128xf32>
    tpu.vector_store %arg12[%c10, %c0_53], %59 {strides = array<i32>} : memref<101x128xf32, #tpu.memory_space<vmem>>, vector<8x128xf32>,
    %c0_54 = arith.constant 0 : index
    %c34_55 = arith.constant 34 : index
    %c0_56 = arith.constant 0 : index
    %61 = tpu.strided_load %arg7[%c0_54, %c34_55, %c0_56] {strides = array<i32: 1, 2, 1>} : memref<1x289x128xf32, #tpu.memory_space<vmem>>, vector<1x8x128xf32>
    %62 = vector.shape_cast %61 : vector<1x8x128xf32> to vector<8x128xf32>
    %c0_57 = arith.constant 0 : index
    %c35_58 = arith.constant 35 : index
    %c0_59 = arith.constant 0 : index
    %63 = tpu.strided_load %arg7[%c0_57, %c35_58, %c0_59] {strides = array<i32: 1, 2, 1>} : memref<1x289x128xf32, #tpu.memory_space<vmem>>, vector<1x8x128xf32>
    %64 = vector.shape_cast %63 : vector<1x8x128xf32> to vector<8x128xf32>
    %c0_60 = arith.constant 0 : index
    %c51 = arith.constant 51 : index
    %c0_61 = arith.constant 0 : index
    %65 = tpu.strided_load %arg7[%c0_60, %c51, %c0_61] {strides = array<i32: 1, 2, 1>} : memref<1x289x128xf32, #tpu.memory_space<vmem>>, vector<1x8x128xf32>
    %66 = vector.shape_cast %65 : vector<1x8x128xf32> to vector<8x128xf32>
    %c0_62 = arith.constant 0 : index
    %c52 = arith.constant 52 : index
    %c0_63 = arith.constant 0 : index
    %67 = tpu.strided_load %arg7[%c0_62, %c52, %c0_63] {strides = array<i32: 1, 2, 1>} : memref<1x289x128xf32, #tpu.memory_space<vmem>>, vector<1x8x128xf32>
    %68 = vector.shape_cast %67 : vector<1x8x128xf32> to vector<8x128xf32>
    %69 = arith.maximumf %62, %64 : vector<8x128xf32>
    %70 = arith.maximumf %66, %68 : vector<8x128xf32>
    %71 = arith.maximumf %69, %70 : vector<8x128xf32>
    %c19_64 = arith.constant 19 : index
    %c0_65 = arith.constant 0 : index
    %72 = vector.load %arg12[%c19_64, %c0_65] : memref<101x128xf32, #tpu.memory_space<vmem>>, vector<8x128xf32>
    tpu.vector_store %arg12[%c19_64, %c0_65], %71 {strides = array<i32>} : memref<101x128xf32, #tpu.memory_space<vmem>>, vector<8x128xf32>,
    %c0_66 = arith.constant 0 : index
    %c68 = arith.constant 68 : index
    %c0_67 = arith.constant 0 : index
    %73 = tpu.strided_load %arg7[%c0_66, %c68, %c0_67] {strides = array<i32: 1, 2, 1>} : memref<1x289x128xf32, #tpu.memory_space<vmem>>, vector<1x8x128xf32>
    %74 = vector.shape_cast %73 : vector<1x8x128xf32> to vector<8x128xf32>
    %c0_68 = arith.constant 0 : index
    %c69 = arith.constant 69 : index
    %c0_69 = arith.constant 0 : index
    %75 = tpu.strided_load %arg7[%c0_68, %c69, %c0_69] {strides = array<i32: 1, 2, 1>} : memref<1x289x128xf32, #tpu.memory_space<vmem>>, vector<1x8x128xf32>
    %76 = vector.shape_cast %75 : vector<1x8x128xf32> to vector<8x128xf32>
    %c0_70 = arith.constant 0 : index
    %c85 = arith.constant 85 : index
    %c0_71 = arith.constant 0 : index
    %77 = tpu.strided_load %arg7[%c0_70, %c85, %c0_71] {strides = array<i32: 1, 2, 1>} : memref<1x289x128xf32, #tpu.memory_space<vmem>>, vector<1x8x128xf32>
    %78 = vector.shape_cast %77 : vector<1x8x128xf32> to vector<8x128xf32>
    %c0_72 = arith.constant 0 : index
    %c86 = arith.constant 86 : index
    %c0_73 = arith.constant 0 : index
    %79 = tpu.strided_load %arg7[%c0_72, %c86, %c0_73] {strides = array<i32: 1, 2, 1>} : memref<1x289x128xf32, #tpu.memory_space<vmem>>, vector<1x8x128xf32>
    %80 = vector.shape_cast %79 : vector<1x8x128xf32> to vector<8x128xf32>
    %81 = arith.maximumf %74, %76 : vector<8x128xf32>
    %82 = arith.maximumf %78, %80 : vector<8x128xf32>
    %83 = arith.maximumf %81, %82 : vector<8x128xf32>
    %c28 = arith.constant 28 : index
    %c0_74 = arith.constant 0 : index
    %84 = vector.load %arg12[%c28, %c0_74] : memref<101x128xf32, #tpu.memory_space<vmem>>, vector<8x128xf32>
    tpu.vector_store %arg12[%c28, %c0_74], %83 {strides = array<i32>} : memref<101x128xf32, #tpu.memory_space<vmem>>, vector<8x128xf32>,
    %c0_75 = arith.constant 0 : index
    %c102 = arith.constant 102 : index
    %c0_76 = arith.constant 0 : index
    %85 = tpu.strided_load %arg7[%c0_75, %c102, %c0_76] {strides = array<i32: 1, 2, 1>} : memref<1x289x128xf32, #tpu.memory_space<vmem>>, vector<1x8x128xf32>
    %86 = vector.shape_cast %85 : vector<1x8x128xf32> to vector<8x128xf32>
    %c0_77 = arith.constant 0 : index
    %c103 = arith.constant 103 : index
    %c0_78 = arith.constant 0 : index
    %87 = tpu.strided_load %arg7[%c0_77, %c103, %c0_78] {strides = array<i32: 1, 2, 1>} : memref<1x289x128xf32, #tpu.memory_space<vmem>>, vector<1x8x128xf32>
    %88 = vector.shape_cast %87 : vector<1x8x128xf32> to vector<8x128xf32>
    %c0_79 = arith.constant 0 : index
    %c119 = arith.constant 119 : index
    %c0_80 = arith.constant 0 : index
    %89 = tpu.strided_load %arg7[%c0_79, %c119, %c0_80] {strides = array<i32: 1, 2, 1>} : memref<1x289x128xf32, #tpu.memory_space<vmem>>, vector<1x8x128xf32>
    %90 = vector.shape_cast %89 : vector<1x8x128xf32> to vector<8x128xf32>
    %c0_81 = arith.constant 0 : index
    %c120 = arith.constant 120 : index
    %c0_82 = arith.constant 0 : index
    %91 = tpu.strided_load %arg7[%c0_81, %c120, %c0_82] {strides = array<i32: 1, 2, 1>} : memref<1x289x128xf32, #tpu.memory_space<vmem>>, vector<1x8x128xf32>
    %92 = vector.shape_cast %91 : vector<1x8x128xf32> to vector<8x128xf32>
    %93 = arith.maximumf %86, %88 : vector<8x128xf32>
    %94 = arith.maximumf %90, %92 : vector<8x128xf32>
    %95 = arith.maximumf %93, %94 : vector<8x128xf32>
    %c37 = arith.constant 37 : index
    %c0_83 = arith.constant 0 : index
    %96 = vector.load %arg12[%c37, %c0_83] : memref<101x128xf32, #tpu.memory_space<vmem>>, vector<8x128xf32>
    tpu.vector_store %arg12[%c37, %c0_83], %95 {strides = array<i32>} : memref<101x128xf32, #tpu.memory_space<vmem>>, vector<8x128xf32>,
    %c0_84 = arith.constant 0 : index
    %c136 = arith.constant 136 : index
    %c0_85 = arith.constant 0 : index
    %97 = tpu.strided_load %arg7[%c0_84, %c136, %c0_85] {strides = array<i32: 1, 2, 1>} : memref<1x289x128xf32, #tpu.memory_space<vmem>>, vector<1x8x128xf32>
    %98 = vector.shape_cast %97 : vector<1x8x128xf32> to vector<8x128xf32>
    %c0_86 = arith.constant 0 : index
    %c137 = arith.constant 137 : index
    %c0_87 = arith.constant 0 : index
    %99 = tpu.strided_load %arg7[%c0_86, %c137, %c0_87] {strides = array<i32: 1, 2, 1>} : memref<1x289x128xf32, #tpu.memory_space<vmem>>, vector<1x8x128xf32>
    %100 = vector.shape_cast %99 : vector<1x8x128xf32> to vector<8x128xf32>
    %c0_88 = arith.constant 0 : index
    %c153 = arith.constant 153 : index
    %c0_89 = arith.constant 0 : index
    %101 = tpu.strided_load %arg7[%c0_88, %c153, %c0_89] {strides = array<i32: 1, 2, 1>} : memref<1x289x128xf32, #tpu.memory_space<vmem>>, vector<1x8x128xf32>
    %102 = vector.shape_cast %101 : vector<1x8x128xf32> to vector<8x128xf32>
    %c0_90 = arith.constant 0 : index
    %c154 = arith.constant 154 : index
    %c0_91 = arith.constant 0 : index
    %103 = tpu.strided_load %arg7[%c0_90, %c154, %c0_91] {strides = array<i32: 1, 2, 1>} : memref<1x289x128xf32, #tpu.memory_space<vmem>>, vector<1x8x128xf32>
    %104 = vector.shape_cast %103 : vector<1x8x128xf32> to vector<8x128xf32>
    %105 = arith.maximumf %98, %100 : vector<8x128xf32>
    %106 = arith.maximumf %102, %104 : vector<8x128xf32>
    %107 = arith.maximumf %105, %106 : vector<8x128xf32>
    %c46 = arith.constant 46 : index
    %c0_92 = arith.constant 0 : index
    %108 = vector.load %arg12[%c46, %c0_92] : memref<101x128xf32, #tpu.memory_space<vmem>>, vector<8x128xf32>
    tpu.vector_store %arg12[%c46, %c0_92], %107 {strides = array<i32>} : memref<101x128xf32, #tpu.memory_space<vmem>>, vector<8x128xf32>,
    %c0_93 = arith.constant 0 : index
    %c170 = arith.constant 170 : index
    %c0_94 = arith.constant 0 : index
    %109 = tpu.strided_load %arg7[%c0_93, %c170, %c0_94] {strides = array<i32: 1, 2, 1>} : memref<1x289x128xf32, #tpu.memory_space<vmem>>, vector<1x8x128xf32>
    %110 = vector.shape_cast %109 : vector<1x8x128xf32> to vector<8x128xf32>
    %c0_95 = arith.constant 0 : index
    %c171 = arith.constant 171 : index
    %c0_96 = arith.constant 0 : index
    %111 = tpu.strided_load %arg7[%c0_95, %c171, %c0_96] {strides = array<i32: 1, 2, 1>} : memref<1x289x128xf32, #tpu.memory_space<vmem>>, vector<1x8x128xf32>
    %112 = vector.shape_cast %111 : vector<1x8x128xf32> to vector<8x128xf32>
    %c0_97 = arith.constant 0 : index
    %c187 = arith.constant 187 : index
    %c0_98 = arith.constant 0 : index
    %113 = tpu.strided_load %arg7[%c0_97, %c187, %c0_98] {strides = array<i32: 1, 2, 1>} : memref<1x289x128xf32, #tpu.memory_space<vmem>>, vector<1x8x128xf32>
    %114 = vector.shape_cast %113 : vector<1x8x128xf32> to vector<8x128xf32>
    %c0_99 = arith.constant 0 : index
    %c188 = arith.constant 188 : index
    %c0_100 = arith.constant 0 : index
    %115 = tpu.strided_load %arg7[%c0_99, %c188, %c0_100] {strides = array<i32: 1, 2, 1>} : memref<1x289x128xf32, #tpu.memory_space<vmem>>, vector<1x8x128xf32>
    %116 = vector.shape_cast %115 : vector<1x8x128xf32> to vector<8x128xf32>
    %117 = arith.maximumf %110, %112 : vector<8x128xf32>
    %118 = arith.maximumf %114, %116 : vector<8x128xf32>
    %119 = arith.maximumf %117, %118 : vector<8x128xf32>
    %c55 = arith.constant 55 : index
    %c0_101 = arith.constant 0 : index
    %120 = vector.load %arg12[%c55, %c0_101] : memref<101x128xf32, #tpu.memory_space<vmem>>, vector<8x128xf32>
    tpu.vector_store %arg12[%c55, %c0_101], %119 {strides = array<i32>} : memref<101x128xf32, #tpu.memory_space<vmem>>, vector<8x128xf32>,
    %c0_102 = arith.constant 0 : index
    %c204 = arith.constant 204 : index
    %c0_103 = arith.constant 0 : index
    %121 = tpu.strided_load %arg7[%c0_102, %c204, %c0_103] {strides = array<i32: 1, 2, 1>} : memref<1x289x128xf32, #tpu.memory_space<vmem>>, vector<1x8x128xf32>
    %122 = vector.shape_cast %121 : vector<1x8x128xf32> to vector<8x128xf32>
    %c0_104 = arith.constant 0 : index
    %c205 = arith.constant 205 : index
    %c0_105 = arith.constant 0 : index
    %123 = tpu.strided_load %arg7[%c0_104, %c205, %c0_105] {strides = array<i32: 1, 2, 1>} : memref<1x289x128xf32, #tpu.memory_space<vmem>>, vector<1x8x128xf32>
    %124 = vector.shape_cast %123 : vector<1x8x128xf32> to vector<8x128xf32>
    %c0_106 = arith.constant 0 : index
    %c221 = arith.constant 221 : index
    %c0_107 = arith.constant 0 : index
    %125 = tpu.strided_load %arg7[%c0_106, %c221, %c0_107] {strides = array<i32: 1, 2, 1>} : memref<1x289x128xf32, #tpu.memory_space<vmem>>, vector<1x8x128xf32>
    %126 = vector.shape_cast %125 : vector<1x8x128xf32> to vector<8x128xf32>
    %c0_108 = arith.constant 0 : index
    %c222 = arith.constant 222 : index
    %c0_109 = arith.constant 0 : index
    %127 = tpu.strided_load %arg7[%c0_108, %c222, %c0_109] {strides = array<i32: 1, 2, 1>} : memref<1x289x128xf32, #tpu.memory_space<vmem>>, vector<1x8x128xf32>
    %128 = vector.shape_cast %127 : vector<1x8x128xf32> to vector<8x128xf32>
    %129 = arith.maximumf %122, %124 : vector<8x128xf32>
    %130 = arith.maximumf %126, %128 : vector<8x128xf32>
    %131 = arith.maximumf %129, %130 : vector<8x128xf32>
    %c64 = arith.constant 64 : index
    %c0_110 = arith.constant 0 : index
    %132 = vector.load %arg12[%c64, %c0_110] : memref<101x128xf32, #tpu.memory_space<vmem>>, vector<8x128xf32>
    tpu.vector_store %arg12[%c64, %c0_110], %131 {strides = array<i32>} : memref<101x128xf32, #tpu.memory_space<vmem>>, vector<8x128xf32>,
    %c0_111 = arith.constant 0 : index
    %c238 = arith.constant 238 : index
    %c0_112 = arith.constant 0 : index
    %133 = tpu.strided_load %arg7[%c0_111, %c238, %c0_112] {strides = array<i32: 1, 2, 1>} : memref<1x289x128xf32, #tpu.memory_space<vmem>>, vector<1x8x128xf32>
    %134 = vector.shape_cast %133 : vector<1x8x128xf32> to vector<8x128xf32>
    %c0_113 = arith.constant 0 : index
    %c239 = arith.constant 239 : index
    %c0_114 = arith.constant 0 : index
    %135 = tpu.strided_load %arg7[%c0_113, %c239, %c0_114] {strides = array<i32: 1, 2, 1>} : memref<1x289x128xf32, #tpu.memory_space<vmem>>, vector<1x8x128xf32>
    %136 = vector.shape_cast %135 : vector<1x8x128xf32> to vector<8x128xf32>
    %c0_115 = arith.constant 0 : index
    %c255 = arith.constant 255 : index
    %c0_116 = arith.constant 0 : index
    %137 = tpu.strided_load %arg7[%c0_115, %c255, %c0_116] {strides = array<i32: 1, 2, 1>} : memref<1x289x128xf32, #tpu.memory_space<vmem>>, vector<1x8x128xf32>
    %138 = vector.shape_cast %137 : vector<1x8x128xf32> to vector<8x128xf32>
    %c0_117 = arith.constant 0 : index
    %c256_118 = arith.constant 256 : index
    %c0_119 = arith.constant 0 : index
    %139 = tpu.strided_load %arg7[%c0_117, %c256_118, %c0_119] {strides = array<i32: 1, 2, 1>} : memref<1x289x128xf32, #tpu.memory_space<vmem>>, vector<1x8x128xf32>
    %140 = vector.shape_cast %139 : vector<1x8x128xf32> to vector<8x128xf32>
    %141 = arith.maximumf %134, %136 : vector<8x128xf32>
    %142 = arith.maximumf %138, %140 : vector<8x128xf32>
    %143 = arith.maximumf %141, %142 : vector<8x128xf32>
    %c73 = arith.constant 73 : index
    %c0_120 = arith.constant 0 : index
    %144 = vector.load %arg12[%c73, %c0_120] : memref<101x128xf32, #tpu.memory_space<vmem>>, vector<8x128xf32>
    tpu.vector_store %arg12[%c73, %c0_120], %143 {strides = array<i32>} : memref<101x128xf32, #tpu.memory_space<vmem>>, vector<8x128xf32>,
    %c0_121 = arith.constant 0 : index
    %c0_122 = arith.constant 0 : index
    %145 = vector.load %arg12[%c0_121, %c0_122] : memref<101x128xf32, #tpu.memory_space<vmem>>, vector<81x128xf32>
    %146 = arith.truncf %145 : vector<81x128xf32> to vector<81x128xbf16>
    %c0_123 = arith.constant 0 : index
    %c0_124 = arith.constant 0 : index
    %147 = vector.load %arg15[%c0_123, %c0_124] : memref<289x1152xbf16, #tpu.memory_space<vmem>>, vector<81x128xbf16>
    tpu.vector_store %arg15[%c0_123, %c0_124], %146 {strides = array<i32>} : memref<289x1152xbf16, #tpu.memory_space<vmem>>, vector<81x128xbf16>,
    %c1_125 = arith.constant 1 : index
    %c0_126 = arith.constant 0 : index
    %148 = vector.load %arg12[%c1_125, %c0_126] : memref<101x128xf32, #tpu.memory_space<vmem>>, vector<81x128xf32>
    %149 = arith.truncf %148 : vector<81x128xf32> to vector<81x128xbf16>
    %c0_127 = arith.constant 0 : index
    %c128_128 = arith.constant 128 : index
    %150 = vector.load %arg15[%c0_127, %c128_128] : memref<289x1152xbf16, #tpu.memory_space<vmem>>, vector<81x128xbf16>
    tpu.vector_store %arg15[%c0_127, %c128_128], %149 {strides = array<i32>} : memref<289x1152xbf16, #tpu.memory_space<vmem>>, vector<81x128xbf16>,
    %c2_129 = arith.constant 2 : index
    %c0_130 = arith.constant 0 : index
    %151 = vector.load %arg12[%c2_129, %c0_130] : memref<101x128xf32, #tpu.memory_space<vmem>>, vector<81x128xf32>
    %152 = arith.truncf %151 : vector<81x128xf32> to vector<81x128xbf16>
    %c0_131 = arith.constant 0 : index
    %c256_132 = arith.constant 256 : index
    %153 = vector.load %arg15[%c0_131, %c256_132] : memref<289x1152xbf16, #tpu.memory_space<vmem>>, vector<81x128xbf16>
    tpu.vector_store %arg15[%c0_131, %c256_132], %152 {strides = array<i32>} : memref<289x1152xbf16, #tpu.memory_space<vmem>>, vector<81x128xbf16>,
    %c9 = arith.constant 9 : index
    %c0_133 = arith.constant 0 : index
    %154 = vector.load %arg12[%c9, %c0_133] : memref<101x128xf32, #tpu.memory_space<vmem>>, vector<81x128xf32>
    %155 = arith.truncf %154 : vector<81x128xf32> to vector<81x128xbf16>
    %c0_134 = arith.constant 0 : index
    %c384_135 = arith.constant 384 : index
    %156 = vector.load %arg15[%c0_134, %c384_135] : memref<289x1152xbf16, #tpu.memory_space<vmem>>, vector<81x128xbf16>
    tpu.vector_store %arg15[%c0_134, %c384_135], %155 {strides = array<i32>} : memref<289x1152xbf16, #tpu.memory_space<vmem>>, vector<81x128xbf16>,
    %c10_136 = arith.constant 10 : index
    %c0_137 = arith.constant 0 : index
    %157 = vector.load %arg12[%c10_136, %c0_137] : memref<101x128xf32, #tpu.memory_space<vmem>>, vector<81x128xf32>
    %158 = arith.truncf %157 : vector<81x128xf32> to vector<81x128xbf16>
    %c0_138 = arith.constant 0 : index
    %c512_139 = arith.constant 512 : index
    %159 = vector.load %arg15[%c0_138, %c512_139] : memref<289x1152xbf16, #tpu.memory_space<vmem>>, vector<81x128xbf16>
    tpu.vector_store %arg15[%c0_138, %c512_139], %158 {strides = array<i32>} : memref<289x1152xbf16, #tpu.memory_space<vmem>>, vector<81x128xbf16>,
    %c11 = arith.constant 11 : index
    %c0_140 = arith.constant 0 : index
    %160 = vector.load %arg12[%c11, %c0_140] : memref<101x128xf32, #tpu.memory_space<vmem>>, vector<81x128xf32>
    %161 = arith.truncf %160 : vector<81x128xf32> to vector<81x128xbf16>
    %c0_141 = arith.constant 0 : index
    %c640_142 = arith.constant 640 : index
    %162 = vector.load %arg15[%c0_141, %c640_142] : memref<289x1152xbf16, #tpu.memory_space<vmem>>, vector<81x128xbf16>
    tpu.vector_store %arg15[%c0_141, %c640_142], %161 {strides = array<i32>} : memref<289x1152xbf16, #tpu.memory_space<vmem>>, vector<81x128xbf16>,
    %c18_143 = arith.constant 18 : index
    %c0_144 = arith.constant 0 : index
    %163 = vector.load %arg12[%c18_143, %c0_144] : memref<101x128xf32, #tpu.memory_space<vmem>>, vector<81x128xf32>
    %164 = arith.truncf %163 : vector<81x128xf32> to vector<81x128xbf16>
    %c0_145 = arith.constant 0 : index
    %c768_146 = arith.constant 768 : index
    %165 = vector.load %arg15[%c0_145, %c768_146] : memref<289x1152xbf16, #tpu.memory_space<vmem>>, vector<81x128xbf16>
    tpu.vector_store %arg15[%c0_145, %c768_146], %164 {strides = array<i32>} : memref<289x1152xbf16, #tpu.memory_space<vmem>>, vector<81x128xbf16>,
    %c19_147 = arith.constant 19 : index
    %c0_148 = arith.constant 0 : index
    %166 = vector.load %arg12[%c19_147, %c0_148] : memref<101x128xf32, #tpu.memory_space<vmem>>, vector<81x128xf32>
    %167 = arith.truncf %166 : vector<81x128xf32> to vector<81x128xbf16>
    %c0_149 = arith.constant 0 : index
    %c896_150 = arith.constant 896 : index
    %168 = vector.load %arg15[%c0_149, %c896_150] : memref<289x1152xbf16, #tpu.memory_space<vmem>>, vector<81x128xbf16>
    tpu.vector_store %arg15[%c0_149, %c896_150], %167 {strides = array<i32>} : memref<289x1152xbf16, #tpu.memory_space<vmem>>, vector<81x128xbf16>,
    %c20 = arith.constant 20 : index
    %c0_151 = arith.constant 0 : index
    %169 = vector.load %arg12[%c20, %c0_151] : memref<101x128xf32, #tpu.memory_space<vmem>>, vector<81x128xf32>
    %170 = arith.truncf %169 : vector<81x128xf32> to vector<81x128xbf16>
    %c0_152 = arith.constant 0 : index
    %c1024_153 = arith.constant 1024 : index
    %171 = vector.load %arg15[%c0_152, %c1024_153] : memref<289x1152xbf16, #tpu.memory_space<vmem>>, vector<81x128xbf16>
    tpu.vector_store %arg15[%c0_152, %c1024_153], %170 {strides = array<i32>} : memref<289x1152xbf16, #tpu.memory_space<vmem>>, vector<81x128xbf16>,
    %c1152 = arith.constant 1152 : index
    %c0_154 = arith.constant 0 : index
    %172 = vector.load %arg2[%c1152, %c0_154] : memref<8064x128xbf16, #tpu.memory_space<vmem>>, vector<1152x128xbf16>
    %c0_155 = arith.constant 0 : index
    %c0_156 = arith.constant 0 : index
    %173 = vector.load %arg15[%c0_155, %c0_156] : memref<289x1152xbf16, #tpu.memory_space<vmem>>, vector<81x1152xbf16>
    %cst_157 = arith.constant dense<0.000000e+00> : vector<81x128xf32>
    %174 = tpu.matmul %173, %172, %cst_157 {dimension_numbers = #tpu.dot_dimension_numbers<[1], [0], [0], [1], [0, 0, 1, 1], [], []>} : vector<81x1152xbf16>, vector<1152x128xbf16>, vector<81x128xf32> -> vector<81x128xf32>
    %c1_158 = arith.constant 1 : index
    %c0_159 = arith.constant 0 : index
    %175 = vector.load %arg3[%c1_158, %c0_159] : memref<7x128xf32, #tpu.memory_space<vmem>>, vector<1x128xf32>
    %176 = vector.broadcast %175 : vector<1x128xf32> to vector<81x128xf32>
    %177 = arith.addf %174, %176 : vector<81x128xf32>
    %cst_160 = arith.constant 0.000000e+00 : f32
    %178 = vector.broadcast %cst_160 : f32 to vector<81x128xf32>
    %179 = arith.maximumf %177, %178 : vector<81x128xf32>
    %c0_161 = arith.constant 0 : index
    %c0_162 = arith.constant 0 : index
    %180 = vector.load %arg4[%c0_161, %c0_162] : memref<81x1xf32, #tpu.memory_space<vmem>>, vector<81x1xf32>
    %181 = vector.broadcast %180 : vector<81x1xf32> to vector<81x128xf32>
    %182 = arith.mulf %179, %181 : vector<81x128xf32>
    %c10_163 = arith.constant 10 : index
    %c0_164 = arith.constant 0 : index
    %183 = vector.load %arg12[%c10_163, %c0_164] : memref<101x128xf32, #tpu.memory_space<vmem>>, vector<81x128xf32>
    tpu.vector_store %arg12[%c10_163, %c0_164], %182 {strides = array<i32>} : memref<101x128xf32, #tpu.memory_space<vmem>>, vector<81x128xf32>,
    %c0_165 = arith.constant 0 : index
    %c0_166 = arith.constant 0 : index
    %184 = vector.load %arg12[%c0_165, %c0_166] : memref<101x128xf32, #tpu.memory_space<vmem>>, vector<81x128xf32>
    %185 = arith.truncf %184 : vector<81x128xf32> to vector<81x128xbf16>
    %c0_167 = arith.constant 0 : index
    %c0_168 = arith.constant 0 : index
    %186 = vector.load %arg15[%c0_167, %c0_168] : memref<289x1152xbf16, #tpu.memory_space<vmem>>, vector<81x128xbf16>
    tpu.vector_store %arg15[%c0_167, %c0_168], %185 {strides = array<i32>} : memref<289x1152xbf16, #tpu.memory_space<vmem>>, vector<81x128xbf16>,
    %c1_169 = arith.constant 1 : index
    %c0_170 = arith.constant 0 : index
    %187 = vector.load %arg12[%c1_169, %c0_170] : memref<101x128xf32, #tpu.memory_space<vmem>>, vector<81x128xf32>
    %188 = arith.truncf %187 : vector<81x128xf32> to vector<81x128xbf16>
    %c0_171 = arith.constant 0 : index
    %c128_172 = arith.constant 128 : index
    %189 = vector.load %arg15[%c0_171, %c128_172] : memref<289x1152xbf16, #tpu.memory_space<vmem>>, vector<81x128xbf16>
    tpu.vector_store %arg15[%c0_171, %c128_172], %188 {strides = array<i32>} : memref<289x1152xbf16, #tpu.memory_space<vmem>>, vector<81x128xbf16>,
    %c2_173 = arith.constant 2 : index
    %c0_174 = arith.constant 0 : index
    %190 = vector.load %arg12[%c2_173, %c0_174] : memref<101x128xf32, #tpu.memory_space<vmem>>, vector<81x128xf32>
    %191 = arith.truncf %190 : vector<81x128xf32> to vector<81x128xbf16>
    %c0_175 = arith.constant 0 : index
    %c256_176 = arith.constant 256 : index
    %192 = vector.load %arg15[%c0_175, %c256_176] : memref<289x1152xbf16, #tpu.memory_space<vmem>>, vector<81x128xbf16>
    tpu.vector_store %arg15[%c0_175, %c256_176], %191 {strides = array<i32>} : memref<289x1152xbf16, #tpu.memory_space<vmem>>, vector<81x128xbf16>,
    %c9_177 = arith.constant 9 : index
    %c0_178 = arith.constant 0 : index
    %193 = vector.load %arg12[%c9_177, %c0_178] : memref<101x128xf32, #tpu.memory_space<vmem>>, vector<81x128xf32>
    %194 = arith.truncf %193 : vector<81x128xf32> to vector<81x128xbf16>
    %c0_179 = arith.constant 0 : index
    %c384_180 = arith.constant 384 : index
    %195 = vector.load %arg15[%c0_179, %c384_180] : memref<289x1152xbf16, #tpu.memory_space<vmem>>, vector<81x128xbf16>
    tpu.vector_store %arg15[%c0_179, %c384_180], %194 {strides = array<i32>} : memref<289x1152xbf16, #tpu.memory_space<vmem>>, vector<81x128xbf16>,
    %c10_181 = arith.constant 10 : index
    %c0_182 = arith.constant 0 : index
    %196 = vector.load %arg12[%c10_181, %c0_182] : memref<101x128xf32, #tpu.memory_space<vmem>>, vector<81x128xf32>
    %197 = arith.truncf %196 : vector<81x128xf32> to vector<81x128xbf16>
    %c0_183 = arith.constant 0 : index
    %c512_184 = arith.constant 512 : index
    %198 = vector.load %arg15[%c0_183, %c512_184] : memref<289x1152xbf16, #tpu.memory_space<vmem>>, vector<81x128xbf16>
    tpu.vector_store %arg15[%c0_183, %c512_184], %197 {strides = array<i32>} : memref<289x1152xbf16, #tpu.memory_space<vmem>>, vector<81x128xbf16>,
    %c11_185 = arith.constant 11 : index
    %c0_186 = arith.constant 0 : index
    %199 = vector.load %arg12[%c11_185, %c0_186] : memref<101x128xf32, #tpu.memory_space<vmem>>, vector<81x128xf32>
    %200 = arith.truncf %199 : vector<81x128xf32> to vector<81x128xbf16>
    %c0_187 = arith.constant 0 : index
    %c640_188 = arith.constant 640 : index
    %201 = vector.load %arg15[%c0_187, %c640_188] : memref<289x1152xbf16, #tpu.memory_space<vmem>>, vector<81x128xbf16>
    tpu.vector_store %arg15[%c0_187, %c640_188], %200 {strides = array<i32>} : memref<289x1152xbf16, #tpu.memory_space<vmem>>, vector<81x128xbf16>,
    %c18_189 = arith.constant 18 : index
    %c0_190 = arith.constant 0 : index
    %202 = vector.load %arg12[%c18_189, %c0_190] : memref<101x128xf32, #tpu.memory_space<vmem>>, vector<81x128xf32>
    %203 = arith.truncf %202 : vector<81x128xf32> to vector<81x128xbf16>
    %c0_191 = arith.constant 0 : index
    %c768_192 = arith.constant 768 : index
    %204 = vector.load %arg15[%c0_191, %c768_192] : memref<289x1152xbf16, #tpu.memory_space<vmem>>, vector<81x128xbf16>
    tpu.vector_store %arg15[%c0_191, %c768_192], %203 {strides = array<i32>} : memref<289x1152xbf16, #tpu.memory_space<vmem>>, vector<81x128xbf16>,
    %c19_193 = arith.constant 19 : index
    %c0_194 = arith.constant 0 : index
    %205 = vector.load %arg12[%c19_193, %c0_194] : memref<101x128xf32, #tpu.memory_space<vmem>>, vector<81x128xf32>
    %206 = arith.truncf %205 : vector<81x128xf32> to vector<81x128xbf16>
    %c0_195 = arith.constant 0 : index
    %c896_196 = arith.constant 896 : index
    %207 = vector.load %arg15[%c0_195, %c896_196] : memref<289x1152xbf16, #tpu.memory_space<vmem>>, vector<81x128xbf16>
    tpu.vector_store %arg15[%c0_195, %c896_196], %206 {strides = array<i32>} : memref<289x1152xbf16, #tpu.memory_space<vmem>>, vector<81x128xbf16>,
    %c20_197 = arith.constant 20 : index
    %c0_198 = arith.constant 0 : index
    %208 = vector.load %arg12[%c20_197, %c0_198] : memref<101x128xf32, #tpu.memory_space<vmem>>, vector<81x128xf32>
    %209 = arith.truncf %208 : vector<81x128xf32> to vector<81x128xbf16>
    %c0_199 = arith.constant 0 : index
    %c1024_200 = arith.constant 1024 : index
    %210 = vector.load %arg15[%c0_199, %c1024_200] : memref<289x1152xbf16, #tpu.memory_space<vmem>>, vector<81x128xbf16>
    tpu.vector_store %arg15[%c0_199, %c1024_200], %209 {strides = array<i32>} : memref<289x1152xbf16, #tpu.memory_space<vmem>>, vector<81x128xbf16>,
    %c2304 = arith.constant 2304 : index
    %c0_201 = arith.constant 0 : index
    %211 = vector.load %arg2[%c2304, %c0_201] : memref<8064x128xbf16, #tpu.memory_space<vmem>>, vector<1152x128xbf16>
    %c0_202 = arith.constant 0 : index
    %c0_203 = arith.constant 0 : index
    %212 = vector.load %arg15[%c0_202, %c0_203] : memref<289x1152xbf16, #tpu.memory_space<vmem>>, vector<81x1152xbf16>
    %cst_204 = arith.constant dense<0.000000e+00> : vector<81x128xf32>
    %213 = tpu.matmul %212, %211, %cst_204 {dimension_numbers = #tpu.dot_dimension_numbers<[1], [0], [0], [1], [0, 0, 1, 1], [], []>} : vector<81x1152xbf16>, vector<1152x128xbf16>, vector<81x128xf32> -> vector<81x128xf32>
    %c2_205 = arith.constant 2 : index
    %c0_206 = arith.constant 0 : index
    %214 = vector.load %arg3[%c2_205, %c0_206] : memref<7x128xf32, #tpu.memory_space<vmem>>, vector<1x128xf32>
    %215 = vector.broadcast %214 : vector<1x128xf32> to vector<81x128xf32>
    %216 = arith.addf %213, %215 : vector<81x128xf32>
    %cst_207 = arith.constant 0.000000e+00 : f32
    %217 = vector.broadcast %cst_207 : f32 to vector<81x128xf32>
    %218 = arith.maximumf %216, %217 : vector<81x128xf32>
    %c0_208 = arith.constant 0 : index
    %c0_209 = arith.constant 0 : index
    %c0_210 = arith.constant 0 : index
    %219 = vector.load %arg8[%c0_208, %c0_209, %c0_210] : memref<1x81x128xf32, #tpu.memory_space<vmem>>, vector<1x81x128xf32>
    %220 = vector.shape_cast %219 : vector<1x81x128xf32> to vector<81x128xf32>
    %221 = vector.shape_cast %218 : vector<81x128xf32> to vector<1x81x128xf32>
    tpu.vector_store %arg8[%c0_208, %c0_209, %c0_210], %221 {strides = array<i32>} : memref<1x81x128xf32, #tpu.memory_space<vmem>>, vector<1x81x128xf32>,
    %cst_211 = arith.constant 0.000000e+00 : f32
    %222 = vector.broadcast %cst_211 : f32 to vector<37x128xf32>
    %c0_212 = arith.constant 0 : index
    %c0_213 = arith.constant 0 : index
    %223 = vector.load %arg13[%c0_212, %c0_213] : memref<37x128xf32, #tpu.memory_space<vmem>>, vector<37x128xf32>
    tpu.vector_store %arg13[%c0_212, %c0_213], %222 {strides = array<i32>} : memref<37x128xf32, #tpu.memory_space<vmem>>, vector<37x128xf32>,
    %c0_214 = arith.constant 0 : index
    %c0_215 = arith.constant 0 : index
    %c0_216 = arith.constant 0 : index
    %224 = tpu.strided_load %arg8[%c0_214, %c0_215, %c0_216] {strides = array<i32: 1, 2, 1>} : memref<1x81x128xf32, #tpu.memory_space<vmem>>, vector<1x4x128xf32>
    %225 = vector.shape_cast %224 : vector<1x4x128xf32> to vector<4x128xf32>
    %c0_217 = arith.constant 0 : index
    %c1_218 = arith.constant 1 : index
    %c0_219 = arith.constant 0 : index
    %226 = tpu.strided_load %arg8[%c0_217, %c1_218, %c0_219] {strides = array<i32: 1, 2, 1>} : memref<1x81x128xf32, #tpu.memory_space<vmem>>, vector<1x4x128xf32>
    %227 = vector.shape_cast %226 : vector<1x4x128xf32> to vector<4x128xf32>
    %c0_220 = arith.constant 0 : index
    %c9_221 = arith.constant 9 : index
    %c0_222 = arith.constant 0 : index
    %228 = tpu.strided_load %arg8[%c0_220, %c9_221, %c0_222] {strides = array<i32: 1, 2, 1>} : memref<1x81x128xf32, #tpu.memory_space<vmem>>, vector<1x4x128xf32>
    %229 = vector.shape_cast %228 : vector<1x4x128xf32> to vector<4x128xf32>
    %c0_223 = arith.constant 0 : index
    %c10_224 = arith.constant 10 : index
    %c0_225 = arith.constant 0 : index
    %230 = tpu.strided_load %arg8[%c0_223, %c10_224, %c0_225] {strides = array<i32: 1, 2, 1>} : memref<1x81x128xf32, #tpu.memory_space<vmem>>, vector<1x4x128xf32>
    %231 = vector.shape_cast %230 : vector<1x4x128xf32> to vector<4x128xf32>
    %232 = arith.maximumf %225, %227 : vector<4x128xf32>
    %233 = arith.maximumf %229, %231 : vector<4x128xf32>
    %234 = arith.maximumf %232, %233 : vector<4x128xf32>
    %c6 = arith.constant 6 : index
    %c0_226 = arith.constant 0 : index
    %235 = vector.load %arg13[%c6, %c0_226] : memref<37x128xf32, #tpu.memory_space<vmem>>, vector<4x128xf32>
    tpu.vector_store %arg13[%c6, %c0_226], %234 {strides = array<i32>} : memref<37x128xf32, #tpu.memory_space<vmem>>, vector<4x128xf32>,
    %c0_227 = arith.constant 0 : index
    %c18_228 = arith.constant 18 : index
    %c0_229 = arith.constant 0 : index
    %236 = tpu.strided_load %arg8[%c0_227, %c18_228, %c0_229] {strides = array<i32: 1, 2, 1>} : memref<1x81x128xf32, #tpu.memory_space<vmem>>, vector<1x4x128xf32>
    %237 = vector.shape_cast %236 : vector<1x4x128xf32> to vector<4x128xf32>
    %c0_230 = arith.constant 0 : index
    %c19_231 = arith.constant 19 : index
    %c0_232 = arith.constant 0 : index
    %238 = tpu.strided_load %arg8[%c0_230, %c19_231, %c0_232] {strides = array<i32: 1, 2, 1>} : memref<1x81x128xf32, #tpu.memory_space<vmem>>, vector<1x4x128xf32>
    %239 = vector.shape_cast %238 : vector<1x4x128xf32> to vector<4x128xf32>
    %c0_233 = arith.constant 0 : index
    %c27 = arith.constant 27 : index
    %c0_234 = arith.constant 0 : index
    %240 = tpu.strided_load %arg8[%c0_233, %c27, %c0_234] {strides = array<i32: 1, 2, 1>} : memref<1x81x128xf32, #tpu.memory_space<vmem>>, vector<1x4x128xf32>
    %241 = vector.shape_cast %240 : vector<1x4x128xf32> to vector<4x128xf32>
    %c0_235 = arith.constant 0 : index
    %c28_236 = arith.constant 28 : index
    %c0_237 = arith.constant 0 : index
    %242 = tpu.strided_load %arg8[%c0_235, %c28_236, %c0_237] {strides = array<i32: 1, 2, 1>} : memref<1x81x128xf32, #tpu.memory_space<vmem>>, vector<1x4x128xf32>
    %243 = vector.shape_cast %242 : vector<1x4x128xf32> to vector<4x128xf32>
    %244 = arith.maximumf %237, %239 : vector<4x128xf32>
    %245 = arith.maximumf %241, %243 : vector<4x128xf32>
    %246 = arith.maximumf %244, %245 : vector<4x128xf32>
    %c11_238 = arith.constant 11 : index
    %c0_239 = arith.constant 0 : index
    %247 = vector.load %arg13[%c11_238, %c0_239] : memref<37x128xf32, #tpu.memory_space<vmem>>, vector<4x128xf32>
    tpu.vector_store %arg13[%c11_238, %c0_239], %246 {strides = array<i32>} : memref<37x128xf32, #tpu.memory_space<vmem>>, vector<4x128xf32>,
    %c0_240 = arith.constant 0 : index
    %c36_241 = arith.constant 36 : index
    %c0_242 = arith.constant 0 : index
    %248 = tpu.strided_load %arg8[%c0_240, %c36_241, %c0_242] {strides = array<i32: 1, 2, 1>} : memref<1x81x128xf32, #tpu.memory_space<vmem>>, vector<1x4x128xf32>
    %249 = vector.shape_cast %248 : vector<1x4x128xf32> to vector<4x128xf32>
    %c0_243 = arith.constant 0 : index
    %c37_244 = arith.constant 37 : index
    %c0_245 = arith.constant 0 : index
    %250 = tpu.strided_load %arg8[%c0_243, %c37_244, %c0_245] {strides = array<i32: 1, 2, 1>} : memref<1x81x128xf32, #tpu.memory_space<vmem>>, vector<1x4x128xf32>
    %251 = vector.shape_cast %250 : vector<1x4x128xf32> to vector<4x128xf32>
    %c0_246 = arith.constant 0 : index
    %c45 = arith.constant 45 : index
    %c0_247 = arith.constant 0 : index
    %252 = tpu.strided_load %arg8[%c0_246, %c45, %c0_247] {strides = array<i32: 1, 2, 1>} : memref<1x81x128xf32, #tpu.memory_space<vmem>>, vector<1x4x128xf32>
    %253 = vector.shape_cast %252 : vector<1x4x128xf32> to vector<4x128xf32>
    %c0_248 = arith.constant 0 : index
    %c46_249 = arith.constant 46 : index
    %c0_250 = arith.constant 0 : index
    %254 = tpu.strided_load %arg8[%c0_248, %c46_249, %c0_250] {strides = array<i32: 1, 2, 1>} : memref<1x81x128xf32, #tpu.memory_space<vmem>>, vector<1x4x128xf32>
    %255 = vector.shape_cast %254 : vector<1x4x128xf32> to vector<4x128xf32>
    %256 = arith.maximumf %249, %251 : vector<4x128xf32>
    %257 = arith.maximumf %253, %255 : vector<4x128xf32>
    %258 = arith.maximumf %256, %257 : vector<4x128xf32>
    %c16 = arith.constant 16 : index
    %c0_251 = arith.constant 0 : index
    %259 = vector.load %arg13[%c16, %c0_251] : memref<37x128xf32, #tpu.memory_space<vmem>>, vector<4x128xf32>
    tpu.vector_store %arg13[%c16, %c0_251], %258 {strides = array<i32>} : memref<37x128xf32, #tpu.memory_space<vmem>>, vector<4x128xf32>,
    %c0_252 = arith.constant 0 : index
    %c54 = arith.constant 54 : index
    %c0_253 = arith.constant 0 : index
    %260 = tpu.strided_load %arg8[%c0_252, %c54, %c0_253] {strides = array<i32: 1, 2, 1>} : memref<1x81x128xf32, #tpu.memory_space<vmem>>, vector<1x4x128xf32>
    %261 = vector.shape_cast %260 : vector<1x4x128xf32> to vector<4x128xf32>
    %c0_254 = arith.constant 0 : index
    %c55_255 = arith.constant 55 : index
    %c0_256 = arith.constant 0 : index
    %262 = tpu.strided_load %arg8[%c0_254, %c55_255, %c0_256] {strides = array<i32: 1, 2, 1>} : memref<1x81x128xf32, #tpu.memory_space<vmem>>, vector<1x4x128xf32>
    %263 = vector.shape_cast %262 : vector<1x4x128xf32> to vector<4x128xf32>
    %c0_257 = arith.constant 0 : index
    %c63 = arith.constant 63 : index
    %c0_258 = arith.constant 0 : index
    %264 = tpu.strided_load %arg8[%c0_257, %c63, %c0_258] {strides = array<i32: 1, 2, 1>} : memref<1x81x128xf32, #tpu.memory_space<vmem>>, vector<1x4x128xf32>
    %265 = vector.shape_cast %264 : vector<1x4x128xf32> to vector<4x128xf32>
    %c0_259 = arith.constant 0 : index
    %c64_260 = arith.constant 64 : index
    %c0_261 = arith.constant 0 : index
    %266 = tpu.strided_load %arg8[%c0_259, %c64_260, %c0_261] {strides = array<i32: 1, 2, 1>} : memref<1x81x128xf32, #tpu.memory_space<vmem>>, vector<1x4x128xf32>
    %267 = vector.shape_cast %266 : vector<1x4x128xf32> to vector<4x128xf32>
    %268 = arith.maximumf %261, %263 : vector<4x128xf32>
    %269 = arith.maximumf %265, %267 : vector<4x128xf32>
    %270 = arith.maximumf %268, %269 : vector<4x128xf32>
    %c21 = arith.constant 21 : index
    %c0_262 = arith.constant 0 : index
    %271 = vector.load %arg13[%c21, %c0_262] : memref<37x128xf32, #tpu.memory_space<vmem>>, vector<4x128xf32>
    tpu.vector_store %arg13[%c21, %c0_262], %270 {strides = array<i32>} : memref<37x128xf32, #tpu.memory_space<vmem>>, vector<4x128xf32>,
    %c0_263 = arith.constant 0 : index
    %c0_264 = arith.constant 0 : index
    %272 = vector.load %arg13[%c0_263, %c0_264] : memref<37x128xf32, #tpu.memory_space<vmem>>, vector<25x128xf32>
    %273 = arith.truncf %272 : vector<25x128xf32> to vector<25x128xbf16>
    %c0_265 = arith.constant 0 : index
    %c0_266 = arith.constant 0 : index
    %274 = vector.load %arg15[%c0_265, %c0_266] : memref<289x1152xbf16, #tpu.memory_space<vmem>>, vector<25x128xbf16>
    tpu.vector_store %arg15[%c0_265, %c0_266], %273 {strides = array<i32>} : memref<289x1152xbf16, #tpu.memory_space<vmem>>, vector<25x128xbf16>,
    %c1_267 = arith.constant 1 : index
    %c0_268 = arith.constant 0 : index
    %275 = vector.load %arg13[%c1_267, %c0_268] : memref<37x128xf32, #tpu.memory_space<vmem>>, vector<25x128xf32>
    %276 = arith.truncf %275 : vector<25x128xf32> to vector<25x128xbf16>
    %c0_269 = arith.constant 0 : index
    %c128_270 = arith.constant 128 : index
    %277 = vector.load %arg15[%c0_269, %c128_270] : memref<289x1152xbf16, #tpu.memory_space<vmem>>, vector<25x128xbf16>
    tpu.vector_store %arg15[%c0_269, %c128_270], %276 {strides = array<i32>} : memref<289x1152xbf16, #tpu.memory_space<vmem>>, vector<25x128xbf16>,
    %c2_271 = arith.constant 2 : index
    %c0_272 = arith.constant 0 : index
    %278 = vector.load %arg13[%c2_271, %c0_272] : memref<37x128xf32, #tpu.memory_space<vmem>>, vector<25x128xf32>
    %279 = arith.truncf %278 : vector<25x128xf32> to vector<25x128xbf16>
    %c0_273 = arith.constant 0 : index
    %c256_274 = arith.constant 256 : index
    %280 = vector.load %arg15[%c0_273, %c256_274] : memref<289x1152xbf16, #tpu.memory_space<vmem>>, vector<25x128xbf16>
    tpu.vector_store %arg15[%c0_273, %c256_274], %279 {strides = array<i32>} : memref<289x1152xbf16, #tpu.memory_space<vmem>>, vector<25x128xbf16>,
    %c5 = arith.constant 5 : index
    %c0_275 = arith.constant 0 : index
    %281 = vector.load %arg13[%c5, %c0_275] : memref<37x128xf32, #tpu.memory_space<vmem>>, vector<25x128xf32>
    %282 = arith.truncf %281 : vector<25x128xf32> to vector<25x128xbf16>
    %c0_276 = arith.constant 0 : index
    %c384_277 = arith.constant 384 : index
    %283 = vector.load %arg15[%c0_276, %c384_277] : memref<289x1152xbf16, #tpu.memory_space<vmem>>, vector<25x128xbf16>
    tpu.vector_store %arg15[%c0_276, %c384_277], %282 {strides = array<i32>} : memref<289x1152xbf16, #tpu.memory_space<vmem>>, vector<25x128xbf16>,
    %c6_278 = arith.constant 6 : index
    %c0_279 = arith.constant 0 : index
    %284 = vector.load %arg13[%c6_278, %c0_279] : memref<37x128xf32, #tpu.memory_space<vmem>>, vector<25x128xf32>
    %285 = arith.truncf %284 : vector<25x128xf32> to vector<25x128xbf16>
    %c0_280 = arith.constant 0 : index
    %c512_281 = arith.constant 512 : index
    %286 = vector.load %arg15[%c0_280, %c512_281] : memref<289x1152xbf16, #tpu.memory_space<vmem>>, vector<25x128xbf16>
    tpu.vector_store %arg15[%c0_280, %c512_281], %285 {strides = array<i32>} : memref<289x1152xbf16, #tpu.memory_space<vmem>>, vector<25x128xbf16>,
    %c7 = arith.constant 7 : index
    %c0_282 = arith.constant 0 : index
    %287 = vector.load %arg13[%c7, %c0_282] : memref<37x128xf32, #tpu.memory_space<vmem>>, vector<25x128xf32>
    %288 = arith.truncf %287 : vector<25x128xf32> to vector<25x128xbf16>
    %c0_283 = arith.constant 0 : index
    %c640_284 = arith.constant 640 : index
    %289 = vector.load %arg15[%c0_283, %c640_284] : memref<289x1152xbf16, #tpu.memory_space<vmem>>, vector<25x128xbf16>
    tpu.vector_store %arg15[%c0_283, %c640_284], %288 {strides = array<i32>} : memref<289x1152xbf16, #tpu.memory_space<vmem>>, vector<25x128xbf16>,
    %c10_285 = arith.constant 10 : index
    %c0_286 = arith.constant 0 : index
    %290 = vector.load %arg13[%c10_285, %c0_286] : memref<37x128xf32, #tpu.memory_space<vmem>>, vector<25x128xf32>
    %291 = arith.truncf %290 : vector<25x128xf32> to vector<25x128xbf16>
    %c0_287 = arith.constant 0 : index
    %c768_288 = arith.constant 768 : index
    %292 = vector.load %arg15[%c0_287, %c768_288] : memref<289x1152xbf16, #tpu.memory_space<vmem>>, vector<25x128xbf16>
    tpu.vector_store %arg15[%c0_287, %c768_288], %291 {strides = array<i32>} : memref<289x1152xbf16, #tpu.memory_space<vmem>>, vector<25x128xbf16>,
    %c11_289 = arith.constant 11 : index
    %c0_290 = arith.constant 0 : index
    %293 = vector.load %arg13[%c11_289, %c0_290] : memref<37x128xf32, #tpu.memory_space<vmem>>, vector<25x128xf32>
    %294 = arith.truncf %293 : vector<25x128xf32> to vector<25x128xbf16>
    %c0_291 = arith.constant 0 : index
    %c896_292 = arith.constant 896 : index
    %295 = vector.load %arg15[%c0_291, %c896_292] : memref<289x1152xbf16, #tpu.memory_space<vmem>>, vector<25x128xbf16>
    tpu.vector_store %arg15[%c0_291, %c896_292], %294 {strides = array<i32>} : memref<289x1152xbf16, #tpu.memory_space<vmem>>, vector<25x128xbf16>,
    %c12 = arith.constant 12 : index
    %c0_293 = arith.constant 0 : index
    %296 = vector.load %arg13[%c12, %c0_293] : memref<37x128xf32, #tpu.memory_space<vmem>>, vector<25x128xf32>
    %297 = arith.truncf %296 : vector<25x128xf32> to vector<25x128xbf16>
    %c0_294 = arith.constant 0 : index
    %c1024_295 = arith.constant 1024 : index
    %298 = vector.load %arg15[%c0_294, %c1024_295] : memref<289x1152xbf16, #tpu.memory_space<vmem>>, vector<25x128xbf16>
    tpu.vector_store %arg15[%c0_294, %c1024_295], %297 {strides = array<i32>} : memref<289x1152xbf16, #tpu.memory_space<vmem>>, vector<25x128xbf16>,
    %c3456 = arith.constant 3456 : index
    %c0_296 = arith.constant 0 : index
    %299 = vector.load %arg2[%c3456, %c0_296] : memref<8064x128xbf16, #tpu.memory_space<vmem>>, vector<1152x128xbf16>
    %c0_297 = arith.constant 0 : index
    %c0_298 = arith.constant 0 : index
    %300 = vector.load %arg15[%c0_297, %c0_298] : memref<289x1152xbf16, #tpu.memory_space<vmem>>, vector<25x1152xbf16>
    %cst_299 = arith.constant dense<0.000000e+00> : vector<25x128xf32>
    %301 = tpu.matmul %300, %299, %cst_299 {dimension_numbers = #tpu.dot_dimension_numbers<[1], [0], [0], [1], [0, 0, 1, 1], [], []>} : vector<25x1152xbf16>, vector<1152x128xbf16>, vector<25x128xf32> -> vector<25x128xf32>
    %c3 = arith.constant 3 : index
    %c0_300 = arith.constant 0 : index
    %302 = vector.load %arg3[%c3, %c0_300] : memref<7x128xf32, #tpu.memory_space<vmem>>, vector<1x128xf32>
    %303 = vector.broadcast %302 : vector<1x128xf32> to vector<25x128xf32>
    %304 = arith.addf %301, %303 : vector<25x128xf32>
    %cst_301 = arith.constant 0.000000e+00 : f32
    %305 = vector.broadcast %cst_301 : f32 to vector<25x128xf32>
    %306 = arith.maximumf %304, %305 : vector<25x128xf32>
    %c0_302 = arith.constant 0 : index
    %c0_303 = arith.constant 0 : index
    %307 = vector.load %arg5[%c0_302, %c0_303] : memref<25x1xf32, #tpu.memory_space<vmem>>, vector<25x1xf32>
    %308 = vector.broadcast %307 : vector<25x1xf32> to vector<25x128xf32>
    %309 = arith.mulf %306, %308 : vector<25x128xf32>
    %c6_304 = arith.constant 6 : index
    %c0_305 = arith.constant 0 : index
    %310 = vector.load %arg13[%c6_304, %c0_305] : memref<37x128xf32, #tpu.memory_space<vmem>>, vector<25x128xf32>
    tpu.vector_store %arg13[%c6_304, %c0_305], %309 {strides = array<i32>} : memref<37x128xf32, #tpu.memory_space<vmem>>, vector<25x128xf32>,
    %c0_306 = arith.constant 0 : index
    %c0_307 = arith.constant 0 : index
    %311 = vector.load %arg13[%c0_306, %c0_307] : memref<37x128xf32, #tpu.memory_space<vmem>>, vector<25x128xf32>
    %312 = arith.truncf %311 : vector<25x128xf32> to vector<25x128xbf16>
    %c0_308 = arith.constant 0 : index
    %c0_309 = arith.constant 0 : index
    %313 = vector.load %arg15[%c0_308, %c0_309] : memref<289x1152xbf16, #tpu.memory_space<vmem>>, vector<25x128xbf16>
    tpu.vector_store %arg15[%c0_308, %c0_309], %312 {strides = array<i32>} : memref<289x1152xbf16, #tpu.memory_space<vmem>>, vector<25x128xbf16>,
    %c1_310 = arith.constant 1 : index
    %c0_311 = arith.constant 0 : index
    %314 = vector.load %arg13[%c1_310, %c0_311] : memref<37x128xf32, #tpu.memory_space<vmem>>, vector<25x128xf32>
    %315 = arith.truncf %314 : vector<25x128xf32> to vector<25x128xbf16>
    %c0_312 = arith.constant 0 : index
    %c128_313 = arith.constant 128 : index
    %316 = vector.load %arg15[%c0_312, %c128_313] : memref<289x1152xbf16, #tpu.memory_space<vmem>>, vector<25x128xbf16>
    tpu.vector_store %arg15[%c0_312, %c128_313], %315 {strides = array<i32>} : memref<289x1152xbf16, #tpu.memory_space<vmem>>, vector<25x128xbf16>,
    %c2_314 = arith.constant 2 : index
    %c0_315 = arith.constant 0 : index
    %317 = vector.load %arg13[%c2_314, %c0_315] : memref<37x128xf32, #tpu.memory_space<vmem>>, vector<25x128xf32>
    %318 = arith.truncf %317 : vector<25x128xf32> to vector<25x128xbf16>
    %c0_316 = arith.constant 0 : index
    %c256_317 = arith.constant 256 : index
    %319 = vector.load %arg15[%c0_316, %c256_317] : memref<289x1152xbf16, #tpu.memory_space<vmem>>, vector<25x128xbf16>
    tpu.vector_store %arg15[%c0_316, %c256_317], %318 {strides = array<i32>} : memref<289x1152xbf16, #tpu.memory_space<vmem>>, vector<25x128xbf16>,
    %c5_318 = arith.constant 5 : index
    %c0_319 = arith.constant 0 : index
    %320 = vector.load %arg13[%c5_318, %c0_319] : memref<37x128xf32, #tpu.memory_space<vmem>>, vector<25x128xf32>
    %321 = arith.truncf %320 : vector<25x128xf32> to vector<25x128xbf16>
    %c0_320 = arith.constant 0 : index
    %c384_321 = arith.constant 384 : index
    %322 = vector.load %arg15[%c0_320, %c384_321] : memref<289x1152xbf16, #tpu.memory_space<vmem>>, vector<25x128xbf16>
    tpu.vector_store %arg15[%c0_320, %c384_321], %321 {strides = array<i32>} : memref<289x1152xbf16, #tpu.memory_space<vmem>>, vector<25x128xbf16>,
    %c6_322 = arith.constant 6 : index
    %c0_323 = arith.constant 0 : index
    %323 = vector.load %arg13[%c6_322, %c0_323] : memref<37x128xf32, #tpu.memory_space<vmem>>, vector<25x128xf32>
    %324 = arith.truncf %323 : vector<25x128xf32> to vector<25x128xbf16>
    %c0_324 = arith.constant 0 : index
    %c512_325 = arith.constant 512 : index
    %325 = vector.load %arg15[%c0_324, %c512_325] : memref<289x1152xbf16, #tpu.memory_space<vmem>>, vector<25x128xbf16>
    tpu.vector_store %arg15[%c0_324, %c512_325], %324 {strides = array<i32>} : memref<289x1152xbf16, #tpu.memory_space<vmem>>, vector<25x128xbf16>,
    %c7_326 = arith.constant 7 : index
    %c0_327 = arith.constant 0 : index
    %326 = vector.load %arg13[%c7_326, %c0_327] : memref<37x128xf32, #tpu.memory_space<vmem>>, vector<25x128xf32>
    %327 = arith.truncf %326 : vector<25x128xf32> to vector<25x128xbf16>
    %c0_328 = arith.constant 0 : index
    %c640_329 = arith.constant 640 : index
    %328 = vector.load %arg15[%c0_328, %c640_329] : memref<289x1152xbf16, #tpu.memory_space<vmem>>, vector<25x128xbf16>
    tpu.vector_store %arg15[%c0_328, %c640_329], %327 {strides = array<i32>} : memref<289x1152xbf16, #tpu.memory_space<vmem>>, vector<25x128xbf16>,
    %c10_330 = arith.constant 10 : index
    %c0_331 = arith.constant 0 : index
    %329 = vector.load %arg13[%c10_330, %c0_331] : memref<37x128xf32, #tpu.memory_space<vmem>>, vector<25x128xf32>
    %330 = arith.truncf %329 : vector<25x128xf32> to vector<25x128xbf16>
    %c0_332 = arith.constant 0 : index
    %c768_333 = arith.constant 768 : index
    %331 = vector.load %arg15[%c0_332, %c768_333] : memref<289x1152xbf16, #tpu.memory_space<vmem>>, vector<25x128xbf16>
    tpu.vector_store %arg15[%c0_332, %c768_333], %330 {strides = array<i32>} : memref<289x1152xbf16, #tpu.memory_space<vmem>>, vector<25x128xbf16>,
    %c11_334 = arith.constant 11 : index
    %c0_335 = arith.constant 0 : index
    %332 = vector.load %arg13[%c11_334, %c0_335] : memref<37x128xf32, #tpu.memory_space<vmem>>, vector<25x128xf32>
    %333 = arith.truncf %332 : vector<25x128xf32> to vector<25x128xbf16>
    %c0_336 = arith.constant 0 : index
    %c896_337 = arith.constant 896 : index
    %334 = vector.load %arg15[%c0_336, %c896_337] : memref<289x1152xbf16, #tpu.memory_space<vmem>>, vector<25x128xbf16>
    tpu.vector_store %arg15[%c0_336, %c896_337], %333 {strides = array<i32>} : memref<289x1152xbf16, #tpu.memory_space<vmem>>, vector<25x128xbf16>,
    %c12_338 = arith.constant 12 : index
    %c0_339 = arith.constant 0 : index
    %335 = vector.load %arg13[%c12_338, %c0_339] : memref<37x128xf32, #tpu.memory_space<vmem>>, vector<25x128xf32>
    %336 = arith.truncf %335 : vector<25x128xf32> to vector<25x128xbf16>
    %c0_340 = arith.constant 0 : index
    %c1024_341 = arith.constant 1024 : index
    %337 = vector.load %arg15[%c0_340, %c1024_341] : memref<289x1152xbf16, #tpu.memory_space<vmem>>, vector<25x128xbf16>
    tpu.vector_store %arg15[%c0_340, %c1024_341], %336 {strides = array<i32>} : memref<289x1152xbf16, #tpu.memory_space<vmem>>, vector<25x128xbf16>,
    %c4608 = arith.constant 4608 : index
    %c0_342 = arith.constant 0 : index
    %338 = vector.load %arg2[%c4608, %c0_342] : memref<8064x128xbf16, #tpu.memory_space<vmem>>, vector<1152x128xbf16>
    %c0_343 = arith.constant 0 : index
    %c0_344 = arith.constant 0 : index
    %339 = vector.load %arg15[%c0_343, %c0_344] : memref<289x1152xbf16, #tpu.memory_space<vmem>>, vector<25x1152xbf16>
    %cst_345 = arith.constant dense<0.000000e+00> : vector<25x128xf32>
    %340 = tpu.matmul %339, %338, %cst_345 {dimension_numbers = #tpu.dot_dimension_numbers<[1], [0], [0], [1], [0, 0, 1, 1], [], []>} : vector<25x1152xbf16>, vector<1152x128xbf16>, vector<25x128xf32> -> vector<25x128xf32>
    %c4 = arith.constant 4 : index
    %c0_346 = arith.constant 0 : index
    %341 = vector.load %arg3[%c4, %c0_346] : memref<7x128xf32, #tpu.memory_space<vmem>>, vector<1x128xf32>
    %342 = vector.broadcast %341 : vector<1x128xf32> to vector<25x128xf32>
    %343 = arith.addf %340, %342 : vector<25x128xf32>
    %cst_347 = arith.constant 0.000000e+00 : f32
    %344 = vector.broadcast %cst_347 : f32 to vector<25x128xf32>
    %345 = arith.maximumf %343, %344 : vector<25x128xf32>
    %c0_348 = arith.constant 0 : index
    %c0_349 = arith.constant 0 : index
    %c0_350 = arith.constant 0 : index
    %346 = vector.load %arg9[%c0_348, %c0_349, %c0_350] : memref<1x25x128xf32, #tpu.memory_space<vmem>>, vector<1x25x128xf32>
    %347 = vector.shape_cast %346 : vector<1x25x128xf32> to vector<25x128xf32>
    %348 = vector.shape_cast %345 : vector<25x128xf32> to vector<1x25x128xf32>
    tpu.vector_store %arg9[%c0_348, %c0_349, %c0_350], %348 {strides = array<i32>} : memref<1x25x128xf32, #tpu.memory_space<vmem>>, vector<1x25x128xf32>,
    %cst_351 = arith.constant 0.000000e+00 : f32
    %349 = vector.broadcast %cst_351 : f32 to vector<17x128xf32>
    %c0_352 = arith.constant 0 : index
    %c0_353 = arith.constant 0 : index
    %350 = vector.load %arg14[%c0_352, %c0_353] : memref<17x128xf32, #tpu.memory_space<vmem>>, vector<17x128xf32>
    tpu.vector_store %arg14[%c0_352, %c0_353], %349 {strides = array<i32>} : memref<17x128xf32, #tpu.memory_space<vmem>>, vector<17x128xf32>,
    %c0_354 = arith.constant 0 : index
    %c0_355 = arith.constant 0 : index
    %c0_356 = arith.constant 0 : index
    %351 = tpu.strided_load %arg9[%c0_354, %c0_355, %c0_356] {strides = array<i32: 1, 2, 1>} : memref<1x25x128xf32, #tpu.memory_space<vmem>>, vector<1x2x128xf32>
    %352 = vector.shape_cast %351 : vector<1x2x128xf32> to vector<2x128xf32>
    %c0_357 = arith.constant 0 : index
    %c1_358 = arith.constant 1 : index
    %c0_359 = arith.constant 0 : index
    %353 = tpu.strided_load %arg9[%c0_357, %c1_358, %c0_359] {strides = array<i32: 1, 2, 1>} : memref<1x25x128xf32, #tpu.memory_space<vmem>>, vector<1x2x128xf32>
    %354 = vector.shape_cast %353 : vector<1x2x128xf32> to vector<2x128xf32>
    %c0_360 = arith.constant 0 : index
    %c5_361 = arith.constant 5 : index
    %c0_362 = arith.constant 0 : index
    %355 = tpu.strided_load %arg9[%c0_360, %c5_361, %c0_362] {strides = array<i32: 1, 2, 1>} : memref<1x25x128xf32, #tpu.memory_space<vmem>>, vector<1x2x128xf32>
    %356 = vector.shape_cast %355 : vector<1x2x128xf32> to vector<2x128xf32>
    %c0_363 = arith.constant 0 : index
    %c6_364 = arith.constant 6 : index
    %c0_365 = arith.constant 0 : index
    %357 = tpu.strided_load %arg9[%c0_363, %c6_364, %c0_365] {strides = array<i32: 1, 2, 1>} : memref<1x25x128xf32, #tpu.memory_space<vmem>>, vector<1x2x128xf32>
    %358 = vector.shape_cast %357 : vector<1x2x128xf32> to vector<2x128xf32>
    %359 = arith.maximumf %352, %354 : vector<2x128xf32>
    %360 = arith.maximumf %356, %358 : vector<2x128xf32>
    %361 = arith.maximumf %359, %360 : vector<2x128xf32>
    %c4_366 = arith.constant 4 : index
    %c0_367 = arith.constant 0 : index
    %362 = vector.load %arg14[%c4_366, %c0_367] : memref<17x128xf32, #tpu.memory_space<vmem>>, vector<2x128xf32>
    tpu.vector_store %arg14[%c4_366, %c0_367], %361 {strides = array<i32>} : memref<17x128xf32, #tpu.memory_space<vmem>>, vector<2x128xf32>,
    %c0_368 = arith.constant 0 : index
    %c10_369 = arith.constant 10 : index
    %c0_370 = arith.constant 0 : index
    %363 = tpu.strided_load %arg9[%c0_368, %c10_369, %c0_370] {strides = array<i32: 1, 2, 1>} : memref<1x25x128xf32, #tpu.memory_space<vmem>>, vector<1x2x128xf32>
    %364 = vector.shape_cast %363 : vector<1x2x128xf32> to vector<2x128xf32>
    %c0_371 = arith.constant 0 : index
    %c11_372 = arith.constant 11 : index
    %c0_373 = arith.constant 0 : index
    %365 = tpu.strided_load %arg9[%c0_371, %c11_372, %c0_373] {strides = array<i32: 1, 2, 1>} : memref<1x25x128xf32, #tpu.memory_space<vmem>>, vector<1x2x128xf32>
    %366 = vector.shape_cast %365 : vector<1x2x128xf32> to vector<2x128xf32>
    %c0_374 = arith.constant 0 : index
    %c15 = arith.constant 15 : index
    %c0_375 = arith.constant 0 : index
    %367 = tpu.strided_load %arg9[%c0_374, %c15, %c0_375] {strides = array<i32: 1, 2, 1>} : memref<1x25x128xf32, #tpu.memory_space<vmem>>, vector<1x2x128xf32>
    %368 = vector.shape_cast %367 : vector<1x2x128xf32> to vector<2x128xf32>
    %c0_376 = arith.constant 0 : index
    %c16_377 = arith.constant 16 : index
    %c0_378 = arith.constant 0 : index
    %369 = tpu.strided_load %arg9[%c0_376, %c16_377, %c0_378] {strides = array<i32: 1, 2, 1>} : memref<1x25x128xf32, #tpu.memory_space<vmem>>, vector<1x2x128xf32>
    %370 = vector.shape_cast %369 : vector<1x2x128xf32> to vector<2x128xf32>
    %371 = arith.maximumf %364, %366 : vector<2x128xf32>
    %372 = arith.maximumf %368, %370 : vector<2x128xf32>
    %373 = arith.maximumf %371, %372 : vector<2x128xf32>
    %c7_379 = arith.constant 7 : index
    %c0_380 = arith.constant 0 : index
    %374 = vector.load %arg14[%c7_379, %c0_380] : memref<17x128xf32, #tpu.memory_space<vmem>>, vector<2x128xf32>
    tpu.vector_store %arg14[%c7_379, %c0_380], %373 {strides = array<i32>} : memref<17x128xf32, #tpu.memory_space<vmem>>, vector<2x128xf32>,
    %c0_381 = arith.constant 0 : index
    %c0_382 = arith.constant 0 : index
    %375 = vector.load %arg14[%c0_381, %c0_382] : memref<17x128xf32, #tpu.memory_space<vmem>>, vector<9x128xf32>
    %376 = arith.truncf %375 : vector<9x128xf32> to vector<9x128xbf16>
    %c0_383 = arith.constant 0 : index
    %c0_384 = arith.constant 0 : index
    %377 = vector.load %arg15[%c0_383, %c0_384] : memref<289x1152xbf16, #tpu.memory_space<vmem>>, vector<9x128xbf16>
    tpu.vector_store %arg15[%c0_383, %c0_384], %376 {strides = array<i32>} : memref<289x1152xbf16, #tpu.memory_space<vmem>>, vector<9x128xbf16>,
    %c1_385 = arith.constant 1 : index
    %c0_386 = arith.constant 0 : index
    %378 = vector.load %arg14[%c1_385, %c0_386] : memref<17x128xf32, #tpu.memory_space<vmem>>, vector<9x128xf32>
    %379 = arith.truncf %378 : vector<9x128xf32> to vector<9x128xbf16>
    %c0_387 = arith.constant 0 : index
    %c128_388 = arith.constant 128 : index
    %380 = vector.load %arg15[%c0_387, %c128_388] : memref<289x1152xbf16, #tpu.memory_space<vmem>>, vector<9x128xbf16>
    tpu.vector_store %arg15[%c0_387, %c128_388], %379 {strides = array<i32>} : memref<289x1152xbf16, #tpu.memory_space<vmem>>, vector<9x128xbf16>,
    %c2_389 = arith.constant 2 : index
    %c0_390 = arith.constant 0 : index
    %381 = vector.load %arg14[%c2_389, %c0_390] : memref<17x128xf32, #tpu.memory_space<vmem>>, vector<9x128xf32>
    %382 = arith.truncf %381 : vector<9x128xf32> to vector<9x128xbf16>
    %c0_391 = arith.constant 0 : index
    %c256_392 = arith.constant 256 : index
    %383 = vector.load %arg15[%c0_391, %c256_392] : memref<289x1152xbf16, #tpu.memory_space<vmem>>, vector<9x128xbf16>
    tpu.vector_store %arg15[%c0_391, %c256_392], %382 {strides = array<i32>} : memref<289x1152xbf16, #tpu.memory_space<vmem>>, vector<9x128xbf16>,
    %c3_393 = arith.constant 3 : index
    %c0_394 = arith.constant 0 : index
    %384 = vector.load %arg14[%c3_393, %c0_394] : memref<17x128xf32, #tpu.memory_space<vmem>>, vector<9x128xf32>
    %385 = arith.truncf %384 : vector<9x128xf32> to vector<9x128xbf16>
    %c0_395 = arith.constant 0 : index
    %c384_396 = arith.constant 384 : index
    %386 = vector.load %arg15[%c0_395, %c384_396] : memref<289x1152xbf16, #tpu.memory_space<vmem>>, vector<9x128xbf16>
    tpu.vector_store %arg15[%c0_395, %c384_396], %385 {strides = array<i32>} : memref<289x1152xbf16, #tpu.memory_space<vmem>>, vector<9x128xbf16>,
    %c4_397 = arith.constant 4 : index
    %c0_398 = arith.constant 0 : index
    %387 = vector.load %arg14[%c4_397, %c0_398] : memref<17x128xf32, #tpu.memory_space<vmem>>, vector<9x128xf32>
    %388 = arith.truncf %387 : vector<9x128xf32> to vector<9x128xbf16>
    %c0_399 = arith.constant 0 : index
    %c512_400 = arith.constant 512 : index
    %389 = vector.load %arg15[%c0_399, %c512_400] : memref<289x1152xbf16, #tpu.memory_space<vmem>>, vector<9x128xbf16>
    tpu.vector_store %arg15[%c0_399, %c512_400], %388 {strides = array<i32>} : memref<289x1152xbf16, #tpu.memory_space<vmem>>, vector<9x128xbf16>,
    %c5_401 = arith.constant 5 : index
    %c0_402 = arith.constant 0 : index
    %390 = vector.load %arg14[%c5_401, %c0_402] : memref<17x128xf32, #tpu.memory_space<vmem>>, vector<9x128xf32>
    %391 = arith.truncf %390 : vector<9x128xf32> to vector<9x128xbf16>
    %c0_403 = arith.constant 0 : index
    %c640_404 = arith.constant 640 : index
    %392 = vector.load %arg15[%c0_403, %c640_404] : memref<289x1152xbf16, #tpu.memory_space<vmem>>, vector<9x128xbf16>
    tpu.vector_store %arg15[%c0_403, %c640_404], %391 {strides = array<i32>} : memref<289x1152xbf16, #tpu.memory_space<vmem>>, vector<9x128xbf16>,
    %c6_405 = arith.constant 6 : index
    %c0_406 = arith.constant 0 : index
    %393 = vector.load %arg14[%c6_405, %c0_406] : memref<17x128xf32, #tpu.memory_space<vmem>>, vector<9x128xf32>
    %394 = arith.truncf %393 : vector<9x128xf32> to vector<9x128xbf16>
    %c0_407 = arith.constant 0 : index
    %c768_408 = arith.constant 768 : index
    %395 = vector.load %arg15[%c0_407, %c768_408] : memref<289x1152xbf16, #tpu.memory_space<vmem>>, vector<9x128xbf16>
    tpu.vector_store %arg15[%c0_407, %c768_408], %394 {strides = array<i32>} : memref<289x1152xbf16, #tpu.memory_space<vmem>>, vector<9x128xbf16>,
    %c7_409 = arith.constant 7 : index
    %c0_410 = arith.constant 0 : index
    %396 = vector.load %arg14[%c7_409, %c0_410] : memref<17x128xf32, #tpu.memory_space<vmem>>, vector<9x128xf32>
    %397 = arith.truncf %396 : vector<9x128xf32> to vector<9x128xbf16>
    %c0_411 = arith.constant 0 : index
    %c896_412 = arith.constant 896 : index
    %398 = vector.load %arg15[%c0_411, %c896_412] : memref<289x1152xbf16, #tpu.memory_space<vmem>>, vector<9x128xbf16>
    tpu.vector_store %arg15[%c0_411, %c896_412], %397 {strides = array<i32>} : memref<289x1152xbf16, #tpu.memory_space<vmem>>, vector<9x128xbf16>,
    %c8 = arith.constant 8 : index
    %c0_413 = arith.constant 0 : index
    %399 = vector.load %arg14[%c8, %c0_413] : memref<17x128xf32, #tpu.memory_space<vmem>>, vector<9x128xf32>
    %400 = arith.truncf %399 : vector<9x128xf32> to vector<9x128xbf16>
    %c0_414 = arith.constant 0 : index
    %c1024_415 = arith.constant 1024 : index
    %401 = vector.load %arg15[%c0_414, %c1024_415] : memref<289x1152xbf16, #tpu.memory_space<vmem>>, vector<9x128xbf16>
    tpu.vector_store %arg15[%c0_414, %c1024_415], %400 {strides = array<i32>} : memref<289x1152xbf16, #tpu.memory_space<vmem>>, vector<9x128xbf16>,
    %c5760 = arith.constant 5760 : index
    %c0_416 = arith.constant 0 : index
    %402 = vector.load %arg2[%c5760, %c0_416] : memref<8064x128xbf16, #tpu.memory_space<vmem>>, vector<1152x128xbf16>
    %c0_417 = arith.constant 0 : index
    %c0_418 = arith.constant 0 : index
    %403 = vector.load %arg15[%c0_417, %c0_418] : memref<289x1152xbf16, #tpu.memory_space<vmem>>, vector<9x1152xbf16>
    %cst_419 = arith.constant dense<0.000000e+00> : vector<9x128xf32>
    %404 = tpu.matmul %403, %402, %cst_419 {dimension_numbers = #tpu.dot_dimension_numbers<[1], [0], [0], [1], [0, 0, 1, 1], [], []>} : vector<9x1152xbf16>, vector<1152x128xbf16>, vector<9x128xf32> -> vector<9x128xf32>
    %c5_420 = arith.constant 5 : index
    %c0_421 = arith.constant 0 : index
    %405 = vector.load %arg3[%c5_420, %c0_421] : memref<7x128xf32, #tpu.memory_space<vmem>>, vector<1x128xf32>
    %406 = vector.broadcast %405 : vector<1x128xf32> to vector<9x128xf32>
    %407 = arith.addf %404, %406 : vector<9x128xf32>
    %cst_422 = arith.constant 0.000000e+00 : f32
    %408 = vector.broadcast %cst_422 : f32 to vector<9x128xf32>
    %409 = arith.maximumf %407, %408 : vector<9x128xf32>
    %c0_423 = arith.constant 0 : index
    %c0_424 = arith.constant 0 : index
    %410 = vector.load %arg6[%c0_423, %c0_424] : memref<9x1xf32, #tpu.memory_space<vmem>>, vector<9x1xf32>
    %411 = vector.broadcast %410 : vector<9x1xf32> to vector<9x128xf32>
    %412 = arith.mulf %409, %411 : vector<9x128xf32>
    %c4_425 = arith.constant 4 : index
    %c0_426 = arith.constant 0 : index
    %413 = vector.load %arg14[%c4_425, %c0_426] : memref<17x128xf32, #tpu.memory_space<vmem>>, vector<9x128xf32>
    tpu.vector_store %arg14[%c4_425, %c0_426], %412 {strides = array<i32>} : memref<17x128xf32, #tpu.memory_space<vmem>>, vector<9x128xf32>,
    %c0_427 = arith.constant 0 : index
    %c0_428 = arith.constant 0 : index
    %414 = vector.load %arg14[%c0_427, %c0_428] : memref<17x128xf32, #tpu.memory_space<vmem>>, vector<9x128xf32>
    %415 = arith.truncf %414 : vector<9x128xf32> to vector<9x128xbf16>
    %c0_429 = arith.constant 0 : index
    %c0_430 = arith.constant 0 : index
    %416 = vector.load %arg15[%c0_429, %c0_430] : memref<289x1152xbf16, #tpu.memory_space<vmem>>, vector<9x128xbf16>
    tpu.vector_store %arg15[%c0_429, %c0_430], %415 {strides = array<i32>} : memref<289x1152xbf16, #tpu.memory_space<vmem>>, vector<9x128xbf16>,
    %c1_431 = arith.constant 1 : index
    %c0_432 = arith.constant 0 : index
    %417 = vector.load %arg14[%c1_431, %c0_432] : memref<17x128xf32, #tpu.memory_space<vmem>>, vector<9x128xf32>
    %418 = arith.truncf %417 : vector<9x128xf32> to vector<9x128xbf16>
    %c0_433 = arith.constant 0 : index
    %c128_434 = arith.constant 128 : index
    %419 = vector.load %arg15[%c0_433, %c128_434] : memref<289x1152xbf16, #tpu.memory_space<vmem>>, vector<9x128xbf16>
    tpu.vector_store %arg15[%c0_433, %c128_434], %418 {strides = array<i32>} : memref<289x1152xbf16, #tpu.memory_space<vmem>>, vector<9x128xbf16>,
    %c2_435 = arith.constant 2 : index
    %c0_436 = arith.constant 0 : index
    %420 = vector.load %arg14[%c2_435, %c0_436] : memref<17x128xf32, #tpu.memory_space<vmem>>, vector<9x128xf32>
    %421 = arith.truncf %420 : vector<9x128xf32> to vector<9x128xbf16>
    %c0_437 = arith.constant 0 : index
    %c256_438 = arith.constant 256 : index
    %422 = vector.load %arg15[%c0_437, %c256_438] : memref<289x1152xbf16, #tpu.memory_space<vmem>>, vector<9x128xbf16>
    tpu.vector_store %arg15[%c0_437, %c256_438], %421 {strides = array<i32>} : memref<289x1152xbf16, #tpu.memory_space<vmem>>, vector<9x128xbf16>,
    %c3_439 = arith.constant 3 : index
    %c0_440 = arith.constant 0 : index
    %423 = vector.load %arg14[%c3_439, %c0_440] : memref<17x128xf32, #tpu.memory_space<vmem>>, vector<9x128xf32>
    %424 = arith.truncf %423 : vector<9x128xf32> to vector<9x128xbf16>
    %c0_441 = arith.constant 0 : index
    %c384_442 = arith.constant 384 : index
    %425 = vector.load %arg15[%c0_441, %c384_442] : memref<289x1152xbf16, #tpu.memory_space<vmem>>, vector<9x128xbf16>
    tpu.vector_store %arg15[%c0_441, %c384_442], %424 {strides = array<i32>} : memref<289x1152xbf16, #tpu.memory_space<vmem>>, vector<9x128xbf16>,
    %c4_443 = arith.constant 4 : index
    %c0_444 = arith.constant 0 : index
    %426 = vector.load %arg14[%c4_443, %c0_444] : memref<17x128xf32, #tpu.memory_space<vmem>>, vector<9x128xf32>
    %427 = arith.truncf %426 : vector<9x128xf32> to vector<9x128xbf16>
    %c0_445 = arith.constant 0 : index
    %c512_446 = arith.constant 512 : index
    %428 = vector.load %arg15[%c0_445, %c512_446] : memref<289x1152xbf16, #tpu.memory_space<vmem>>, vector<9x128xbf16>
    tpu.vector_store %arg15[%c0_445, %c512_446], %427 {strides = array<i32>} : memref<289x1152xbf16, #tpu.memory_space<vmem>>, vector<9x128xbf16>,
    %c5_447 = arith.constant 5 : index
    %c0_448 = arith.constant 0 : index
    %429 = vector.load %arg14[%c5_447, %c0_448] : memref<17x128xf32, #tpu.memory_space<vmem>>, vector<9x128xf32>
    %430 = arith.truncf %429 : vector<9x128xf32> to vector<9x128xbf16>
    %c0_449 = arith.constant 0 : index
    %c640_450 = arith.constant 640 : index
    %431 = vector.load %arg15[%c0_449, %c640_450] : memref<289x1152xbf16, #tpu.memory_space<vmem>>, vector<9x128xbf16>
    tpu.vector_store %arg15[%c0_449, %c640_450], %430 {strides = array<i32>} : memref<289x1152xbf16, #tpu.memory_space<vmem>>, vector<9x128xbf16>,
    %c6_451 = arith.constant 6 : index
    %c0_452 = arith.constant 0 : index
    %432 = vector.load %arg14[%c6_451, %c0_452] : memref<17x128xf32, #tpu.memory_space<vmem>>, vector<9x128xf32>
    %433 = arith.truncf %432 : vector<9x128xf32> to vector<9x128xbf16>
    %c0_453 = arith.constant 0 : index
    %c768_454 = arith.constant 768 : index
    %434 = vector.load %arg15[%c0_453, %c768_454] : memref<289x1152xbf16, #tpu.memory_space<vmem>>, vector<9x128xbf16>
    tpu.vector_store %arg15[%c0_453, %c768_454], %433 {strides = array<i32>} : memref<289x1152xbf16, #tpu.memory_space<vmem>>, vector<9x128xbf16>,
    %c7_455 = arith.constant 7 : index
    %c0_456 = arith.constant 0 : index
    %435 = vector.load %arg14[%c7_455, %c0_456] : memref<17x128xf32, #tpu.memory_space<vmem>>, vector<9x128xf32>
    %436 = arith.truncf %435 : vector<9x128xf32> to vector<9x128xbf16>
    %c0_457 = arith.constant 0 : index
    %c896_458 = arith.constant 896 : index
    %437 = vector.load %arg15[%c0_457, %c896_458] : memref<289x1152xbf16, #tpu.memory_space<vmem>>, vector<9x128xbf16>
    tpu.vector_store %arg15[%c0_457, %c896_458], %436 {strides = array<i32>} : memref<289x1152xbf16, #tpu.memory_space<vmem>>, vector<9x128xbf16>,
    %c8_459 = arith.constant 8 : index
    %c0_460 = arith.constant 0 : index
    %438 = vector.load %arg14[%c8_459, %c0_460] : memref<17x128xf32, #tpu.memory_space<vmem>>, vector<9x128xf32>
    %439 = arith.truncf %438 : vector<9x128xf32> to vector<9x128xbf16>
    %c0_461 = arith.constant 0 : index
    %c1024_462 = arith.constant 1024 : index
    %440 = vector.load %arg15[%c0_461, %c1024_462] : memref<289x1152xbf16, #tpu.memory_space<vmem>>, vector<9x128xbf16>
    tpu.vector_store %arg15[%c0_461, %c1024_462], %439 {strides = array<i32>} : memref<289x1152xbf16, #tpu.memory_space<vmem>>, vector<9x128xbf16>,
    %c6912 = arith.constant 6912 : index
    %c0_463 = arith.constant 0 : index
    %441 = vector.load %arg2[%c6912, %c0_463] : memref<8064x128xbf16, #tpu.memory_space<vmem>>, vector<1152x128xbf16>
    %c0_464 = arith.constant 0 : index
    %c0_465 = arith.constant 0 : index
    %442 = vector.load %arg15[%c0_464, %c0_465] : memref<289x1152xbf16, #tpu.memory_space<vmem>>, vector<9x1152xbf16>
    %cst_466 = arith.constant dense<0.000000e+00> : vector<9x128xf32>
    %443 = tpu.matmul %442, %441, %cst_466 {dimension_numbers = #tpu.dot_dimension_numbers<[1], [0], [0], [1], [0, 0, 1, 1], [], []>} : vector<9x1152xbf16>, vector<1152x128xbf16>, vector<9x128xf32> -> vector<9x128xf32>
    %c6_467 = arith.constant 6 : index
    %c0_468 = arith.constant 0 : index
    %444 = vector.load %arg3[%c6_467, %c0_468] : memref<7x128xf32, #tpu.memory_space<vmem>>, vector<1x128xf32>
    %445 = vector.broadcast %444 : vector<1x128xf32> to vector<9x128xf32>
    %446 = arith.addf %443, %445 : vector<9x128xf32>
    %cst_469 = arith.constant 0.000000e+00 : f32
    %447 = vector.broadcast %cst_469 : f32 to vector<9x128xf32>
    %448 = arith.maximumf %446, %447 : vector<9x128xf32>
    %c0_470 = arith.constant 0 : index
    %c0_471 = arith.constant 0 : index
    %c0_472 = arith.constant 0 : index
    %449 = vector.load %arg10[%c0_470, %c0_471, %c0_472] : memref<1x9x128xf32, #tpu.memory_space<vmem>>, vector<1x9x128xf32>
    %450 = vector.shape_cast %449 : vector<1x9x128xf32> to vector<9x128xf32>
    %451 = vector.shape_cast %448 : vector<9x128xf32> to vector<1x9x128xf32>
    tpu.vector_store %arg10[%c0_470, %c0_471, %c0_472], %451 {strides = array<i32>} : memref<1x9x128xf32, #tpu.memory_space<vmem>>, vector<1x9x128xf32>,
    %c0_473 = arith.constant 0 : index
    %c0_474 = arith.constant 0 : index
    %c0_475 = arith.constant 0 : index
    %452 = tpu.strided_load %arg10[%c0_473, %c0_474, %c0_475] {strides = array<i32: 1, 2, 1>} : memref<1x9x128xf32, #tpu.memory_space<vmem>>, vector<1x1x128xf32>
    %453 = vector.shape_cast %452 : vector<1x1x128xf32> to vector<1x128xf32>
    %c0_476 = arith.constant 0 : index
    %c1_477 = arith.constant 1 : index
    %c0_478 = arith.constant 0 : index
    %454 = tpu.strided_load %arg10[%c0_476, %c1_477, %c0_478] {strides = array<i32: 1, 2, 1>} : memref<1x9x128xf32, #tpu.memory_space<vmem>>, vector<1x1x128xf32>
    %455 = vector.shape_cast %454 : vector<1x1x128xf32> to vector<1x128xf32>
    %c0_479 = arith.constant 0 : index
    %c3_480 = arith.constant 3 : index
    %c0_481 = arith.constant 0 : index
    %456 = tpu.strided_load %arg10[%c0_479, %c3_480, %c0_481] {strides = array<i32: 1, 2, 1>} : memref<1x9x128xf32, #tpu.memory_space<vmem>>, vector<1x1x128xf32>
    %457 = vector.shape_cast %456 : vector<1x1x128xf32> to vector<1x128xf32>
    %c0_482 = arith.constant 0 : index
    %c4_483 = arith.constant 4 : index
    %c0_484 = arith.constant 0 : index
    %458 = tpu.strided_load %arg10[%c0_482, %c4_483, %c0_484] {strides = array<i32: 1, 2, 1>} : memref<1x9x128xf32, #tpu.memory_space<vmem>>, vector<1x1x128xf32>
    %459 = vector.shape_cast %458 : vector<1x1x128xf32> to vector<1x128xf32>
    %460 = arith.maximumf %453, %455 : vector<1x128xf32>
    %461 = arith.maximumf %457, %459 : vector<1x128xf32>
    %462 = arith.maximumf %460, %461 : vector<1x128xf32>
    %c0_485 = arith.constant 0 : index
    %c0_486 = arith.constant 0 : index
    %c0_487 = arith.constant 0 : index
    %463 = vector.load %arg11[%c0_485, %c0_486, %c0_487] : memref<1x4x128xf32, #tpu.memory_space<vmem>>, vector<1x1x128xf32>
    %464 = vector.shape_cast %463 : vector<1x1x128xf32> to vector<1x128xf32>
    %465 = vector.shape_cast %462 : vector<1x128xf32> to vector<1x1x128xf32>
    tpu.vector_store %arg11[%c0_485, %c0_486, %c0_487], %465 {strides = array<i32>} : memref<1x4x128xf32, #tpu.memory_space<vmem>>, vector<1x1x128xf32>,
    return
  }
  func.func @transform_0(%arg0: i32) -> (i32, i32, i32) {
    %c0_i32 = arith.constant 0 : i32
    %c0_i32_0 = arith.constant 0 : i32
    %c0_i32_1 = arith.constant 0 : i32
    return %arg0, %c0_i32, %c0_i32_0 : i32, i32, i32
  }
  func.func @transform_1(%arg0: i32) -> (i32, i32) {
    %c0_i32 = arith.constant 0 : i32
    %c0_i32_0 = arith.constant 0 : i32
    %c0_i32_1 = arith.constant 0 : i32
    return %c0_i32, %c0_i32_0 : i32, i32
  }
  func.func @transform_2(%arg0: i32) -> (i32, i32) {
    %c0_i32 = arith.constant 0 : i32
    %c0_i32_0 = arith.constant 0 : i32
    %c0_i32_1 = arith.constant 0 : i32
    return %c0_i32, %c0_i32_0 : i32, i32
  }
  func.func @transform_3(%arg0: i32) -> (i32, i32) {
    %c0_i32 = arith.constant 0 : i32
    %c0_i32_0 = arith.constant 0 : i32
    %c0_i32_1 = arith.constant 0 : i32
    return %c0_i32, %c0_i32_0 : i32, i32
  }
  func.func @transform_4(%arg0: i32) -> (i32, i32) {
    %c0_i32 = arith.constant 0 : i32
    %c0_i32_0 = arith.constant 0 : i32
    %c0_i32_1 = arith.constant 0 : i32
    return %c0_i32, %c0_i32_0 : i32, i32
  }
  func.func @transform_5(%arg0: i32) -> (i32, i32) {
    %c0_i32 = arith.constant 0 : i32
    %c0_i32_0 = arith.constant 0 : i32
    %c0_i32_1 = arith.constant 0 : i32
    return %c0_i32, %c0_i32_0 : i32, i32
  }
  func.func @transform_6(%arg0: i32) -> (i32, i32, i32) {
    %c0_i32 = arith.constant 0 : i32
    %c0_i32_0 = arith.constant 0 : i32
    %c0_i32_1 = arith.constant 0 : i32
    return %arg0, %c0_i32, %c0_i32_0 : i32, i32, i32
  }
  func.func @transform_7(%arg0: i32) -> (i32, i32, i32) {
    %c0_i32 = arith.constant 0 : i32
    %c0_i32_0 = arith.constant 0 : i32
    %c0_i32_1 = arith.constant 0 : i32
    return %arg0, %c0_i32, %c0_i32_0 : i32, i32, i32
  }
  func.func @transform_8(%arg0: i32) -> (i32, i32, i32) {
    %c0_i32 = arith.constant 0 : i32
    %c0_i32_0 = arith.constant 0 : i32
    %c0_i32_1 = arith.constant 0 : i32
    return %arg0, %c0_i32, %c0_i32_0 : i32, i32, i32
  }
  func.func @transform_9(%arg0: i32) -> (i32, i32, i32) {
    %c0_i32 = arith.constant 0 : i32
    %c0_i32_0 = arith.constant 0 : i32
    %c0_i32_1 = arith.constant 0 : i32
    return %arg0, %c0_i32, %c0_i32_0 : i32, i32, i32
  }
  func.func @transform_10(%arg0: i32) -> (i32, i32, i32) {
    %c0_i32 = arith.constant 0 : i32
    %c0_i32_0 = arith.constant 0 : i32
    %c0_i32_1 = arith.constant 0 : i32
    return %arg0, %c0_i32, %c0_i32_0 : i32, i32, i32
  }
}

</mosaic_0001>

<bundles_post_ra>
// kernel: ynet_encoder_forward.1
= control target key start
LH: loop header
LB: loop body
LE: loop exit
PB: predicated region body
PF: predicated region fallthrough
CT: control target
= control target key end

     0   :  { %s18456_s13 = smov 0   ;;  %s20953_s0 = inlined_call_operand.vmem [shape: f32[2,325,128], index: 0, kind: input, shape index: {}]   ;;  %s20954_s1 = inlined_call_operand.vmem [shape: bf16[8064,128], index: 1, kind: input, shape index: {}]   ;;  %s20955_s2 = inlined_call_operand.vmem [shape: f32[7,128], index: 2, kind: input, shape index: {}]   ;;  %s20956_s3 = inlined_call_operand.vmem [shape: f32[81,1], index: 3, kind: input, shape index: {}]   ;;  %s20957_s4 = inlined_call_operand.vmem [shape: f32[25,1], index: 4, kind: input, shape index: {}]   ;;  %s20958_s5 = inlined_call_operand.vmem [shape: f32[9,1], index: 5, kind: input, shape index: {}]   ;;  %s20959_s6 = inlined_call_operand.vmem [shape: f32[2,289,128], index: 6, kind: output, shape index: {0}]   ;;  %s20960_s7 = inlined_call_operand.vmem [shape: f32[2,81,128], index: 7, kind: output, shape index: {1}]   ;;  %s20961_s8 = inlined_call_operand.vmem [shape: f32[2,25,128], index: 8, kind: output, shape index: {2}]   ;;  %s20962_s9 = inlined_call_operand.vmem [shape: f32[2,9,128], index: 9, kind: output, shape index: {3}]   ;;  %s20963_s10 = inlined_call_operand.vmem [shape: f32[2,4,128], index: 10, kind: output, shape index: {4}]  }
   0x1 LB: > { %s13743_s14 = sadd.s32 4294967295, %s18396_s13   ;;  %p13747_p0 = scmp.ge.s32.totalorder %s18396_s13, 1  ;;  %s18396_s13 = sphi %s18456_s13, %s21_s13  }
   0x2   : > { %p321_p1 = scmp.lt.s32.totalorder %s18396_s13, 3 }
   0x4   : > { %p322_p2 = pnand %p13747_p0, %p321_p1 }
   0x5   : > { %v17432_v0 = vld [vmem:[%s20954_s1] sm:$0xff] (!%p322_p2)   ;;  %v18398_v1 = vmov (!%p322_p2), 0   ;;  %p378_p3 = scmp.lt.s32.totalorder (!%p322_p2), %s13743_s14, 1  ;;  %v17433_v2 = vld [vmem:[%s20954_s1 + $0x8] sm:$0xff] (!%p322_p2)   ;;  %v18399_v3 = vmov (!%p322_p2), 0.0   ;;  %v17434_v4 = vld [vmem:[%s20954_s1 + $0x10] sm:$0xff] (!%p322_p2)  }
   0x6   : > { %325 = sbr.rel (%p322_p2) target bundleno = 3274 (0xcca), region = 44  ;;  %4062 = vmatprep.subr.bf16.mxu0 (!%p322_p2), %v18398_v1  ;;  %17430 = vset.pattern.permute.xlu0 (!%p322_p2), %v18398_v1  ;;  %5066 = vst [vmem:[#allocation2 + $0x50] sm:$0xff] (!%p322_p2), %v18399_v3  ;;  %5056 = vst [vmem:[#allocation2] sm:$0xff] (!%p322_p2), %v18399_v3  ;;  %v17435_v5 = vld [vmem:[%s20954_s1 + $0x18] sm:$0xff] (!%p322_p2)   ;;  %v17436_v6 = vld [vmem:[%s20954_s1 + $0x20] sm:$0xff] (!%p322_p2)   ;;  %vm630_vm0 = vcmask (!%p322_p2), 1040384  }
   0x7   : > { %4063 = vmatpush1.bf16.msra.mxu0 (!%p322_p2), %v17432_v0  ;;  %17431 = vset.pattern.permute.xlu1 (!%p322_p2), %v18398_v1  ;;  %5057 = vst [vmem:[#allocation2 + $0x8] sm:$0xff] (!%p322_p2), %v18399_v3  ;;  %5058 = vst [vmem:[#allocation2 + $0x10] sm:$0xff] (!%p322_p2), %v18399_v3  ;;  %v17437_v14 = vld [vmem:[%s20954_s1 + $0x28] sm:$0xff] (!%p322_p2)   ;;  %v17438_v29 = vld [vmem:[%s20954_s1 + $0x30] sm:$0xff] (!%p322_p2)   ;;  %vm631_vm1 = vsmask.f32 (!%p322_p2), 256 }
   0x8   : > { %4064 = vmatprep.subr.bf16.mxu0 (!%p322_p2), %v18398_v1  ;;  %5059 = vst [vmem:[#allocation2 + $0x18] sm:$0xff] (!%p322_p2), %v18399_v3  ;;  %5060 = vst [vmem:[#allocation2 + $0x20] sm:$0xff] (!%p322_p2), %v18399_v3  ;;  %v17439_v40 = vld [vmem:[%s20954_s1 + $0x38] sm:$0xff] (!%p322_p2)   ;;  %v17440_v55 = vld [vmem:[%s20954_s1 + $0x40] sm:$0xff] (!%p322_p2)   ;;  %vm18400_vm3 = vmmov (!%p322_p2), 0  }
   0x9   : > { %5061 = vst [vmem:[#allocation2 + $0x28] sm:$0xff] (!%p322_p2), %v18399_v3  ;;  %5062 = vst [vmem:[#allocation2 + $0x30] sm:$0xff] (!%p322_p2), %v18399_v3  ;;  %v17441_v60 = vld [vmem:[%s20954_s1 + $0x48] sm:$0xff] (!%p322_p2)  }
   0xa   : > { %5063 = vst [vmem:[#allocation2 + $0x38] sm:$0xff] (!%p322_p2), %v18399_v3  ;;  %5065 = vst [vmem:[#allocation2 + $0x48] sm:$0xff] (!%p322_p2), %v18399_v3 }
   0xb   : > { %5067 = vst [vmem:[#allocation2 + $0x58] sm:$0xff] (!%p322_p2), %v18399_v3  ;;  %5068 = vst [vmem:[#allocation2 + $0x60] sm:$0x1f] (!%p322_p2), %v18399_v3  ;;  %4065 = vmatpush1.bf16.msra.mxu0 (!%p322_p2), %v17433_v2 }
   0xc   : > { %9123 = vst [vmem:[#allocation3] sm:$0xff] (!%p322_p2), %v18399_v3  ;;  %9124 = vst [vmem:[#allocation3 + $0x8] sm:$0xff] (!%p322_p2), %v18399_v3  ;;  %4066 = vmatprep.subr.bf16.mxu0 (!%p322_p2), %v18398_v1 }
   0xd   : > { %s20967_s14 = smov (!%p378_p3, %s13743_s14), 1  ;;  %9125 = vst [vmem:[#allocation3 + $0x10] sm:$0xff] %v18399_v3  ;;  %9126 = vst [vmem:[#allocation3 + $0x18] sm:$0xff] %v18399_v3  ;;  %v5243_v61 = vld [vmem:[#allocation2 + $0x51] sm:$0x1] }
   0xe   : > { %9127 = vst [vmem:[#allocation3 + $0x20] sm:$0x1f] %v18399_v3  ;;  %11563 = vst [vmem:[#allocation4] sm:$0xff] %v18399_v3  ;;  %s17416_s21 = smul.u32 328, %s20967_s14  ;;  %s13755_s19 = sshll.u32 %s20967_s14, 2 }
   0xf   : > { %11564 = vst [vmem:[#allocation4 + $0x8] sm:$0xff] %v18399_v3  ;;  %11565 = vst [vmem:[#allocation4 + $0x10] sm:$0x1] %v18399_v3  ;;  %4067 = vmatpush1.bf16.msra.mxu0 %v17434_v4  ;;  %s17417_s22 = smul.u32 296, %s20967_s14 }
  0x10   : > { %4068 = vmatprep.subr.bf16.mxu0 %v18398_v1  ;;  %s18488_s26 = scalar_lea.vmem %s20953_s0, %s17416_s21  ;;  %vm18555_vm2 = vmand %vm630_vm0, %vm631_vm1  ;;  %s17418_s15 = smul.u32 88, %s20967_s14 }
  0x11   : > { %v408_v7 = vld [vmem:[%s18488_s26] sm:$0xff]  ;;  %v409_v8 = vld [vmem:[%s18488_s26 + $0x8] sm:$0xff]  ;;  %v410_v16 = vld [vmem:[%s18488_s26 + $0x10] sm:$0xff]  ;;  %s19168_s27 = scalar_lea.vmem %s20959_s6, %s17417_s22  ;;  %s15297_s21 = sshll.u32 %s20967_s14, 5 }
  0x12   : > { %v636_v9 = vld [vmem:[%s18488_s26 + $0x1] sm:$0xff]  ;;  %v15299_v10 = vpack.c.bf16 %v408_v7, %v408_v7  ;;  %v15300_v11 = vpack.c.bf16 %v409_v8, %v409_v8  ;;  %v637_v12 = vld [vmem:[%s18488_s26 + $0x9] sm:$0xff]  ;;  %v411_v17 = vld [vmem:[%s18488_s26 + $0x18] sm:$0xff]  ;;  %v15301_v18 = vpack.c.bf16 %v410_v16, %v410_v16  ;;  %v15653_v7 = vpack.c.bf16 %v5243_v61, %v5243_v61  ;;  %s19989_s18 = scalar_lea.vmem %s20960_s7, %s17418_s15  ;;  %s397_s24 = scalar_lea.vmem %s20961_s8, %s15297_s21 }
  0x13   : > { %4069 = vmatpush1.bf16.msra.mxu0 %v17435_v5  ;;  %v15336_v13 = vpack.c.bf16 %v636_v9, %v636_v9  ;;  %v15337_v15 = vpack.c.bf16 %v637_v12, %v637_v12  ;;  %v15302_v19 = vpack.c.bf16 %v411_v17, %v411_v17  ;;  %v638_v20 = vld [vmem:[%s18488_s26 + $0x11] sm:$0xff]  ;;  %v639_v21 = vld [vmem:[%s18488_s26 + $0x19] sm:$0xff]  ;;  %v413_v25 = vld [vmem:[%s18488_s26 + $0x28] sm:$0xff]  ;;  %s15298_s15 = sshll.u32 %s20967_s14, 4  ;;  %s406_s22 = scalar_lea.vmem %s20963_s10, %s13755_s19 }
  0x14   : > { %4070 = vmatprep.subr.bf16.mxu0 %v18398_v1  ;;  %594 = vst [vmem:[#allocation5] sm:$0xf] %v15299_v10  ;;  %595 = vst [vmem:[#allocation5 + $0x24] sm:$0xf] %v15300_v11  ;;  %v15338_v22 = vpack.c.bf16 %v638_v20, %v638_v20  ;;  %v15339_v23 = vpack.c.bf16 %v639_v21, %v639_v21  ;;  %v412_v24 = vld [vmem:[%s18488_s26 + $0x20] sm:$0xff]  ;;  %v641_v28 = vld [vmem:[%s18488_s26 + $0x29] sm:$0xff]  ;;  %v15304_v30 = vpack.c.bf16 %v413_v25, %v413_v25 }
  0x15   : > { %822 = vst [vmem:[#allocation5 + $0x4] sm:$0xf] %v15336_v13  ;;  %823 = vst [vmem:[#allocation5 + $0x28] sm:$0xf] %v15337_v15  ;;  %v15303_v26 = vpack.c.bf16 %v412_v24, %v412_v24  ;;  %v640_v27 = vld [vmem:[%s18488_s26 + $0x21] sm:$0xff]  ;;  %v15341_v32 = vpack.c.bf16 %v641_v28, %v641_v28  ;;  %v414_v33 = vld [vmem:[%s18488_s26 + $0x30] sm:$0xff] }
  0x16   : > { %596 = vst [vmem:[#allocation5 + $0x48] sm:$0xf] %v15301_v18  ;;  %597 = vst [vmem:[#allocation5 + $0x6c] sm:$0xf] %v15302_v19  ;;  %v15340_v31 = vpack.c.bf16 %v640_v27, %v640_v27  ;;  %v415_v34 = vld [vmem:[%s18488_s26 + $0x38] sm:$0xff]  ;;  %v15305_v36 = vpack.c.bf16 %v414_v33, %v414_v33  ;;  %v416_v42 = vld [vmem:[%s18488_s26 + $0x40] sm:$0xff] }
  0x17   : > { %4071 = vmatpush1.bf16.msra.mxu0 %v17436_v6  ;;  %824 = vst [vmem:[#allocation5 + $0x4c] sm:$0xf] %v15338_v22  ;;  %825 = vst [vmem:[#allocation5 + $0x70] sm:$0xf] %v15339_v23  ;;  %v642_v35 = vld [vmem:[%s18488_s26 + $0x31] sm:$0xff]  ;;  %v15306_v37 = vpack.c.bf16 %v415_v34, %v415_v34  ;;  %v643_v38 = vld [vmem:[%s18488_s26 + $0x39] sm:$0xff]  ;;  %v15307_v44 = vpack.c.bf16 %v416_v42, %v416_v42 }
  0x18   : > { %4072 = vmatprep.subr.bf16.mxu0 %v18398_v1  ;;  %1272 = vst [vmem:[#allocation5 + $0xc] sm:$0xf] %v15338_v22  ;;  %1273 = vst [vmem:[#allocation5 + $0x30] sm:$0xf] %v15339_v23  ;;  %v15342_v39 = vpack.c.bf16 %v642_v35, %v642_v35  ;;  %v15343_v41 = vpack.c.bf16 %v643_v38, %v643_v38  ;;  %v417_v43 = vld [vmem:[%s18488_s26 + $0x48] sm:$0xff]  ;;  %v418_v51 = vld [vmem:[%s18488_s26 + $0x50] sm:$0xff] }
  0x19   : > { %598 = vst [vmem:[#allocation5 + $0x90] sm:$0xf] %v15303_v26  ;;  %599 = vst [vmem:[#allocation5 + $0xb4] sm:$0xf] %v15304_v30  ;;  %v15308_v45 = vpack.c.bf16 %v417_v43, %v417_v43  ;;  %v644_v46 = vld [vmem:[%s18488_s26 + $0x41] sm:$0xff]  ;;  %v645_v47 = vld [vmem:[%s18488_s26 + $0x49] sm:$0xff]  ;;  %v15309_v53 = vpack.c.bf16 %v418_v51, %v418_v51 }
  0x1a   : > { %826 = vst [vmem:[#allocation5 + $0x94] sm:$0xf] %v15340_v31  ;;  %827 = vst [vmem:[#allocation5 + $0xb8] sm:$0xf] %v15341_v32  ;;  %v15344_v49 = vpack.c.bf16 %v644_v46, %v644_v46  ;;  %v15345_v50 = vpack.c.bf16 %v645_v47, %v645_v47  ;;  %v419_v52 = vld [vmem:[%s18488_s26 + $0x58] sm:$0xff]  ;;  %v420_v62 = vld [vmem:[%s18488_s26 + $0x60] sm:$0xff] }
  0x1b   : > { %4073 = vmatpush1.bf16.msra.mxu0 %v17437_v14  ;;  %1274 = vst [vmem:[#allocation5 + $0x54] sm:$0xf] %v15340_v31  ;;  %1275 = vst [vmem:[#allocation5 + $0x78] sm:$0xf] %v15341_v32  ;;  %v15310_v54 = vpack.c.bf16 %v419_v52, %v419_v52  ;;  %v646_v56 = vld [vmem:[%s18488_s26 + $0x51] sm:$0xff]  ;;  %v647_v57 = vld [vmem:[%s18488_s26 + $0x59] sm:$0xff]  ;;  %v15311_v2 = vpack.c.bf16 %v420_v62, %v420_v62 }
  0x1c   : > { %4074 = vmatprep.subr.bf16.mxu0 %v18398_v1  ;;  %600 = vst [vmem:[#allocation5 + $0xd8] sm:$0xf] %v15305_v36  ;;  %601 = vst [vmem:[#allocation5 + $0xfc] sm:$0xf] %v15306_v37  ;;  %v17448_v48 = vld [vmem:[#allocation5 + $0x4] ss:$36 sps:$4 sm:$0xff]   ;;  %v15346_v58 = vpack.c.bf16 %v646_v56, %v646_v56  ;;  %v15347_v59 = vpack.c.bf16 %v647_v57, %v647_v57 }
  0x1d   : > { %828 = vst [vmem:[#allocation5 + $0xdc] sm:$0xf] %v15342_v39  ;;  %1276 = vst [vmem:[#allocation5 + $0x9c] sm:$0xf] %v15342_v39  ;;  %4094 = vmatprep.mubr.bf16.mxu0 %v17448_v48  ;;  %v421_v63 = vld [vmem:[%s18488_s26 + $0x68] sm:$0xff]  ;;  %v17442_v6 = vld [vmem:[%s20954_s1 + $0x50] sm:$0xff]  }
  0x1e   : > { %829 = vst [vmem:[#allocation5 + $0x100] sm:$0xf] %v15343_v41  ;;  %1277 = vst [vmem:[#allocation5 + $0xc0] sm:$0xf] %v15343_v41  ;;  %v648_v0 = vld [vmem:[%s18488_s26 + $0x61] sm:$0xff]  ;;  %v15312_v3 = vpack.c.bf16 %v421_v63, %v421_v63  ;;  %v649_v5 = vld [vmem:[%s18488_s26 + $0x69] sm:$0xff] }
  0x1f   : > { %4075 = vmatpush1.bf16.msra.mxu0 %v17438_v29  ;;  %602 = vst [vmem:[#allocation5 + $0x120] sm:$0xf] %v15307_v44  ;;  %603 = vst [vmem:[#allocation5 + $0x144] sm:$0xf] %v15308_v45  ;;  %v15348_v4 = vpack.c.bf16 %v648_v0, %v648_v0  ;;  %v15349_v8 = vpack.c.bf16 %v649_v5, %v649_v5  ;;  %v422_v9 = vld [vmem:[%s18488_s26 + $0x70] sm:$0xff]  ;;  %v423_v10 = vld [vmem:[%s18488_s26 + $0x78] sm:$0xff] }
  0x20   : > { %4076 = vmatprep.subr.bf16.mxu0 %v18398_v1  ;;  %830 = vst [vmem:[#allocation5 + $0x124] sm:$0xf] %v15344_v49  ;;  %831 = vst [vmem:[#allocation5 + $0x148] sm:$0xf] %v15345_v50  ;;  %v15313_v11 = vpack.c.bf16 %v422_v9, %v422_v9  ;;  %v650_v12 = vld [vmem:[%s18488_s26 + $0x71] sm:$0xff]  ;;  %v651_v13 = vld [vmem:[%s18488_s26 + $0x79] sm:$0xff]  ;;  %v15314_v16 = vpack.c.bf16 %v423_v10, %v423_v10 }
  0x21   : > { %1278 = vst [vmem:[#allocation5 + $0xe4] sm:$0xf] %v15344_v49  ;;  %1279 = vst [vmem:[#allocation5 + $0x108] sm:$0xf] %v15345_v50  ;;  %v17443_v14 = vld [vmem:[%s20954_s1 + $0x58] sm:$0xff]   ;;  %v15350_v17 = vpack.c.bf16 %v650_v12, %v650_v12  ;;  %v15351_v18 = vpack.c.bf16 %v651_v13, %v651_v13  ;;  %v424_v22 = vld [vmem:[%s18488_s26 + $0x80] sm:$0xff] }
  0x22   : > { %604 = vst [vmem:[#allocation5 + $0x168] sm:$0xf] %v15309_v53  ;;  %605 = vst [vmem:[#allocation5 + $0x18c] sm:$0xf] %v15310_v54  ;;  %v425_v23 = vld [vmem:[%s18488_s26 + $0x88] sm:$0xff]  ;;  %v15315_v24 = vpack.c.bf16 %v424_v22, %v424_v22  ;;  %v17444_v28 = vld [vmem:[%s20954_s1 + $0x60] sm:$0xff]  }
  0x23   : > { %4077 = vmatpush1.bf16.msra.mxu0 %v17439_v40  ;;  %832 = vst [vmem:[#allocation5 + $0x16c] sm:$0xf] %v15346_v58  ;;  %833 = vst [vmem:[#allocation5 + $0x190] sm:$0xf] %v15347_v59  ;;  %v15316_v25 = vpack.c.bf16 %v425_v23, %v425_v23  ;;  %v652_v26 = vld [vmem:[%s18488_s26 + $0x81] sm:$0xff]  ;;  %v653_v27 = vld [vmem:[%s18488_s26 + $0x89] sm:$0xff] }
  0x24   : > { %4078 = vmatprep.subr.bf16.mxu0 %v18398_v1  ;;  %1280 = vst [vmem:[#allocation5 + $0x12c] sm:$0xf] %v15346_v58  ;;  %1281 = vst [vmem:[#allocation5 + $0x150] sm:$0xf] %v15347_v59  ;;  %v15352_v29 = vpack.c.bf16 %v652_v26, %v652_v26  ;;  %v15353_v30 = vpack.c.bf16 %v653_v27, %v653_v27  ;;  %v426_v31 = vld [vmem:[%s18488_s26 + $0x90] sm:$0xff]  ;;  %v427_v32 = vld [vmem:[%s18488_s26 + $0x98] sm:$0xff] }
  0x25   : > { %606 = vst [vmem:[#allocation5 + $0x1b0] sm:$0xf] %v15311_v2  ;;  %607 = vst [vmem:[#allocation5 + $0x1d4] sm:$0xf] %v15312_v3  ;;  %v15317_v33 = vpack.c.bf16 %v426_v31, %v426_v31  ;;  %v654_v34 = vld [vmem:[%s18488_s26 + $0x91] sm:$0xff]  ;;  %v15318_v35 = vpack.c.bf16 %v427_v32, %v427_v32  ;;  %v655_v36 = vld [vmem:[%s18488_s26 + $0x99] sm:$0xff] }
  0x26   : > { %834 = vst [vmem:[#allocation5 + $0x1b4] sm:$0xf] %v15348_v4  ;;  %1282 = vst [vmem:[#allocation5 + $0x174] sm:$0xf] %v15348_v4  ;;  %v15354_v37 = vpack.c.bf16 %v654_v34, %v654_v34  ;;  %v15355_v38 = vpack.c.bf16 %v655_v36, %v655_v36  ;;  %v428_v39 = vld [vmem:[%s18488_s26 + $0xa0] sm:$0xff]  ;;  %v429_v40 = vld [vmem:[%s18488_s26 + $0xa8] sm:$0xff] }
  0x27   : > { %4079 = vmatpush1.bf16.msra.mxu0 %v17440_v55  ;;  %835 = vst [vmem:[#allocation5 + $0x1d8] sm:$0xf] %v15349_v8  ;;  %1283 = vst [vmem:[#allocation5 + $0x198] sm:$0xf] %v15349_v8  ;;  %v15319_v41 = vpack.c.bf16 %v428_v39, %v428_v39  ;;  %v15320_v42 = vpack.c.bf16 %v429_v40, %v429_v40  ;;  %v17445_v43 = vld [vmem:[%s20954_s1 + $0x68] sm:$0xff]   ;;  %v430_v48 = vld [vmem:[%s18488_s26 + $0xb0] sm:$0xff] }
  0x28   : > { %4080 = vmatprep.subr.bf16.mxu0 %v18398_v1  ;;  %608 = vst [vmem:[#allocation5 + $0x1f8] sm:$0xf] %v15313_v11  ;;  %609 = vst [vmem:[#allocation5 + $0x21c] sm:$0xf] %v15314_v16  ;;  %v656_v44 = vld [vmem:[%s18488_s26 + $0xa1] sm:$0xff]  ;;  %v657_v45 = vld [vmem:[%s18488_s26 + $0xa9] sm:$0xff]  ;;  %v15321_v51 = vpack.c.bf16 %v430_v48, %v430_v48 }
  0x29   : > { %836 = vst [vmem:[#allocation5 + $0x1fc] sm:$0xf] %v15350_v17  ;;  %837 = vst [vmem:[#allocation5 + $0x220] sm:$0xf] %v15351_v18  ;;  %v15356_v46 = vpack.c.bf16 %v656_v44, %v656_v44  ;;  %v15357_v47 = vpack.c.bf16 %v657_v45, %v657_v45  ;;  %v431_v49 = vld [vmem:[%s18488_s26 + $0xb8] sm:$0xff]  ;;  %v17446_v56 = vld [vmem:[%s20954_s1 + $0x70] sm:$0xff]  }
  0x2a   : > { %v5299_v19 = vld [vmem:[#allocation5 + $0x16c] sm:$0x1]  ;;  %1284 = vst [vmem:[#allocation5 + $0x1bc] sm:$0xf] %v15350_v17  ;;  %1285 = vst [vmem:[#allocation5 + $0x1e0] sm:$0xf] %v15351_v18  ;;  %v15322_v52 = vpack.c.bf16 %v431_v49, %v431_v49 }
  0x2b   : > { %4081 = vmatpush1.bf16.msra.mxu0 %v17441_v60  ;;  %v18559_v20 = vld [vmem:[#allocation5 + $0x16c] ss:$36 sps:$4 sm:$0xff]   ;;  %v5300_v21 = vsel %vm18555_vm2, %v15653_v7, %v5299_v19  ;;  %610 = vst [vmem:[#allocation5 + $0x240] sm:$0xf] %v15315_v24  ;;  %611 = vst [vmem:[#allocation5 + $0x264] sm:$0xf] %v15316_v25 }
  0x2c   : > { %4082 = vmatprep.subr.bf16.mxu0 %v18398_v1  ;;  %5301 = vst [vmem:[#allocation5 + $0x16c] sm:$0x1] %v5300_v21  ;;  %838 = vst [vmem:[#allocation5 + $0x244] sm:$0xf] %v15352_v29  ;;  %v658_v50 = vld [vmem:[%s18488_s26 + $0xb1] sm:$0xff]  ;;  %v659_v53 = vld [vmem:[%s18488_s26 + $0xb9] sm:$0xff] }
  0x2d   : > { %839 = vst [vmem:[#allocation5 + $0x268] sm:$0xf] %v15353_v30  ;;  %1286 = vst [vmem:[#allocation5 + $0x204] sm:$0xf] %v15352_v29  ;;  %v15358_v54 = vpack.c.bf16 %v658_v50, %v658_v50  ;;  %v15359_v55 = vpack.c.bf16 %v659_v53, %v659_v53  ;;  %v432_v57 = vld [vmem:[%s18488_s26 + $0xc0] sm:$0xff]  ;;  %v433_v58 = vld [vmem:[%s18488_s26 + $0xc8] sm:$0xff] }
  0x2e   : > { %1287 = vst [vmem:[#allocation5 + $0x228] sm:$0xf] %v15353_v30  ;;  %612 = vst [vmem:[#allocation5 + $0x288] sm:$0xf] %v15317_v33  ;;  %v15323_v59 = vpack.c.bf16 %v432_v57, %v432_v57  ;;  %v660_v60 = vld [vmem:[%s18488_s26 + $0xc1] sm:$0xff]  ;;  %v15324_v61 = vpack.c.bf16 %v433_v58, %v433_v58  ;;  %v661_v63 = vld [vmem:[%s18488_s26 + $0xc9] sm:$0xff] }
  0x2f   : > { %4083 = vmatpush1.bf16.msra.mxu0 %v17442_v6  ;;  %613 = vst [vmem:[#allocation5 + $0x2ac] sm:$0xf] %v15318_v35  ;;  %840 = vst [vmem:[#allocation5 + $0x28c] sm:$0xf] %v15354_v37  ;;  %v15360_v62 = vpack.c.bf16 %v660_v60, %v660_v60  ;;  %v17447_v0 = vld [vmem:[%s20954_s1 + $0x78] sm:$0xff]   ;;  %v15361_v2 = vpack.c.bf16 %v661_v63, %v661_v63  ;;  %v434_v3 = vld [vmem:[%s18488_s26 + $0xd0] sm:$0xff] }
  0x30   : > { %4084 = vmatprep.subr.bf16.mxu0 %v18398_v1  ;;  %1288 = vst [vmem:[#allocation5 + $0x24c] sm:$0xf] %v15354_v37  ;;  %841 = vst [vmem:[#allocation5 + $0x2b0] sm:$0xf] %v15355_v38  ;;  %v435_v4 = vld [vmem:[%s18488_s26 + $0xd8] sm:$0xff]  ;;  %v15325_v5 = vpack.c.bf16 %v434_v3, %v434_v3  ;;  %v17451_v12 = vld [vmem:[%s20954_s1 + $0x80] sm:$0xff]  }
  0x31   : > { %1289 = vst [vmem:[#allocation5 + $0x270] sm:$0xf] %v15355_v38  ;;  %614 = vst [vmem:[#allocation5 + $0x2d0] sm:$0xf] %v15319_v41  ;;  %v15326_v6 = vpack.c.bf16 %v435_v4, %v435_v4  ;;  %v662_v7 = vld [vmem:[%s18488_s26 + $0xd1] sm:$0xff]  ;;  %v663_v8 = vld [vmem:[%s18488_s26 + $0xd9] sm:$0xff] }
  0x32   : > { %615 = vst [vmem:[#allocation5 + $0x2f4] sm:$0xf] %v15320_v42  ;;  %842 = vst [vmem:[#allocation5 + $0x2d4] sm:$0xf] %v15356_v46  ;;  %v15362_v9 = vpack.c.bf16 %v662_v7, %v662_v7  ;;  %v15363_v10 = vpack.c.bf16 %v663_v8, %v663_v8  ;;  %v17450_v11 = vld [vmem:[#allocation5] ss:$36 sps:$4 sm:$0xff]  }
  0x33   : > { %4085 = vmatpush1.bf16.msra.mxu0 %v17443_v14  ;;  %843 = vst [vmem:[#allocation5 + $0x2f8] sm:$0xf] %v15357_v47  ;;  %1290 = vst [vmem:[#allocation5 + $0x294] sm:$0xf] %v15356_v46  ;;  %v17452_v13 = vld [vmem:[#allocation5 + $0x4c] ss:$36 sps:$4 sm:$0xff]  }
  0x34   : > { %4086 = vmatprep.subr.bf16.mxu0 %v18398_v1  ;;  %1291 = vst [vmem:[#allocation5 + $0x2b8] sm:$0xf] %v15357_v47  ;;  %616 = vst [vmem:[#allocation5 + $0x318] sm:$0xf] %v15321_v51  ;;  %v436_v14 = vld [vmem:[%s18488_s26 + $0xe0] sm:$0xff]  ;;  %v437_v16 = vld [vmem:[%s18488_s26 + $0xe8] sm:$0xff] }
  0x35   : > { %617 = vst [vmem:[#allocation5 + $0x33c] sm:$0xf] %v15322_v52  ;;  %844 = vst [vmem:[#allocation5 + $0x31c] sm:$0xf] %v15358_v54  ;;  %v15327_v17 = vpack.c.bf16 %v436_v14, %v436_v14  ;;  %v15328_v18 = vpack.c.bf16 %v437_v16, %v437_v16  ;;  %v664_v19 = vld [vmem:[%s18488_s26 + $0xe1] sm:$0xff]  ;;  %v665_v21 = vld [vmem:[%s18488_s26 + $0xe9] sm:$0xff] }
  0x36   : > { %1292 = vst [vmem:[#allocation5 + $0x2dc] sm:$0xf] %v15358_v54  ;;  %845 = vst [vmem:[#allocation5 + $0x340] sm:$0xf] %v15359_v55  ;;  %v17455_v22 = vld [vmem:[%s20954_s1 + $0x88] sm:$0xff]   ;;  %v15364_v23 = vpack.c.bf16 %v664_v19, %v664_v19  ;;  %v15365_v24 = vpack.c.bf16 %v665_v21, %v665_v21  ;;  %v438_v25 = vld [vmem:[%s18488_s26 + $0xf0] sm:$0xff] }
  0x37   : > { %4087 = vmatpush1.bf16.msra.mxu0 %v17444_v28  ;;  %1293 = vst [vmem:[#allocation5 + $0x300] sm:$0xf] %v15359_v55  ;;  %618 = vst [vmem:[#allocation5 + $0x360] sm:$0xf] %v15323_v59  ;;  %v439_v26 = vld [vmem:[%s18488_s26 + $0xf8] sm:$0xff]  ;;  %v15329_v28 = vpack.c.bf16 %v438_v25, %v438_v25  ;;  %v17459_v35 = vld [vmem:[%s20954_s1 + $0x90] sm:$0xff]  }
  0x38   : > { %4088 = vmatprep.subr.bf16.mxu0 %v18398_v1  ;;  %619 = vst [vmem:[#allocation5 + $0x384] sm:$0xf] %v15324_v61  ;;  %846 = vst [vmem:[#allocation5 + $0x364] sm:$0xf] %v15360_v62  ;;  %v666_v27 = vld [vmem:[%s18488_s26 + $0xf1] sm:$0xff]  ;;  %v15330_v29 = vpack.c.bf16 %v439_v26, %v439_v26  ;;  %v667_v31 = vld [vmem:[%s18488_s26 + $0xf9] sm:$0xff] }
  0x39   : > { %1294 = vst [vmem:[#allocation5 + $0x324] sm:$0xf] %v15360_v62  ;;  %847 = vst [vmem:[#allocation5 + $0x388] sm:$0xf] %v15361_v2  ;;  %v15366_v30 = vpack.c.bf16 %v666_v27, %v666_v27  ;;  %v17454_v32 = vld [vmem:[#allocation5 + $0x48] ss:$36 sps:$4 sm:$0xff]   ;;  %v15367_v33 = vpack.c.bf16 %v667_v31, %v667_v31 }
  0x3a   : > { %1295 = vst [vmem:[#allocation5 + $0x348] sm:$0xf] %v15361_v2  ;;  %620 = vst [vmem:[#allocation5 + $0x3a8] sm:$0xf] %v15325_v5  ;;  %v17456_v34 = vld [vmem:[#allocation5 + $0x94] ss:$36 sps:$4 sm:$0xff]  }
  0x3b   : > { %4089 = vmatpush1.bf16.msra.mxu0 %v17445_v43  ;;  %621 = vst [vmem:[#allocation5 + $0x3cc] sm:$0xf] %v15326_v6  ;;  %848 = vst [vmem:[#allocation5 + $0x3ac] sm:$0xf] %v15362_v9  ;;  %v440_v36 = vld [vmem:[%s18488_s26 + $0x100] sm:$0xff]  ;;  %v441_v37 = vld [vmem:[%s18488_s26 + $0x108] sm:$0xff] }
  0x3c   : > { %4090 = vmatprep.subr.bf16.mxu0 %v18398_v1  ;;  %849 = vst [vmem:[#allocation5 + $0x3d0] sm:$0xf] %v15363_v10  ;;  %1296 = vst [vmem:[#allocation5 + $0x36c] sm:$0xf] %v15362_v9  ;;  %v15331_v38 = vpack.c.bf16 %v440_v36, %v440_v36  ;;  %v668_v39 = vld [vmem:[%s18488_s26 + $0x101] sm:$0xff]  ;;  %v669_v40 = vld [vmem:[%s18488_s26 + $0x109] sm:$0xff]  ;;  %v15332_v41 = vpack.c.bf16 %v441_v37, %v441_v37 }
  0x3d   : > { %1297 = vst [vmem:[#allocation5 + $0x390] sm:$0xf] %v15363_v10  ;;  %622 = vst [vmem:[#allocation5 + $0x3f0] sm:$0xf] %v15327_v17  ;;  %v15368_v42 = vpack.c.bf16 %v668_v39, %v668_v39  ;;  %v15369_v43 = vpack.c.bf16 %v669_v40, %v669_v40  ;;  %v442_v44 = vld [vmem:[%s18488_s26 + $0x110] sm:$0xff]  ;;  %v443_v45 = vld [vmem:[%s18488_s26 + $0x118] sm:$0xff] }
  0x3e   : > { %623 = vst [vmem:[#allocation5 + $0x414] sm:$0xf] %v15328_v18  ;;  %850 = vst [vmem:[#allocation5 + $0x3f4] sm:$0xf] %v15364_v23  ;;  %v670_v46 = vld [vmem:[%s18488_s26 + $0x111] sm:$0xff]  ;;  %v15333_v48 = vpack.c.bf16 %v442_v44, %v442_v44  ;;  %v15334_v49 = vpack.c.bf16 %v443_v45, %v443_v45  ;;  %v671_v52 = vld [vmem:[%s18488_s26 + $0x119] sm:$0xff] }
  0x3f   : > { %4091 = vmatpush1.bf16.msra.mxu0 %v17446_v56  ;;  %851 = vst [vmem:[#allocation5 + $0x418] sm:$0xf] %v15365_v24  ;;  %1298 = vst [vmem:[#allocation5 + $0x3b4] sm:$0xf] %v15364_v23  ;;  %v17463_v47 = vld [vmem:[%s20954_s1 + $0x98] sm:$0xff]   ;;  %v15370_v50 = vpack.c.bf16 %v670_v46, %v670_v46  ;;  %v15371_v54 = vpack.c.bf16 %v671_v52, %v671_v52  ;;  %v17469_v61 = vld [vmem:[%s20954_s1 + $0xa0] sm:$0xff]  }
  0x40   : > { %4092 = vmatprep.subr.bf16.mxu0 %v18398_v1  ;;  %1299 = vst [vmem:[#allocation5 + $0x3d8] sm:$0xf] %v15365_v24  ;;  %624 = vst [vmem:[#allocation5 + $0x438] sm:$0xf] %v15329_v28  ;;  %v17458_v51 = vld [vmem:[#allocation5 + $0x90] ss:$36 sps:$4 sm:$0xff]  }
  0x41   : > { %625 = vst [vmem:[#allocation5 + $0x45c] sm:$0xf] %v15330_v29  ;;  %852 = vst [vmem:[#allocation5 + $0x43c] sm:$0xf] %v15366_v30  ;;  %v444_v53 = vld [vmem:[%s18488_s26 + $0x120] sm:$0x1] }
  0x42   : > { %1300 = vst [vmem:[#allocation5 + $0x3fc] sm:$0xf] %v15366_v30  ;;  %853 = vst [vmem:[#allocation5 + $0x460] sm:$0xf] %v15367_v33  ;;  %v15335_v55 = vpack.c.bf16 %v444_v53, %v444_v53  ;;  %v633_v56 = vld [vmem:[#allocation5 + $0x510] sm:$0x1] }
  0x43   : > { %4093 = vmatpush1.bf16.msra.mxu0 %v17447_v0  ;;  %1301 = vst [vmem:[#allocation5 + $0x420] sm:$0xf] %v15367_v33  ;;  %626 = vst [vmem:[#allocation5 + $0x480] sm:$0xf] %v15331_v38  ;;  %v672_v57 = vld [vmem:[%s18488_s26 + $0x121] sm:$0x1] }
  0x44   : > { %4246 = vmatprep.subr.bf16.mxu0 %v18398_v1  ;;  %627 = vst [vmem:[#allocation5 + $0x4a4] sm:$0xf] %v15332_v41  ;;  %854 = vst [vmem:[#allocation5 + $0x484] sm:$0xf] %v15368_v42  ;;  %v15372_v58 = vpack.c.bf16 %v672_v57, %v672_v57  ;;  %v858_v59 = vld [vmem:[#allocation5 + $0x514] sm:$0x1]  ;;  %v634_v62 = vsel %vm18555_vm2, %v15335_v55, %v633_v56 }
  0x45   : > { %855 = vst [vmem:[#allocation5 + $0x4a8] sm:$0xf] %v15369_v43  ;;  %1302 = vst [vmem:[#allocation5 + $0x444] sm:$0xf] %v15368_v42  ;;  %v17460_v60 = vld [vmem:[#allocation5 + $0xdc] ss:$36 sps:$4 sm:$0xff]  }
  0x46   : > { %4095 = vmatmul.mubr.bf16.vlgmr.msra.gmra.mrb[0].mxu0 %v17450_v11  ;;  %1303 = vst [vmem:[#allocation5 + $0x468] sm:$0xf] %v15369_v43  ;;  %628 = vst [vmem:[#allocation5 + $0x4c8] sm:$0xf] %v15333_v48  ;;  %v859_v63 = vsel %vm18555_vm2, %v15372_v58, %v858_v59  ;;  %v861_v0 = vld [vmem:[%s18488_s26 + $0x2] sm:$0xff]  ;;  %v862_v2 = vld [vmem:[%s18488_s26 + $0xa] sm:$0xff] }
  0x47   : > { %4247 = vmatpush1.bf16.msra.mxu0 %v17451_v12  ;;  %4102 = vmatprep.mubr.bf16.mxu0 %v17452_v13  ;;  %629 = vst [vmem:[#allocation5 + $0x4ec] sm:$0xf] %v15334_v49  ;;  %856 = vst [vmem:[#allocation5 + $0x4cc] sm:$0xf] %v15370_v50  ;;  %v15373_v3 = vpack.c.bf16 %v861_v0, %v861_v0  ;;  %v15374_v4 = vpack.c.bf16 %v862_v2, %v862_v2  ;;  %v17473_v5 = vld [vmem:[%s20954_s1 + $0xa8] sm:$0xff]   ;;  %v863_v7 = vld [vmem:[%s18488_s26 + $0x12] sm:$0xff] }
  0x48   : > { %4248 = vmatprep.subr.bf16.mxu0 %v18398_v1  ;;  %1304 = vst [vmem:[#allocation5 + $0x48c] sm:$0xf] %v15370_v50  ;;  %857 = vst [vmem:[#allocation5 + $0x4f0] sm:$0xf] %v15371_v54  ;;  %v17462_v6 = vld [vmem:[#allocation5 + $0xd8] ss:$36 sps:$4 sm:$0xff]   ;;  %v15375_v11 = vpack.c.bf16 %v863_v7, %v863_v7 }
  0x49   : > { %1305 = vst [vmem:[#allocation5 + $0x4b0] sm:$0xf] %v15371_v54  ;;  %635 = vst [vmem:[#allocation5 + $0x510] sm:$0x1] %v634_v62  ;;  %v864_v8 = vld [vmem:[%s18488_s26 + $0x1a] sm:$0xff]  ;;  %v17477_v10 = vld [vmem:[%s20954_s1 + $0xb0] sm:$0xff]  }
  0x4a   : > { %860 = vst [vmem:[#allocation5 + $0x514] sm:$0x1] %v859_v63  ;;  %1047 = vst [vmem:[#allocation5 + $0x8] sm:$0xf] %v15373_v3  ;;  %v17464_v9 = vld [vmem:[#allocation5 + $0x124] ss:$36 sps:$4 sm:$0xff]   ;;  %v15376_v12 = vpack.c.bf16 %v864_v8, %v864_v8 }
  0x4b   : > { %4249 = vmatpush1.bf16.msra.mxu0 %v17455_v22  ;;  %1048 = vst [vmem:[#allocation5 + $0x2c] sm:$0xf] %v15374_v4  ;;  %1049 = vst [vmem:[#allocation5 + $0x50] sm:$0xf] %v15375_v11  ;;  %v17481_v13 = vld [vmem:[%s20954_s1 + $0xb8] sm:$0xff]   ;;  %v865_v16 = vld [vmem:[%s18488_s26 + $0x22] sm:$0xff] }
  0x4c   : > { %4250 = vmatprep.subr.bf16.mxu0 %v18398_v1  ;;  %1050 = vst [vmem:[#allocation5 + $0x74] sm:$0xf] %v15376_v12  ;;  %1497 = vst [vmem:[#allocation5 + $0x10] sm:$0xf] %v15375_v11  ;;  %v17466_v14 = vld [vmem:[#allocation5 + $0x120] ss:$36 sps:$4 sm:$0xff]   ;;  %v15377_v18 = vpack.c.bf16 %v865_v16, %v865_v16 }
  0x4d   : > { %1498 = vst [vmem:[#allocation5 + $0x34] sm:$0xf] %v15376_v12  ;;  %v866_v17 = vld [vmem:[%s18488_s26 + $0x2a] sm:$0xff]  ;;  %v17485_v21 = vld [vmem:[%s20954_s1 + $0xc0] sm:$0xff]   ;;  %v2635_v23 = vld [vmem:[#allocation5 + $0x18c] sm:$0xff] }
  0x4e   : > { %4103 = vmatmul.mubr.bf16.gmra.mrb[4].mxu0 %v17454_v32  ;;  %v15378_v19 = vpack.c.bf16 %v866_v17, %v866_v17  ;;  %1051 = vst [vmem:[#allocation5 + $0x98] sm:$0xf] %v15377_v18  ;;  %1499 = vst [vmem:[#allocation5 + $0x58] sm:$0xf] %v15377_v18  ;;  %v2630_v22 = vld [vmem:[#allocation5 + $0x168] sm:$0xff]  ;;  %v17491_v24 = vld [vmem:[%s20954_s1 + $0xc8] sm:$0xff]  }
  0x4f   : > { %4110 = vmatprep.mubr.bf16.mxu0 %v17456_v34  ;;  %4251 = vmatpush1.bf16.msra.mxu0 %v17459_v35  ;;  %v17470_v25 = vld [vmem:[#allocation5 + $0x1b4] ss:$36 sps:$4 sm:$0xff]   ;;  %v867_v26 = vld [vmem:[%s18488_s26 + $0x32] sm:$0xff]  ;;  %v14135_v28 = vcombine.low %v2630_v22, %v2635_v23  ;;  %v17474_v33 = vld [vmem:[#allocation5 + $0x1fc] ss:$36 sps:$4 sm:$0xff]  }
  0x50   : > { %4252 = vmatprep.subr.bf16.mxu0 %v18398_v1  ;;  %1052 = vst [vmem:[#allocation5 + $0xbc] sm:$0xf] %v15378_v19  ;;  %1500 = vst [vmem:[#allocation5 + $0x7c] sm:$0xf] %v15378_v19  ;;  %v868_v27 = vld [vmem:[%s18488_s26 + $0x3a] sm:$0xff]  ;;  %v15379_v29 = vpack.c.bf16 %v867_v26, %v867_v26  ;;  %v17496_v31 = vld [vmem:[%s20954_s1 + $0xd0] sm:$0xff]  }
  0x51   : > { %v15380_v30 = vpack.c.bf16 %v868_v27, %v868_v27  ;;  %v17472_v32 = vld [vmem:[#allocation5 + $0x1b0] ss:$36 sps:$4 sm:$0xff]   ;;  %v869_v34 = vld [vmem:[%s18488_s26 + $0x42] sm:$0xff]  ;;  %v870_v35 = vld [vmem:[%s18488_s26 + $0x4a] sm:$0xff] }
  0x52   : > { %1053 = vst [vmem:[#allocation5 + $0xe0] sm:$0xf] %v15379_v29  ;;  %1501 = vst [vmem:[#allocation5 + $0xa0] sm:$0xf] %v15379_v29  ;;  %v15381_v36 = vpack.c.bf16 %v869_v34, %v869_v34  ;;  %v15382_v37 = vpack.c.bf16 %v870_v35, %v870_v35  ;;  %v17504_v38 = vld [vmem:[%s20954_s1 + $0xe0] sm:$0xff]   ;;  %v17508_v39 = vld [vmem:[%s20954_s1 + $0xe8] sm:$0xff]  }
  0x53   : > { %4253 = vmatpush1.bf16.msra.mxu0 %v17463_v47  ;;  %1054 = vst [vmem:[#allocation5 + $0x104] sm:$0xf] %v15380_v30  ;;  %1502 = vst [vmem:[#allocation5 + $0xc4] sm:$0xf] %v15380_v30  ;;  %v5380_v40 = vld [vmem:[#allocation2 + $0x51] sm:$0xff]  ;;  %v872_v44 = vld [vmem:[%s18488_s26 + $0x5a] sm:$0xff] }
  0x54   : > { %4254 = vmatprep.subr.bf16.mxu0 %v18398_v1  ;;  %1055 = vst [vmem:[#allocation5 + $0x128] sm:$0xf] %v15381_v36  ;;  %1056 = vst [vmem:[#allocation5 + $0x14c] sm:$0xf] %v15382_v37  ;;  %v17476_v41 = vld [vmem:[#allocation5 + $0x1f8] ss:$36 sps:$4 sm:$0xff]   ;;  %v15674_v42 = vpack.c.bf16 %v5380_v40, %v5380_v40  ;;  %v15384_v46 = vpack.c.bf16 %v872_v44, %v872_v44 }
  0x55   : > { %1503 = vst [vmem:[#allocation5 + $0xe8] sm:$0xf] %v15381_v36  ;;  %1504 = vst [vmem:[#allocation5 + $0x10c] sm:$0xf] %v15382_v37  ;;  %v871_v43 = vld [vmem:[%s18488_s26 + $0x52] sm:$0xff]  ;;  %v873_v57 = vld [vmem:[%s18488_s26 + $0x62] sm:$0xff] }
  0x56   : > { %4111 = vmatmul.mubr.bf16.gmra.mrb[8].mxu0 %v17458_v51  ;;  %v15383_v45 = vpack.c.bf16 %v871_v43, %v871_v43  ;;  %v17478_v47 = vld [vmem:[#allocation5 + $0x244] ss:$36 sps:$4 sm:$0xff]   ;;  %v18698_v49 = vld [vmem:[#allocation5 + $0x12c] ss:$36 sps:$4 sm:$0xff]   ;;  %1058 = vst [vmem:[#allocation5 + $0x194] sm:$0xf] %v15384_v46 }
  0x57   : > { %4118 = vmatprep.mubr.bf16.mxu0 %v17460_v60  ;;  %4255 = vmatpush1.bf16.msra.mxu0 %v17469_v61  ;;  %v17512_v48 = vld [vmem:[%s20954_s1 + $0xf0] sm:$0xff]   ;;  %5436 = vst [vmem:[#allocation5 + $0x150] sm:$0xf] %v15674_v42  ;;  %1506 = vst [vmem:[#allocation5 + $0x154] sm:$0xf] %v15384_v46  ;;  %v17518_v50 = vld [vmem:[%s20954_s1 + $0xf8] sm:$0xff]   ;;  %v15385_v60 = vpack.c.bf16 %v873_v57, %v873_v57 }
  0x58   : > { %4256 = vmatprep.subr.bf16.mxu0 %v18398_v1  ;;  %1057 = vst [vmem:[#allocation5 + $0x170] sm:$0xf] %v15383_v45  ;;  %1505 = vst [vmem:[#allocation5 + $0x130] sm:$0xf] %v15383_v45  ;;  %v5312_v51 = vld [vmem:[#allocation2 + $0x52] sm:$0x1] }
  0x59   : > { %v5381_v52 = vld [vmem:[#allocation2 + $0x59] sm:$0x1]  ;;  %v5437_v53 = vld [vmem:[#allocation5 + $0x174] sm:$0x1]  ;;  %v17480_v54 = vld [vmem:[#allocation5 + $0x240] ss:$36 sps:$4 sm:$0xff]   ;;  %v15664_v56 = vpack.c.bf16 %v5312_v51, %v5312_v51 }
  0x5a   : > { %v15675_v55 = vpack.c.bf16 %v5381_v52, %v5381_v52  ;;  %v874_v58 = vld [vmem:[%s18488_s26 + $0x6a] sm:$0xff]  ;;  %v17482_v62 = vld [vmem:[#allocation5 + $0x28c] ss:$36 sps:$4 sm:$0xff]   ;;  %v18709_v63 = vld [vmem:[#allocation5 + $0x174] ss:$36 sps:$4 sm:$0xff]  }
  0x5b   : > { %4257 = vmatpush1.bf16.msra.mxu0 %v17473_v5  ;;  %v15386_v61 = vpack.c.bf16 %v874_v58, %v874_v58  ;;  %1059 = vst [vmem:[#allocation5 + $0x1b8] sm:$0xf] %v15385_v60  ;;  %1507 = vst [vmem:[#allocation5 + $0x178] sm:$0xf] %v15385_v60  ;;  %v17484_v3 = vld [vmem:[#allocation5 + $0x288] ss:$36 sps:$4 sm:$0xff]  }
  0x5c   : > { %4258 = vmatprep.subr.bf16.mxu0 %v18398_v1  ;;  %v5438_v59 = vsel %vm18555_vm2, %v15675_v55, %v5437_v53  ;;  %v875_v4 = vld [vmem:[%s18488_s26 + $0x72] sm:$0xff]  ;;  %v876_v5 = vld [vmem:[%s18488_s26 + $0x7a] sm:$0xff]  ;;  %v878_v11 = vld [vmem:[%s18488_s26 + $0x8a] sm:$0xff] }
  0x5d   : > { %5439 = vst [vmem:[#allocation5 + $0x174] sm:$0x1] %v5438_v59  ;;  %1060 = vst [vmem:[#allocation5 + $0x1dc] sm:$0xf] %v15386_v61  ;;  %v15388_v7 = vpack.c.bf16 %v876_v5, %v876_v5  ;;  %v17486_v8 = vld [vmem:[#allocation5 + $0x2d4] ss:$36 sps:$4 sm:$0xff]  }
  0x5e   : > { %4119 = vmatmul.mubr.bf16.gmra.mrb[12].mxu0 %v17462_v6  ;;  %1508 = vst [vmem:[#allocation5 + $0x19c] sm:$0xf] %v15386_v61  ;;  %v15387_v6 = vpack.c.bf16 %v875_v4, %v875_v4  ;;  %v17492_v16 = vld [vmem:[#allocation5 + $0x318] ss:$36 sps:$4 sm:$0xff]   ;;  %v879_v17 = vld [vmem:[%s18488_s26 + $0x92] sm:$0xff]  ;;  %v886_v36 = vld [vmem:[%s18488_s26 + $0xca] sm:$0xff] }
  0x5f   : > { %4126 = vmatprep.mubr.bf16.mxu0 %v17464_v9  ;;  %4259 = vmatpush1.bf16.msra.mxu0 %v17477_v10  ;;  %v5368_v0 = vld [vmem:[#allocation5 + $0x170] sm:$0x1]  ;;  %1062 = vst [vmem:[#allocation5 + $0x224] sm:$0xf] %v15388_v7  ;;  %1510 = vst [vmem:[#allocation5 + $0x1e4] sm:$0xf] %v15388_v7  ;;  %v15391_v19 = vpack.c.bf16 %v879_v17, %v879_v17 }
  0x60   : > { %4260 = vmatprep.subr.bf16.mxu0 %v18398_v1  ;;  %v5369_v2 = vsel %vm18555_vm2, %v15664_v56, %v5368_v0  ;;  %1061 = vst [vmem:[#allocation5 + $0x200] sm:$0xf] %v15387_v6  ;;  %1509 = vst [vmem:[#allocation5 + $0x1c0] sm:$0xf] %v15387_v6  ;;  %v17488_v9 = vld [vmem:[#allocation5 + $0x2d0] ss:$36 sps:$4 sm:$0xff]  }
  0x61   : > { %5370 = vst [vmem:[#allocation5 + $0x170] sm:$0x1] %v5369_v2  ;;  %v877_v10 = vld [vmem:[%s18488_s26 + $0x82] sm:$0xff]  ;;  %v880_v18 = vld [vmem:[%s18488_s26 + $0x9a] sm:$0xff]  ;;  %v17493_v22 = vld [vmem:[#allocation5 + $0x364] ss:$36 sps:$4 sm:$0xff]  }
  0x62   : > { %v15389_v12 = vpack.c.bf16 %v877_v10, %v877_v10  ;;  %1065 = vst [vmem:[#allocation5 + $0x290] sm:$0xf] %v15391_v19  ;;  %1513 = vst [vmem:[#allocation5 + $0x250] sm:$0xf] %v15391_v19  ;;  %v17495_v23 = vld [vmem:[#allocation5 + $0x360] ss:$36 sps:$4 sm:$0xff]  }
  0x63   : > { %4261 = vmatpush1.bf16.msra.mxu0 %v17481_v13  ;;  %v15390_v13 = vpack.c.bf16 %v878_v11, %v878_v11  ;;  %v17499_v29 = vld [vmem:[#allocation5 + $0x3a8] ss:$36 sps:$4 sm:$0xff]   ;;  %v17503_v34 = vld [vmem:[#allocation5 + $0x3f0] ss:$36 sps:$4 sm:$0xff]   ;;  %v885_v35 = vld [vmem:[%s18488_s26 + $0xc2] sm:$0xff] }
  0x64   : > { %4262 = vmatprep.subr.bf16.mxu0 %v18398_v1  ;;  %1063 = vst [vmem:[#allocation5 + $0x248] sm:$0xf] %v15389_v12  ;;  %1511 = vst [vmem:[#allocation5 + $0x208] sm:$0xf] %v15389_v12  ;;  %v883_v30 = vld [vmem:[%s18488_s26 + $0xb2] sm:$0xff]  ;;  %v15397_v37 = vpack.c.bf16 %v885_v35, %v885_v35  ;;  %v888_v42 = vld [vmem:[%s18488_s26 + $0xda] sm:$0xff] }
  0x65   : > { %1064 = vst [vmem:[#allocation5 + $0x26c] sm:$0xf] %v15390_v13  ;;  %1512 = vst [vmem:[#allocation5 + $0x22c] sm:$0xf] %v15390_v13  ;;  %v17507_v40 = vld [vmem:[#allocation5 + $0x438] ss:$36 sps:$4 sm:$0xff]   ;;  %v15400_v44 = vpack.c.bf16 %v888_v42, %v888_v42 }
  0x66   : > { %4127 = vmatmul.mubr.bf16.gmra.mrb[16].mxu0 %v17466_v14  ;;  %v17489_v14 = vld [vmem:[#allocation5 + $0x31c] ss:$36 sps:$4 sm:$0xff]   ;;  %1071 = vst [vmem:[#allocation5 + $0x368] sm:$0xf] %v15397_v37  ;;  %1519 = vst [vmem:[#allocation5 + $0x328] sm:$0xf] %v15397_v37 }
  0x67   : > { %4134 = vmatprep.mubr.bf16.mxu0 %v18559_v20  ;;  %4263 = vmatpush1.bf16.msra.mxu0 %v17485_v21  ;;  %v17500_v20 = vld [vmem:[%s20954_s1 + $0xd8] sm:$0xff]   ;;  %v15392_v21 = vpack.c.bf16 %v880_v18, %v880_v18  ;;  %v17509_v45 = vld [vmem:[#allocation5 + $0x484] ss:$36 sps:$4 sm:$0xff]   ;;  %1074 = vst [vmem:[#allocation5 + $0x3d4] sm:$0xf] %v15400_v44  ;;  %v893_v60 = vld [vmem:[%s18488_s26 + $0x102] sm:$0xff] }
  0x68   : > { %4264 = vmatprep.subr.bf16.mxu0 %v18398_v1  ;;  %1522 = vst [vmem:[#allocation5 + $0x394] sm:$0xf] %v15400_v44  ;;  %v17511_v46 = vld [vmem:[#allocation5 + $0x480] ss:$36 sps:$4 sm:$0xff]   ;;  %v17513_v52 = vld [vmem:[#allocation5 + $0x4cc] ss:$36 sps:$4 sm:$0xff]   ;;  %v15405_v0 = vpack.c.bf16 %v893_v60, %v893_v60 }
  0x69   : > { %1066 = vst [vmem:[#allocation5 + $0x2b4] sm:$0xf] %v15392_v21  ;;  %1514 = vst [vmem:[#allocation5 + $0x274] sm:$0xf] %v15392_v21  ;;  %v2760_v53 = vld [vmem:[#allocation5 + $0x510] sm:$0x11] }
  0x6a   : > { %v891_v55 = vld [vmem:[%s18488_s26 + $0xf2] sm:$0xff]  ;;  %v892_v56 = vld [vmem:[%s18488_s26 + $0xfa] sm:$0xff]  ;;  %v14253_v59 = vcombine.high %v2760_v53, %v2760_v53  ;;  %v894_v61 = vld [vmem:[%s18488_s26 + $0x10a] sm:$0xff]  ;;  %1079 = vst [vmem:[#allocation5 + $0x488] sm:$0xf] %v15405_v0 }
  0x6b   : > { %4265 = vmatpush1.bf16.msra.mxu0 %v17491_v24  ;;  %v881_v24 = vld [vmem:[%s18488_s26 + $0xa2] sm:$0xff]  ;;  %v15403_v57 = vpack.c.bf16 %v891_v55, %v891_v55  ;;  %v15404_v58 = vpack.c.bf16 %v892_v56, %v892_v56  ;;  %v15406_v2 = vpack.c.bf16 %v894_v61, %v894_v61  ;;  %1527 = vst [vmem:[#allocation5 + $0x448] sm:$0xf] %v15405_v0  ;;  %v17521_v4 = vld [vmem:[#allocation5 + $0x8] ss:$36 sps:$4 sm:$0xff]   ;;  %v896_v7 = vld [vmem:[%s18488_s26 + $0x11a] sm:$0xff] }
  0x6c   : > { %4266 = vmatprep.subr.bf16.mxu0 %v18398_v1  ;;  %v15393_v26 = vpack.c.bf16 %v881_v24, %v881_v24  ;;  %v17522_v5 = vld [vmem:[%s20954_s1 + $0x100] sm:$0xff]   ;;  %v895_v6 = vld [vmem:[%s18488_s26 + $0x112] sm:$0xff]  ;;  %v15408_v10 = vpack.c.bf16 %v896_v7, %v896_v7  ;;  %v1121_v11 = vld [vmem:[%s18488_s26 + $0x129] sm:$0xff] }
  0x6d   : > { %1077 = vst [vmem:[#allocation5 + $0x440] sm:$0xf] %v15403_v57  ;;  %1078 = vst [vmem:[#allocation5 + $0x464] sm:$0xf] %v15404_v58  ;;  %v17523_v13 = vld [vmem:[#allocation5 + $0x54] ss:$36 sps:$4 sm:$0xff]  }
  0x6e   : > { %4135 = vmatmul.mubr.bf16.gmra.mrb[20].mxu0 %v14135_v28  ;;  %v17497_v28 = vld [vmem:[#allocation5 + $0x3ac] ss:$36 sps:$4 sm:$0xff]   ;;  %1067 = vst [vmem:[#allocation5 + $0x2d8] sm:$0xf] %v15393_v26  ;;  %1515 = vst [vmem:[#allocation5 + $0x298] sm:$0xf] %v15393_v26 }
  0x6f   : > { %4142 = vmatprep.mubr.bf16.mxu0 %v17470_v25  ;;  %4267 = vmatpush1.bf16.msra.mxu0 %v17496_v31  ;;  %v882_v25 = vld [vmem:[%s18488_s26 + $0xaa] sm:$0xff]  ;;  %v884_v31 = vld [vmem:[%s18488_s26 + $0xba] sm:$0xff]  ;;  %1525 = vst [vmem:[#allocation5 + $0x400] sm:$0xf] %v15403_v57  ;;  %1526 = vst [vmem:[#allocation5 + $0x424] sm:$0xf] %v15404_v58 }
  0x70   : > { %4268 = vmatprep.subr.bf16.mxu0 %v18398_v1  ;;  %v15394_v27 = vpack.c.bf16 %v882_v25, %v882_v25  ;;  %1080 = vst [vmem:[#allocation5 + $0x4ac] sm:$0xf] %v15406_v2  ;;  %1528 = vst [vmem:[#allocation5 + $0x46c] sm:$0xf] %v15406_v2  ;;  %v897_v17 = vld [vmem:[%s18488_s26 + $0x122] sm:$0x1] }
  0x71   : > { %1082 = vst [vmem:[#allocation5 + $0x4f4] sm:$0xf] %v15408_v10  ;;  %1530 = vst [vmem:[#allocation5 + $0x4b4] sm:$0xf] %v15408_v10  ;;  %v1122_v18 = vld [vmem:[%s18488_s26 + $0x131] sm:$0x1]  ;;  %v15409_v21 = vpack.c.bf16 %v897_v17, %v897_v17 }
  0x72   : > { %1068 = vst [vmem:[#allocation5 + $0x2fc] sm:$0xf] %v15394_v27  ;;  %1516 = vst [vmem:[#allocation5 + $0x2bc] sm:$0xf] %v15394_v27  ;;  %v17525_v19 = vld [vmem:[#allocation5 + $0x50] ss:$36 sps:$4 sm:$0xff]  }
  0x73   : > { %4269 = vmatpush1.bf16.msra.mxu0 %v17500_v20  ;;  %v15395_v20 = vpack.c.bf16 %v883_v30, %v883_v30  ;;  %v17530_v24 = vld [vmem:[%s20954_s1 + $0x110] sm:$0xff]   ;;  %v1083_v25 = vld [vmem:[#allocation5 + $0x518] sm:$0x1]  ;;  %v1308_v26 = vld [vmem:[#allocation5 + $0x51c] sm:$0x1] }
  0x74   : > { %4270 = vmatprep.subr.bf16.mxu0 %v18398_v1  ;;  %v1084_v27 = vsel %vm18555_vm2, %v15409_v21, %v1083_v25  ;;  %v17529_v30 = vld [vmem:[#allocation5 + $0x98] ss:$36 sps:$4 sm:$0xff]   ;;  %v17533_v37 = vld [vmem:[#allocation5 + $0xe0] ss:$36 sps:$4 sm:$0xff]   ;;  %v17547_v42 = vld [vmem:[%s20954_s1 + $0x130] sm:$0xff]  }
  0x75   : > { %1069 = vst [vmem:[#allocation5 + $0x320] sm:$0xf] %v15395_v20  ;;  %1517 = vst [vmem:[#allocation5 + $0x2e0] sm:$0xf] %v15395_v20  ;;  %v1536_v20 = vld [vmem:[%s18488_s26 + $0x13] sm:$0xff]  ;;  %v1542_v56 = vld [vmem:[%s18488_s26 + $0x43] sm:$0xff] }
  0x76   : > { %4143 = vmatmul.mubr.bf16.gmra.mrb[24].mxu0 %v17472_v32  ;;  %v15396_v32 = vpack.c.bf16 %v884_v31, %v884_v31  ;;  %1085 = vst [vmem:[#allocation5 + $0x518] sm:$0x1] %v1084_v27  ;;  %v17531_v31 = vld [vmem:[#allocation5 + $0xe4] ss:$36 sps:$4 sm:$0xff]   ;;  %v2626_v44 = vld [vmem:[#allocation5 + $0x14c] sm:$0xff] }
  0x77   : > { %4150 = vmatprep.mubr.bf16.mxu0 %v17474_v33  ;;  %4271 = vmatpush1.bf16.msra.mxu0 %v17504_v38  ;;  %v17501_v33 = vld [vmem:[#allocation5 + $0x3f4] ss:$36 sps:$4 sm:$0xff]   ;;  %v15398_v38 = vpack.c.bf16 %v886_v36, %v886_v36  ;;  %v17543_v36 = vld [vmem:[%s20954_s1 + $0x128] sm:$0xff]   ;;  %v17566_v61 = vld [vmem:[%s20954_s1 + $0x150] sm:$0xff]  }
  0x78   : > { %4272 = vmatprep.subr.bf16.mxu0 %v18398_v1  ;;  %1070 = vst [vmem:[#allocation5 + $0x344] sm:$0xf] %v15396_v32  ;;  %1518 = vst [vmem:[#allocation5 + $0x304] sm:$0xf] %v15396_v32  ;;  %v1537_v32 = vld [vmem:[%s18488_s26 + $0x1b] sm:$0xff]  ;;  %v1543_v57 = vld [vmem:[%s18488_s26 + $0x4b] sm:$0xff] }
  0x79   : > { %1072 = vst [vmem:[#allocation5 + $0x38c] sm:$0xf] %v15398_v38  ;;  %1520 = vst [vmem:[#allocation5 + $0x34c] sm:$0xf] %v15398_v38  ;;  %v15485_v35 = vpack.c.bf16 %v1537_v32, %v1537_v32  ;;  %v1538_v38 = vld [vmem:[%s18488_s26 + $0x23] sm:$0xff]  ;;  %v15491_v60 = vpack.c.bf16 %v1543_v57, %v1543_v57  ;;  %v1544_v2 = vld [vmem:[%s18488_s26 + $0x53] sm:$0xff] }
  0x7a   : > { %v17540_v55 = vld [vmem:[#allocation5 + $0x1bc] ss:$36 sps:$4 sm:$0xff]   ;;  %v17544_v0 = vld [vmem:[#allocation5 + $0x204] ss:$36 sps:$4 sm:$0xff]   ;;  %v5519_v25 = vld [vmem:[#allocation2 + $0x5b] sm:$0x1] }
  0x7b   : > { %4273 = vmatpush1.bf16.msra.mxu0 %v17508_v39  ;;  %v17505_v39 = vld [vmem:[#allocation5 + $0x43c] ss:$36 sps:$4 sm:$0xff]   ;;  %1723 = vst [vmem:[#allocation5 + $0x38] sm:$0xf] %v15485_v35  ;;  %1729 = vst [vmem:[#allocation5 + $0x110] sm:$0xf] %v15491_v60 }
  0x7c   : > { %4274 = vmatprep.subr.bf16.mxu0 %v18398_v1  ;;  %2177 = vst [vmem:[#allocation5 + $0xd0] sm:$0xf] %v15491_v60  ;;  %v17578_v7 = vld [vmem:[%s20954_s1 + $0x168] sm:$0xff]   ;;  %v1557_v57 = vld [vmem:[%s18488_s26 + $0xbb] sm:$0xff] }
  0x7d   : > { %v17546_v10 = vld [vmem:[#allocation5 + $0x200] ss:$36 sps:$4 sm:$0xff]   ;;  %v17567_v60 = vld [vmem:[#allocation5 + $0x3b4] ss:$36 sps:$4 sm:$0xff]  }
  0x7e   : > { %4151 = vmatmul.mubr.bf16.gmra.mrb[28].mxu0 %v17476_v41  ;;  %v887_v41 = vld [vmem:[%s18488_s26 + $0xd2] sm:$0xff] }
  0x7f   : > { %4158 = vmatprep.mubr.bf16.mxu0 %v17478_v47  ;;  %4275 = vmatpush1.bf16.msra.mxu0 %v17512_v48  ;;  %v15399_v43 = vpack.c.bf16 %v887_v41, %v887_v41  ;;  %v889_v47 = vld [vmem:[%s18488_s26 + $0xe2] sm:$0xff]  ;;  %v890_v48 = vld [vmem:[%s18488_s26 + $0xea] sm:$0xff] }
  0x80   : > { %4276 = vmatprep.subr.bf16.mxu0 %v18398_v1  ;;  %v15402_v51 = vpack.c.bf16 %v890_v48, %v890_v48 }
  0x81   : > { %1073 = vst [vmem:[#allocation5 + $0x3b0] sm:$0xf] %v15399_v43  ;;  %1521 = vst [vmem:[#allocation5 + $0x370] sm:$0xf] %v15399_v43  ;;  %v2621_v43 = vld [vmem:[#allocation5 + $0x128] sm:$0xff] }
  0x82   : > { %1076 = vst [vmem:[#allocation5 + $0x41c] sm:$0xf] %v15402_v51  ;;  %1524 = vst [vmem:[#allocation5 + $0x3dc] sm:$0xf] %v15402_v51  ;;  %v14128_v48 = vcombine.low %v2621_v43, %v2626_v44  ;;  %v17558_v43 = vld [vmem:[#allocation5 + $0x2d8] ss:$36 sps:$4 sm:$0xff]  }
  0x83   : > { %4277 = vmatpush1.bf16.msra.mxu0 %v17518_v50  ;;  %v15401_v50 = vpack.c.bf16 %v889_v47, %v889_v47  ;;  %v1541_v47 = vld [vmem:[%s18488_s26 + $0x3b] sm:$0xff]  ;;  %v1552_v44 = vld [vmem:[%s18488_s26 + $0x93] sm:$0xff] }
  0x84   : > { %4430 = vmatprep.subr.bf16.mxu0 %v18398_v1  ;;  %v15489_v51 = vpack.c.bf16 %v1541_v47, %v1541_v47 }
  0x85   : > { %1075 = vst [vmem:[#allocation5 + $0x3f8] sm:$0xf] %v15401_v50  ;;  %1523 = vst [vmem:[#allocation5 + $0x3b8] sm:$0xf] %v15401_v50 }
  0x86   : > { %4159 = vmatmul.mubr.bf16.gmra.mrb[32].mxu0 %v17480_v54  ;;  %v17515_v54 = vld [vmem:[#allocation5 + $0x4c8] ss:$36 sps:$4 sm:$0xff]   ;;  %1727 = vst [vmem:[#allocation5 + $0xc8] sm:$0xf] %v15489_v51  ;;  %2175 = vst [vmem:[#allocation5 + $0x88] sm:$0xf] %v15489_v51 }
  0x87   : > { %4166 = vmatprep.mubr.bf16.mxu0 %v17482_v62  ;;  %v14252_v62 = vcombine.low %v2760_v53, %v2760_v53  ;;  %v2636_v53 = vld [vmem:[#allocation5 + $0x194] sm:$0xff] }
  0x88   : > { %v1554_v51 = vld [vmem:[%s18488_s26 + $0xa3] sm:$0xff] }
  0x8e   : > { %4167 = vmatmul.mubr.bf16.gmra.mrb[36].mxu0 %v17484_v3  ;;  %v17519_v3 = vld [vmem:[#allocation5 + $0xc] ss:$36 sps:$4 sm:$0xff]  }
  0x8f   : > { %4174 = vmatprep.mubr.bf16.mxu0 %v17486_v8  ;;  %v1120_v8 = vld [vmem:[%s18488_s26 + $0x121] sm:$0xff] }
  0x90   : > { %v15444_v12 = vpack.c.bf16 %v1120_v8, %v1120_v8  ;;  %v5449_v8 = vld [vmem:[#allocation2 + $0x52] sm:$0xff] }
  0x92   : > { %1306 = vst [vmem:[#allocation5 + $0x4d4] sm:$0xf] %v15444_v12 }
  0x96   : > { %4175 = vmatmul.mubr.bf16.gmra.mrb[40].mxu0 %v17488_v9  ;;  %v15407_v9 = vpack.c.bf16 %v895_v6, %v895_v6  ;;  %v17574_v6 = vld [vmem:[%s20954_s1 + $0x160] sm:$0xff]  }
  0x97   : > { %4182 = vmatprep.mubr.bf16.mxu0 %v17489_v14  ;;  %v15445_v14 = vpack.c.bf16 %v1121_v11, %v1121_v11  ;;  %v18811_v11 = vpack.c.bf16 %v5449_v8, %v5449_v8 }
  0x98   : > { %1081 = vst [vmem:[#allocation5 + $0x4d0] sm:$0xf] %v15407_v9  ;;  %1529 = vst [vmem:[#allocation5 + $0x490] sm:$0xf] %v15407_v9  ;;  %v5518_v9 = vld [vmem:[#allocation2 + $0x53] sm:$0xff] }
  0x99   : > { %1307 = vst [vmem:[#allocation5 + $0x4f8] sm:$0xf] %v15445_v14  ;;  %v18813_v12 = vpack.c.bf16 %v5518_v9, %v5518_v9  ;;  %v1547_v14 = vld [vmem:[%s18488_s26 + $0x6b] sm:$0xff]  ;;  %5505 = vst [vmem:[#allocation5 + $0x154] sm:$0xf] %v18811_v11 }
  0x9a   : > { %v15495_v17 = vpack.c.bf16 %v1547_v14, %v1547_v14  ;;  %v17575_v9 = vld [vmem:[#allocation5 + $0x444] ss:$36 sps:$4 sm:$0xff]  }
  0x9b   : > { %v1563_v14 = vld [vmem:[%s18488_s26 + $0xeb] sm:$0xff] }
  0x9c   : > { %1733 = vst [vmem:[#allocation5 + $0x1a0] sm:$0xf] %v15495_v17  ;;  %2181 = vst [vmem:[#allocation5 + $0x160] sm:$0xf] %v15495_v17  ;;  %v15511_v17 = vpack.c.bf16 %v1563_v14, %v1563_v14 }
  0x9e   : > { %4183 = vmatmul.mubr.bf16.gmra.mrb[44].mxu0 %v17492_v16  ;;  %v17526_v16 = vld [vmem:[%s20954_s1 + $0x108] sm:$0xff]   ;;  %1749 = vst [vmem:[#allocation5 + $0x3e0] sm:$0xf] %v15511_v17  ;;  %2197 = vst [vmem:[#allocation5 + $0x3a0] sm:$0xf] %v15511_v17  ;;  %v17617_v17 = vld [vmem:[%s20954_s1 + $0x1b0] sm:$0xff]  }
  0x9f   : > { %4190 = vmatprep.mubr.bf16.mxu0 %v17493_v22  ;;  %v15446_v22 = vpack.c.bf16 %v1122_v18, %v1122_v18  ;;  %v17548_v18 = vld [vmem:[#allocation5 + $0x24c] ss:$36 sps:$4 sm:$0xff]  }
  0xa6   : > { %4191 = vmatmul.mubr.bf16.gmra.mrb[48].mxu0 %v17495_v23  ;;  %v17527_v23 = vld [vmem:[#allocation5 + $0x9c] ss:$36 sps:$4 sm:$0xff]  }
  0xa7   : > { %4198 = vmatprep.mubr.bf16.mxu0 %v17497_v28  ;;  %v1309_v28 = vsel %vm18555_vm2, %v15446_v22, %v1308_v26  ;;  %v17588_v22 = vld [vmem:[%s20954_s1 + $0x178] sm:$0xff]   ;;  %v17550_v26 = vld [vmem:[#allocation5 + $0x248] ss:$36 sps:$4 sm:$0xff]  }
  0xa8   : > { %1310 = vst [vmem:[#allocation5 + $0x51c] sm:$0x1] %v1309_v28  ;;  %v15697_v28 = vpack.c.bf16 %v5519_v25, %v5519_v25 }
  0xae   : > { %4199 = vmatmul.mubr.bf16.gmra.mrb[52].mxu0 %v17499_v29  ;;  %v17534_v29 = vld [vmem:[%s20954_s1 + $0x118] sm:$0xff]  }
  0xaf   : > { %4206 = vmatprep.mubr.bf16.mxu0 %v17501_v33  ;;  %v17539_v33 = vld [vmem:[%s20954_s1 + $0x120] sm:$0xff]  }
  0xb6   : > { %4207 = vmatmul.mubr.bf16.gmra.mrb[56].mxu0 %v17503_v34  ;;  %v15484_v34 = vpack.c.bf16 %v1536_v20, %v1536_v20 }
  0xb7   : > { %4214 = vmatprep.mubr.bf16.mxu0 %v17505_v39  ;;  %v1539_v39 = vld [vmem:[%s18488_s26 + $0x2b] sm:$0xff] }
  0xb8   : > { %1722 = vst [vmem:[#allocation5 + $0x14] sm:$0xf] %v15484_v34  ;;  %v15487_v41 = vpack.c.bf16 %v1539_v39, %v1539_v39  ;;  %v1551_v39 = vld [vmem:[%s18488_s26 + $0x8b] sm:$0xff] }
  0xba   : > { %1725 = vst [vmem:[#allocation5 + $0x80] sm:$0xf] %v15487_v41  ;;  %2173 = vst [vmem:[#allocation5 + $0x40] sm:$0xf] %v15487_v41  ;;  %v15499_v41 = vpack.c.bf16 %v1551_v39, %v1551_v39 }
  0xbc   : > { %1737 = vst [vmem:[#allocation5 + $0x230] sm:$0xf] %v15499_v41  ;;  %2185 = vst [vmem:[#allocation5 + $0x1f0] sm:$0xf] %v15499_v41  ;;  %v17592_v41 = vld [vmem:[%s20954_s1 + $0x180] sm:$0xff]  }
  0xbe   : > { %4215 = vmatmul.mubr.bf16.gmra.mrb[60].mxu0 %v17507_v40  ;;  %v15486_v40 = vpack.c.bf16 %v1538_v38, %v1538_v38  ;;  %v1550_v38 = vld [vmem:[%s18488_s26 + $0x83] sm:$0xff] }
  0xbf   : > { %4222 = vmatprep.mubr.bf16.mxu0 %v17509_v45  ;;  %v17551_v45 = vld [vmem:[%s20954_s1 + $0x138] sm:$0xff]  }
  0xc0   : > { %1724 = vst [vmem:[#allocation5 + $0x5c] sm:$0xf] %v15486_v40  ;;  %2172 = vst [vmem:[#allocation5 + $0x1c] sm:$0xf] %v15486_v40  ;;  %v15498_v40 = vpack.c.bf16 %v1550_v38, %v1550_v38  ;;  %v17589_v39 = vld [vmem:[#allocation5 + $0x14] ss:$36 sps:$4 sm:$0xff]  }
  0xc2   : > { %1736 = vst [vmem:[#allocation5 + $0x20c] sm:$0xf] %v15498_v40  ;;  %2184 = vst [vmem:[#allocation5 + $0x1cc] sm:$0xf] %v15498_v40  ;;  %v17591_v40 = vld [vmem:[#allocation5 + $0x10] ss:$36 sps:$4 sm:$0xff]  }
  0xc6   : > { %4223 = vmatmul.mubr.bf16.gmra.mrb[64].mxu0 %v17511_v46  ;;  %v1540_v46 = vld [vmem:[%s18488_s26 + $0x33] sm:$0xff] }
  0xc7   : > { %4230 = vmatprep.mubr.bf16.mxu0 %v17513_v52  ;;  %v15488_v50 = vpack.c.bf16 %v1540_v46, %v1540_v46  ;;  %v17555_v52 = vld [vmem:[%s20954_s1 + $0x140] sm:$0xff]   ;;  %v15500_v46 = vpack.c.bf16 %v1552_v44, %v1552_v44 }
  0xc8   : > { %v1570_v44 = vld [vmem:[%s18488_s26 + $0x123] sm:$0xff] }
  0xc9   : > { %1726 = vst [vmem:[#allocation5 + $0xa4] sm:$0xf] %v15488_v50  ;;  %2174 = vst [vmem:[#allocation5 + $0x64] sm:$0xf] %v15488_v50  ;;  %v17562_v50 = vld [vmem:[#allocation5 + $0x320] ss:$36 sps:$4 sm:$0xff]  }
  0xca   : > { %1738 = vst [vmem:[#allocation5 + $0x254] sm:$0xf] %v15500_v46  ;;  %2186 = vst [vmem:[#allocation5 + $0x214] sm:$0xf] %v15500_v46 }
  0xce   : > { %4231 = vmatmul.mubr.bf16.gmra.mrb[68].mxu0 %v17515_v54  ;;  %v17561_v54 = vld [vmem:[%s20954_s1 + $0x148] sm:$0xff]  }
  0xcf   : > { %4238 = vmatprep.mubr.bf16.mxu0 %v14253_v59  ;;  %v15490_v59 = vpack.c.bf16 %v1542_v56, %v1542_v56  ;;  %v1556_v56 = vld [vmem:[%s18488_s26 + $0xb3] sm:$0xff] }
  0xd1   : > { %1728 = vst [vmem:[#allocation5 + $0xec] sm:$0xf] %v15490_v59  ;;  %2176 = vst [vmem:[#allocation5 + $0xac] sm:$0xf] %v15490_v59  ;;  %v15505_v59 = vpack.c.bf16 %v1557_v57, %v1557_v57  ;;  %v17597_v57 = vld [vmem:[#allocation5 + $0xa4] ss:$36 sps:$4 sm:$0xff]  }
  0xd3   : > { %1743 = vst [vmem:[#allocation5 + $0x308] sm:$0xf] %v15505_v59  ;;  %2191 = vst [vmem:[#allocation5 + $0x2c8] sm:$0xf] %v15505_v59  ;;  %v1533_v59 = vld [vmem:[#allocation5 + $0x520] sm:$0x1] }
  0xd6   : > { %4239 = vmatmul.mubr.bf16.gmra.mrb[72].mxu0 %v14252_v62  ;;  %v17542_v62 = vld [vmem:[#allocation5 + $0x1b8] ss:$36 sps:$4 sm:$0xff]  }
  0xd7   : > { %4278 = vmatprep.mubr.bf16.mxu0 %v17519_v3  ;;  %v1545_v3 = vld [vmem:[%s18488_s26 + $0x5b] sm:$0xff] }
  0xde   : > { %4279 = vmatmul.mubr.bf16.vlgmr.msra.gmra.mrb[0].mxu0 %v17521_v4  ;;  %v15492_v4 = vpack.c.bf16 %v1544_v2, %v1544_v2 }
  0xdf   : > { %4431 = vmatpush1.bf16.msra.mxu0 %v17522_v5  ;;  %4286 = vmatprep.mubr.bf16.mxu0 %v17523_v13  ;;  %v15493_v5 = vpack.c.bf16 %v1545_v3, %v1545_v3  ;;  %v1546_v13 = vld [vmem:[%s18488_s26 + $0x63] sm:$0xff] }
  0xe0   : > { %4432 = vmatprep.subr.bf16.mxu0 %v18398_v1  ;;  %1730 = vst [vmem:[#allocation5 + $0x134] sm:$0xf] %v15492_v4  ;;  %2178 = vst [vmem:[#allocation5 + $0xf4] sm:$0xf] %v15492_v4  ;;  %v17571_v3 = vld [vmem:[#allocation5 + $0x3fc] ss:$36 sps:$4 sm:$0xff]  }
  0xe1   : > { %1731 = vst [vmem:[#allocation5 + $0x158] sm:$0xf] %v15493_v5  ;;  %2179 = vst [vmem:[#allocation5 + $0x118] sm:$0xf] %v15493_v5  ;;  %v17573_v4 = vld [vmem:[#allocation5 + $0x3f8] ss:$36 sps:$4 sm:$0xff]  }
  0xe2   : > { %v1560_v5 = vld [vmem:[%s18488_s26 + $0xd3] sm:$0xff] }
  0xe3   : > { %4433 = vmatpush1.bf16.msra.mxu0 %v17526_v16  ;;  %v15494_v16 = vpack.c.bf16 %v1546_v13, %v1546_v13  ;;  %v1562_v13 = vld [vmem:[%s18488_s26 + $0xe3] sm:$0xff] }
  0xe4   : > { %4434 = vmatprep.subr.bf16.mxu0 %v18398_v1 }
  0xe5   : > { %1732 = vst [vmem:[#allocation5 + $0x17c] sm:$0xf] %v15494_v16  ;;  %2180 = vst [vmem:[#allocation5 + $0x13c] sm:$0xf] %v15494_v16  ;;  %v15510_v16 = vpack.c.bf16 %v1562_v13, %v1562_v13  ;;  %v1764_v13 = vld [vmem:[%s18488_s26 + $0x3a] sm:$0xff] }
  0xe6   : > { %4287 = vmatmul.mubr.bf16.gmra.mrb[4].mxu0 %v17525_v19  ;;  %v17582_v19 = vld [vmem:[%s20954_s1 + $0x170] sm:$0xff]  }
  0xe7   : > { %4294 = vmatprep.mubr.bf16.mxu0 %v17527_v23  ;;  %4435 = vmatpush1.bf16.msra.mxu0 %v17530_v24  ;;  %v5450_v23 = vld [vmem:[#allocation2 + $0x5a] sm:$0x1]  ;;  %v5506_v24 = vld [vmem:[#allocation5 + $0x178] sm:$0x1]  ;;  %1748 = vst [vmem:[#allocation5 + $0x3bc] sm:$0xf] %v15510_v16 }
  0xe8   : > { %4436 = vmatprep.subr.bf16.mxu0 %v18398_v1  ;;  %v18820_v21 = vld [vmem:[#allocation5 + $0x134] ss:$36 sps:$4 sm:$0xff]   ;;  %v15686_v27 = vpack.c.bf16 %v5450_v23, %v5450_v23  ;;  %2196 = vst [vmem:[#allocation5 + $0x37c] sm:$0xf] %v15510_v16  ;;  %v15524_v16 = vpack.c.bf16 %v1764_v13, %v1764_v13 }
  0xe9   : > { %5574 = vst [vmem:[#allocation5 + $0x158] sm:$0xf] %v18813_v12  ;;  %v1565_v23 = vld [vmem:[%s18488_s26 + $0xfb] sm:$0xff] }
  0xea   : > { %v15513_v25 = vpack.c.bf16 %v1565_v23, %v1565_v23  ;;  %1950 = vst [vmem:[#allocation5 + $0x84] sm:$0xf] %v15524_v16  ;;  %v1765_v23 = vld [vmem:[%s18488_s26 + $0x42] sm:$0xff] }
  0xeb   : > { %4437 = vmatpush1.bf16.msra.mxu0 %v17534_v29  ;;  %v1548_v29 = vld [vmem:[%s18488_s26 + $0x73] sm:$0xff]  ;;  %v17628_v16 = vld [vmem:[#allocation5 + $0x2e0] ss:$36 sps:$4 sm:$0xff]  }
  0xec   : > { %4438 = vmatprep.subr.bf16.mxu0 %v18398_v1  ;;  %v15496_v20 = vpack.c.bf16 %v1548_v29, %v1548_v29  ;;  %v18833_v34 = vld [vmem:[#allocation5 + $0x17c] ss:$36 sps:$4 sm:$0xff]   ;;  %1751 = vst [vmem:[#allocation5 + $0x428] sm:$0xf] %v15513_v25  ;;  %2199 = vst [vmem:[#allocation5 + $0x3e8] sm:$0xf] %v15513_v25 }
  0xed   : > { %v5575_v35 = vld [vmem:[#allocation5 + $0x17c] sm:$0x1] }
  0xee   : > { %4295 = vmatmul.mubr.bf16.gmra.mrb[8].mxu0 %v17529_v30  ;;  %v1549_v30 = vld [vmem:[%s18488_s26 + $0x7b] sm:$0xff]  ;;  %1734 = vst [vmem:[#allocation5 + $0x1c4] sm:$0xf] %v15496_v20  ;;  %2182 = vst [vmem:[#allocation5 + $0x184] sm:$0xf] %v15496_v20  ;;  %v1566_v29 = vld [vmem:[%s18488_s26 + $0x103] sm:$0xff] }
  0xef   : > { %4302 = vmatprep.mubr.bf16.mxu0 %v17531_v31  ;;  %4439 = vmatpush1.bf16.msra.mxu0 %v17539_v33  ;;  %v5507_v31 = vsel %vm18555_vm2, %v15686_v27, %v5506_v24  ;;  %v15497_v32 = vpack.c.bf16 %v1549_v30, %v1549_v30  ;;  %v17552_v33 = vld [vmem:[#allocation5 + $0x294] ss:$36 sps:$4 sm:$0xff]   ;;  %v1567_v30 = vld [vmem:[%s18488_s26 + $0x10b] sm:$0xff] }
  0xf0   : > { %4440 = vmatprep.subr.bf16.mxu0 %v18398_v1  ;;  %5508 = vst [vmem:[#allocation5 + $0x178] sm:$0x1] %v5507_v31  ;;  %v2761_v27 = vld [vmem:[#allocation5 + $0x518] sm:$0x11]  ;;  %v15514_v31 = vpack.c.bf16 %v1566_v29, %v1566_v29  ;;  %v15515_v20 = vpack.c.bf16 %v1567_v30, %v1567_v30  ;;  %v17631_v30 = vld [vmem:[%s20954_s1 + $0x1c8] sm:$0xff]  }
  0xf1   : > { %1735 = vst [vmem:[#allocation5 + $0x1e8] sm:$0xf] %v15497_v32  ;;  %2183 = vst [vmem:[#allocation5 + $0x1a8] sm:$0xf] %v15497_v32  ;;  %v14255_v32 = vcombine.high %v2761_v27, %v2761_v27  ;;  %v2637_v29 = vld [vmem:[#allocation5 + $0x19c] sm:$0xff] }
  0xf2   : > { %1752 = vst [vmem:[#allocation5 + $0x44c] sm:$0xf] %v15514_v31  ;;  %1753 = vst [vmem:[#allocation5 + $0x470] sm:$0xf] %v15515_v20 }
  0xf3   : > { %4441 = vmatpush1.bf16.msra.mxu0 %v17543_v36  ;;  %v5576_v36 = vsel %vm18555_vm2, %v15697_v28, %v5575_v35  ;;  %v17585_v28 = vld [vmem:[#allocation5 + $0x4d0] ss:$36 sps:$4 sm:$0xff]   ;;  %2200 = vst [vmem:[#allocation5 + $0x40c] sm:$0xf] %v15514_v31  ;;  %2201 = vst [vmem:[#allocation5 + $0x430] sm:$0xf] %v15515_v20 }
  0xf4   : > { %4442 = vmatprep.subr.bf16.mxu0 %v18398_v1  ;;  %5577 = vst [vmem:[#allocation5 + $0x17c] sm:$0x1] %v5576_v36  ;;  %v1569_v35 = vld [vmem:[%s18488_s26 + $0x11b] sm:$0xff]  ;;  %v14254_v36 = vcombine.low %v2761_v27, %v2761_v27  ;;  %v1767_v20 = vld [vmem:[%s18488_s26 + $0x52] sm:$0xff] }
  0xf5   : > { %v15517_v38 = vpack.c.bf16 %v1569_v35, %v1569_v35  ;;  %v15527_v35 = vpack.c.bf16 %v1767_v20, %v1767_v20 }
  0xf6   : > { %4303 = vmatmul.mubr.bf16.gmra.mrb[12].mxu0 %v17533_v37  ;;  %v17554_v37 = vld [vmem:[#allocation5 + $0x290] ss:$36 sps:$4 sm:$0xff]  }
  0xf7   : > { %4310 = vmatprep.mubr.bf16.mxu0 %v18698_v49  ;;  %4443 = vmatpush1.bf16.msra.mxu0 %v17547_v42  ;;  %v2631_v49 = vld [vmem:[#allocation5 + $0x170] sm:$0xff]  ;;  %v17556_v42 = vld [vmem:[#allocation5 + $0x2dc] ss:$36 sps:$4 sm:$0xff]   ;;  %1755 = vst [vmem:[#allocation5 + $0x4b8] sm:$0xf] %v15517_v38 }
  0xf8   : > { %4444 = vmatprep.subr.bf16.mxu0 %v18398_v1  ;;  %v14137_v58 = vcombine.low %v2631_v49, %v2636_v53  ;;  %v15502_v49 = vpack.c.bf16 %v1554_v51, %v1554_v51  ;;  %2203 = vst [vmem:[#allocation5 + $0x478] sm:$0xf] %v15517_v38  ;;  %v17610_v31 = vld [vmem:[#allocation5 + $0x1c4] ss:$36 sps:$4 sm:$0xff]   ;;  %1953 = vst [vmem:[#allocation5 + $0xf0] sm:$0xf] %v15527_v35 }
  0xf9   : > { %v17612_v38 = vld [vmem:[#allocation5 + $0x1c0] ss:$36 sps:$4 sm:$0xff]   ;;  %v17639_v35 = vld [vmem:[#allocation5 + $0x3b8] ss:$36 sps:$4 sm:$0xff]  }
  0xfa   : > { %1740 = vst [vmem:[#allocation5 + $0x29c] sm:$0xf] %v15502_v49  ;;  %2188 = vst [vmem:[#allocation5 + $0x25c] sm:$0xf] %v15502_v49  ;;  %v1347_v49 = vld [vmem:[%s18488_s26 + $0x132] sm:$0x1] }
  0xfb   : > { %4445 = vmatpush1.bf16.msra.mxu0 %v17551_v45  ;;  %v1553_v45 = vld [vmem:[%s18488_s26 + $0x9b] sm:$0xff] }
  0xfc   : > { %4446 = vmatprep.subr.bf16.mxu0 %v18398_v1  ;;  %v15501_v47 = vpack.c.bf16 %v1553_v45, %v1553_v45 }
  0xfe   : > { %4311 = vmatmul.mubr.bf16.gmra.mrb[16].mxu0 %v14128_v48  ;;  %v17559_v48 = vld [vmem:[#allocation5 + $0x324] ss:$36 sps:$4 sm:$0xff]   ;;  %1739 = vst [vmem:[#allocation5 + $0x278] sm:$0xf] %v15501_v47  ;;  %2187 = vst [vmem:[#allocation5 + $0x238] sm:$0xf] %v15501_v47 }
  0xff   : > { %4318 = vmatprep.mubr.bf16.mxu0 %v18709_v63  ;;  %4447 = vmatpush1.bf16.msra.mxu0 %v17555_v52  ;;  %v17570_v63 = vld [vmem:[%s20954_s1 + $0x158] sm:$0xff]   ;;  %v1555_v52 = vld [vmem:[%s18488_s26 + $0xab] sm:$0xff] }
 0x100   : > { %4448 = vmatprep.subr.bf16.mxu0 %v18398_v1  ;;  %v15503_v53 = vpack.c.bf16 %v1555_v52, %v1555_v52  ;;  %v1571_v47 = vld [vmem:[%s18488_s26 + $0x12b] sm:$0xff] }
 0x101   : > { %v15519_v51 = vpack.c.bf16 %v1571_v47, %v1571_v47  ;;  %v17596_v52 = vld [vmem:[%s20954_s1 + $0x188] sm:$0xff]   ;;  %v17616_v47 = vld [vmem:[#allocation5 + $0x208] ss:$36 sps:$4 sm:$0xff]  }
 0x102   : > { %1741 = vst [vmem:[#allocation5 + $0x2c0] sm:$0xf] %v15503_v53  ;;  %2189 = vst [vmem:[#allocation5 + $0x280] sm:$0xf] %v15503_v53  ;;  %v1572_v53 = vld [vmem:[%s18488_s26 + $0x133] sm:$0x1] }
 0x103   : > { %4449 = vmatpush1.bf16.msra.mxu0 %v17561_v54  ;;  %v17563_v54 = vld [vmem:[#allocation5 + $0x36c] ss:$36 sps:$4 sm:$0xff]   ;;  %1757 = vst [vmem:[#allocation5 + $0x500] sm:$0xf] %v15519_v51  ;;  %2205 = vst [vmem:[#allocation5 + $0x4c0] sm:$0xf] %v15519_v51 }
 0x104   : > { %4450 = vmatprep.subr.bf16.mxu0 %v18398_v1  ;;  %v1772_v51 = vld [vmem:[%s18488_s26 + $0x7a] sm:$0xff] }
 0x106   : > { %4319 = vmatmul.mubr.bf16.gmra.mrb[20].mxu0 %v14137_v58  ;;  %v15504_v58 = vpack.c.bf16 %v1556_v56, %v1556_v56  ;;  %v15520_v56 = vpack.c.bf16 %v1572_v53, %v1572_v53  ;;  %v17618_v53 = vld [vmem:[#allocation5 + $0x254] ss:$36 sps:$4 sm:$0xff]  }
 0x107   : > { %4326 = vmatprep.mubr.bf16.mxu0 %v17540_v55  ;;  %4451 = vmatpush1.bf16.msra.mxu0 %v17566_v61  ;;  %v17565_v55 = vld [vmem:[#allocation5 + $0x368] ss:$36 sps:$4 sm:$0xff]   ;;  %v17569_v61 = vld [vmem:[#allocation5 + $0x3b0] ss:$36 sps:$4 sm:$0xff]  }
 0x108   : > { %4452 = vmatprep.subr.bf16.mxu0 %v18398_v1  ;;  %1742 = vst [vmem:[#allocation5 + $0x2e4] sm:$0xf] %v15504_v58  ;;  %2190 = vst [vmem:[#allocation5 + $0x2a4] sm:$0xf] %v15504_v58  ;;  %v17600_v58 = vld [vmem:[%s20954_s1 + $0x190] sm:$0xff]  }
 0x10b   : > { %4453 = vmatpush1.bf16.msra.mxu0 %v17570_v63  ;;  %v1558_v63 = vld [vmem:[%s18488_s26 + $0xc3] sm:$0xff] }
 0x10c   : > { %4454 = vmatprep.subr.bf16.mxu0 %v18398_v1 }
 0x10e   : > { %4327 = vmatmul.mubr.bf16.gmra.mrb[24].mxu0 %v17542_v62  ;;  %v1559_v62 = vld [vmem:[%s18488_s26 + $0xcb] sm:$0xff] }
 0x10f   : > { %4334 = vmatprep.mubr.bf16.mxu0 %v17544_v0  ;;  %4455 = vmatpush1.bf16.msra.mxu0 %v17574_v6  ;;  %v15506_v0 = vpack.c.bf16 %v1558_v63, %v1558_v63  ;;  %v15507_v2 = vpack.c.bf16 %v1559_v62, %v1559_v62  ;;  %v1561_v6 = vld [vmem:[%s18488_s26 + $0xdb] sm:$0xff] }
 0x110   : > { %4456 = vmatprep.subr.bf16.mxu0 %v18398_v1  ;;  %v15509_v8 = vpack.c.bf16 %v1561_v6, %v1561_v6  ;;  %v17604_v62 = vld [vmem:[%s20954_s1 + $0x198] sm:$0xff]  }
 0x111   : > { %1744 = vst [vmem:[#allocation5 + $0x32c] sm:$0xf] %v15506_v0  ;;  %1745 = vst [vmem:[#allocation5 + $0x350] sm:$0xf] %v15507_v2 }
 0x112   : > { %2192 = vst [vmem:[#allocation5 + $0x2ec] sm:$0xf] %v15506_v0  ;;  %2193 = vst [vmem:[#allocation5 + $0x310] sm:$0xf] %v15507_v2  ;;  %v17599_v0 = vld [vmem:[#allocation5 + $0xa0] ss:$36 sps:$4 sm:$0xff]  }
 0x113   : > { %4457 = vmatpush1.bf16.msra.mxu0 %v17578_v7  ;;  %v15508_v7 = vpack.c.bf16 %v1560_v5, %v1560_v5  ;;  %1747 = vst [vmem:[#allocation5 + $0x398] sm:$0xf] %v15509_v8  ;;  %2195 = vst [vmem:[#allocation5 + $0x358] sm:$0xf] %v15509_v8  ;;  %v17601_v2 = vld [vmem:[#allocation5 + $0xec] ss:$36 sps:$4 sm:$0xff]  }
 0x114   : > { %4458 = vmatprep.subr.bf16.mxu0 %v18398_v1  ;;  %v17609_v5 = vld [vmem:[%s20954_s1 + $0x1a0] sm:$0xff]   ;;  %v17613_v8 = vld [vmem:[%s20954_s1 + $0x1a8] sm:$0xff]  }
 0x115   : > { %1746 = vst [vmem:[#allocation5 + $0x374] sm:$0xf] %v15508_v7  ;;  %2194 = vst [vmem:[#allocation5 + $0x334] sm:$0xf] %v15508_v7 }
 0x116   : > { %4335 = vmatmul.mubr.bf16.gmra.mrb[28].mxu0 %v17546_v10  ;;  %v17577_v10 = vld [vmem:[#allocation5 + $0x440] ss:$36 sps:$4 sm:$0xff]  }
 0x117   : > { %4342 = vmatprep.mubr.bf16.mxu0 %v17548_v18  ;;  %4459 = vmatpush1.bf16.msra.mxu0 %v17582_v19  ;;  %v17579_v18 = vld [vmem:[#allocation5 + $0x48c] ss:$36 sps:$4 sm:$0xff]  }
 0x118   : > { %4460 = vmatprep.subr.bf16.mxu0 %v18398_v1  ;;  %v17581_v19 = vld [vmem:[#allocation5 + $0x488] ss:$36 sps:$4 sm:$0xff]  }
 0x11b   : > { %4461 = vmatpush1.bf16.msra.mxu0 %v17588_v22  ;;  %v1564_v22 = vld [vmem:[%s18488_s26 + $0xf3] sm:$0xff] }
 0x11c   : > { %4614 = vmatprep.subr.bf16.mxu0 %v18398_v1  ;;  %v15512_v24 = vpack.c.bf16 %v1564_v22, %v1564_v22  ;;  %v17621_v22 = vld [vmem:[%s20954_s1 + $0x1b8] sm:$0xff]  }
 0x11e   : > { %4343 = vmatmul.mubr.bf16.gmra.mrb[32].mxu0 %v17550_v26  ;;  %v17583_v26 = vld [vmem:[#allocation5 + $0x4d4] ss:$36 sps:$4 sm:$0xff]   ;;  %1750 = vst [vmem:[#allocation5 + $0x404] sm:$0xf] %v15512_v24  ;;  %2198 = vst [vmem:[#allocation5 + $0x3c4] sm:$0xf] %v15512_v24 }
 0x11f   : > { %4350 = vmatprep.mubr.bf16.mxu0 %v17552_v33  ;;  %v1568_v33 = vld [vmem:[%s18488_s26 + $0x113] sm:$0xff]  ;;  %v1766_v24 = vld [vmem:[%s18488_s26 + $0x4a] sm:$0xff] }
 0x120   : > { %v15526_v27 = vpack.c.bf16 %v1766_v24, %v1766_v24  ;;  %v17632_v24 = vld [vmem:[#allocation5 + $0x328] ss:$36 sps:$4 sm:$0xff]  }
 0x122   : > { %1952 = vst [vmem:[#allocation5 + $0xcc] sm:$0xf] %v15526_v27 }
 0x126   : > { %4351 = vmatmul.mubr.bf16.gmra.mrb[36].mxu0 %v17554_v37  ;;  %v15516_v37 = vpack.c.bf16 %v1568_v33, %v1568_v33 }
 0x127   : > { %4358 = vmatprep.mubr.bf16.mxu0 %v17556_v42  ;;  %v1345_v42 = vld [vmem:[%s18488_s26 + $0x122] sm:$0xff] }
 0x128   : > { %1754 = vst [vmem:[#allocation5 + $0x494] sm:$0xf] %v15516_v37  ;;  %2202 = vst [vmem:[#allocation5 + $0x454] sm:$0xf] %v15516_v37  ;;  %v15481_v45 = vpack.c.bf16 %v1345_v42, %v1345_v42  ;;  %v17636_v37 = vld [vmem:[%s20954_s1 + $0x1d0] sm:$0xff]  }
 0x12a   : > { %1531 = vst [vmem:[#allocation5 + $0x4d8] sm:$0xf] %v15481_v45  ;;  %1979 = vst [vmem:[#allocation5 + $0x498] sm:$0xf] %v15481_v45  ;;  %v17648_v45 = vld [vmem:[%s20954_s1 + $0x1e8] sm:$0xff]  }
 0x12e   : > { %4359 = vmatmul.mubr.bf16.gmra.mrb[40].mxu0 %v17558_v43  ;;  %v1346_v43 = vld [vmem:[%s18488_s26 + $0x12a] sm:$0xff] }
 0x12f   : > { %4366 = vmatprep.mubr.bf16.mxu0 %v17559_v48  ;;  %v15482_v46 = vpack.c.bf16 %v1346_v43, %v1346_v43  ;;  %v15518_v48 = vpack.c.bf16 %v1570_v44, %v1570_v44  ;;  %v17644_v44 = vld [vmem:[%s20954_s1 + $0x1e0] sm:$0xff]  }
 0x131   : > { %1532 = vst [vmem:[#allocation5 + $0x4fc] sm:$0xf] %v15482_v46  ;;  %1756 = vst [vmem:[#allocation5 + $0x4dc] sm:$0xf] %v15518_v48 }
 0x132   : > { %1980 = vst [vmem:[#allocation5 + $0x4bc] sm:$0xf] %v15482_v46  ;;  %2204 = vst [vmem:[#allocation5 + $0x49c] sm:$0xf] %v15518_v48  ;;  %v5587_v46 = vld [vmem:[#allocation2 + $0x5a] sm:$0xff] }
 0x133   : > { %v15707_v48 = vpack.c.bf16 %v5587_v46, %v5587_v46  ;;  %v17647_v46 = vld [vmem:[#allocation5 + $0x448] ss:$36 sps:$4 sm:$0xff]  }
 0x136   : > { %4367 = vmatmul.mubr.bf16.gmra.mrb[44].mxu0 %v17562_v50  ;;  %v17593_v50 = vld [vmem:[#allocation5 + $0x5c] ss:$36 sps:$4 sm:$0xff]  }
 0x137   : > { %4374 = vmatprep.mubr.bf16.mxu0 %v17563_v54  ;;  %v17595_v54 = vld [vmem:[#allocation5 + $0x58] ss:$36 sps:$4 sm:$0xff]  }
 0x13e   : > { %4375 = vmatmul.mubr.bf16.gmra.mrb[48].mxu0 %v17565_v55  ;;  %v15483_v55 = vpack.c.bf16 %v1347_v49, %v1347_v49  ;;  %v15532_v49 = vpack.c.bf16 %v1772_v51, %v1772_v51 }
 0x13f   : > { %4382 = vmatprep.mubr.bf16.mxu0 %v17567_v60  ;;  %v1758_v60 = vld [vmem:[#allocation5 + $0x524] sm:$0x1] }
 0x140   : > { %v1759_v63 = vsel %vm18555_vm2, %v15520_v56, %v1758_v60  ;;  %1958 = vst [vmem:[#allocation5 + $0x1a4] sm:$0xf] %v15532_v49  ;;  %v17658_v56 = vld [vmem:[%s20954_s1 + $0x1f8] sm:$0xff]  }
 0x141   : > { %1760 = vst [vmem:[#allocation5 + $0x524] sm:$0x1] %v1759_v63  ;;  %v17620_v60 = vld [vmem:[#allocation5 + $0x250] ss:$36 sps:$4 sm:$0xff]   ;;  %v1773_v63 = vld [vmem:[%s18488_s26 + $0x82] sm:$0xff] }
 0x142   : > { %v17651_v49 = vld [vmem:[#allocation5 + $0x490] ss:$36 sps:$4 sm:$0xff]  }
 0x146   : > { %4383 = vmatmul.mubr.bf16.gmra.mrb[52].mxu0 %v17569_v61  ;;  %v1534_v61 = vsel %vm18555_vm2, %v15483_v55, %v1533_v59  ;;  %v18940_v55 = vld [vmem:[#allocation5 + $0x13c] ss:$36 sps:$4 sm:$0xff]   ;;  %v5713_v59 = vld [vmem:[#allocation5 + $0x184] sm:$0x1] }
 0x147   : > { %4390 = vmatprep.mubr.bf16.mxu0 %v17571_v3  ;;  %1535 = vst [vmem:[#allocation5 + $0x520] sm:$0x1] %v1534_v61  ;;  %v1761_v3 = vld [vmem:[%s18488_s26 + $0x22] sm:$0xff]  ;;  %5711 = vst [vmem:[#allocation5 + $0x13c] sm:$0xf] %v18813_v12 }
 0x148   : > { %v15521_v6 = vpack.c.bf16 %v1761_v3, %v1761_v3  ;;  %v17622_v3 = vld [vmem:[#allocation5 + $0x29c] ss:$36 sps:$4 sm:$0xff]  }
 0x14a   : > { %1947 = vst [vmem:[#allocation5 + $0x18] sm:$0xf] %v15521_v6 }
 0x14e   : > { %4391 = vmatmul.mubr.bf16.gmra.mrb[56].mxu0 %v17573_v4  ;;  %v1762_v4 = vld [vmem:[%s18488_s26 + $0x2a] sm:$0xff] }
 0x14f   : > { %4398 = vmatprep.mubr.bf16.mxu0 %v17575_v9  ;;  %v15522_v7 = vpack.c.bf16 %v1762_v4, %v1762_v4  ;;  %v17603_v9 = vld [vmem:[#allocation5 + $0xe8] ss:$36 sps:$4 sm:$0xff]  }
 0x150   : > { %v18953_v4 = vld [vmem:[#allocation5 + $0x184] ss:$36 sps:$4 sm:$0xff]  }
 0x151   : > { %1948 = vst [vmem:[#allocation5 + $0x3c] sm:$0xf] %v15522_v7  ;;  %v17624_v7 = vld [vmem:[#allocation5 + $0x298] ss:$36 sps:$4 sm:$0xff]  }
 0x156   : > { %4399 = vmatmul.mubr.bf16.gmra.mrb[60].mxu0 %v17577_v10  ;;  %v1763_v10 = vld [vmem:[%s18488_s26 + $0x32] sm:$0xff] }
 0x157   : > { %4406 = vmatprep.mubr.bf16.mxu0 %v17579_v18  ;;  %v15523_v14 = vpack.c.bf16 %v1763_v10, %v1763_v10  ;;  %v2622_v18 = vld [vmem:[#allocation5 + $0x130] sm:$0xff] }
 0x159   : > { %1949 = vst [vmem:[#allocation5 + $0x60] sm:$0xf] %v15523_v14  ;;  %v17626_v14 = vld [vmem:[#allocation5 + $0x2e4] ss:$36 sps:$4 sm:$0xff]  }
 0x15e   : > { %4407 = vmatmul.mubr.bf16.gmra.mrb[64].mxu0 %v17581_v19  ;;  %v2627_v19 = vld [vmem:[#allocation5 + $0x154] sm:$0xff] }
 0x15f   : > { %4414 = vmatprep.mubr.bf16.mxu0 %v17583_v26  ;;  %v14130_v25 = vcombine.low %v2622_v18, %v2627_v19  ;;  %v15525_v26 = vpack.c.bf16 %v1765_v23, %v1765_v23  ;;  %v1778_v18 = vld [vmem:[%s18488_s26 + $0xaa] sm:$0xff]  ;;  %v17629_v23 = vld [vmem:[#allocation5 + $0x32c] ss:$36 sps:$4 sm:$0xff]  }
 0x161   : > { %1951 = vst [vmem:[#allocation5 + $0xa8] sm:$0xf] %v15525_v26  ;;  %v1780_v26 = vld [vmem:[%s18488_s26 + $0xba] sm:$0xff] }
 0x166   : > { %4415 = vmatmul.mubr.bf16.gmra.mrb[68].mxu0 %v17585_v28  ;;  %v17625_v28 = vld [vmem:[%s20954_s1 + $0x1c0] sm:$0xff]  }
 0x167   : > { %4422 = vmatprep.mubr.bf16.mxu0 %v14255_v32  ;;  %v1768_v32 = vld [vmem:[%s18488_s26 + $0x5a] sm:$0xff] }
 0x16e   : > { %4423 = vmatmul.mubr.bf16.gmra.mrb[72].mxu0 %v14254_v36  ;;  %v15528_v36 = vpack.c.bf16 %v1768_v32, %v1768_v32 }
 0x16f   : > { %4462 = vmatprep.mubr.bf16.mxu0 %v17589_v39  ;;  %v17614_v39 = vld [vmem:[#allocation5 + $0x20c] ss:$36 sps:$4 sm:$0xff]  }
 0x170   : > { %1954 = vst [vmem:[#allocation5 + $0x114] sm:$0xf] %v15528_v36  ;;  %v1783_v36 = vld [vmem:[%s18488_s26 + $0xd2] sm:$0xff] }
 0x176   : > { %4463 = vmatmul.mubr.bf16.vlgmr.msra.gmra.mrb[0].mxu0 %v17591_v40  ;;  %v1769_v40 = vld [vmem:[%s18488_s26 + $0x62] sm:$0xff] }
 0x177   : > { %4615 = vmatpush1.bf16.msra.mxu0 %v17592_v41  ;;  %4470 = vmatprep.mubr.bf16.mxu0 %v17593_v50  ;;  %v1770_v41 = vld [vmem:[%s18488_s26 + $0x6a] sm:$0xff]  ;;  %v15529_v42 = vpack.c.bf16 %v1769_v40, %v1769_v40  ;;  %v1771_v50 = vld [vmem:[%s18488_s26 + $0x72] sm:$0xff] }
 0x178   : > { %4616 = vmatprep.subr.bf16.mxu0 %v18398_v1  ;;  %v15530_v43 = vpack.c.bf16 %v1770_v41, %v1770_v41  ;;  %v17643_v40 = vld [vmem:[#allocation5 + $0x400] ss:$36 sps:$4 sm:$0xff]  }
 0x179   : > { %1955 = vst [vmem:[#allocation5 + $0x138] sm:$0xf] %v15529_v42  ;;  %v1785_v41 = vld [vmem:[%s18488_s26 + $0xe2] sm:$0xff]  ;;  %v1786_v42 = vld [vmem:[%s18488_s26 + $0xea] sm:$0xff] }
 0x17a   : > { %1956 = vst [vmem:[#allocation5 + $0x15c] sm:$0xf] %v15530_v43  ;;  %5642 = vst [vmem:[#allocation5 + $0x138] sm:$0xf] %v18811_v11  ;;  %v15545_v43 = vpack.c.bf16 %v1785_v41, %v1785_v41  ;;  %v2214_v41 = vld [vmem:[%s18488_s26 + $0x3c] sm:$0xff] }
 0x17b   : > { %4617 = vmatpush1.bf16.msra.mxu0 %v17596_v52  ;;  %v15531_v52 = vpack.c.bf16 %v1771_v50, %v1771_v50  ;;  %5643 = vst [vmem:[#allocation5 + $0x15c] sm:$0xf] %v15707_v48  ;;  %v1788_v48 = vld [vmem:[%s18488_s26 + $0xfa] sm:$0xff] }
 0x17c   : > { %4618 = vmatprep.subr.bf16.mxu0 %v18398_v1  ;;  %1971 = vst [vmem:[#allocation5 + $0x378] sm:$0xf] %v15545_v43  ;;  %v15548_v51 = vpack.c.bf16 %v1788_v48, %v1788_v48 }
 0x17d   : > { %1957 = vst [vmem:[#allocation5 + $0x180] sm:$0xf] %v15531_v52  ;;  %v17649_v52 = vld [vmem:[#allocation5 + $0x494] ss:$36 sps:$4 sm:$0xff]  }
 0x17e   : > { %4471 = vmatmul.mubr.bf16.gmra.mrb[4].mxu0 %v17595_v54  ;;  %v17652_v54 = vld [vmem:[%s20954_s1 + $0x1f0] sm:$0xff]   ;;  %1974 = vst [vmem:[#allocation5 + $0x3e4] sm:$0xf] %v15548_v51 }
 0x17f   : > { %4478 = vmatprep.mubr.bf16.mxu0 %v17597_v57  ;;  %4619 = vmatpush1.bf16.msra.mxu0 %v17600_v58  ;;  %v5588_v57 = vld [vmem:[#allocation2 + $0x62] sm:$0x1]  ;;  %v5657_v58 = vld [vmem:[#allocation2 + $0x63] sm:$0x1]  ;;  %v2216_v51 = vld [vmem:[%s18488_s26 + $0x4c] sm:$0xff] }
 0x180   : > { %4620 = vmatprep.subr.bf16.mxu0 %v18398_v1  ;;  %v15719_v11 = vpack.c.bf16 %v5657_v58, %v5657_v58  ;;  %v15708_v61 = vpack.c.bf16 %v5588_v57, %v5588_v57  ;;  %v17653_v58 = vld [vmem:[#allocation5 + $0x4dc] ss:$36 sps:$4 sm:$0xff]  }
 0x182   : > { %v5714_v12 = vsel %vm18555_vm2, %v15719_v11, %v5713_v59  ;;  %v2762_v59 = vld [vmem:[#allocation5 + $0x520] sm:$0x11]  ;;  %v1791_v11 = vld [vmem:[%s18488_s26 + $0x112] sm:$0xff] }
 0x183   : > { %4621 = vmatpush1.bf16.msra.mxu0 %v17604_v62  ;;  %v1774_v62 = vld [vmem:[%s18488_s26 + $0x8a] sm:$0xff]  ;;  %5715 = vst [vmem:[#allocation5 + $0x184] sm:$0x1] %v5714_v12  ;;  %v14257_v12 = vcombine.high %v2762_v59, %v2762_v59 }
 0x184   : > { %4622 = vmatprep.subr.bf16.mxu0 %v18398_v1 }
 0x186   : > { %4479 = vmatmul.mubr.bf16.gmra.mrb[8].mxu0 %v17599_v0  ;;  %v15533_v0 = vpack.c.bf16 %v1773_v63, %v1773_v63  ;;  %v15551_v63 = vpack.c.bf16 %v1791_v11, %v1791_v11  ;;  %v2219_v11 = vld [vmem:[%s18488_s26 + $0x64] sm:$0xff] }
 0x187   : > { %4486 = vmatprep.mubr.bf16.mxu0 %v17601_v2  ;;  %4623 = vmatpush1.bf16.msra.mxu0 %v17609_v5  ;;  %v15534_v2 = vpack.c.bf16 %v1774_v62, %v1774_v62  ;;  %v18955_v5 = vld [vmem:[#allocation2 + $0x50] sm:$0xff] }
 0x188   : > { %4624 = vmatprep.subr.bf16.mxu0 %v18398_v1  ;;  %1959 = vst [vmem:[#allocation5 + $0x1c8] sm:$0xf] %v15533_v0  ;;  %1977 = vst [vmem:[#allocation5 + $0x450] sm:$0xf] %v15551_v63  ;;  %v14256_v0 = vcombine.low %v2762_v59, %v2762_v59  ;;  %v17681_v63 = vld [vmem:[#allocation5 + $0x214] ss:$36 sps:$4 sm:$0xff]  }
 0x189   : > { %1960 = vst [vmem:[#allocation5 + $0x1ec] sm:$0xf] %v15534_v2  ;;  %v17659_v2 = vld [vmem:[#allocation5 + $0x1c] ss:$36 sps:$4 sm:$0xff]  }
 0x18b   : > { %4625 = vmatpush1.bf16.msra.mxu0 %v17613_v8  ;;  %v1775_v8 = vld [vmem:[%s18488_s26 + $0x92] sm:$0xff] }
 0x18c   : > { %4626 = vmatprep.subr.bf16.mxu0 %v18398_v1  ;;  %v15535_v10 = vpack.c.bf16 %v1775_v8, %v1775_v8  ;;  %v1796_v8 = vld [vmem:[%s18488_s26 + $0x13a] sm:$0xff] }
 0x18e   : > { %4487 = vmatmul.mubr.bf16.gmra.mrb[12].mxu0 %v17603_v9  ;;  %v1776_v9 = vld [vmem:[%s18488_s26 + $0x9a] sm:$0xff]  ;;  %1961 = vst [vmem:[#allocation5 + $0x210] sm:$0xf] %v15535_v10 }
 0x18f   : > { %4494 = vmatprep.mubr.bf16.mxu0 %v18820_v21  ;;  %4627 = vmatpush1.bf16.msra.mxu0 %v17617_v17  ;;  %v2632_v21 = vld [vmem:[#allocation5 + $0x178] sm:$0xff]  ;;  %v15536_v13 = vpack.c.bf16 %v1776_v9, %v1776_v9  ;;  %v2020_v9 = vld [vmem:[%s18488_s26 + $0x133] sm:$0xff] }
 0x190   : > { %4628 = vmatprep.subr.bf16.mxu0 %v18398_v1  ;;  %v14139_v33 = vcombine.low %v2632_v21, %v2637_v29  ;;  %v1777_v17 = vld [vmem:[%s18488_s26 + $0xa2] sm:$0xff]  ;;  %v17635_v29 = vld [vmem:[#allocation5 + $0x370] ss:$36 sps:$4 sm:$0xff]  }
 0x191   : > { %1962 = vst [vmem:[#allocation5 + $0x234] sm:$0xf] %v15536_v13  ;;  %v15537_v19 = vpack.c.bf16 %v1777_v17, %v1777_v17  ;;  %v17633_v21 = vld [vmem:[#allocation5 + $0x374] ss:$36 sps:$4 sm:$0xff]   ;;  %v15556_v13 = vpack.c.bf16 %v1796_v8, %v1796_v8 }
 0x192   : > { %v5725_v8 = vld [vmem:[#allocation2 + $0x5c] sm:$0xff] }
 0x193   : > { %4629 = vmatpush1.bf16.msra.mxu0 %v17621_v22  ;;  %v15538_v22 = vpack.c.bf16 %v1778_v18, %v1778_v18  ;;  %1963 = vst [vmem:[#allocation5 + $0x258] sm:$0xf] %v15537_v19  ;;  %1982 = vst [vmem:[#allocation5 + $0x504] sm:$0xf] %v15556_v13  ;;  %v17669_v18 = vld [vmem:[%s20954_s1 + $0x208] sm:$0xff]  }
 0x194   : > { %4630 = vmatprep.subr.bf16.mxu0 %v18398_v1  ;;  %v1797_v19 = vld [vmem:[%s18488_s26 + $0x142] sm:$0x1] }
 0x195   : > { %1964 = vst [vmem:[#allocation5 + $0x27c] sm:$0xf] %v15538_v22  ;;  %v2022_v22 = vld [vmem:[%s18488_s26 + $0x143] sm:$0x1] }
 0x196   : > { %4495 = vmatmul.mubr.bf16.gmra.mrb[16].mxu0 %v14130_v25  ;;  %v1779_v25 = vld [vmem:[%s18488_s26 + $0xb2] sm:$0xff] }
 0x197   : > { %4502 = vmatprep.mubr.bf16.mxu0 %v18833_v34  ;;  %4631 = vmatpush1.bf16.msra.mxu0 %v17625_v28  ;;  %v17640_v34 = vld [vmem:[%s20954_s1 + $0x1d8] sm:$0xff]   ;;  %v15539_v27 = vpack.c.bf16 %v1779_v25, %v1779_v25  ;;  %v15540_v28 = vpack.c.bf16 %v1780_v26, %v1780_v26  ;;  %v15594_v25 = vpack.c.bf16 %v2022_v22, %v2022_v22 }
 0x198   : > { %4632 = vmatprep.subr.bf16.mxu0 %v18398_v1  ;;  %v17666_v26 = vld [vmem:[#allocation5 + $0xac] ss:$36 sps:$4 sm:$0xff]  }
 0x199   : > { %1965 = vst [vmem:[#allocation5 + $0x2a0] sm:$0xf] %v15539_v27  ;;  %1966 = vst [vmem:[#allocation5 + $0x2c4] sm:$0xf] %v15540_v28  ;;  %v17677_v27 = vld [vmem:[%s20954_s1 + $0x210] sm:$0xff]  }
 0x19a   : > { %v1983_v28 = vld [vmem:[#allocation5 + $0x528] sm:$0x1] }
 0x19b   : > { %4633 = vmatpush1.bf16.msra.mxu0 %v17631_v30  ;;  %v1781_v30 = vld [vmem:[%s18488_s26 + $0xc2] sm:$0xff] }
 0x19c   : > { %4634 = vmatprep.subr.bf16.mxu0 %v18398_v1  ;;  %v15541_v20 = vpack.c.bf16 %v1781_v30, %v1781_v30 }
 0x19e   : > { %4503 = vmatmul.mubr.bf16.gmra.mrb[20].mxu0 %v14139_v33  ;;  %v17637_v33 = vld [vmem:[#allocation5 + $0x3bc] ss:$36 sps:$4 sm:$0xff]   ;;  %1967 = vst [vmem:[#allocation5 + $0x2e8] sm:$0xf] %v15541_v20  ;;  %v17668_v20 = vld [vmem:[#allocation5 + $0xa8] ss:$36 sps:$4 sm:$0xff]  }
 0x19f   : > { %4510 = vmatprep.mubr.bf16.mxu0 %v17610_v31  ;;  %4635 = vmatpush1.bf16.msra.mxu0 %v17636_v37  ;;  %v1782_v31 = vld [vmem:[%s18488_s26 + $0xca] sm:$0xff]  ;;  %v1784_v37 = vld [vmem:[%s18488_s26 + $0xda] sm:$0xff] }
 0x1a0   : > { %4636 = vmatprep.subr.bf16.mxu0 %v18398_v1  ;;  %v15542_v32 = vpack.c.bf16 %v1782_v31, %v1782_v31  ;;  %v17684_v31 = vld [vmem:[%s20954_s1 + $0x218] sm:$0xff]  }
 0x1a2   : > { %1968 = vst [vmem:[#allocation5 + $0x30c] sm:$0xf] %v15542_v32  ;;  %v2211_v32 = vld [vmem:[%s18488_s26 + $0x24] sm:$0xff] }
 0x1a3   : > { %4637 = vmatpush1.bf16.msra.mxu0 %v17640_v34  ;;  %v15543_v34 = vpack.c.bf16 %v1783_v36, %v1783_v36  ;;  %v17691_v36 = vld [vmem:[%s20954_s1 + $0x220] sm:$0xff]  }
 0x1a4   : > { %4638 = vmatprep.subr.bf16.mxu0 %v18398_v1 }
 0x1a5   : > { %1969 = vst [vmem:[#allocation5 + $0x330] sm:$0xf] %v15543_v34 }
 0x1a6   : > { %4511 = vmatmul.mubr.bf16.gmra.mrb[24].mxu0 %v17612_v38  ;;  %v15544_v38 = vpack.c.bf16 %v1784_v37, %v1784_v37  ;;  %v15595_v37 = vpack.c.bf16 %v2211_v32, %v2211_v32 }
 0x1a7   : > { %4518 = vmatprep.mubr.bf16.mxu0 %v17614_v39  ;;  %4639 = vmatpush1.bf16.msra.mxu0 %v17644_v44  ;;  %v17641_v39 = vld [vmem:[#allocation5 + $0x404] ss:$36 sps:$4 sm:$0xff]   ;;  %v15546_v44 = vpack.c.bf16 %v1786_v42, %v1786_v42 }
 0x1a8   : > { %4640 = vmatprep.subr.bf16.mxu0 %v18398_v1  ;;  %1970 = vst [vmem:[#allocation5 + $0x354] sm:$0xf] %v15544_v38  ;;  %2397 = vst [vmem:[#allocation5 + $0x20] sm:$0xf] %v15595_v37  ;;  %v17701_v38 = vld [vmem:[%s20954_s1 + $0x228] sm:$0xff]   ;;  %v17708_v42 = vld [vmem:[%s20954_s1 + $0x230] sm:$0xff]  }
 0x1a9   : > { %1972 = vst [vmem:[#allocation5 + $0x39c] sm:$0xf] %v15546_v44  ;;  %v15598_v44 = vpack.c.bf16 %v2214_v41, %v2214_v41  ;;  %v17694_v32 = vld [vmem:[#allocation5 + $0x2e8] ss:$36 sps:$4 sm:$0xff]   ;;  %v17698_v41 = vld [vmem:[#allocation5 + $0x37c] ss:$36 sps:$4 sm:$0xff]  }
 0x1ab   : > { %4641 = vmatpush1.bf16.msra.mxu0 %v17648_v45  ;;  %v17645_v45 = vld [vmem:[#allocation5 + $0x44c] ss:$36 sps:$4 sm:$0xff]   ;;  %2400 = vst [vmem:[#allocation5 + $0x8c] sm:$0xf] %v15598_v44 }
 0x1ac   : > { %4642 = vmatprep.subr.bf16.mxu0 %v18398_v1 }
 0x1ae   : > { %4519 = vmatmul.mubr.bf16.gmra.mrb[28].mxu0 %v17616_v47  ;;  %v1787_v47 = vld [vmem:[%s18488_s26 + $0xf2] sm:$0xff] }
 0x1af   : > { %4526 = vmatprep.mubr.bf16.mxu0 %v17618_v53  ;;  %4643 = vmatpush1.bf16.msra.mxu0 %v17652_v54  ;;  %v15547_v50 = vpack.c.bf16 %v1787_v47, %v1787_v47  ;;  %v1789_v53 = vld [vmem:[%s18488_s26 + $0x102] sm:$0xff]  ;;  %v1790_v54 = vld [vmem:[%s18488_s26 + $0x10a] sm:$0xff]  ;;  %v17715_v47 = vld [vmem:[%s20954_s1 + $0x238] sm:$0xff]  }
 0x1b0   : > { %4644 = vmatprep.subr.bf16.mxu0 %v18398_v1  ;;  %v5644_v1 = vld [vmem:[#allocation5 + $0x180] sm:$0x1]  ;;  %v15550_v57 = vpack.c.bf16 %v1790_v54, %v1790_v54  ;;  %v17700_v44 = vld [vmem:[#allocation5 + $0x378] ss:$36 sps:$4 sm:$0xff]  }
 0x1b1   : > { %v5645_v6 = vsel %vm18555_vm2, %v15708_v61, %v5644_v1  ;;  %1973 = vst [vmem:[#allocation5 + $0x3c0] sm:$0xf] %v15547_v50  ;;  %v1792_v61 = vld [vmem:[%s18488_s26 + $0x11a] sm:$0xff]  ;;  %v2215_v50 = vld [vmem:[%s18488_s26 + $0x44] sm:$0xff] }
 0x1b2   : > { %5646 = vst [vmem:[#allocation5 + $0x180] sm:$0x1] %v5645_v6  ;;  %1976 = vst [vmem:[#allocation5 + $0x42c] sm:$0xf] %v15550_v57  ;;  %v15552_v62 = vpack.c.bf16 %v1792_v61, %v1792_v61  ;;  %v17662_v1 = vld [vmem:[%s20954_s1 + $0x200] sm:$0xff]   ;;  %v2220_v61 = vld [vmem:[%s18488_s26 + $0x6c] sm:$0xff] }
 0x1b3   : > { %4645 = vmatpush1.bf16.msra.mxu0 %v17658_v56  ;;  %v15549_v56 = vpack.c.bf16 %v1789_v53, %v1789_v53  ;;  %v17663_v6 = vld [vmem:[#allocation5 + $0x64] ss:$36 sps:$4 sm:$0xff]   ;;  %v2218_v57 = vld [vmem:[%s18488_s26 + $0x5c] sm:$0xff] }
 0x1b4   : > { %16847 = vmatprep.subr.bf16.mxu0 %v18955_v5  ;;  %1978 = vst [vmem:[#allocation5 + $0x474] sm:$0xf] %v15552_v62  ;;  %v2638_v53 = vld [vmem:[#allocation5 + $0x1a4] sm:$0xff]  ;;  %v15602_v59 = vpack.c.bf16 %v2218_v57, %v2218_v57  ;;  %v15603_v62 = vpack.c.bf16 %v2219_v11, %v2219_v11  ;;  %v2235_v57 = vld [vmem:[%s18488_s26 + $0xe4] sm:$0xff] }
 0x1b5   : > { %1975 = vst [vmem:[#allocation5 + $0x408] sm:$0xf] %v15549_v56  ;;  %v2217_v56 = vld [vmem:[%s18488_s26 + $0x54] sm:$0xff] }
 0x1b6   : > { %4527 = vmatmul.mubr.bf16.gmra.mrb[32].mxu0 %v17620_v60  ;;  %v17655_v60 = vld [vmem:[#allocation5 + $0x4d8] ss:$36 sps:$4 sm:$0xff]   ;;  %2404 = vst [vmem:[#allocation5 + $0x11c] sm:$0xf] %v15602_v59  ;;  %2405 = vst [vmem:[#allocation5 + $0x140] sm:$0xf] %v15603_v62  ;;  %v15619_v59 = vpack.c.bf16 %v2235_v57, %v2235_v57 }
 0x1b7   : > { %4534 = vmatprep.mubr.bf16.mxu0 %v17622_v3  ;;  %v17661_v3 = vld [vmem:[#allocation5 + $0x18] ss:$36 sps:$4 sm:$0xff]   ;;  %v17751_v57 = vld [vmem:[%s20954_s1 + $0x268] sm:$0xff]  }
 0x1b8   : > { %2421 = vst [vmem:[#allocation5 + $0x380] sm:$0xf] %v15619_v59  ;;  %v17712_v62 = vld [vmem:[#allocation5 + $0x49c] ss:$36 sps:$4 sm:$0xff]  }
 0x1bb   : > { %v17711_v11 = vld [vmem:[#allocation5 + $0x450] ss:$36 sps:$4 sm:$0xff]  }
 0x1be   : > { %4535 = vmatmul.mubr.bf16.gmra.mrb[36].mxu0 %v17624_v7  ;;  %v1795_v7 = vld [vmem:[%s18488_s26 + $0x132] sm:$0xff] }
 0x1bf   : > { %4542 = vmatprep.mubr.bf16.mxu0 %v17626_v14  ;;  %v15555_v10 = vpack.c.bf16 %v1795_v7, %v1795_v7  ;;  %v2021_v14 = vld [vmem:[%s18488_s26 + $0x13b] sm:$0xff] }
 0x1c0   : > { %v15593_v17 = vpack.c.bf16 %v2021_v14, %v2021_v14  ;;  %v5724_v7 = vld [vmem:[#allocation2 + $0x54] sm:$0xff]  ;;  %v17687_v14 = vld [vmem:[#allocation5 + $0x258] ss:$36 sps:$4 sm:$0xff]  }
 0x1c1   : > { %1981 = vst [vmem:[#allocation5 + $0x4e0] sm:$0xf] %v15555_v10  ;;  %v15729_v10 = vpack.c.bf16 %v5725_v8, %v5725_v8 }
 0x1c2   : > { %2207 = vst [vmem:[#allocation5 + $0x508] sm:$0xf] %v15593_v17  ;;  %v2224_v17 = vld [vmem:[%s18488_s26 + $0x8c] sm:$0xff] }
 0x1c3   : > { %v15608_v22 = vpack.c.bf16 %v2224_v17, %v2224_v17 }
 0x1c5   : > { %2410 = vst [vmem:[#allocation5 + $0x1f4] sm:$0xf] %v15608_v22  ;;  %v2243_v22 = vld [vmem:[%s18488_s26 + $0x124] sm:$0xff] }
 0x1c6   : > { %4543 = vmatmul.mubr.bf16.gmra.mrb[40].mxu0 %v17628_v16  ;;  %v15592_v16 = vpack.c.bf16 %v2020_v9, %v2020_v9  ;;  %v15728_v9 = vpack.c.bf16 %v5724_v7, %v5724_v7 }
 0x1c7   : > { %4550 = vmatprep.mubr.bf16.mxu0 %v17629_v23  ;;  %v17665_v23 = vld [vmem:[#allocation5 + $0x60] ss:$36 sps:$4 sm:$0xff]  }
 0x1c8   : > { %2206 = vst [vmem:[#allocation5 + $0x4e4] sm:$0xf] %v15592_v16  ;;  %v2223_v16 = vld [vmem:[%s18488_s26 + $0x84] sm:$0xff] }
 0x1ce   : > { %4551 = vmatmul.mubr.bf16.gmra.mrb[44].mxu0 %v17632_v24  ;;  %v15557_v24 = vpack.c.bf16 %v1797_v19, %v1797_v19  ;;  %v15607_v19 = vpack.c.bf16 %v2223_v16, %v2223_v16 }
 0x1cf   : > { %4558 = vmatprep.mubr.bf16.mxu0 %v17633_v21  ;;  %v2208_v21 = vld [vmem:[#allocation5 + $0x52c] sm:$0x1] }
 0x1d0   : > { %v2209_v30 = vsel %vm18555_vm2, %v15594_v25, %v2208_v21  ;;  %2409 = vst [vmem:[#allocation5 + $0x1d0] sm:$0xf] %v15607_v19  ;;  %v2225_v21 = vld [vmem:[%s18488_s26 + $0x94] sm:$0xff] }
 0x1d1   : > { %2210 = vst [vmem:[#allocation5 + $0x52c] sm:$0x1] %v2209_v30  ;;  %v17692_v30 = vld [vmem:[#allocation5 + $0x2ec] ss:$36 sps:$4 sm:$0xff]  }
 0x1d6   : > { %4559 = vmatmul.mubr.bf16.gmra.mrb[48].mxu0 %v17635_v29  ;;  %v1984_v29 = vsel %vm18555_vm2, %v15557_v24, %v1983_v28  ;;  %v17690_v28 = vld [vmem:[#allocation5 + $0x2a0] ss:$36 sps:$4 sm:$0xff]  }
 0x1d7   : > { %4566 = vmatprep.mubr.bf16.mxu0 %v17637_v33  ;;  %1985 = vst [vmem:[#allocation5 + $0x528] sm:$0x1] %v1984_v29  ;;  %v2212_v33 = vld [vmem:[%s18488_s26 + $0x2c] sm:$0xff]  ;;  %v2226_v29 = vld [vmem:[%s18488_s26 + $0x9c] sm:$0xff] }
 0x1d8   : > { %v15596_v34 = vpack.c.bf16 %v2212_v33, %v2212_v33  ;;  %v2227_v33 = vld [vmem:[%s18488_s26 + $0xa4] sm:$0xff] }
 0x1d9   : > { %v15611_v37 = vpack.c.bf16 %v2227_v33, %v2227_v33 }
 0x1da   : > { %2398 = vst [vmem:[#allocation5 + $0x44] sm:$0xf] %v15596_v34 }
 0x1db   : > { %2413 = vst [vmem:[#allocation5 + $0x260] sm:$0xf] %v15611_v37 }
 0x1de   : > { %4567 = vmatmul.mubr.bf16.gmra.mrb[52].mxu0 %v17639_v35  ;;  %v17670_v35 = vld [vmem:[#allocation5 + $0xf4] ss:$36 sps:$4 sm:$0xff]   ;;  %v2763_v8 = vld [vmem:[#allocation5 + $0x528] sm:$0x11] }
 0x1df   : > { %4574 = vmatprep.mubr.bf16.mxu0 %v17641_v39  ;;  %v17672_v39 = vld [vmem:[#allocation5 + $0xf0] ss:$36 sps:$4 sm:$0xff]   ;;  %v14259_v16 = vcombine.high %v2763_v8, %v2763_v8  ;;  %v14258_v19 = vcombine.low %v2763_v8, %v2763_v8 }
 0x1e6   : > { %4575 = vmatmul.mubr.bf16.gmra.mrb[56].mxu0 %v17643_v40  ;;  %v2213_v40 = vld [vmem:[%s18488_s26 + $0x34] sm:$0xff] }
 0x1e7   : > { %4582 = vmatprep.mubr.bf16.mxu0 %v17645_v45  ;;  %v15597_v43 = vpack.c.bf16 %v2213_v40, %v2213_v40  ;;  %v2623_v45 = vld [vmem:[#allocation5 + $0x138] sm:$0xff] }
 0x1e8   : > { %v2230_v40 = vld [vmem:[%s18488_s26 + $0xbc] sm:$0xff] }
 0x1e9   : > { %2399 = vst [vmem:[#allocation5 + $0x68] sm:$0xf] %v15597_v43  ;;  %v15614_v43 = vpack.c.bf16 %v2230_v40, %v2230_v40 }
 0x1eb   : > { %2416 = vst [vmem:[#allocation5 + $0x2cc] sm:$0xf] %v15614_v43 }
 0x1ee   : > { %4583 = vmatmul.mubr.bf16.gmra.mrb[60].mxu0 %v17647_v46  ;;  %v2628_v46 = vld [vmem:[#allocation5 + $0x15c] sm:$0xff] }
 0x1ef   : > { %4590 = vmatprep.mubr.bf16.mxu0 %v17649_v52  ;;  %v14132_v48 = vcombine.low %v2623_v45, %v2628_v46  ;;  %v15599_v52 = vpack.c.bf16 %v2215_v50, %v2215_v50  ;;  %v2231_v45 = vld [vmem:[%s18488_s26 + $0xc4] sm:$0xff]  ;;  %v2232_v46 = vld [vmem:[%s18488_s26 + $0xcc] sm:$0xff] }
 0x1f0   : > { %v15616_v50 = vpack.c.bf16 %v2232_v46, %v2232_v46  ;;  %v17742_v46 = vld [vmem:[%s20954_s1 + $0x288] sm:$0xff]  }
 0x1f1   : > { %2401 = vst [vmem:[#allocation5 + $0xb0] sm:$0xf] %v15599_v52  ;;  %v2233_v52 = vld [vmem:[%s18488_s26 + $0xd4] sm:$0xff] }
 0x1f2   : > { %2418 = vst [vmem:[#allocation5 + $0x314] sm:$0xf] %v15616_v50  ;;  %v17744_v50 = vld [vmem:[%s20954_s1 + $0x290] sm:$0xff]  }
 0x1f6   : > { %4591 = vmatmul.mubr.bf16.gmra.mrb[64].mxu0 %v17651_v49  ;;  %v15600_v49 = vpack.c.bf16 %v2216_v51, %v2216_v51  ;;  %v17704_v51 = vld [vmem:[#allocation5 + $0x3c0] ss:$36 sps:$4 sm:$0xff]  }
 0x1f7   : > { %4598 = vmatprep.mubr.bf16.mxu0 %v17653_v58  ;;  %v17678_v58 = vld [vmem:[#allocation5 + $0x1cc] ss:$36 sps:$4 sm:$0xff]  }
 0x1f8   : > { %2402 = vst [vmem:[#allocation5 + $0xd4] sm:$0xf] %v15600_v49  ;;  %v2234_v49 = vld [vmem:[%s18488_s26 + $0xdc] sm:$0xff] }
 0x1fe   : > { %4599 = vmatmul.mubr.bf16.gmra.mrb[68].mxu0 %v17655_v60  ;;  %v17680_v60 = vld [vmem:[#allocation5 + $0x1c8] ss:$36 sps:$4 sm:$0xff]  }
 0x1ff   : > { %4606 = vmatprep.mubr.bf16.mxu0 %v14257_v12  ;;  %v15604_v12 = vpack.c.bf16 %v2220_v61, %v2220_v61  ;;  %v2237_v61 = vld [vmem:[%s18488_s26 + $0xf4] sm:$0xff] }
 0x200   : > { %v17723_v37 = vld [vmem:[#allocation5 + $0xb0] ss:$36 sps:$4 sm:$0xff]  }
 0x201   : > { %2406 = vst [vmem:[#allocation5 + $0x164] sm:$0xf] %v15604_v12  ;;  %v15621_v12 = vpack.c.bf16 %v2237_v61, %v2237_v61  ;;  %v17752_v61 = vld [vmem:[%s20954_s1 + $0x2b0] sm:$0xff]  }
 0x203   : > { %2423 = vst [vmem:[#allocation5 + $0x3c8] sm:$0xf] %v15621_v12  ;;  %v17754_v12 = vld [vmem:[%s20954_s1 + $0x2b8] sm:$0xff]  }
 0x206   : > { %4607 = vmatmul.mubr.bf16.gmra.mrb[72].mxu0 %v14256_v0  ;;  %v2221_v0 = vld [vmem:[%s18488_s26 + $0x74] sm:$0xff] }
 0x207   : > { %4646 = vmatprep.mubr.bf16.mxu0 %v17659_v2  ;;  %v2222_v2 = vld [vmem:[%s18488_s26 + $0x7c] sm:$0xff] }
 0x208   : > { %v19033_v13 = vld [vmem:[#allocation5 + $0x140] ss:$36 sps:$4 sm:$0xff]  }
 0x209   : > { %5780 = vst [vmem:[#allocation5 + $0x140] sm:$0xf] %v15728_v9  ;;  %5781 = vst [vmem:[#allocation5 + $0x164] sm:$0xf] %v15729_v10  ;;  %v17718_v9 = vld [vmem:[#allocation5 + $0x4e0] ss:$36 sps:$4 sm:$0xff]  }
 0x20a   : > { %v2241_v10 = vld [vmem:[%s18488_s26 + $0x114] sm:$0xff] }
 0x20b   : > { %v15625_v17 = vpack.c.bf16 %v2241_v10, %v2241_v10 }
 0x20d   : > { %2427 = vst [vmem:[#allocation5 + $0x458] sm:$0xf] %v15625_v17 }
 0x20e   : > { %4647 = vmatmul.mubr.bf16.vlgmr.msra.gmra.mrb[0].mxu0 %v17661_v3  ;;  %v17685_v3 = vld [vmem:[#allocation5 + $0x25c] ss:$36 sps:$4 sm:$0xff]  }
 0x20f   : > { %16848 = vmatpush3.bf16.msra.mxu0 %v17662_v1  ;;  %4654 = vmatprep.mubr.bf16.mxu0 %v17663_v6  ;;  %v15605_v1 = vpack.c.bf16 %v2221_v0, %v2221_v0  ;;  %v15606_v6 = vpack.c.bf16 %v2222_v2, %v2222_v2  ;;  %v17714_v0 = vld [vmem:[#allocation5 + $0x498] ss:$36 sps:$4 sm:$0xff]  }
 0x210   : > { %16849 = vmatprep.subr.bf16.mxu0 %v18955_v5  ;;  %v2239_v2 = vld [vmem:[%s18488_s26 + $0x104] sm:$0xff] }
 0x211   : > { %2407 = vst [vmem:[#allocation5 + $0x188] sm:$0xf] %v15605_v1  ;;  %2408 = vst [vmem:[#allocation5 + $0x1ac] sm:$0xf] %v15606_v6  ;;  %v17716_v1 = vld [vmem:[#allocation5 + $0x4e4] ss:$36 sps:$4 sm:$0xff]   ;;  %v15623_v6 = vpack.c.bf16 %v2239_v2, %v2239_v2 }
 0x213   : > { %16850 = vmatpush3.bf16.msra.mxu0 %v17669_v18  ;;  %v17688_v18 = vld [vmem:[#allocation5 + $0x2a4] ss:$36 sps:$4 sm:$0xff]   ;;  %2425 = vst [vmem:[#allocation5 + $0x410] sm:$0xf] %v15623_v6 }
 0x214   : > { %16851 = vmatprep.subr.bf16.mxu0 %v18955_v5 }
 0x216   : > { %4655 = vmatmul.mubr.bf16.gmra.mrb[4].mxu0 %v17665_v23  ;;  %v5726_v23 = vld [vmem:[#allocation2 + $0x64] sm:$0x1] }
 0x217   : > { %4662 = vmatprep.mubr.bf16.mxu0 %v17666_v26  ;;  %16852 = vmatpush3.bf16.msra.mxu0 %v17677_v27  ;;  %v15730_v25 = vpack.c.bf16 %v5726_v23, %v5726_v23  ;;  %v2244_v23 = vld [vmem:[%s18488_s26 + $0x12c] sm:$0xff] }
 0x218   : > { %16853 = vmatprep.subr.bf16.mxu0 %v18955_v5  ;;  %v5782_v24 = vld [vmem:[#allocation5 + $0x188] sm:$0x1] }
 0x219   : > { %v19037_v26 = vld [vmem:[#allocation5 + $0x188] ss:$36 sps:$4 sm:$0xff]   ;;  %v5783_v27 = vsel %vm18555_vm2, %v15730_v25, %v5782_v24  ;;  %v15627_v24 = vpack.c.bf16 %v2243_v22, %v2243_v22  ;;  %v15628_v25 = vpack.c.bf16 %v2244_v23, %v2244_v23 }
 0x21a   : > { %5784 = vst [vmem:[#allocation5 + $0x188] sm:$0x1] %v5783_v27  ;;  %v19061_v27 = vld [vmem:[#allocation2 + $0x50] sm:$0xff] }
 0x21b   : > { %16854 = vmatpush3.bf16.msra.mxu0 %v17684_v31  ;;  %v15609_v31 = vpack.c.bf16 %v2225_v21, %v2225_v21  ;;  %2429 = vst [vmem:[#allocation5 + $0x4a0] sm:$0xf] %v15627_v24  ;;  %2430 = vst [vmem:[#allocation5 + $0x4c4] sm:$0xf] %v15628_v25  ;;  %v2245_v21 = vld [vmem:[%s18488_s26 + $0x134] sm:$0xff]  ;;  %v15632_v59 = vpack.c.bf16 %v19061_v27, %v19061_v27 }
 0x21c   : > { %16855 = vmatprep.subr.bf16.mxu0 %v18955_v5 }
 0x21d   : > { %2411 = vst [vmem:[#allocation5 + $0x218] sm:$0xf] %v15609_v31  ;;  %5220 = vst [vmem:[#allocation5] sm:$0xf] %v15632_v59 }
 0x21e   : > { %4663 = vmatmul.mubr.bf16.gmra.mrb[8].mxu0 %v17668_v20  ;;  %v15610_v20 = vpack.c.bf16 %v2226_v29, %v2226_v29  ;;  %v2246_v29 = vld [vmem:[%s18488_s26 + $0x13c] sm:$0xff] }
 0x21f   : > { %4670 = vmatprep.mubr.bf16.mxu0 %v17670_v35  ;;  %16856 = vmatpush3.bf16.msra.mxu0 %v17691_v36  ;;  %v2228_v35 = vld [vmem:[%s18488_s26 + $0xac] sm:$0xff]  ;;  %v17695_v36 = vld [vmem:[#allocation5 + $0x334] ss:$36 sps:$4 sm:$0xff]   ;;  %v15630_v31 = vpack.c.bf16 %v2246_v29, %v2246_v29 }
 0x220   : > { %16857 = vmatprep.subr.bf16.mxu0 %v18955_v5  ;;  %2412 = vst [vmem:[#allocation5 + $0x23c] sm:$0xf] %v15610_v20  ;;  %v15612_v34 = vpack.c.bf16 %v2228_v35, %v2228_v35  ;;  %v2247_v20 = vld [vmem:[%s18488_s26 + $0x144] sm:$0x1]  ;;  %v2433_v35 = vld [vmem:[#allocation5 + $0x530] sm:$0x1] }
 0x221   : > { %2432 = vst [vmem:[#allocation5 + $0x50c] sm:$0xf] %v15630_v31  ;;  %v15631_v33 = vpack.c.bf16 %v2247_v20, %v2247_v20 }
 0x222   : > { %2414 = vst [vmem:[#allocation5 + $0x284] sm:$0xf] %v15612_v34 }
 0x223   : > { %16858 = vmatpush3.bf16.msra.mxu0 %v17701_v38  ;;  %v17697_v38 = vld [vmem:[#allocation5 + $0x330] ss:$36 sps:$4 sm:$0xff]  }
 0x224   : > { %16859 = vmatprep.subr.bf16.mxu0 %v18955_v5 }
 0x226   : > { %4671 = vmatmul.mubr.bf16.gmra.mrb[12].mxu0 %v17672_v39  ;;  %v2229_v39 = vld [vmem:[%s18488_s26 + $0xb4] sm:$0xff] }
 0x227   : > { %4678 = vmatprep.mubr.bf16.mxu0 %v18940_v55  ;;  %16860 = vmatpush3.bf16.msra.mxu0 %v17708_v42  ;;  %v2633_v55 = vld [vmem:[#allocation5 + $0x180] sm:$0xff]  ;;  %v15613_v42 = vpack.c.bf16 %v2229_v39, %v2229_v39  ;;  %v17728_v39 = vld [vmem:[#allocation5 + $0x218] ss:$36 sps:$4 sm:$0xff]  }
 0x228   : > { %16861 = vmatprep.subr.bf16.mxu0 %v18955_v5  ;;  %v14141_v54 = vcombine.low %v2633_v55, %v2638_v53  ;;  %v15601_v5 = vpack.c.bf16 %v2217_v56, %v2217_v56  ;;  %v17705_v55 = vld [vmem:[#allocation5 + $0x40c] ss:$36 sps:$4 sm:$0xff]   ;;  %v15617_v53 = vpack.c.bf16 %v2233_v52, %v2233_v52 }
 0x229   : > { %2415 = vst [vmem:[#allocation5 + $0x2a8] sm:$0xf] %v15613_v42  ;;  %v17707_v56 = vld [vmem:[#allocation5 + $0x408] ss:$36 sps:$4 sm:$0xff]   ;;  %v17729_v40 = vld [vmem:[#allocation5 + $0x260] ss:$36 sps:$4 sm:$0xff]  }
 0x22a   : > { %2403 = vst [vmem:[#allocation5 + $0xf8] sm:$0xf] %v15601_v5  ;;  %2419 = vst [vmem:[#allocation5 + $0x338] sm:$0xf] %v15617_v53  ;;  %v17709_v5 = vld [vmem:[#allocation5 + $0x454] ss:$36 sps:$4 sm:$0xff]  }
 0x22b   : > { %16862 = vmatpush3.bf16.msra.mxu0 %v17715_v47  ;;  %v17702_v47 = vld [vmem:[#allocation5 + $0x3c4] ss:$36 sps:$4 sm:$0xff]   ;;  %v17746_v52 = vld [vmem:[%s20954_s1 + $0x298] sm:$0xff]   ;;  %v17748_v53 = vld [vmem:[%s20954_s1 + $0x2a0] sm:$0xff]  }
 0x22e   : > { %4679 = vmatmul.mubr.bf16.gmra.mrb[16].mxu0 %v14132_v48  ;;  %v15615_v48 = vpack.c.bf16 %v2231_v45, %v2231_v45  ;;  %v17741_v45 = vld [vmem:[%s20954_s1 + $0x240] sm:$0xff]  }
 0x22f   : > { %4686 = vmatprep.mubr.bf16.mxu0 %v18953_v4  ;;  %v17683_v4 = vld [vmem:[#allocation5 + $0x210] ss:$36 sps:$4 sm:$0xff]  }
 0x230   : > { %2417 = vst [vmem:[#allocation5 + $0x2f0] sm:$0xf] %v15615_v48 }
 0x231   : > { %v17724_v34 = vld [vmem:[#allocation5 + $0xf8] ss:$36 sps:$4 sm:$0xff]  }
 0x236   : > { %4687 = vmatmul.mubr.bf16.gmra.mrb[20].mxu0 %v14141_v54  ;;  %v15618_v54 = vpack.c.bf16 %v2234_v49, %v2234_v49  ;;  %v17747_v49 = vld [vmem:[%s20954_s1 + $0x258] sm:$0xff]  }
 0x237   : > { %4694 = vmatprep.mubr.bf16.mxu0 %v17678_v58  ;;  %v2236_v58 = vld [vmem:[%s18488_s26 + $0xec] sm:$0xff] }
 0x238   : > { %2420 = vst [vmem:[#allocation5 + $0x35c] sm:$0xf] %v15618_v54  ;;  %v17749_v54 = vld [vmem:[%s20954_s1 + $0x260] sm:$0xff]  }
 0x23e   : > { %4695 = vmatmul.mubr.bf16.gmra.mrb[24].mxu0 %v17680_v60  ;;  %v15620_v60 = vpack.c.bf16 %v2236_v58, %v2236_v58  ;;  %v5233_v58 = vld [vmem:[#allocation2 + $0x1] sm:$0xff] }
 0x23f   : > { %4702 = vmatprep.mubr.bf16.mxu0 %v17681_v63  ;;  %v2238_v63 = vld [vmem:[%s18488_s26 + $0xfc] sm:$0xff] }
 0x240   : > { %2422 = vst [vmem:[#allocation5 + $0x3a4] sm:$0xf] %v15620_v60  ;;  %v15643_v60 = vpack.c.bf16 %v5233_v58, %v5233_v58 }
 0x242   : > { %5289 = vst [vmem:[#allocation5 + $0x4] sm:$0xf] %v15643_v60 }
 0x246   : > { %4703 = vmatmul.mubr.bf16.gmra.mrb[28].mxu0 %v17683_v4  ;;  %v15622_v4 = vpack.c.bf16 %v2238_v63, %v2238_v63 }
 0x247   : > { %4710 = vmatprep.mubr.bf16.mxu0 %v17685_v3  ;;  %v2240_v3 = vld [vmem:[%s18488_s26 + $0x10c] sm:$0xff] }
 0x248   : > { %2424 = vst [vmem:[#allocation5 + $0x3ec] sm:$0xf] %v15622_v4  ;;  %v15624_v7 = vpack.c.bf16 %v2240_v3, %v2240_v3  ;;  %v17733_v42 = vld [vmem:[#allocation5 + $0x380] ss:$36 sps:$4 sm:$0xff]   ;;  %v17755_v4 = vld [vmem:[%s20954_s1 + $0x278] sm:$0xff]  }
 0x249   : > { %v19162_v3 = vld [vmem:[%s20955_s2] ss:$0 sm:$0xff] }
 0x24a   : > { %2426 = vst [vmem:[#allocation5 + $0x434] sm:$0xf] %v15624_v7 }
 0x24e   : > { %4711 = vmatmul.mubr.bf16.gmra.mrb[32].mxu0 %v17687_v14  ;;  %v2242_v14 = vld [vmem:[%s18488_s26 + $0x11c] sm:$0xff] }
 0x24f   : > { %4718 = vmatprep.mubr.bf16.mxu0 %v17688_v18  ;;  %v15626_v18 = vpack.c.bf16 %v2242_v14, %v2242_v14  ;;  %v17734_v43 = vld [vmem:[#allocation5 + $0x3c8] ss:$36 sps:$4 sm:$0xff]  }
 0x251   : > { %2428 = vst [vmem:[#allocation5 + $0x47c] sm:$0xf] %v15626_v18  ;;  %v17735_v48 = vld [vmem:[#allocation5 + $0x410] ss:$36 sps:$4 sm:$0xff]  }
 0x256   : > { %4719 = vmatmul.mubr.bf16.gmra.mrb[36].mxu0 %v17690_v28  ;;  %v17721_v28 = vld [vmem:[#allocation5 + $0x20] ss:$36 sps:$4 sm:$0xff]  }
 0x257   : > { %4726 = vmatprep.mubr.bf16.mxu0 %v17692_v30  ;;  %v15629_v30 = vpack.c.bf16 %v2245_v21, %v2245_v21 }
 0x259   : > { %2431 = vst [vmem:[#allocation5 + $0x4e8] sm:$0xf] %v15629_v30 }
 0x25e   : > { %4727 = vmatmul.mubr.bf16.gmra.mrb[40].mxu0 %v17694_v32  ;;  %v17722_v32 = vld [vmem:[#allocation5 + $0x68] ss:$36 sps:$4 sm:$0xff]  }
 0x25f   : > { %4734 = vmatprep.mubr.bf16.mxu0 %v17695_v36  ;;  %v2434_v36 = vsel %vm18555_vm2, %v15631_v33, %v2433_v35  ;;  %v17765_v33 = vld [vmem:[%s20954_s1 + $0x300] sm:$0xff]  }
 0x260   : > { %2435 = vst [vmem:[#allocation5 + $0x530] sm:$0x1] %v2434_v36 }
 0x266   : > { %4735 = vmatmul.mubr.bf16.gmra.mrb[44].mxu0 %v17697_v38  ;;  %v17727_v38 = vld [vmem:[#allocation5 + $0x1d0] ss:$36 sps:$4 sm:$0xff]  }
 0x267   : > { %4742 = vmatprep.mubr.bf16.mxu0 %v17698_v41  ;;  %v17732_v41 = vld [vmem:[#allocation5 + $0x338] ss:$36 sps:$4 sm:$0xff]   ;;  %v17739_v2 = vld [vmem:[#allocation5 + $0x530] ss:$0 sps:$4 sm:$0x11]  }
 0x26e   : > { %4743 = vmatmul.mubr.bf16.gmra.mrb[48].mxu0 %v17700_v44  ;;  %v17740_v44 = vld [vmem:[%s20954_s1 + $0x280] sm:$0xff]  }
 0x26f   : > { %4750 = vmatprep.mubr.bf16.mxu0 %v17702_v47  ;;  %15965 = vmatprep.subr.bf16.mxu1 %v17740_v44  ;;  %v17743_v47 = vld [vmem:[%s20954_s1 + $0x248] sm:$0xff]  }
 0x270   : > { %15966 = vmatpush3.bf16.msra.mxu1 %v17741_v45 }
 0x271   : > { %15967 = vmatprep.subr.bf16.mxu1 %v17742_v46 }
 0x274   : > { %15968 = vmatpush3.bf16.msra.mxu1 %v17743_v47 }
 0x275   : > { %15969 = vmatprep.subr.bf16.mxu1 %v17744_v50 }
 0x276   : > { %4751 = vmatmul.mubr.bf16.gmra.mrb[52].mxu0 %v17704_v51  ;;  %v17745_v51 = vld [vmem:[%s20954_s1 + $0x250] sm:$0xff]  }
 0x277   : > { %4758 = vmatprep.mubr.bf16.mxu0 %v17705_v55  ;;  %v17736_v55 = vld [vmem:[#allocation5 + $0x458] ss:$36 sps:$4 sm:$0xff]  }
 0x278   : > { %15970 = vmatpush3.bf16.msra.mxu1 %v17745_v51 }
 0x279   : > { %15971 = vmatprep.subr.bf16.mxu1 %v17746_v52 }
 0x27c   : > { %15972 = vmatpush3.bf16.msra.mxu1 %v17747_v49 }
 0x27d   : > { %15973 = vmatprep.subr.bf16.mxu1 %v17748_v53 }
 0x27e   : > { %4759 = vmatmul.mubr.bf16.gmra.mrb[56].mxu0 %v17707_v56  ;;  %v17750_v56 = vld [vmem:[%s20954_s1 + $0x2a8] sm:$0xff]  }
 0x27f   : > { %4766 = vmatprep.mubr.bf16.mxu0 %v17709_v5  ;;  %v17737_v5 = vld [vmem:[#allocation5 + $0x4a0] ss:$36 sps:$4 sm:$0xff]  }
 0x280   : > { %15974 = vmatpush3.bf16.msra.mxu1 %v17749_v54 }
 0x281   : > { %15975 = vmatprep.subr.bf16.mxu1 %v17750_v56 }
 0x284   : > { %15976 = vmatpush3.bf16.msra.mxu1 %v17751_v57 }
 0x285   : > { %15977 = vmatprep.subr.bf16.mxu1 %v17752_v61 }
 0x286   : > { %4767 = vmatmul.mubr.bf16.gmra.mrb[60].mxu0 %v17711_v11  ;;  %v5302_v11 = vld [vmem:[#allocation2 + $0x2] sm:$0xff] }
 0x287   : > { %4774 = vmatprep.mubr.bf16.mxu0 %v17712_v62  ;;  %v15654_v63 = vpack.c.bf16 %v5302_v11, %v5302_v11  ;;  %v17753_v62 = vld [vmem:[%s20954_s1 + $0x270] sm:$0xff]  }
 0x288   : > { %15978 = vmatpush3.bf16.msra.mxu1 %v17753_v62 }
 0x289   : > { %5358 = vst [vmem:[#allocation5 + $0x8] sm:$0xf] %v15654_v63  ;;  %15979 = vmatprep.subr.bf16.mxu1 %v17754_v12 }
 0x28c   : > { %15980 = vmatpush3.bf16.msra.mxu1 %v17755_v4 }
 0x28d   : > { %16017 = vmatprep.subr.bf16.mxu1 %v17765_v33 }
 0x28e   : > { %4775 = vmatmul.mubr.bf16.gmra.mrb[64].mxu0 %v17714_v0  ;;  %v17738_v0 = vld [vmem:[#allocation5 + $0x4e8] ss:$36 sps:$4 sm:$0xff]  }
 0x28f   : > { %4782 = vmatprep.mubr.bf16.mxu0 %v17716_v1 }
 0x296   : > { %4783 = vmatmul.mubr.bf16.gmra.mrb[68].mxu0 %v17718_v9 }
 0x297   : > { %4790 = vmatprep.mubr.bf16.mxu0 %v14259_v16 }
 0x29e   : > { %4791 = vmatmul.mubr.bf16.gmra.mrb[72].mxu0 %v14258_v19 }
 0x29f   : > { %16863 = vmatprep.mubr.msk.bf16.mxu0 %vm18400_vm3, %v19061_v27 }
 0x2a6   : > { %16864 = vmatmul.mubr.bf16.vlgmr.msra.gmra.mrb[0].mxu0 %v17721_v28 }
 0x2a7   : > { %16867 = vmatprep.mubr.msk.bf16.mxu0 %vm18400_vm3, %v19061_v27 }
 0x2ae   : > { %16868 = vmatmul.mubr.bf16.gmra.mrb[4].mxu0 %v17722_v32 }
 0x2af   : > { %16871 = vmatprep.mubr.msk.bf16.mxu0 %vm18400_vm3, %v19061_v27 }
 0x2b6   : > { %16872 = vmatmul.mubr.bf16.gmra.mrb[8].mxu0 %v17723_v37 }
 0x2b7   : > { %16875 = vmatprep.mubr.msk.bf16.mxu0 %vm18400_vm3, %v19061_v27 }
 0x2be   : > { %16876 = vmatmul.mubr.bf16.gmra.mrb[12].mxu0 %v17724_v34 }
 0x2bf   : > { %16879 = vmatprep.mubr.msk.bf16.mxu0 %vm18400_vm3, %v19061_v27 }
 0x2c6   : > { %16880 = vmatmul.mubr.bf16.gmra.mrb[16].mxu0 %v19033_v13  ;;  %v17730_v13 = vld [vmem:[#allocation5 + $0x2a8] ss:$36 sps:$4 sm:$0xff]  }
 0x2c7   : > { %16883 = vmatprep.mubr.msk.bf16.mxu0 %vm18400_vm3, %v19061_v27 }
 0x2ce   : > { %16884 = vmatmul.mubr.bf16.gmra.mrb[20].mxu0 %v19037_v26  ;;  %v17731_v26 = vld [vmem:[#allocation5 + $0x2f0] ss:$36 sps:$4 sm:$0xff]  }
 0x2cf   : > { %16887 = vmatprep.mubr.msk.bf16.mxu0 %vm18400_vm3, %v19061_v27 }
 0x2d6   : > { %16888 = vmatmul.mubr.bf16.gmra.mrb[24].mxu0 %v17727_v38 }
 0x2d7   : > { %16891 = vmatprep.mubr.msk.bf16.mxu0 %vm18400_vm3, %v19061_v27 }
 0x2de   : > { %16892 = vmatmul.mubr.bf16.gmra.mrb[28].mxu0 %v17728_v39 }
 0x2df   : > { %16895 = vmatprep.mubr.msk.bf16.mxu0 %vm18400_vm3, %v19061_v27 }
 0x2e6   : > { %16896 = vmatmul.mubr.bf16.gmra.mrb[32].mxu0 %v17729_v40 }
 0x2e7   : > { %16899 = vmatprep.mubr.msk.bf16.mxu0 %vm18400_vm3, %v19061_v27 }
 0x2ee   : > { %16900 = vmatmul.mubr.bf16.gmra.mrb[36].mxu0 %v17730_v13 }
 0x2ef   : > { %16903 = vmatprep.mubr.msk.bf16.mxu0 %vm18400_vm3, %v19061_v27 }
 0x2f6   : > { %16904 = vmatmul.mubr.bf16.gmra.mrb[40].mxu0 %v17731_v26 }
 0x2f7   : > { %16907 = vmatprep.mubr.msk.bf16.mxu0 %vm18400_vm3, %v19061_v27 }
 0x2fe   : > { %16908 = vmatmul.mubr.bf16.gmra.mrb[44].mxu0 %v17732_v41 }
 0x2ff   : > { %16911 = vmatprep.mubr.msk.bf16.mxu0 %vm18400_vm3, %v19061_v27 }
 0x306   : > { %16912 = vmatmul.mubr.bf16.gmra.mrb[48].mxu0 %v17733_v42 }
 0x307   : > { %16915 = vmatprep.mubr.msk.bf16.mxu0 %vm18400_vm3, %v19061_v27 }
 0x30e   : > { %16916 = vmatmul.mubr.bf16.gmra.mrb[52].mxu0 %v17734_v43 }
 0x30f   : > { %16919 = vmatprep.mubr.msk.bf16.mxu0 %vm18400_vm3, %v19061_v27 }
 0x316   : > { %16920 = vmatmul.mubr.bf16.gmra.mrb[56].mxu0 %v17735_v48 }
 0x317   : > { %16923 = vmatprep.mubr.msk.bf16.mxu0 %vm18400_vm3, %v19061_v27 }
 0x31e   : > { %16924 = vmatmul.mubr.bf16.gmra.mrb[60].mxu0 %v17736_v55 }
 0x31f   : > { %16927 = vmatprep.mubr.msk.bf16.mxu0 %vm18400_vm3, %v19061_v27 }
 0x326   : > { %16928 = vmatmul.mubr.bf16.gmra.mrb[64].mxu0 %v17737_v5 }
 0x327   : > { %16931 = vmatprep.mubr.msk.bf16.mxu0 %vm18400_vm3, %v19061_v27 }
 0x32e   : > { %16932 = vmatmul.mubr.bf16.gmra.mrb[68].mxu0 %v17738_v0 }
 0x32f   : > { %16935 = vmatprep.mubr.msk.bf16.mxu0 %vm18400_vm3, %v19061_v27 }
 0x336   : > { %16936 = vmatmul.mubr.bf16.gmra.mrb[72].mxu0 %v17739_v2 }
 0x379   : > { %v4832_v1 = vpop.f32.mrb[0].mxu0 }
 0x37a   : > { %v17075_v6 = vadd.f32 %v19162_v3, %v4832_v1  ;;  %v16865_v7 = vpop.f32.mrb[1].mxu0 }
 0x37b   : > { %v4835_v8 = vpop.f32.mrb[2].mxu0 }
 0x37c   : > { %v4982_v9 = vmax.f32 %v17075_v6, 0.0  ;;  %v17076_v10 = vadd.f32 %v19162_v3, %v4835_v8  ;;  %v16866_v14 = vpop.f32.mrb[3].mxu0 }
 0x37e   : > { %5019 = vst [vmem:[%s19168_s27] sm:$0xff] %v4982_v9  ;;  %v4983_v16 = vmax.f32 %v17076_v10, 0.0 }
 0x380   : > { %5020 = vst [vmem:[%s19168_s27 + $0x8] sm:$0xff] %v4983_v16 }
 0x381   : > { %v4840_v17 = vpop.f32.mrb[4].mxu0 }
 0x382   : > { %v17077_v18 = vadd.f32 %v19162_v3, %v4840_v17  ;;  %v16869_v19 = vpop.f32.mrb[5].mxu0 }
 0x383   : > { %v4843_v22 = vpop.f32.mrb[6].mxu0 }
 0x384   : > { %v4984_v23 = vmax.f32 %v17077_v18, 0.0  ;;  %v17078_v24 = vadd.f32 %v19162_v3, %v4843_v22  ;;  %v16870_v25 = vpop.f32.mrb[7].mxu0  ;;  %v17766_v22 = vld [vmem:[%s20954_s1 + $0x2c0] sm:$0xff]  }
 0x386   : > { %5021 = vst [vmem:[%s19168_s27 + $0x10] sm:$0xff] %v4984_v23  ;;  %v4985_v27 = vmax.f32 %v17078_v24, 0.0 }
 0x387   : > { %v5069_v38 = vld [vmem:[%s19168_s27] ss:$2 sm:$0xff]  ;;  %v14333_v39 = vld [vmem:[%s19168_s27 + $0x1] ss:$2 sm:$0xff] }
 0x388   : > { %5022 = vst [vmem:[%s19168_s27 + $0x18] sm:$0xff] %v4985_v27  ;;  %v5076_v44 = vmax.f32 %v5069_v38, %v14333_v39 }
 0x389   : > { %v4848_v28 = vpop.f32.mrb[8].mxu0 }
 0x38a   : > { %v17079_v21 = vadd.f32 %v19162_v3, %v4848_v28  ;;  %v16873_v29 = vpop.f32.mrb[9].mxu0 }
 0x38b   : > { %v4851_v30 = vpop.f32.mrb[10].mxu0 }
 0x38c   : > { %v4986_v31 = vmax.f32 %v17079_v21, 0.0  ;;  %v17080_v20 = vadd.f32 %v19162_v3, %v4851_v30  ;;  %v16874_v32 = vpop.f32.mrb[11].mxu0  ;;  %v17767_v30 = vld [vmem:[%s20954_s1 + $0x308] sm:$0xff]  }
 0x38d   : > { %v17769_v32 = vld [vmem:[%s20954_s1 + $0x310] sm:$0xff]  }
 0x38e   : > { %5023 = vst [vmem:[%s19168_s27 + $0x20] sm:$0xff] %v4986_v31  ;;  %v4987_v35 = vmax.f32 %v17080_v20, 0.0  ;;  %v17768_v20 = vld [vmem:[%s20954_s1 + $0x2c8] sm:$0xff]  }
 0x38f   : > { %v14334_v42 = vld [vmem:[%s19168_s27 + $0x11] ss:$2 sm:$0xff] }
 0x390   : > { %5024 = vst [vmem:[%s19168_s27 + $0x28] sm:$0xff] %v4987_v35 }
 0x391   : > { %v4856_v36 = vpop.f32.mrb[12].mxu0 }
 0x392   : > { %v17081_v37 = vadd.f32 %v19162_v3, %v4856_v36  ;;  %v16877_v34 = vpop.f32.mrb[13].mxu0 }
 0x393   : > { %v4859_v40 = vpop.f32.mrb[14].mxu0 }
 0x394   : > { %v4988_v13 = vmax.f32 %v17081_v37, 0.0  ;;  %v17082_v26 = vadd.f32 %v19162_v3, %v4859_v40  ;;  %v16878_v41 = vpop.f32.mrb[15].mxu0 }
 0x395   : > { %v14335_v43 = vld [vmem:[%s19168_s27 + $0x12] ss:$2 sm:$0xff] }
 0x396   : > { %v5077_v45 = vmax.f32 %v14334_v42, %v14335_v43  ;;  %5025 = vst [vmem:[%s19168_s27 + $0x30] sm:$0xff] %v4988_v13  ;;  %v4989_v46 = vmax.f32 %v17082_v26, 0.0  ;;  %v17770_v26 = vld [vmem:[%s20954_s1 + $0x2d0] sm:$0xff]  }
 0x398   : > { %v5078_v47 = vmax.f32 %v5076_v44, %v5077_v45  ;;  %5026 = vst [vmem:[%s19168_s27 + $0x38] sm:$0xff] %v4989_v46 }
 0x399   : > { %v4864_v48 = vpop.f32.mrb[16].mxu0 }
 0x39a   : > { %5079 = vst [vmem:[#allocation2 + $0xa] sm:$0xff] %v5078_v47  ;;  %v15655_v50 = vpack.c.bf16 %v5078_v47, %v5078_v47  ;;  %v17083_v51 = vadd.f32 %v19162_v3, %v4864_v48  ;;  %v16881_v52 = vpop.f32.mrb[17].mxu0  ;;  %v17774_v48 = vld [vmem:[%s20954_s1 + $0x318] sm:$0xff]  }
 0x39b   : > { %v4867_v49 = vpop.f32.mrb[18].mxu0 }
 0x39c   : > { %5359 = vst [vmem:[#allocation5 + $0x2c] sm:$0xf] %v15655_v50  ;;  %5496 = vst [vmem:[#allocation5 + $0x10] sm:$0xf] %v15655_v50  ;;  %v4990_v55 = vmax.f32 %v17083_v51, 0.0  ;;  %v17084_v53 = vadd.f32 %v19162_v3, %v4867_v49  ;;  %v16882_v54 = vpop.f32.mrb[19].mxu0 }
 0x39d   : > { %v14336_v12 = vld [vmem:[%s19168_s27 + $0x22] ss:$2 sm:$0xff]  ;;  %v14337_v4 = vld [vmem:[%s19168_s27 + $0x23] ss:$2 sm:$0xff]  ;;  %v17775_v54 = vld [vmem:[%s20954_s1 + $0x2d8] sm:$0xff]  }
 0x39e   : > { %5027 = vst [vmem:[%s19168_s27 + $0x40] sm:$0xff] %v4990_v55  ;;  %v4991_v56 = vmax.f32 %v17084_v53, 0.0  ;;  %v5088_v9 = vmax.f32 %v14336_v12, %v14337_v4  ;;  %v17778_v12 = vld [vmem:[%s20954_s1 + $0x328] sm:$0xff]  }
 0x3a0   : > { %5028 = vst [vmem:[%s19168_s27 + $0x48] sm:$0xff] %v4991_v56 }
 0x3a1   : > { %v5371_v57 = vld [vmem:[#allocation2 + $0x9] sm:$0xff]  ;;  %v4872_v5 = vpop.f32.mrb[20].mxu0 }
 0x3a2   : > { %v5509_v58 = vld [vmem:[#allocation2 + $0xb] sm:$0xff]  ;;  %v15665_v60 = vpack.c.bf16 %v5371_v57, %v5371_v57  ;;  %v17085_v11 = vadd.f32 %v19162_v3, %v4872_v5  ;;  %v16885_v61 = vpop.f32.mrb[21].mxu0  ;;  %v17776_v57 = vld [vmem:[%s20954_s1 + $0x320] sm:$0xff]  }
 0x3a3   : > { %v5165_v59 = vld [vmem:[#allocation2 + $0x8] sm:$0xff]  ;;  %v15687_v62 = vpack.c.bf16 %v5509_v58, %v5509_v58  ;;  %v4875_v0 = vpop.f32.mrb[22].mxu0 }
 0x3a4   : > { %v15633_v63 = vpack.c.bf16 %v5165_v59, %v5165_v59  ;;  %5427 = vst [vmem:[#allocation5 + $0xc] sm:$0xf] %v15665_v60  ;;  %v4992_v2 = vmax.f32 %v17085_v11, 0.0  ;;  %v17086_v1 = vadd.f32 %v19162_v3, %v4875_v0  ;;  %v16886_v6 = vpop.f32.mrb[23].mxu0  ;;  %5290 = vst [vmem:[#allocation5 + $0x28] sm:$0xf] %v15665_v60 }
 0x3a5   : > { %5565 = vst [vmem:[#allocation5 + $0x14] sm:$0xf] %v15687_v62  ;;  %v14338_v7 = vld [vmem:[%s19168_s27 + $0x33] ss:$2 sm:$0xff]  ;;  %v14339_v8 = vld [vmem:[%s19168_s27 + $0x34] ss:$2 sm:$0xff] }
 0x3a6   : > { %5221 = vst [vmem:[#allocation5 + $0x24] sm:$0xf] %v15633_v63  ;;  %v5089_v10 = vmax.f32 %v14338_v7, %v14339_v8  ;;  %5029 = vst [vmem:[%s19168_s27 + $0x50] sm:$0xff] %v4992_v2  ;;  %v4993_v14 = vmax.f32 %v17086_v1, 0.0  ;;  %v17777_v11 = vld [vmem:[%s20954_s1 + $0x2e0] sm:$0xff]   ;;  %v17781_v0 = vld [vmem:[%s20954_s1 + $0x2e8] sm:$0xff]  }
 0x3a7   : > { %v17784_v2 = vld [vmem:[%s20954_s1 + $0x330] sm:$0xff]  }
 0x3a8   : > { %v5090_v16 = vmax.f32 %v5088_v9, %v5089_v10  ;;  %5030 = vst [vmem:[%s19168_s27 + $0x58] sm:$0xff] %v4993_v14 }
 0x3a9   : > { %v4880_v17 = vpop.f32.mrb[24].mxu0 }
 0x3aa   : > { %5091 = vst [vmem:[#allocation2 + $0x13] sm:$0xff] %v5090_v16  ;;  %v17087_v18 = vadd.f32 %v19162_v3, %v4880_v17  ;;  %v16889_v19 = vpop.f32.mrb[25].mxu0  ;;  %v15688_v23 = vpack.c.bf16 %v5090_v16, %v5090_v16 }
 0x3ab   : > { %v4883_v24 = vpop.f32.mrb[26].mxu0  ;;  %v17756_v25 = vld [vmem:[#allocation5 + $0x4] ss:$36 sps:$4 sm:$0xff]  }
 0x3ac   : > { %v4994_v28 = vmax.f32 %v17087_v18, 0.0  ;;  %v17088_v21 = vadd.f32 %v19162_v3, %v4883_v24  ;;  %v16890_v29 = vpop.f32.mrb[27].mxu0  ;;  %5566 = vst [vmem:[#allocation5 + $0x38] sm:$0xf] %v15688_v23  ;;  %5703 = vst [vmem:[#allocation5 + $0x1c] sm:$0xf] %v15688_v23  ;;  %6715 = vmatprep.mubr.bf16.mxu1 %v17756_v25 }
 0x3ad   : > { %v17758_v27 = vld [vmem:[#allocation5] ss:$36 sps:$4 sm:$0xff]   ;;  %v17785_v18 = vld [vmem:[%s20954_s1 + $0x2f0] sm:$0xff]  }
 0x3ae   : > { %5031 = vst [vmem:[%s19168_s27 + $0x60] sm:$0xff] %v4994_v28  ;;  %v4995_v31 = vmax.f32 %v17088_v21, 0.0  ;;  %6716 = vmatmul.mubr.bf16.vlgmr.msra.gmra.mrb[0].mxu1 %v17758_v27  ;;  %v14340_v41 = vld [vmem:[%s19168_s27 + $0x44] ss:$2 sm:$0xff]  ;;  %v14341_v42 = vld [vmem:[%s19168_s27 + $0x45] ss:$2 sm:$0xff] }
 0x3af   : > { %16018 = vmatpush3.bf16.msra.mxu1 %v17766_v22  ;;  %v5100_v49 = vmax.f32 %v14340_v41, %v14341_v42 }
 0x3b0   : > { %5032 = vst [vmem:[%s19168_s27 + $0x68] sm:$0xff] %v4995_v31  ;;  %16019 = vmatprep.subr.bf16.mxu1 %v17767_v30  ;;  %v17789_v30 = vld [vmem:[%s20954_s1 + $0x338] sm:$0xff]  }
 0x3b1   : > { %v5372_v33 = vld [vmem:[#allocation2 + $0x11] sm:$0xff]  ;;  %v4888_v36 = vpop.f32.mrb[28].mxu0 }
 0x3b2   : > { %v5441_v35 = vld [vmem:[#allocation2 + $0x12] sm:$0xff]  ;;  %v17089_v38 = vadd.f32 %v19162_v3, %v4888_v36  ;;  %v16893_v39 = vpop.f32.mrb[29].mxu0  ;;  %v15645_v13 = vpack.c.bf16 %v5372_v33, %v5372_v33 }
 0x3b3   : > { %v5166_v37 = vld [vmem:[#allocation2 + $0x10] sm:$0xff]  ;;  %v15677_v34 = vpack.c.bf16 %v5441_v35, %v5441_v35  ;;  %v4891_v43 = vpop.f32.mrb[30].mxu0  ;;  %16020 = vmatpush3.bf16.msra.mxu1 %v17768_v20 }
 0x3b4   : > { %v15634_v40 = vpack.c.bf16 %v5166_v37, %v5166_v37  ;;  %v5716_v44 = vld [vmem:[#allocation2 + $0x14] sm:$0xff]  ;;  %v4996_v45 = vmax.f32 %v17089_v38, 0.0  ;;  %v17090_v46 = vadd.f32 %v19162_v3, %v4891_v43  ;;  %v16894_v47 = vpop.f32.mrb[31].mxu0  ;;  %5291 = vst [vmem:[#allocation5 + $0x4c] sm:$0xf] %v15645_v13  ;;  %16021 = vmatprep.subr.bf16.mxu1 %v17769_v32  ;;  %v17792_v38 = vld [vmem:[%s20954_s1 + $0x380] sm:$0xff]  }
 0x3b5   : > { %5497 = vst [vmem:[#allocation5 + $0x34] sm:$0xf] %v15677_v34  ;;  %5634 = vst [vmem:[#allocation5 + $0x18] sm:$0xf] %v15677_v34  ;;  %v15720_v50 = vpack.c.bf16 %v5716_v44, %v5716_v44  ;;  %v14342_v51 = vld [vmem:[%s19168_s27 + $0x55] ss:$2 sm:$0xff] }
 0x3b6   : > { %5222 = vst [vmem:[#allocation5 + $0x48] sm:$0xf] %v15634_v40  ;;  %5428 = vst [vmem:[#allocation5 + $0x30] sm:$0xf] %v15645_v13  ;;  %v14343_v52 = vld [vmem:[%s19168_s27 + $0x56] ss:$2 sm:$0xff] }
 0x3b7   : > { %5360 = vst [vmem:[#allocation5 + $0x50] sm:$0xf] %v15677_v34  ;;  %v5101_v55 = vmax.f32 %v14342_v51, %v14343_v52  ;;  %5033 = vst [vmem:[%s19168_s27 + $0x70] sm:$0xff] %v4996_v45  ;;  %v4997_v53 = vmax.f32 %v17090_v46, 0.0  ;;  %16022 = vmatpush3.bf16.msra.mxu1 %v17770_v26  ;;  %v17790_v37 = vld [vmem:[%s20954_s1 + $0x2f8] sm:$0xff]  }
 0x3b8   : > { %5772 = vst [vmem:[#allocation5 + $0x20] sm:$0xf] %v15720_v50  ;;  %16023 = vmatprep.subr.bf16.mxu1 %v17774_v48 }
 0x3b9   : > { %v5102_v56 = vmax.f32 %v5100_v49, %v5101_v55  ;;  %5034 = vst [vmem:[%s19168_s27 + $0x78] sm:$0xff] %v4997_v53  ;;  %v4896_v58 = vpop.f32.mrb[32].mxu0 }
 0x3ba   : > { %v17091_v5 = vadd.f32 %v19162_v3, %v4896_v58  ;;  %v16897_v59 = vpop.f32.mrb[33].mxu0 }
 0x3bb   : > { %5103 = vst [vmem:[#allocation2 + $0x1c] sm:$0xff] %v5102_v56  ;;  %v4899_v60 = vpop.f32.mrb[34].mxu0  ;;  %16024 = vmatpush3.bf16.msra.mxu1 %v17775_v54 }
 0x3bc   : > { %v4998_v61 = vmax.f32 %v17091_v5, 0.0  ;;  %v17092_v63 = vadd.f32 %v19162_v3, %v4899_v60  ;;  %v16898_v62 = vpop.f32.mrb[35].mxu0  ;;  %16025 = vmatprep.subr.bf16.mxu1 %v17776_v57 }
 0x3be   : > { %5035 = vst [vmem:[%s19168_s27 + $0x80] sm:$0xff] %v4998_v61  ;;  %v4999_v4 = vmax.f32 %v17092_v63, 0.0  ;;  %v14344_v22 = vld [vmem:[%s19168_s27 + $0x66] ss:$2 sm:$0xff]  ;;  %v14345_v23 = vld [vmem:[%s19168_s27 + $0x67] ss:$2 sm:$0xff] }
 0x3bf   : > { %16026 = vmatpush3.bf16.msra.mxu1 %v17777_v11  ;;  %v5112_v33 = vmax.f32 %v14344_v22, %v14345_v23 }
 0x3c0   : > { %5036 = vst [vmem:[%s19168_s27 + $0x88] sm:$0xff] %v4999_v4  ;;  %16027 = vmatprep.subr.bf16.mxu1 %v17778_v12 }
 0x3c1   : > { %v4904_v7 = vpop.f32.mrb[36].mxu0 }
 0x3c2   : > { %v5579_v1 = vld [vmem:[#allocation2 + $0x1a] sm:$0xff]  ;;  %v17093_v10 = vadd.f32 %v19162_v3, %v4904_v7  ;;  %v16901_v14 = vpop.f32.mrb[37].mxu0 }
 0x3c3   : > { %v5648_v6 = vld [vmem:[#allocation2 + $0x1b] sm:$0xff]  ;;  %v15699_v9 = vpack.c.bf16 %v5579_v1, %v5579_v1  ;;  %v4907_v24 = vpop.f32.mrb[38].mxu0  ;;  %16028 = vmatpush3.bf16.msra.mxu1 %v17781_v0 }
 0x3c4   : > { %v5167_v8 = vld [vmem:[#allocation2 + $0x18] sm:$0xff]  ;;  %v15689_v19 = vpack.c.bf16 %v5648_v6, %v5648_v6  ;;  %v5000_v28 = vmax.f32 %v17093_v10, 0.0  ;;  %v17094_v21 = vadd.f32 %v19162_v3, %v4907_v24  ;;  %v16902_v29 = vpop.f32.mrb[39].mxu0  ;;  %16029 = vmatprep.subr.bf16.mxu1 %v17784_v2 }
 0x3c5   : > { %v15635_v16 = vpack.c.bf16 %v5167_v8, %v5167_v8  ;;  %v5236_v17 = vld [vmem:[#allocation2 + $0x19] sm:$0xff]  ;;  %5635 = vst [vmem:[#allocation5 + $0x3c] sm:$0xf] %v15699_v9  ;;  %5361 = vst [vmem:[#allocation5 + $0x74] sm:$0xf] %v15699_v9 }
 0x3c6   : > { %v15646_v25 = vpack.c.bf16 %v5236_v17, %v5236_v17  ;;  %v5717_v27 = vld [vmem:[#allocation2 + $0x1c] sm:$0xff]  ;;  %5498 = vst [vmem:[#allocation5 + $0x58] sm:$0xf] %v15699_v9  ;;  %5567 = vst [vmem:[#allocation5 + $0x5c] sm:$0xf] %v15689_v19  ;;  %v5001_v36 = vmax.f32 %v17094_v21, 0.0 }
 0x3c7   : > { %5223 = vst [vmem:[#allocation5 + $0x6c] sm:$0xf] %v15635_v16  ;;  %5704 = vst [vmem:[#allocation5 + $0x40] sm:$0xf] %v15689_v19  ;;  %v15721_v31 = vpack.c.bf16 %v5717_v27, %v5717_v27  ;;  %v14346_v20 = vld [vmem:[%s19168_s27 + $0x77] ss:$2 sm:$0xff]  ;;  %16030 = vmatpush3.bf16.msra.mxu1 %v17785_v18 }
 0x3c8   : > { %v14347_v32 = vld [vmem:[%s19168_s27 + $0x78] ss:$2 sm:$0xff]  ;;  %5292 = vst [vmem:[#allocation5 + $0x70] sm:$0xf] %v15646_v25  ;;  %5429 = vst [vmem:[#allocation5 + $0x54] sm:$0xf] %v15646_v25  ;;  %16031 = vmatprep.subr.bf16.mxu1 %v17789_v30 }
 0x3c9   : > { %v5113_v35 = vmax.f32 %v14346_v20, %v14347_v32  ;;  %5037 = vst [vmem:[%s19168_s27 + $0x90] sm:$0xff] %v5000_v28  ;;  %5773 = vst [vmem:[#allocation5 + $0x44] sm:$0xf] %v15721_v31  ;;  %v4912_v39 = vpop.f32.mrb[40].mxu0 }
 0x3ca   : > { %5038 = vst [vmem:[%s19168_s27 + $0x98] sm:$0xff] %v5001_v36  ;;  %v17095_v40 = vadd.f32 %v19162_v3, %v4912_v39  ;;  %v16905_v13 = vpop.f32.mrb[41].mxu0 }
 0x3cb   : > { %v5114_v34 = vmax.f32 %v5112_v33, %v5113_v35  ;;  %v4915_v26 = vpop.f32.mrb[42].mxu0  ;;  %16032 = vmatpush3.bf16.msra.mxu1 %v17790_v37 }
 0x3cc   : > { %v5002_v41 = vmax.f32 %v17095_v40, 0.0  ;;  %v17096_v42 = vadd.f32 %v19162_v3, %v4915_v26  ;;  %v16906_v43 = vpop.f32.mrb[43].mxu0  ;;  %16069 = vmatprep.subr.bf16.mxu1 %v17792_v38 }
 0x3cd   : > { %5115 = vst [vmem:[#allocation2 + $0x25] sm:$0xff] %v5114_v34 }
 0x3ce   : > { %v17761_v45 = vld [vmem:[#allocation5 + $0x48] ss:$36 sps:$4 sm:$0xff]   ;;  %5039 = vst [vmem:[%s19168_s27 + $0xa0] sm:$0xff] %v5002_v41  ;;  %v5003_v46 = vmax.f32 %v17096_v42, 0.0 }
 0x3cf   : > { %v17759_v44 = vld [vmem:[#allocation5 + $0x4c] ss:$36 sps:$4 sm:$0xff]  }
 0x3d0   : > { %6723 = vmatprep.mubr.bf16.mxu1 %v17759_v44  ;;  %5040 = vst [vmem:[%s19168_s27 + $0xa8] sm:$0xff] %v5003_v46  ;;  %v14348_v63 = vld [vmem:[%s19168_s27 + $0x88] ss:$2 sm:$0xff]  ;;  %v14349_v62 = vld [vmem:[%s19168_s27 + $0x89] ss:$2 sm:$0xff] }
 0x3d1   : > { %6724 = vmatmul.mubr.bf16.gmra.mrb[4].mxu1 %v17761_v45  ;;  %v4920_v47 = vpop.f32.mrb[44].mxu0  ;;  %v5124_v2 = vmax.f32 %v14348_v63, %v14349_v62 }
 0x3d2   : > { %v17097_v52 = vadd.f32 %v19162_v3, %v4920_v47  ;;  %v16909_v49 = vpop.f32.mrb[45].mxu0 }
 0x3d3   : > { %v4923_v58 = vpop.f32.mrb[46].mxu0 }
 0x3d4   : > { %v5168_v48 = vld [vmem:[#allocation2 + $0x20] sm:$0xff]  ;;  %v5004_v60 = vmax.f32 %v17097_v52, 0.0  ;;  %v17098_v11 = vadd.f32 %v19162_v3, %v4923_v58  ;;  %v16910_v61 = vpop.f32.mrb[47].mxu0 }
 0x3d5   : > { %v5237_v50 = vld [vmem:[#allocation2 + $0x21] sm:$0xff]  ;;  %v15636_v55 = vpack.c.bf16 %v5168_v48, %v5168_v48 }
 0x3d6   : > { %v5306_v51 = vld [vmem:[#allocation2 + $0x22] sm:$0xff]  ;;  %v15647_v53 = vpack.c.bf16 %v5237_v50, %v5237_v50  ;;  %5041 = vst [vmem:[%s19168_s27 + $0xb0] sm:$0xff] %v5004_v60  ;;  %v5005_v12 = vmax.f32 %v17098_v11, 0.0 }
 0x3d7   : > { %v15658_v54 = vpack.c.bf16 %v5306_v51, %v5306_v51  ;;  %v5512_v56 = vld [vmem:[#allocation2 + $0x23] sm:$0xff]  ;;  %5224 = vst [vmem:[#allocation5 + $0x90] sm:$0xf] %v15636_v55 }
 0x3d8   : > { %v5718_v57 = vld [vmem:[#allocation2 + $0x24] sm:$0xff]  ;;  %v15690_v5 = vpack.c.bf16 %v5512_v56, %v5512_v56  ;;  %5293 = vst [vmem:[#allocation5 + $0x94] sm:$0xf] %v15647_v53  ;;  %5430 = vst [vmem:[#allocation5 + $0x78] sm:$0xf] %v15647_v53 }
 0x3d9   : > { %v15722_v59 = vpack.c.bf16 %v5718_v57, %v5718_v57  ;;  %5362 = vst [vmem:[#allocation5 + $0x98] sm:$0xf] %v15658_v54  ;;  %5499 = vst [vmem:[#allocation5 + $0x7c] sm:$0xf] %v15658_v54  ;;  %v14350_v4 = vld [vmem:[%s19168_s27 + $0x99] ss:$2 sm:$0xff] }
 0x3da   : > { %5636 = vst [vmem:[#allocation5 + $0x60] sm:$0xf] %v15658_v54  ;;  %5568 = vst [vmem:[#allocation5 + $0x80] sm:$0xf] %v15690_v5  ;;  %v14351_v0 = vld [vmem:[%s19168_s27 + $0x9a] ss:$2 sm:$0xff] }
 0x3db   : > { %5705 = vst [vmem:[#allocation5 + $0x64] sm:$0xf] %v15690_v5  ;;  %5774 = vst [vmem:[#allocation5 + $0x68] sm:$0xf] %v15722_v59  ;;  %v5125_v1 = vmax.f32 %v14350_v4, %v14351_v0  ;;  %v4928_v6 = vpop.f32.mrb[48].mxu0 }
 0x3dc   : > { %5042 = vst [vmem:[%s19168_s27 + $0xb8] sm:$0xff] %v5005_v12  ;;  %v17099_v8 = vadd.f32 %v19162_v3, %v4928_v6  ;;  %v16913_v9 = vpop.f32.mrb[49].mxu0 }
 0x3dd   : > { %v5126_v7 = vmax.f32 %v5124_v2, %v5125_v1  ;;  %v4931_v10 = vpop.f32.mrb[50].mxu0 }
 0x3de   : > { %v5006_v14 = vmax.f32 %v17099_v8, 0.0  ;;  %v17100_v16 = vadd.f32 %v19162_v3, %v4931_v10  ;;  %v16914_v17 = vpop.f32.mrb[51].mxu0 }
 0x3df   : > { %5127 = vst [vmem:[#allocation2 + $0x2e] sm:$0xff] %v5126_v7 }
 0x3e0   : > { %5043 = vst [vmem:[%s19168_s27 + $0xc0] sm:$0xff] %v5006_v14  ;;  %v5007_v18 = vmax.f32 %v17100_v16, 0.0 }
 0x3e1   : > { %v4936_v19 = vpop.f32.mrb[52].mxu0 }
 0x3e2   : > { %5044 = vst [vmem:[%s19168_s27 + $0xc8] sm:$0xff] %v5007_v18  ;;  %v17101_v22 = vadd.f32 %v19162_v3, %v4936_v19  ;;  %v16917_v23 = vpop.f32.mrb[53].mxu0 }
 0x3e3   : > { %v4939_v24 = vpop.f32.mrb[54].mxu0  ;;  %v14352_v35 = vld [vmem:[%s19168_s27 + $0xaa] ss:$2 sm:$0xff]  ;;  %v14353_v36 = vld [vmem:[%s19168_s27 + $0xab] ss:$2 sm:$0xff] }
 0x3e4   : > { %v5008_v21 = vmax.f32 %v17101_v22, 0.0  ;;  %v17102_v29 = vadd.f32 %v19162_v3, %v4939_v24  ;;  %v16918_v30 = vpop.f32.mrb[55].mxu0  ;;  %v5136_v26 = vmax.f32 %v14352_v35, %v14353_v36 }
 0x3e6   : > { %v5169_v25 = vld [vmem:[#allocation2 + $0x28] sm:$0xff]  ;;  %5045 = vst [vmem:[%s19168_s27 + $0xd0] sm:$0xff] %v5008_v21  ;;  %v5009_v39 = vmax.f32 %v17102_v29, 0.0 }
 0x3e7   : > { %v5238_v27 = vld [vmem:[#allocation2 + $0x29] sm:$0xff]  ;;  %v15637_v31 = vpack.c.bf16 %v5169_v25, %v5169_v25 }
 0x3e8   : > { %v5307_v28 = vld [vmem:[#allocation2 + $0x2a] sm:$0xff]  ;;  %v15648_v20 = vpack.c.bf16 %v5238_v27, %v5238_v27  ;;  %5046 = vst [vmem:[%s19168_s27 + $0xd8] sm:$0xff] %v5009_v39 }
 0x3e9   : > { %v5513_v32 = vld [vmem:[#allocation2 + $0x2b] sm:$0xff]  ;;  %v15659_v37 = vpack.c.bf16 %v5307_v28, %v5307_v28  ;;  %5225 = vst [vmem:[#allocation5 + $0xb4] sm:$0xf] %v15637_v31  ;;  %v14354_v40 = vld [vmem:[%s19168_s27 + $0xbb] ss:$2 sm:$0xff]  ;;  %v4944_v42 = vpop.f32.mrb[56].mxu0 }
 0x3ea   : > { %v5719_v33 = vld [vmem:[#allocation2 + $0x2c] sm:$0xff]  ;;  %v15691_v34 = vpack.c.bf16 %v5513_v32, %v5513_v32  ;;  %5294 = vst [vmem:[#allocation5 + $0xb8] sm:$0xf] %v15648_v20  ;;  %5431 = vst [vmem:[#allocation5 + $0x9c] sm:$0xf] %v15648_v20  ;;  %v17103_v44 = vadd.f32 %v19162_v3, %v4944_v42  ;;  %v16921_v45 = vpop.f32.mrb[57].mxu0 }
 0x3eb   : > { %v15723_v38 = vpack.c.bf16 %v5719_v33, %v5719_v33  ;;  %v14355_v13 = vld [vmem:[%s19168_s27 + $0xbc] ss:$2 sm:$0xff]  ;;  %5363 = vst [vmem:[#allocation5 + $0xbc] sm:$0xf] %v15659_v37  ;;  %5500 = vst [vmem:[#allocation5 + $0xa0] sm:$0xf] %v15659_v37 }
 0x3ec   : > { %5569 = vst [vmem:[#allocation5 + $0xa4] sm:$0xf] %v15691_v34  ;;  %5637 = vst [vmem:[#allocation5 + $0x84] sm:$0xf] %v15659_v37  ;;  %v5137_v41 = vmax.f32 %v14354_v40, %v14355_v13  ;;  %v4947_v46 = vpop.f32.mrb[58].mxu0  ;;  %v5010_v47 = vmax.f32 %v17103_v44, 0.0 }
 0x3ed   : > { %5706 = vst [vmem:[#allocation5 + $0x88] sm:$0xf] %v15691_v34  ;;  %5775 = vst [vmem:[#allocation5 + $0x8c] sm:$0xf] %v15723_v38  ;;  %v17104_v48 = vadd.f32 %v19162_v3, %v4947_v46  ;;  %v16922_v50 = vpop.f32.mrb[59].mxu0 }
 0x3ee   : > { %v5138_v43 = vmax.f32 %v5136_v26, %v5137_v41  ;;  %5047 = vst [vmem:[%s19168_s27 + $0xe0] sm:$0xff] %v5010_v47 }
 0x3ef   : > { %v5011_v49 = vmax.f32 %v17104_v48, 0.0  ;;  %v14356_v0 = vld [vmem:[%s19168_s27 + $0xcc] ss:$2 sm:$0xff]  ;;  %v14357_v2 = vld [vmem:[%s19168_s27 + $0xcd] ss:$2 sm:$0xff] }
 0x3f0   : > { %5139 = vst [vmem:[#allocation2 + $0x37] sm:$0xff] %v5138_v43  ;;  %v17764_v52 = vld [vmem:[#allocation5 + $0x90] ss:$36 sps:$4 sm:$0xff]   ;;  %v5148_v16 = vmax.f32 %v14356_v0, %v14357_v2 }
 0x3f1   : > { %v17762_v51 = vld [vmem:[#allocation5 + $0x94] ss:$36 sps:$4 sm:$0xff]   ;;  %5048 = vst [vmem:[%s19168_s27 + $0xe8] sm:$0xff] %v5011_v49  ;;  %v4952_v55 = vpop.f32.mrb[60].mxu0 }
 0x3f2   : > { %6731 = vmatprep.mubr.bf16.mxu1 %v17762_v51  ;;  %v17105_v53 = vadd.f32 %v19162_v3, %v4952_v55  ;;  %v16925_v54 = vpop.f32.mrb[61].mxu0 }
 0x3f3   : > { %6732 = vmatmul.mubr.bf16.gmra.mrb[8].mxu1 %v17764_v52  ;;  %v4955_v56 = vpop.f32.mrb[62].mxu0  ;;  %v7537_v52 = vld [vmem:[#allocation2 + $0x5b] sm:$0x1] }
 0x3f4   : > { %v5012_v59 = vmax.f32 %v17105_v53, 0.0  ;;  %v17106_v60 = vadd.f32 %v19162_v3, %v4955_v56  ;;  %v16926_v11 = vpop.f32.mrb[63].mxu0  ;;  %v15796_v55 = vpack.c.bf16 %v7537_v52, %v7537_v52  ;;  %v7593_v53 = vld [vmem:[#allocation5 + $0x17c] sm:$0x1] }
 0x3f5   : > { %v17812_v52 = vld [vmem:[%s20954_s1 + $0x360] sm:$0xff]  }
 0x3f6   : > { %5049 = vst [vmem:[%s19168_s27 + $0xf0] sm:$0xff] %v5012_v59  ;;  %v5013_v9 = vmax.f32 %v17106_v60, 0.0  ;;  %v7594_v59 = vsel %vm18555_vm2, %v15796_v55, %v7593_v53  ;;  %v17813_v55 = vld [vmem:[%s20954_s1 + $0x3a8] sm:$0xff]  }
 0x3f7   : > { %v5170_v57 = vld [vmem:[#allocation2 + $0x30] sm:$0xff]  ;;  %v5171_v58 = vld [vmem:[#allocation2 + $0x38] sm:$0xff] }
 0x3f8   : > { %v5239_v5 = vld [vmem:[#allocation2 + $0x31] sm:$0xff]  ;;  %v15638_v61 = vpack.c.bf16 %v5170_v57, %v5170_v57  ;;  %v15639_v63 = vpack.c.bf16 %v5171_v58, %v5171_v58  ;;  %v14358_v10 = vld [vmem:[%s19168_s27 + $0xdd] ss:$2 sm:$0xff]  ;;  %v14359_v14 = vld [vmem:[%s19168_s27 + $0xde] ss:$2 sm:$0xff]  ;;  %5050 = vst [vmem:[%s19168_s27 + $0xf8] sm:$0xff] %v5013_v9 }
 0x3f9   : > { %v5308_v62 = vld [vmem:[#allocation2 + $0x32] sm:$0xff]  ;;  %v15649_v1 = vpack.c.bf16 %v5239_v5, %v5239_v5  ;;  %v5149_v17 = vmax.f32 %v14358_v10, %v14359_v14  ;;  %v4960_v18 = vpop.f32.mrb[64].mxu0  ;;  %v19325_v5 = vld [vmem:[#allocation5 + $0x178] sm:$0x11] }
 0x3fa   : > { %v5514_v12 = vld [vmem:[#allocation2 + $0x33] sm:$0xff]  ;;  %v15660_v6 = vpack.c.bf16 %v5308_v62, %v5308_v62  ;;  %5226 = vst [vmem:[#allocation5 + $0xd8] sm:$0xf] %v15638_v61  ;;  %5227 = vst [vmem:[#allocation5 + $0xfc] sm:$0xf] %v15639_v63  ;;  %v17107_v22 = vadd.f32 %v19162_v3, %v4960_v18  ;;  %v16929_v23 = vpop.f32.mrb[65].mxu0 }
 0x3fb   : > { %v5720_v4 = vld [vmem:[#allocation2 + $0x34] sm:$0xff]  ;;  %v15692_v7 = vpack.c.bf16 %v5514_v12, %v5514_v12  ;;  %5295 = vst [vmem:[#allocation5 + $0xdc] sm:$0xf] %v15649_v1  ;;  %5432 = vst [vmem:[#allocation5 + $0xc0] sm:$0xf] %v15649_v1  ;;  %v5150_v19 = vmax.f32 %v5148_v16, %v5149_v17  ;;  %v4963_v24 = vpop.f32.mrb[66].mxu0 }
 0x3fc   : > { %v15724_v8 = vpack.c.bf16 %v5720_v4, %v5720_v4  ;;  %5364 = vst [vmem:[#allocation5 + $0xe0] sm:$0xf] %v15660_v6  ;;  %5501 = vst [vmem:[#allocation5 + $0xc4] sm:$0xf] %v15660_v6  ;;  %v5014_v25 = vmax.f32 %v17107_v22, 0.0  ;;  %v17108_v27 = vadd.f32 %v19162_v3, %v4963_v24  ;;  %v16930_v28 = vpop.f32.mrb[67].mxu0 }
 0x3fd   : > { %5570 = vst [vmem:[#allocation5 + $0xc8] sm:$0xf] %v15692_v7  ;;  %5638 = vst [vmem:[#allocation5 + $0xa8] sm:$0xf] %v15660_v6  ;;  %v15640_v21 = vpack.c.bf16 %v5150_v19, %v5150_v19 }
 0x3fe   : > { %5707 = vst [vmem:[#allocation5 + $0xac] sm:$0xf] %v15692_v7  ;;  %5776 = vst [vmem:[#allocation5 + $0xb0] sm:$0xf] %v15724_v8  ;;  %v5015_v29 = vmax.f32 %v17108_v27, 0.0 }
 0x3ff   : > { %5151 = vst [vmem:[#allocation2 + $0x40] sm:$0xff] %v5150_v19  ;;  %5051 = vst [vmem:[%s19168_s27 + $0x100] sm:$0xff] %v5014_v25  ;;  %v14360_v41 = vld [vmem:[%s19168_s27 + $0xee] ss:$2 sm:$0xff]  ;;  %v14361_v42 = vld [vmem:[%s19168_s27 + $0xef] ss:$2 sm:$0xff] }
 0x400   : > { %5228 = vst [vmem:[#allocation5 + $0x120] sm:$0xf] %v15640_v21  ;;  %5052 = vst [vmem:[%s19168_s27 + $0x108] sm:$0xff] %v5015_v29  ;;  %v5160_v50 = vmax.f32 %v14360_v41, %v14361_v42  ;;  %v17787_v29 = vld [vmem:[#allocation5 + $0xc] ss:$36 sps:$4 sm:$0xff]  }
 0x401   : > { %v4968_v30 = vpop.f32.mrb[68].mxu0  ;;  %7595 = vst [vmem:[#allocation5 + $0x17c] sm:$0x1] %v7594_v59  ;;  %v17773_v62 = vld [vmem:[#allocation5 + $0xd8] ss:$36 sps:$4 sm:$0xff]   ;;  %v17822_v59 = vld [vmem:[%s20954_s1 + $0x3b8] sm:$0xff]  }
 0x402   : > { %v17109_v31 = vadd.f32 %v19162_v3, %v4968_v30  ;;  %v16933_v20 = vpop.f32.mrb[69].mxu0  ;;  %v5656_v30 = vld [vmem:[#allocation2 + $0x5b] sm:$0xff]  ;;  %v7731_v41 = vld [vmem:[#allocation5 + $0x184] sm:$0x1] }
 0x403   : > { %v4971_v32 = vpop.f32.mrb[70].mxu0  ;;  %v17795_v20 = vld [vmem:[%s20954_s1 + $0x340] sm:$0xff]   ;;  %v19346_v42 = vld [vmem:[#allocation5 + $0x180] sm:$0x11] }
 0x404   : > { %v5016_v37 = vmax.f32 %v17109_v31, 0.0  ;;  %v17110_v34 = vadd.f32 %v19162_v3, %v4971_v32  ;;  %v16934_v38 = vpop.f32.mrb[71].mxu0  ;;  %v15718_v31 = vpack.c.bf16 %v5656_v30, %v5656_v30  ;;  %v17791_v32 = vld [vmem:[#allocation5 + $0x8] ss:$36 sps:$4 sm:$0xff]   ;;  %v17836_v30 = vld [vmem:[#allocation5 + $0xa0] ss:$36 sps:$4 sm:$0xff]  }
 0x405   : > { %v7675_v38 = vld [vmem:[#allocation2 + $0x63] sm:$0x1] }
 0x406   : > { %v5240_v33 = vld [vmem:[#allocation2 + $0x39] sm:$0xff]  ;;  %v5241_v35 = vld [vmem:[#allocation2 + $0x41] sm:$0xff]  ;;  %5053 = vst [vmem:[%s19168_s27 + $0x110] sm:$0xff] %v5016_v37  ;;  %v5017_v46 = vmax.f32 %v17110_v34, 0.0  ;;  %5712 = vst [vmem:[#allocation5 + $0x160] sm:$0xf] %v15718_v31 }
 0x407   : > { %v5309_v36 = vld [vmem:[#allocation2 + $0x3a] sm:$0xff]  ;;  %v15650_v39 = vpack.c.bf16 %v5240_v33, %v5240_v33  ;;  %v15651_v40 = vpack.c.bf16 %v5241_v35, %v5241_v35  ;;  %v17796_v33 = vld [vmem:[%s20954_s1 + $0x388] sm:$0xff]   ;;  %v7606_v37 = vld [vmem:[#allocation2 + $0x62] sm:$0x1] }
 0x408   : > { %v5515_v13 = vld [vmem:[#allocation2 + $0x3b] sm:$0xff]  ;;  %v15661_v43 = vpack.c.bf16 %v5309_v36, %v5309_v36  ;;  %5054 = vst [vmem:[%s19168_s27 + $0x118] sm:$0xff] %v5017_v46  ;;  %v17797_v36 = vld [vmem:[%s20954_s1 + $0x348] sm:$0xff]  }
 0x409   : > { %v5721_v26 = vld [vmem:[#allocation2 + $0x3c] sm:$0xff]  ;;  %v15693_v44 = vpack.c.bf16 %v5515_v13, %v5515_v13  ;;  %5296 = vst [vmem:[#allocation5 + $0x100] sm:$0xf] %v15650_v39  ;;  %5297 = vst [vmem:[#allocation5 + $0x124] sm:$0xf] %v15651_v40  ;;  %v4976_v49 = vpop.f32.mrb[72].mxu0  ;;  %v15807_v13 = vpack.c.bf16 %v7606_v37, %v7606_v37 }
 0x40a   : > { %v15725_v45 = vpack.c.bf16 %v5721_v26, %v5721_v26  ;;  %5433 = vst [vmem:[#allocation5 + $0xe4] sm:$0xf] %v15650_v39  ;;  %5434 = vst [vmem:[#allocation5 + $0x108] sm:$0xf] %v15651_v40  ;;  %v14362_v47 = vld [vmem:[%s19168_s27 + $0xff] ss:$2 sm:$0xff]  ;;  %v17111_v56 = vadd.f32 %v19162_v3, %v4976_v49  ;;  %v15818_v26 = vpack.c.bf16 %v7675_v38, %v7675_v38 }
 0x40b   : > { %v14363_v48 = vld [vmem:[%s19168_s27 + $0x100] ss:$2 sm:$0xff]  ;;  %5365 = vst [vmem:[#allocation5 + $0x104] sm:$0xf] %v15661_v43  ;;  %5502 = vst [vmem:[#allocation5 + $0xe8] sm:$0xf] %v15661_v43 }
 0x40c   : > { %5571 = vst [vmem:[#allocation5 + $0xec] sm:$0xf] %v15693_v44  ;;  %5639 = vst [vmem:[#allocation5 + $0xcc] sm:$0xf] %v15661_v43  ;;  %v5161_v51 = vmax.f32 %v14362_v47, %v14363_v48  ;;  %v16937_v57 = vpop.f32.mrb[73].mxu0  ;;  %v5018_v60 = vmax.f32 %v17111_v56, 0.0 }
 0x40d   : > { %5708 = vst [vmem:[#allocation5 + $0xd0] sm:$0xf] %v15693_v44  ;;  %5777 = vst [vmem:[#allocation5 + $0xd4] sm:$0xf] %v15725_v45  ;;  %v4979_v58 = vpop.f32.mrb[74].mxu0  ;;  %v17801_v39 = vld [vmem:[%s20954_s1 + $0x390] sm:$0xff]   ;;  %v7732_v44 = vsel %vm18555_vm2, %v15818_v26, %v7731_v41  ;;  %v14514_v26 = vcombine.high %v19325_v5, %v19325_v5 }
 0x40e   : > { %v5162_v54 = vmax.f32 %v5160_v50, %v5161_v51  ;;  %v16938_v11 = vpop.f32.mrb[75].mxu0  ;;  %5055 = vst [vmem:[%s19168_s27 + $0x120] sm:$0x1] %v5018_v60  ;;  %v5230_v3 = vld [vmem:[#allocation5 + $0x168] sm:$0x1]  ;;  %v17806_v47 = vld [vmem:[%s20954_s1 + $0x398] sm:$0xff]  }
 0x40f   : > { %v17793_v35 = vld [vmem:[#allocation5 + $0x54] ss:$36 sps:$4 sm:$0xff]   ;;  %v7662_v34 = vld [vmem:[#allocation5 + $0x180] sm:$0x1]  ;;  %v17802_v45 = vld [vmem:[%s20954_s1 + $0x350] sm:$0xff]  }
 0x410   : > { %5163 = vst [vmem:[#allocation2 + $0x49] sm:$0xff] %v5162_v54  ;;  %v15652_v61 = vpack.c.bf16 %v5162_v54, %v5162_v54  ;;  %v17771_v63 = vld [vmem:[#allocation5 + $0xdc] ss:$36 sps:$4 sm:$0xff]   ;;  %v7663_v43 = vsel %vm18555_vm2, %v15807_v13, %v7662_v34  ;;  %7733 = vst [vmem:[#allocation5 + $0x184] sm:$0x1] %v7732_v44  ;;  %v17807_v50 = vld [vmem:[%s20954_s1 + $0x358] sm:$0xff]  }
 0x411   : > { %6739 = vmatprep.mubr.bf16.mxu1 %v17771_v63  ;;  %v19344_v40 = vld [vmem:[#allocation5 + $0x13c] ss:$36 sps:$4 sm:$0xff]   ;;  %7664 = vst [vmem:[#allocation5 + $0x180] sm:$0x1] %v7663_v43  ;;  %v17798_v46 = vld [vmem:[#allocation5 + $0x50] ss:$36 sps:$4 sm:$0xff]  }
 0x412   : > { %5298 = vst [vmem:[#allocation5 + $0x148] sm:$0xf] %v15652_v61  ;;  %5435 = vst [vmem:[#allocation5 + $0x12c] sm:$0xf] %v15652_v61  ;;  %6740 = vmatmul.mubr.bf16.gmra.mrb[12].mxu1 %v17773_v62  ;;  %v17799_v48 = vld [vmem:[#allocation5 + $0x9c] ss:$36 sps:$4 sm:$0xff]  }
 0x413   : > { %7730 = vst [vmem:[#allocation5 + $0x160] sm:$0xf] %v15718_v31  ;;  %v17809_v51 = vld [vmem:[%s20954_s1 + $0x3a0] sm:$0xff]   ;;  %v17804_v53 = vld [vmem:[#allocation5 + $0xe4] ss:$36 sps:$4 sm:$0xff]   ;;  %v17823_v11 = vld [vmem:[%s20954_s1 + $0x378] sm:$0xff]  }
 0x414   : > { %v17803_v49 = vld [vmem:[#allocation5 + $0x98] ss:$36 sps:$4 sm:$0xff]   ;;  %v17814_v54 = vld [vmem:[%s20954_s1 + $0x368] sm:$0xff]   ;;  %v17816_v56 = vld [vmem:[%s20954_s1 + $0x3b0] sm:$0xff]  }
 0x415   : > { %v17817_v57 = vld [vmem:[%s20954_s1 + $0x370] sm:$0xff]   ;;  %v17808_v58 = vld [vmem:[#allocation5 + $0xe0] ss:$36 sps:$4 sm:$0xff]   ;;  %v7743_v61 = vld [vmem:[#allocation2 + $0x5c] sm:$0xff] }
 0x416   : > { %v5980_v63 = vld [vmem:[#allocation5 + $0x170] sm:$0x11]  ;;  %v17825_v62 = vld [vmem:[%s20954_s1 + $0x400] sm:$0xff]   ;;  %v17846_v31 = vld [vmem:[%s20954_s1 + $0x428] sm:$0xff]  }
 0x417   : > { %v5173_v12 = vld [vmem:[#allocation2 + $0x48] sm:$0xff]  ;;  %v5174_v4 = vld [vmem:[#allocation2 + $0x50] sm:$0x1]  ;;  %v17854_v37 = vld [vmem:[%s20954_s1 + $0x438] sm:$0xff]  }
 0x418   : > { %v5310_v0 = vld [vmem:[#allocation2 + $0x42] sm:$0xff]  ;;  %v15641_v2 = vpack.c.bf16 %v5173_v12, %v5173_v12  ;;  %v15642_v1 = vpack.c.bf16 %v5174_v4, %v5174_v4  ;;  %v5311_v6 = vld [vmem:[#allocation2 + $0x4a] sm:$0xff]  ;;  %v14512_v4 = vcombine.high %v5980_v63, %v5980_v63  ;;  %v17855_v38 = vld [vmem:[%s20954_s1 + $0x3f8] sm:$0xff]  }
 0x419   : > { %v15662_v7 = vpack.c.bf16 %v5310_v0, %v5310_v0  ;;  %v5516_v8 = vld [vmem:[#allocation2 + $0x43] sm:$0xff]  ;;  %v5517_v9 = vld [vmem:[#allocation2 + $0x4b] sm:$0xff]  ;;  %v15663_v10 = vpack.c.bf16 %v5311_v6, %v5311_v6  ;;  %v17810_v60 = vld [vmem:[#allocation5 + $0x12c] ss:$36 sps:$4 sm:$0xff]  }
 0x41a   : > { %v15694_v14 = vpack.c.bf16 %v5516_v8, %v5516_v8  ;;  %v15695_v16 = vpack.c.bf16 %v5517_v9, %v5517_v9  ;;  %v5722_v17 = vld [vmem:[#allocation2 + $0x44] sm:$0xff]  ;;  %v5723_v18 = vld [vmem:[#allocation2 + $0x4c] sm:$0xff]  ;;  %5229 = vst [vmem:[#allocation5 + $0x144] sm:$0xf] %v15641_v2  ;;  %v5231_v19 = vsel %vm18555_vm2, %v15642_v1, %v5230_v3  ;;  %v15828_v3 = vpack.c.bf16 %v7743_v61, %v7743_v61 }
 0x41b   : > { %5366 = vst [vmem:[#allocation5 + $0x128] sm:$0xf] %v15662_v7  ;;  %5503 = vst [vmem:[#allocation5 + $0x10c] sm:$0xf] %v15662_v7  ;;  %v15726_v22 = vpack.c.bf16 %v5722_v17, %v5722_v17  ;;  %v15727_v23 = vpack.c.bf16 %v5723_v18, %v5723_v18  ;;  %v17779_v24 = vld [vmem:[#allocation5 + $0x124] ss:$36 sps:$4 sm:$0xff]   ;;  %v14511_v9 = vcombine.low %v5980_v63, %v5980_v63 }
 0x41c   : > { %5640 = vst [vmem:[#allocation5 + $0xf0] sm:$0xf] %v15662_v7  ;;  %5232 = vst [vmem:[#allocation5 + $0x168] sm:$0x1] %v5231_v19  ;;  %6747 = vmatprep.mubr.bf16.mxu1 %v17779_v24  ;;  %v19388_v12 = vld [vmem:[#allocation5 + $0x140] ss:$36 sps:$4 sm:$0xff]  }
 0x41d   : > { %5367 = vst [vmem:[#allocation5 + $0x14c] sm:$0xf] %v15663_v10  ;;  %5572 = vst [vmem:[#allocation5 + $0x110] sm:$0xf] %v15694_v14  ;;  %v7744_v2 = vld [vmem:[#allocation2 + $0x64] sm:$0x1] }
 0x41e   : > { %5504 = vst [vmem:[#allocation5 + $0x130] sm:$0xf] %v15663_v10  ;;  %5573 = vst [vmem:[#allocation5 + $0x134] sm:$0xf] %v15695_v16  ;;  %v7800_v1 = vld [vmem:[#allocation5 + $0x188] sm:$0x1]  ;;  %v15829_v6 = vpack.c.bf16 %v7744_v2, %v7744_v2 }
 0x41f   : > { %5641 = vst [vmem:[#allocation5 + $0x114] sm:$0xf] %v15663_v10  ;;  %5709 = vst [vmem:[#allocation5 + $0xf4] sm:$0xf] %v15694_v14  ;;  %v17820_v10 = vld [vmem:[#allocation5 + $0x14] ss:$36 sps:$4 sm:$0xff]  }
 0x420   : > { %5710 = vst [vmem:[#allocation5 + $0x118] sm:$0xf] %v15695_v16  ;;  %5778 = vst [vmem:[#allocation5 + $0xf8] sm:$0xf] %v15726_v22  ;;  %v7801_v8 = vsel %vm18555_vm2, %v15829_v6, %v7800_v1  ;;  %v17828_v14 = vld [vmem:[%s20954_s1 + $0x3c0] sm:$0xff]   ;;  %v17829_v17 = vld [vmem:[%s20954_s1 + $0x408] sm:$0xff]  }
 0x421   : > { %5779 = vst [vmem:[#allocation5 + $0x11c] sm:$0xf] %v15727_v23  ;;  %v17782_v25 = vld [vmem:[#allocation5 + $0x120] ss:$36 sps:$4 sm:$0xff]   ;;  %7799 = vst [vmem:[#allocation5 + $0x164] sm:$0xf] %v15828_v3 }
 0x422   : > { %6748 = vmatmul.mubr.bf16.gmra.mrb[16].mxu1 %v17782_v25  ;;  %v19390_v7 = vld [vmem:[#allocation5 + $0x188] ss:$0 sps:$4 sm:$0x11]   ;;  %v17824_v16 = vld [vmem:[#allocation5 + $0x10] ss:$36 sps:$4 sm:$0xff]   ;;  %v17830_v19 = vld [vmem:[%s20954_s1 + $0x3c8] sm:$0xff]  }
 0x423   : > { %v5979_v27 = vld [vmem:[#allocation5 + $0x168] sm:$0x11]  ;;  %7802 = vst [vmem:[#allocation5 + $0x188] sm:$0x1] %v7801_v8  ;;  %v17826_v18 = vld [vmem:[#allocation5 + $0x5c] ss:$36 sps:$4 sm:$0xff]  }
 0x424   : > { %v14510_v28 = vcombine.high %v5979_v27, %v5979_v27  ;;  %v14509_v21 = vcombine.low %v5979_v27, %v5979_v27  ;;  %v17815_v0 = vld [vmem:[#allocation5 + $0x128] ss:$36 sps:$4 sm:$0xff]   ;;  %v17831_v24 = vld [vmem:[#allocation5 + $0x58] ss:$36 sps:$4 sm:$0xff]   ;;  %v17839_v25 = vld [vmem:[%s20954_s1 + $0x418] sm:$0xff]  }
 0x425   : > { %v17834_v22 = vld [vmem:[%s20954_s1 + $0x410] sm:$0xff]   ;;  %v17843_v34 = vld [vmem:[#allocation5 + $0x134] ss:$36 sps:$4 sm:$0xff]   ;;  %v7095_v43 = vld [vmem:[%s20956_s3 + $0x8] sm:$0xff] }
 0x426   : > { %6755 = vmatprep.mubr.bf16.mxu1 %v14510_v28  ;;  %v17835_v23 = vld [vmem:[%s20954_s1 + $0x3d0] sm:$0xff]   ;;  %v17840_v28 = vld [vmem:[%s20954_s1 + $0x3d8] sm:$0xff]   ;;  %v17857_v13 = vld [vmem:[%s20954_s1 + $0x440] sm:$0xff]  }
 0x427   : > { %v17832_v27 = vld [vmem:[#allocation5 + $0xa4] ss:$36 sps:$4 sm:$0xff]   ;;  %v17848_v41 = vld [vmem:[#allocation5 + $0x130] ss:$36 sps:$4 sm:$0xff]   ;;  %v10351_v1 = vld [vmem:[%s20957_s4] sm:$0xff] }
 0x428   : > { %v17864_v61 = vld [vmem:[%s20954_s1 + $0x450] sm:$0xff]   ;;  %v10352_v63 = vld [vmem:[%s20957_s4 + $0x8] sm:$0xff]  ;;  %v10354_v2 = vld [vmem:[%s20957_s4 + $0x18] sm:$0x1] }
 0x429   : > { %v17861_v3 = vld [vmem:[#allocation5 + $0x60] ss:$36 sps:$4 sm:$0xff]   ;;  %v17870_v6 = vld [vmem:[%s20954_s1 + $0x460] sm:$0xff]  }
 0x42a   : > { %6756 = vmatmul.mubr.bf16.gmra.mrb[20].mxu1 %v14509_v21  ;;  %v17842_v21 = vld [vmem:[%s20954_s1 + $0x420] sm:$0xff]   ;;  %v12560_v8 = vld [vmem:[%s20958_s5 + $0x8] sm:$0x1] }
 0x42b   : > { %6795 = vmatprep.mubr.bf16.mxu1 %v17787_v29  ;;  %v17845_v29 = vld [vmem:[%s20954_s1 + $0x3e0] sm:$0xff]  }
 0x432   : > { %6796 = vmatmul.mubr.bf16.vlgmr.msra.gmra.mrb[24].mxu1 %v17791_v32  ;;  %v17847_v32 = vld [vmem:[%s20954_s1 + $0x3e8] sm:$0xff]  }
 0x433   : > { %6803 = vmatprep.mubr.bf16.mxu1 %v17793_v35  ;;  %16070 = vmatpush3.bf16.msra.mxu1 %v17795_v20  ;;  %v17837_v20 = vld [vmem:[#allocation5 + $0xec] ss:$36 sps:$4 sm:$0xff]  }
 0x434   : > { %16071 = vmatprep.subr.bf16.mxu1 %v17796_v33  ;;  %v17849_v33 = vld [vmem:[%s20954_s1 + $0x430] sm:$0xff]  }
 0x435   : > { %v17850_v35 = vld [vmem:[%s20954_s1 + $0x3f0] sm:$0xff]  }
 0x437   : > { %16072 = vmatpush3.bf16.msra.mxu1 %v17797_v36  ;;  %v17841_v36 = vld [vmem:[#allocation5 + $0xe8] ss:$36 sps:$4 sm:$0xff]  }
 0x438   : > { %16073 = vmatprep.subr.bf16.mxu1 %v17801_v39  ;;  %v7094_v39 = vld [vmem:[%s20956_s3] sm:$0xff] }
 0x439   : > { %7107 = vperm.xlu0 %17430, %v7094_v39  }
 0x43a   : > { %6804 = vmatmul.mubr.bf16.gmra.mrb[28].mxu1 %v17798_v46 }
 0x43b   : > { %6811 = vmatprep.mubr.bf16.mxu1 %v17799_v48  ;;  %16074 = vmatpush3.bf16.msra.mxu1 %v17802_v45  ;;  %v7098_v45 = vld [vmem:[%s20956_s3 + $0x20] sm:$0xff] }
 0x43c   : > { %16075 = vmatprep.subr.bf16.mxu1 %v17806_v47 }
 0x43d   : > { %7112 = vperm.xlu0 %17430, %v7095_v43  }
 0x43f   : > { %16076 = vmatpush3.bf16.msra.mxu1 %v17807_v50 }
 0x440   : > { %16077 = vmatprep.subr.bf16.mxu1 %v17809_v51  ;;  %v14513_v51 = vcombine.low %v19325_v5, %v19325_v5  ;;  %v7097_v5 = vld [vmem:[%s20956_s3 + $0x18] sm:$0xff] }
 0x441   : > { %7127 = vperm.xlu0 %17430, %v7098_v45  }
 0x442   : > { %6812 = vmatmul.mubr.bf16.gmra.mrb[32].mxu1 %v17803_v49  ;;  %v17852_v49 = vld [vmem:[#allocation5 + $0x1c] ss:$36 sps:$4 sm:$0xff]  }
 0x443   : > { %6819 = vmatprep.mubr.bf16.mxu1 %v17804_v53  ;;  %16078 = vmatpush3.bf16.msra.mxu1 %v17812_v52  ;;  %v7100_v53 = vld [vmem:[%s20956_s3 + $0x30] sm:$0xff] }
 0x444   : > { %16079 = vmatprep.subr.bf16.mxu1 %v17813_v55  ;;  %v7096_v55 = vld [vmem:[%s20956_s3 + $0x10] sm:$0xff] }
 0x445   : > { %7117 = vperm.xlu1 %17431, %v7096_v55   ;;  %7137 = vperm.xlu0 %17430, %v7100_v53  }
 0x447   : > { %16080 = vmatpush3.bf16.msra.mxu1 %v17814_v54  ;;  %v7102_v54 = vld [vmem:[%s20956_s3 + $0x40] sm:$0xff] }
 0x448   : > { %16081 = vmatprep.subr.bf16.mxu1 %v17816_v56  ;;  %v7099_v56 = vld [vmem:[%s20956_s3 + $0x28] sm:$0xff] }
 0x449   : > { %7122 = vperm.xlu1 %17431, %v7097_v5   ;;  %7147 = vperm.xlu0 %17430, %v7102_v54  }
 0x44a   : > { %6820 = vmatmul.mubr.bf16.gmra.mrb[36].mxu1 %v17808_v58  ;;  %v17860_v58 = vld [vmem:[%s20954_s1 + $0x448] sm:$0xff]  }
 0x44b   : > { %6827 = vmatprep.mubr.bf16.mxu1 %v17810_v60  ;;  %16082 = vmatpush3.bf16.msra.mxu1 %v17817_v57  ;;  %v17856_v57 = vld [vmem:[#allocation5 + $0x18] ss:$36 sps:$4 sm:$0xff]   ;;  %v7104_v60 = vld [vmem:[%s20956_s3 + $0x50] sm:$0x1] }
 0x44c   : > { %16083 = vmatprep.subr.bf16.mxu1 %v17822_v59  ;;  %v17858_v59 = vld [vmem:[#allocation5 + $0x64] ss:$36 sps:$4 sm:$0xff]  }
 0x44d   : > { %7132 = vperm.xlu1 %17431, %v7099_v56   ;;  %7157 = vperm.xlu0 %17430, %v7104_v60  }
 0x44f   : > { %16084 = vmatpush3.bf16.msra.mxu1 %v17823_v11  ;;  %v7101_v11 = vld [vmem:[%s20956_s3 + $0x38] sm:$0xff] }
 0x450   : > { %16121 = vmatprep.subr.bf16.mxu1 %v17825_v62  ;;  %v7103_v62 = vld [vmem:[%s20956_s3 + $0x48] sm:$0xff] }
 0x451   : > { %7142 = vperm.xlu1 %17431, %v7101_v11   ;;  %10362 = vperm.xlu0 %17430, %v10352_v63  }
 0x452   : > { %6828 = vmatmul.mubr.bf16.gmra.mrb[40].mxu1 %v17815_v0  ;;  %v17862_v0 = vld [vmem:[#allocation5 + $0xac] ss:$36 sps:$4 sm:$0xff]  }
 0x453   : > { %6835 = vmatprep.mubr.bf16.mxu1 %v14512_v4  ;;  %v17868_v4 = vld [vmem:[%s20954_s1 + $0x458] sm:$0xff]  }
 0x455   : > { %7152 = vperm.xlu1 %17431, %v7103_v62   ;;  %10372 = vperm.xlu0 %17430, %v10354_v2  }
 0x459   : > { %10357 = vperm.xlu1 %17431, %v10351_v1   ;;  %12568 = vperm.xlu0 %17430, %v12560_v8  }
 0x45a   : > { %6836 = vmatmul.mubr.bf16.gmra.mrb[44].mxu1 %v14511_v9  ;;  %v10353_v9 = vld [vmem:[%s20957_s4 + $0x10] sm:$0xff] }
 0x45b   : > { %6875 = vmatprep.mubr.bf16.mxu1 %v17820_v10  ;;  %v17865_v10 = vld [vmem:[#allocation5 + $0xa8] ss:$36 sps:$4 sm:$0xff]  }
 0x45d   : > { %10367 = vperm.xlu1 %17431, %v10353_v9  }
 0x462   : > { %6876 = vmatmul.mubr.bf16.vlgmr.msra.gmra.mrb[48].mxu1 %v17824_v16  ;;  %v17866_v16 = vld [vmem:[#allocation5 + $0xf4] ss:$36 sps:$4 sm:$0xff]  }
 0x463   : > { %6883 = vmatprep.mubr.bf16.mxu1 %v17826_v18  ;;  %16122 = vmatpush3.bf16.msra.mxu1 %v17828_v14  ;;  %v17871_v14 = vld [vmem:[%s20954_s1 + $0x468] sm:$0xff]  }
 0x464   : > { %16123 = vmatprep.subr.bf16.mxu1 %v17829_v17  ;;  %v12559_v17 = vld [vmem:[%s20958_s5] sm:$0xff] }
 0x465   : > { %12563 = vperm.xlu1 %17431, %v12559_v17  }
 0x467   : > { %16124 = vmatpush3.bf16.msra.mxu1 %v17830_v19  ;;  %v17874_v19 = vld [vmem:[%s20954_s1 + $0x470] sm:$0xff]  }
 0x468   : > { %16125 = vmatprep.subr.bf16.mxu1 %v17834_v22 }
 0x46a   : > { %6884 = vmatmul.mubr.bf16.gmra.mrb[52].mxu1 %v17831_v24 }
 0x46b   : > { %6891 = vmatprep.mubr.bf16.mxu1 %v17832_v27  ;;  %16126 = vmatpush3.bf16.msra.mxu1 %v17835_v23 }
 0x46c   : > { %16127 = vmatprep.subr.bf16.mxu1 %v17839_v25 }
 0x46f   : > { %16128 = vmatpush3.bf16.msra.mxu1 %v17840_v28  ;;  %v17869_v28 = vld [vmem:[#allocation5 + $0xf0] ss:$36 sps:$4 sm:$0xff]  }
 0x470   : > { %16129 = vmatprep.subr.bf16.mxu1 %v17842_v21  ;;  %v17877_v21 = vld [vmem:[%s20954_s1 + $0x478] sm:$0xff]  }
 0x472   : > { %6892 = vmatmul.mubr.bf16.gmra.mrb[56].mxu1 %v17836_v30  ;;  %v5977_v30 = vld [vmem:[#allocation5 + $0x15c] sm:$0xff] }
 0x473   : > { %6899 = vmatprep.mubr.bf16.mxu1 %v17837_v20  ;;  %16130 = vmatpush3.bf16.msra.mxu1 %v17845_v29  ;;  %v5972_v29 = vld [vmem:[#allocation5 + $0x138] sm:$0xff]  ;;  %v14516_v20 = vcombine.high %v19346_v42, %v19346_v42 }
 0x474   : > { %16131 = vmatprep.subr.bf16.mxu1 %v17846_v31  ;;  %v14506_v31 = vcombine.low %v5972_v29, %v5977_v30 }
 0x477   : > { %16132 = vmatpush3.bf16.msra.mxu1 %v17847_v32  ;;  %v14515_v32 = vcombine.low %v19346_v42, %v19346_v42 }
 0x478   : > { %16133 = vmatprep.subr.bf16.mxu1 %v17849_v33  ;;  %v17876_v33 = vld [vmem:[#allocation5 + $0x20] ss:$36 sps:$4 sm:$0xff]  }
 0x47a   : > { %6900 = vmatmul.mubr.bf16.gmra.mrb[60].mxu1 %v17841_v36  ;;  %v17879_v36 = vld [vmem:[#allocation5 + $0xb0] ss:$36 sps:$4 sm:$0xff]  }
 0x47b   : > { %6907 = vmatprep.mubr.bf16.mxu1 %v17843_v34  ;;  %16134 = vmatpush3.bf16.msra.mxu1 %v17850_v35  ;;  %v17878_v35 = vld [vmem:[#allocation5 + $0x68] ss:$36 sps:$4 sm:$0xff]  }
 0x47c   : > { %16135 = vmatprep.subr.bf16.mxu1 %v17854_v37 }
 0x47f   : > { %16136 = vmatpush3.bf16.msra.mxu1 %v17855_v38 }
 0x480   : > { %16939 = vmatprep.subr.bf16.mxu1 %v17857_v13 }
 0x481   : > { %v15981_v44 = vpop.f32.mrb[0].mxu1 }
 0x482   : > { %6908 = vmatmul.mubr.bf16.gmra.mrb[64].mxu1 %v17848_v41  ;;  %v15982_v46 = vpop.f32.mrb[1].mxu1 }
 0x483   : > { %6915 = vmatprep.mubr.bf16.mxu1 %v14514_v26  ;;  %v19453_v47 = vadd.f32 %v15982_v46, %v15981_v44  ;;  %v15984_v48 = vpop.f32.mrb[2].mxu1 }
 0x484   : > { %v15985_v50 = vpop.f32.mrb[3].mxu1 }
 0x485   : > { %v19457_v52 = vadd.f32 %v15985_v50, %v15984_v48 }
 0x48a   : > { %6916 = vmatmul.mubr.bf16.gmra.mrb[68].mxu1 %v14513_v51 }
 0x48b   : > { %6955 = vmatprep.mubr.bf16.mxu1 %v17852_v49 }
 0x492   : > { %6956 = vmatmul.mubr.bf16.vlgmr.msra.gmra.mrb[72].mxu1 %v17856_v57  ;;  %v19542_v57 = vld [vmem:[%s20955_s2 + $0x1] ss:$0 sm:$0xff] }
 0x493   : > { %6963 = vmatprep.mubr.bf16.mxu1 %v17858_v59  ;;  %16940 = vmatpush3.bf16.msra.mxu1 %v17857_v13  ;;  %v17880_v13 = vld [vmem:[#allocation5 + $0xf8] ss:$36 sps:$4 sm:$0xff]   ;;  %v6718_v60 = vadd.f32 %v19453_v47, %v19542_v57  ;;  %v6721_v62 = vadd.f32 %v19457_v52, %v19542_v57 }
 0x494   : > { %16941 = vmatprep.subr.bf16.mxu1 %v17860_v58  ;;  %v17883_v47 = vld [vmem:[%s20954_s1 + $0x4c0] sm:$0xff]  }
 0x495   : > { %v17884_v52 = vld [vmem:[%s20954_s1 + $0x480] sm:$0xff]  }
 0x497   : > { %16942 = vmatpush3.bf16.msra.mxu1 %v17860_v58 }
 0x498   : > { %16943 = vmatprep.subr.bf16.mxu1 %v17864_v61 }
 0x49a   : > { %6964 = vmatmul.mubr.bf16.gmra.mrb[76].mxu1 %v17861_v3 }
 0x49b   : > { %6971 = vmatprep.mubr.bf16.mxu1 %v17862_v0  ;;  %16944 = vmatpush3.bf16.msra.mxu1 %v17864_v61 }
 0x49c   : > { %16945 = vmatprep.subr.bf16.mxu1 %v17868_v4 }
 0x49f   : > { %16946 = vmatpush3.bf16.msra.mxu1 %v17868_v4 }
 0x4a0   : > { %16947 = vmatprep.subr.bf16.mxu1 %v17870_v6 }
 0x4a2   : > { %6972 = vmatmul.mubr.bf16.gmra.mrb[80].mxu1 %v17865_v10 }
 0x4a3   : > { %6979 = vmatprep.mubr.bf16.mxu1 %v17866_v16  ;;  %16948 = vmatpush3.bf16.msra.mxu1 %v17870_v6 }
 0x4a4   : > { %v15987_v18 = vpop.f32.mrb[4].mxu1  ;;  %16949 = vmatprep.subr.bf16.mxu1 %v17871_v14 }
 0x4a5   : > { %v15988_v22 = vpop.f32.mrb[5].mxu1 }
 0x4a6   : > { %v19519_v23 = vadd.f32 %v15988_v22, %v15987_v18  ;;  %v15990_v24 = vpop.f32.mrb[6].mxu1 }
 0x4a7   : > { %v15991_v25 = vpop.f32.mrb[7].mxu1  ;;  %16950 = vmatpush3.bf16.msra.mxu1 %v17871_v14 }
 0x4a8   : > { %v19521_v27 = vadd.f32 %v15991_v25, %v15990_v24  ;;  %16951 = vmatprep.subr.bf16.mxu1 %v17874_v19  ;;  %v6726_v6 = vadd.f32 %v19519_v23, %v19542_v57 }
 0x4aa   : > { %6980 = vmatmul.mubr.bf16.gmra.mrb[84].mxu1 %v17869_v28  ;;  %v6729_v14 = vadd.f32 %v19521_v27, %v19542_v57  ;;  %v17885_v27 = vld [vmem:[%s20954_s1 + $0x4c8] sm:$0xff]  }
 0x4ab   : > { %6987 = vmatprep.mubr.bf16.mxu1 %v19344_v40  ;;  %16952 = vmatpush3.bf16.msra.mxu1 %v17874_v19 }
 0x4ac   : > { %16953 = vmatprep.subr.bf16.mxu1 %v17877_v21 }
 0x4af   : > { %16954 = vmatpush3.bf16.msra.mxu1 %v17877_v21 }
 0x4b0   : > { %16187 = vmatprep.subr.bf16.mxu1 %v17883_v47  ;;  %v17897_v47 = vld [vmem:[%s20954_s1 + $0x4f8] sm:$0xff]  }
 0x4b2   : > { %6988 = vmatmul.mubr.bf16.gmra.mrb[88].mxu1 %v14506_v31  ;;  %v17886_v31 = vld [vmem:[%s20954_s1 + $0x488] sm:$0xff]  }
 0x4b3   : > { %6995 = vmatprep.mubr.bf16.mxu1 %v14516_v20 }
 0x4ba   : > { %6996 = vmatmul.mubr.bf16.gmra.mrb[92].mxu1 %v14515_v32 }
 0x4bb   : > { %16955 = vmatprep.mubr.bf16.mxu1 %v17876_v33  ;;  %v17887_v33 = vld [vmem:[%s20954_s1 + $0x4d0] sm:$0xff]  }
 0x4c2   : > { %16956 = vmatmul.mubr.bf16.vlgmr.msra.gmra.mrb[96].mxu1 %v17878_v35 }
 0x4c3   : > { %16959 = vmatprep.mubr.bf16.mxu1 %v17879_v36  ;;  %16188 = vmatpush3.bf16.msra.mxu1 %v17884_v52  ;;  %v17888_v36 = vld [vmem:[%s20954_s1 + $0x490] sm:$0xff]  }
 0x4c4   : > { %16189 = vmatprep.subr.bf16.mxu1 %v17885_v27 }
 0x4c6   : > { %v15993_v40 = vpop.f32.mrb[8].mxu1 }
 0x4c7   : > { %v15994_v37 = vpop.f32.mrb[9].mxu1  ;;  %16190 = vmatpush3.bf16.msra.mxu1 %v17886_v31 }
 0x4c8   : > { %v15995_v34 = vadd.f32 %v15994_v37, %v15993_v40  ;;  %v15996_v38 = vpop.f32.mrb[10].mxu1  ;;  %16191 = vmatprep.subr.bf16.mxu1 %v17887_v33 }
 0x4c9   : > { %v15997_v39 = vpop.f32.mrb[11].mxu1 }
 0x4ca   : > { %v15998_v26 = vadd.f32 %v15997_v39, %v15996_v38  ;;  %16960 = vmatmul.mubr.bf16.gmra.mrb[100].mxu1 %v17880_v13  ;;  %v6734_v23 = vadd.f32 %v15995_v34, %v19542_v57 }
 0x4cb   : > { %16963 = vmatprep.mubr.bf16.mxu1 %v19388_v12  ;;  %16192 = vmatpush3.bf16.msra.mxu1 %v17888_v36 }
 0x4cc   : > { %v6737_v21 = vadd.f32 %v15998_v26, %v19542_v57 }
 0x4d2   : > { %16964 = vmatmul.mubr.bf16.gmra.mrb[104].mxu1 %v19390_v7 }
 0x4e5   : > { %v15999_v42 = vpop.f32.mrb[12].mxu1 }
 0x4e6   : > { %v16000_v41 = vpop.f32.mrb[13].mxu1 }
 0x4e7   : > { %v16001_v43 = vadd.f32 %v16000_v41, %v15999_v42  ;;  %v16002_v44 = vpop.f32.mrb[14].mxu1  ;;  %v17889_v42 = vld [vmem:[%s20954_s1 + $0x4d8] sm:$0xff]  }
 0x4e8   : > { %v16003_v45 = vpop.f32.mrb[15].mxu1  ;;  %v17890_v41 = vld [vmem:[%s20954_s1 + $0x498] sm:$0xff]   ;;  %16193 = vmatprep.subr.bf16.mxu1 %v17889_v42 }
 0x4e9   : > { %v16004_v46 = vadd.f32 %v16003_v45, %v16002_v44  ;;  %v6742_v40 = vadd.f32 %v16001_v43, %v19542_v57  ;;  %16194 = vmatpush3.bf16.msra.mxu1 %v17890_v41  ;;  %v17891_v45 = vld [vmem:[%s20954_s1 + $0x4e0] sm:$0xff]  }
 0x4ea   : > { %16195 = vmatprep.subr.bf16.mxu1 %v17891_v45 }
 0x4eb   : > { %v6745_v39 = vadd.f32 %v16004_v46, %v19542_v57 }
 0x4f5   : > { %v16005_v48 = vpop.f32.mrb[16].mxu1 }
 0x4f6   : > { %v16006_v50 = vpop.f32.mrb[17].mxu1 }
 0x4f7   : > { %v19533_v51 = vadd.f32 %v16006_v50, %v16005_v48  ;;  %v16008_v49 = vpop.f32.mrb[18].mxu1  ;;  %v17892_v48 = vld [vmem:[%s20954_s1 + $0x4a0] sm:$0xff]  }
 0x4f8   : > { %v16009_v55 = vpop.f32.mrb[19].mxu1  ;;  %16196 = vmatpush3.bf16.msra.mxu1 %v17892_v48 }
 0x4f9   : > { %v19535_v53 = vadd.f32 %v16009_v55, %v16008_v49  ;;  %v6750_v50 = vadd.f32 %v19533_v51, %v19542_v57  ;;  %v7251_v51 = vld [vmem:[#allocation2 + $0x1] sm:$0xff] }
 0x4fd   : > { %v16011_v5 = vpop.f32.mrb[20].mxu1 }
 0x4fe   : > { %v16012_v54 = vpop.f32.mrb[21].mxu1 }
 0x4ff   : > { %v19537_v56 = vadd.f32 %v16012_v54, %v16011_v5  ;;  %v16014_v12 = vpop.f32.mrb[22].mxu1  ;;  %v6753_v54 = vadd.f32 %v19535_v53, %v19542_v57 }
 0x500   : > { %v16015_v7 = vpop.f32.mrb[23].mxu1 }
 0x505   : > { %v16033_v58 = vpop.f32.mrb[24].mxu1 }
 0x506   : > { %v16034_v59 = vpop.f32.mrb[25].mxu1 }
 0x507   : > { %v16035_v11 = vadd.f32 %v16034_v59, %v16033_v58  ;;  %v16036_v61 = vpop.f32.mrb[26].mxu1  ;;  %v17893_v58 = vld [vmem:[%s20954_s1 + $0x4e8] sm:$0xff]  }
 0x508   : > { %v16037_v63 = vpop.f32.mrb[27].mxu1  ;;  %v17894_v59 = vld [vmem:[%s20954_s1 + $0x4a8] sm:$0xff]   ;;  %16197 = vmatprep.subr.bf16.mxu1 %v17893_v58 }
 0x509   : > { %v19548_v3 = vadd.f32 %v16035_v11, %v6718_v60  ;;  %v16038_v4 = vadd.f32 %v16037_v63, %v16036_v61  ;;  %v7320_v60 = vld [vmem:[#allocation2 + $0x2] sm:$0xff]  ;;  %16198 = vmatpush3.bf16.msra.mxu1 %v17894_v59 }
 0x50a   : > { %v18388_v61 = vld [vmem:[#allocation2] sm:$0xff]  ;;  %v15753_v53 = vpack.c.bf16 %v7320_v60, %v7320_v60 }
 0x50b   : > { %v19550_v0 = vadd.f32 %v16038_v4, %v6721_v62  ;;  %v15731_v63 = vpack.c.bf16 %v18388_v61, %v18388_v61  ;;  %v15742_v62 = vpack.c.bf16 %v7251_v51, %v7251_v51 }
 0x50c   : > { %7376 = vst [vmem:[#allocation5 + $0x8] sm:$0xf] %v15753_v53 }
 0x50d   : > { %v16039_v2 = vpop.f32.mrb[28].mxu1  ;;  %7238 = vst [vmem:[#allocation5] sm:$0xf] %v15731_v63  ;;  %7307 = vst [vmem:[#allocation5 + $0x4] sm:$0xf] %v15742_v62 }
 0x50e   : > { %v16040_v1 = vpop.f32.mrb[29].mxu1 }
 0x50f   : > { %v16041_v8 = vadd.f32 %v16040_v1, %v16039_v2  ;;  %v16042_v9 = vpop.f32.mrb[30].mxu1  ;;  %v17895_v2 = vld [vmem:[%s20954_s1 + $0x4f0] sm:$0xff]  }
 0x510   : > { %v16043_v10 = vpop.f32.mrb[31].mxu1  ;;  %16199 = vmatprep.subr.bf16.mxu1 %v17895_v2 }
 0x511   : > { %v16044_v16 = vadd.f32 %v16043_v10, %v16042_v9  ;;  %v19562_v17 = vadd.f32 %v16041_v8, %v6726_v6  ;;  %v17896_v6 = vld [vmem:[%s20954_s1 + $0x4b0] sm:$0xff]   ;;  %v6758_v8 = vadd.f32 %v19537_v56, %v19542_v57 }
 0x512   : > { %16200 = vmatpush3.bf16.msra.mxu1 %v17896_v6 }
 0x513   : > { %v19564_v18 = vadd.f32 %v16044_v16, %v6729_v14  ;;  %v17898_v14 = vld [vmem:[%s20954_s1 + $0x4b8] sm:$0xff]   ;;  %16201 = vmatprep.subr.bf16.mxu1 %v17897_v47 }
 0x515   : > { %v16045_v19 = vpop.f32.mrb[32].mxu1 }
 0x516   : > { %v16046_v22 = vpop.f32.mrb[33].mxu1  ;;  %16202 = vmatpush3.bf16.msra.mxu1 %v17898_v14 }
 0x517   : > { %v16047_v24 = vadd.f32 %v16046_v22, %v16045_v19  ;;  %v16048_v25 = vpop.f32.mrb[34].mxu1  ;;  %v17902_v19 = vld [vmem:[%s20954_s1 + $0x540] sm:$0xff]  }
 0x518   : > { %v16049_v28 = vpop.f32.mrb[35].mxu1  ;;  %16239 = vmatprep.subr.bf16.mxu1 %v17902_v19 }
 0x519   : > { %v16050_v29 = vadd.f32 %v16049_v28, %v16048_v25  ;;  %v19568_v30 = vadd.f32 %v16047_v24, %v6734_v23 }
 0x51b   : > { %v19576_v20 = vadd.f32 %v16050_v29, %v6737_v21 }
 0x51d   : > { %v16051_v32 = vpop.f32.mrb[36].mxu1 }
 0x51e   : > { %v16052_v35 = vpop.f32.mrb[37].mxu1 }
 0x51f   : > { %v16053_v37 = vadd.f32 %v16052_v35, %v16051_v32  ;;  %v16054_v34 = vpop.f32.mrb[38].mxu1 }
 0x520   : > { %v16055_v38 = vpop.f32.mrb[39].mxu1 }
 0x521   : > { %v16056_v13 = vadd.f32 %v16055_v38, %v16054_v34  ;;  %v19586_v26 = vadd.f32 %v16053_v37, %v6742_v40 }
 0x523   : > { %v19594_v44 = vadd.f32 %v16056_v13, %v6745_v39 }
 0x525   : > { %v16057_v43 = vpop.f32.mrb[40].mxu1 }
 0x526   : > { %v16058_v46 = vpop.f32.mrb[41].mxu1 }
 0x527   : > { %v16059_v49 = vadd.f32 %v16058_v46, %v16057_v43  ;;  %v16060_v55 = vpop.f32.mrb[42].mxu1 }
 0x528   : > { %v16061_v5 = vpop.f32.mrb[43].mxu1 }
 0x529   : > { %v16062_v12 = vadd.f32 %v16061_v5, %v16060_v55  ;;  %v19606_v7 = vadd.f32 %v16059_v49, %v6750_v50 }
 0x52b   : > { %v19614_v11 = vadd.f32 %v16062_v12, %v6753_v54 }
 0x52d   : > { %v16063_v4 = vpop.f32.mrb[44].mxu1 }
 0x52e   : > { %v16064_v1 = vpop.f32.mrb[45].mxu1 }
 0x52f   : > { %v16065_v9 = vadd.f32 %v16064_v1, %v16063_v4  ;;  %v16066_v10 = vpop.f32.mrb[46].mxu1 }
 0x530   : > { %v16067_v52 = vpop.f32.mrb[47].mxu1 }
 0x531   : > { %v6838_v16 = vadd.f32 %v16065_v9, %v6758_v8 }
 0x535   : > { %v16085_v56 = vpop.f32.mrb[48].mxu1 }
 0x536   : > { %v16086_v57 = vpop.f32.mrb[49].mxu1 }
 0x537   : > { %v16087_v22 = vadd.f32 %v16086_v57, %v16085_v56  ;;  %v16088_v23 = vpop.f32.mrb[50].mxu1 }
 0x538   : > { %v16089_v24 = vpop.f32.mrb[51].mxu1 }
 0x539   : > { %v16090_v25 = vadd.f32 %v16089_v24, %v16088_v23  ;;  %v6878_v28 = vadd.f32 %v16087_v22, %v19548_v3 }
 0x53b   : > { %v6881_v21 = vadd.f32 %v16090_v25, %v19550_v0 }
 0x53d   : > { %v16091_v29 = vpop.f32.mrb[52].mxu1 }
 0x53e   : > { %v16092_v27 = vpop.f32.mrb[53].mxu1 }
 0x53f   : > { %v16093_v31 = vadd.f32 %v16092_v27, %v16091_v29  ;;  %v16094_v32 = vpop.f32.mrb[54].mxu1 }
 0x540   : > { %v16095_v33 = vpop.f32.mrb[55].mxu1 }
 0x541   : > { %v6886_v35 = vadd.f32 %v16093_v31, %v19562_v17  ;;  %v16096_v36 = vadd.f32 %v16095_v33, %v16094_v32 }
 0x543   : > { %v6889_v40 = vadd.f32 %v16096_v36, %v19564_v18 }
 0x545   : > { %v16097_v37 = vpop.f32.mrb[56].mxu1 }
 0x546   : > { %v16098_v34 = vpop.f32.mrb[57].mxu1 }
 0x547   : > { %v16099_v38 = vadd.f32 %v16098_v34, %v16097_v37  ;;  %v16100_v39 = vpop.f32.mrb[58].mxu1 }
 0x548   : > { %v16101_v13 = vpop.f32.mrb[59].mxu1 }
 0x549   : > { %v6894_v42 = vadd.f32 %v16099_v38, %v19568_v30  ;;  %v16102_v3 = vadd.f32 %v16101_v13, %v16100_v39 }
 0x54b   : > { %v6897_v0 = vadd.f32 %v16102_v3, %v19576_v20 }
 0x54d   : > { %v16103_v41 = vpop.f32.mrb[60].mxu1 }
 0x54e   : > { %v16104_v43 = vpop.f32.mrb[61].mxu1 }
 0x54f   : > { %v16105_v45 = vadd.f32 %v16104_v43, %v16103_v41  ;;  %v16106_v46 = vpop.f32.mrb[62].mxu1  ;;  %v7108_v41 = vpop.permute.xlu0 %7107 }
 0x550   : > { %v16107_v48 = vpop.f32.mrb[63].mxu1 }
 0x551   : > { %v6902_v17 = vadd.f32 %v16105_v45, %v19586_v26  ;;  %v16108_v50 = vadd.f32 %v16107_v48, %v16106_v46 }
 0x553   : > { %v6905_v18 = vadd.f32 %v16108_v50, %v19594_v44  ;;  %v7113_v48 = vpop.permute.xlu0 %7112 }
 0x555   : > { %v16109_v49 = vpop.f32.mrb[64].mxu1 }
 0x556   : > { %v16110_v55 = vpop.f32.mrb[65].mxu1 }
 0x557   : > { %v16111_v5 = vadd.f32 %v16110_v55, %v16109_v49  ;;  %v16112_v54 = vpop.f32.mrb[66].mxu1  ;;  %v7118_v49 = vpop.permute.xlu1 %7117 }
 0x558   : > { %v16113_v12 = vpop.f32.mrb[67].mxu1  ;;  %v7128_v55 = vpop.permute.xlu0 %7127 }
 0x559   : > { %v6910_v30 = vadd.f32 %v16111_v5, %v19606_v7  ;;  %v16114_v58 = vadd.f32 %v16113_v12, %v16112_v54 }
 0x55b   : > { %v6913_v20 = vadd.f32 %v16114_v58, %v19614_v11  ;;  %v7123_v12 = vpop.permute.xlu1 %7122 }
 0x55d   : > { %v16115_v59 = vpop.f32.mrb[68].mxu1 }
 0x55e   : > { %v16116_v51 = vpop.f32.mrb[69].mxu1 }
 0x55f   : > { %v16117_v60 = vadd.f32 %v16116_v51, %v16115_v59  ;;  %v16118_v61 = vpop.f32.mrb[70].mxu1 }
 0x560   : > { %v16119_v63 = vpop.f32.mrb[71].mxu1 }
 0x561   : > { %v6918_v62 = vadd.f32 %v16117_v60, %v6838_v16 }
 0x565   : > { %v16137_v26 = vpop.f32.mrb[72].mxu1 }
 0x566   : > { %v16138_v53 = vpop.f32.mrb[73].mxu1 }
 0x567   : > { %v16139_v4 = vadd.f32 %v16138_v53, %v16137_v26  ;;  %v16140_v44 = vpop.f32.mrb[74].mxu1 }
 0x568   : > { %v16141_v2 = vpop.f32.mrb[75].mxu1 }
 0x569   : > { %v16142_v1 = vadd.f32 %v16141_v2, %v16140_v44  ;;  %v6958_v6 = vadd.f32 %v16139_v4, %v6878_v28  ;;  %v7138_v44 = vpop.permute.xlu0 %7137 }
 0x56b   : > { %v6961_v8 = vadd.f32 %v16142_v1, %v6881_v21  ;;  %v7133_v1 = vpop.permute.xlu1 %7132 }
 0x56d   : > { %v16143_v9 = vpop.f32.mrb[76].mxu1 }
 0x56e   : > { %v16144_v10 = vpop.f32.mrb[77].mxu1 }
 0x56f   : > { %v16145_v7 = vadd.f32 %v16144_v10, %v16143_v9  ;;  %v16146_v47 = vpop.f32.mrb[78].mxu1 }
 0x570   : > { %v16147_v52 = vpop.f32.mrb[79].mxu1 }
 0x571   : > { %v16148_v11 = vadd.f32 %v16147_v52, %v16146_v47  ;;  %v6966_v14 = vadd.f32 %v16145_v7, %v6886_v35 }
 0x573   : > { %v6969_v19 = vadd.f32 %v16148_v11, %v6889_v40 }
 0x575   : > { %v16149_v56 = vpop.f32.mrb[80].mxu1 }
 0x576   : > { %v16150_v57 = vpop.f32.mrb[81].mxu1 }
 0x577   : > { %v16151_v22 = vadd.f32 %v16150_v57, %v16149_v56  ;;  %v16152_v16 = vpop.f32.mrb[82].mxu1 }
 0x578   : > { %v16153_v23 = vpop.f32.mrb[83].mxu1 }
 0x579   : > { %v16154_v24 = vadd.f32 %v16153_v23, %v16152_v16  ;;  %v6974_v25 = vadd.f32 %v16151_v22, %v6894_v42 }
 0x57b   : > { %v19643_v29 = vadd.f32 %v16154_v24, %v6897_v0 }
 0x57d   : > { %v16155_v27 = vpop.f32.mrb[84].mxu1 }
 0x57e   : > { %v16156_v28 = vpop.f32.mrb[85].mxu1 }
 0x57f   : > { %v16157_v21 = vadd.f32 %v16156_v28, %v16155_v27  ;;  %v16158_v31 = vpop.f32.mrb[86].mxu1  ;;  %v19652_v27 = vpop.permute.xlu0 %7147 }
 0x580   : > { %v16159_v32 = vpop.f32.mrb[87].mxu1  ;;  %v7143_v28 = vpop.permute.xlu1 %7142 }
 0x581   : > { %v16160_v33 = vadd.f32 %v16159_v32, %v16158_v31  ;;  %v6982_v36 = vadd.f32 %v16157_v21, %v6902_v17 }
 0x583   : > { %v6985_v37 = vadd.f32 %v16160_v33, %v6905_v18 }
 0x585   : > { %v16161_v34 = vpop.f32.mrb[88].mxu1 }
 0x586   : > { %v16162_v35 = vpop.f32.mrb[89].mxu1 }
 0x587   : > { %v16163_v40 = vadd.f32 %v16162_v35, %v16161_v34  ;;  %v16164_v38 = vpop.f32.mrb[90].mxu1 }
 0x588   : > { %v16165_v39 = vpop.f32.mrb[91].mxu1 }
 0x589   : > { %v16166_v13 = vadd.f32 %v16165_v39, %v16164_v38  ;;  %v19645_v3 = vadd.f32 %v16163_v40, %v6910_v30 }
 0x58b   : > { %v19647_v42 = vadd.f32 %v16166_v13, %v6913_v20 }
 0x58d   : > { %v16167_v0 = vpop.f32.mrb[92].mxu1 }
 0x58e   : > { %v16168_v43 = vpop.f32.mrb[93].mxu1 }
 0x58f   : > { %v16169_v45 = vadd.f32 %v16168_v43, %v16167_v0  ;;  %v16170_v46 = vpop.f32.mrb[94].mxu1 }
 0x590   : > { %v16171_v50 = vpop.f32.mrb[95].mxu1 }
 0x591   : > { %v19649_v17 = vadd.f32 %v16169_v45, %v6918_v62 }
 0x595   : > { %v16957_v18 = vpop.f32.mrb[96].mxu1 }
 0x596   : > { %v7046_v5 = vadd.f32 %v16957_v18, %v6966_v14  ;;  %v7037_v54 = vpop.f32.mrb[97].mxu1 }
 0x597   : > { %v7038_v58 = vadd.f32 %v7037_v54, %v6958_v6  ;;  %v16958_v30 = vpop.f32.mrb[98].mxu1 }
 0x598   : > { %v7085_v59 = vmax.f32 %v7046_v5, 0.0  ;;  %v7049_v51 = vadd.f32 %v16958_v30, %v6969_v19  ;;  %v7040_v20 = vpop.f32.mrb[99].mxu1 }
 0x599   : > { %v7083_v60 = vmax.f32 %v7038_v58, 0.0  ;;  %v7041_v61 = vadd.f32 %v7040_v20, %v6961_v8 }
 0x59a   : > { %v7162_v63 = vmul.f32 %v7118_v49, %v7085_v59  ;;  %v7086_v26 = vmax.f32 %v7049_v51, 0.0 }
 0x59b   : > { %v7160_v53 = vmul.f32 %v7108_v41, %v7083_v60  ;;  %v7084_v4 = vmax.f32 %v7041_v61, 0.0 }
 0x59c   : > { %7173 = vst [vmem:[#allocation2 + $0x1a] sm:$0xff] %v7162_v63  ;;  %v7163_v62 = vmul.f32 %v7123_v12, %v7086_v26  ;;  %v15756_v2 = vpack.c.bf16 %v7162_v63, %v7162_v63  ;;  %v7158_v26 = vpop.permute.xlu0 %7157 }
 0x59d   : > { %7171 = vst [vmem:[#allocation2 + $0xa] sm:$0xff] %v7160_v53  ;;  %v7161_v9 = vmul.f32 %v7113_v48, %v7084_v4  ;;  %v16961_v10 = vpop.f32.mrb[100].mxu1  ;;  %v15754_v7 = vpack.c.bf16 %v7160_v53, %v7160_v53 }
 0x59e   : > { %7174 = vst [vmem:[#allocation2 + $0x22] sm:$0xff] %v7163_v62  ;;  %v7062_v6 = vadd.f32 %v16961_v10, %v6982_v36  ;;  %v7053_v47 = vpop.f32.mrb[101].mxu1  ;;  %7379 = vst [vmem:[#allocation5 + $0x74] sm:$0xf] %v15756_v2  ;;  %v15757_v52 = vpack.c.bf16 %v7163_v62, %v7163_v62 }
 0x59f   : > { %7516 = vst [vmem:[#allocation5 + $0x58] sm:$0xf] %v15756_v2  ;;  %7172 = vst [vmem:[#allocation2 + $0x12] sm:$0xff] %v7161_v9  ;;  %v7054_v8 = vadd.f32 %v7053_v47, %v6974_v25  ;;  %v16962_v11 = vpop.f32.mrb[102].mxu1  ;;  %v15755_v14 = vpack.c.bf16 %v7161_v9, %v7161_v9 }
 0x5a0   : > { %7377 = vst [vmem:[#allocation5 + $0x2c] sm:$0xf] %v15754_v7  ;;  %7514 = vst [vmem:[#allocation5 + $0x10] sm:$0xf] %v15754_v7  ;;  %v7089_v19 = vmax.f32 %v7062_v6, 0.0  ;;  %v7065_v56 = vadd.f32 %v16962_v11, %v6985_v37  ;;  %v7056_v57 = vpop.f32.mrb[103].mxu1 }
 0x5a1   : > { %7380 = vst [vmem:[#allocation5 + $0x98] sm:$0xf] %v15757_v52  ;;  %7517 = vst [vmem:[#allocation5 + $0x7c] sm:$0xf] %v15757_v52  ;;  %v7087_v22 = vmax.f32 %v7054_v8, 0.0  ;;  %v7057_v16 = vadd.f32 %v7056_v57, %v19643_v29  ;;  %v19665_v57 = vld [vmem:[%s20954_s1 + $0x500] sm:$0xff]  }
 0x5a2   : > { %7378 = vst [vmem:[#allocation5 + $0x50] sm:$0xf] %v15755_v14  ;;  %7515 = vst [vmem:[#allocation5 + $0x34] sm:$0xf] %v15755_v14  ;;  %v7166_v23 = vmul.f32 %v7138_v44, %v7089_v19  ;;  %v7090_v24 = vmax.f32 %v7065_v56, 0.0  ;;  %v7153_v19 = vpop.permute.xlu1 %7152 }
 0x5a3   : > { %v7164_v25 = vmul.f32 %v7128_v55, %v7087_v22  ;;  %v7088_v21 = vmax.f32 %v7057_v16, 0.0  ;;  %v7597_v31 = vld [vmem:[#allocation2 + $0x1a] sm:$0xff] }
 0x5a4   : > { %7177 = vst [vmem:[#allocation2 + $0x3a] sm:$0xff] %v7166_v23  ;;  %v7167_v32 = vmul.f32 %v7143_v28, %v7090_v24  ;;  %v7183_v33 = vld [vmem:[#allocation2 + $0x8] sm:$0xff]  ;;  %v15760_v37 = vpack.c.bf16 %v7166_v23, %v7166_v23  ;;  %v15798_v34 = vpack.c.bf16 %v7597_v31, %v7597_v31  ;;  %v19657_v44 = vld [vmem:[#allocation3 + $0x19] sm:$0x1]  ;;  %v19667_v23 = vld [vmem:[#allocation3 + $0x1a] sm:$0x1] }
 0x5a5   : > { %v7252_v36 = vld [vmem:[#allocation2 + $0x9] sm:$0xff]  ;;  %7175 = vst [vmem:[#allocation2 + $0x2a] sm:$0xff] %v7164_v25  ;;  %v7165_v35 = vmul.f32 %v7133_v1, %v7088_v21  ;;  %v16965_v40 = vpop.f32.mrb[104].mxu1  ;;  %v15732_v29 = vpack.c.bf16 %v7183_v33, %v7183_v33  ;;  %v7186_v39 = vld [vmem:[#allocation2 + $0x20] sm:$0xff]  ;;  %v15758_v41 = vpack.c.bf16 %v7164_v25, %v7164_v25  ;;  %v15837_v56 = vpack.c.bf16 %v19657_v44, %v19657_v44 }
 0x5a6   : > { %v15743_v38 = vpack.c.bf16 %v7252_v36, %v7252_v36  ;;  %v7255_v13 = vld [vmem:[#allocation2 + $0x21] sm:$0xff]  ;;  %7178 = vst [vmem:[#allocation2 + $0x42] sm:$0xff] %v7167_v32  ;;  %v7078_v0 = vadd.f32 %v16965_v40, %v19649_v17  ;;  %v7069_v43 = vpop.f32.mrb[105].mxu1  ;;  %v7184_v45 = vld [vmem:[#allocation2 + $0x10] sm:$0xff]  ;;  %v7185_v46 = vld [vmem:[#allocation2 + $0x18] sm:$0xff]  ;;  %v15735_v50 = vpack.c.bf16 %v7186_v39, %v7186_v39 }
 0x5a7   : > { %v7253_v48 = vld [vmem:[#allocation2 + $0x11] sm:$0xff]  ;;  %v15746_v49 = vpack.c.bf16 %v7255_v13, %v7255_v13  ;;  %7383 = vst [vmem:[#allocation5 + $0x104] sm:$0xf] %v15760_v37  ;;  %7653 = vst [vmem:[#allocation5 + $0x3c] sm:$0xf] %v15798_v34  ;;  %v7070_v18 = vadd.f32 %v7069_v43, %v19645_v3  ;;  %v16966_v55 = vpop.f32.mrb[106].mxu1  ;;  %v15733_v5 = vpack.c.bf16 %v7184_v45, %v7184_v45 }
 0x5a8   : > { %7176 = vst [vmem:[#allocation2 + $0x32] sm:$0xff] %v7165_v35  ;;  %7239 = vst [vmem:[#allocation5 + $0x24] sm:$0xf] %v15732_v29  ;;  %v15734_v54 = vpack.c.bf16 %v7185_v46, %v7185_v46  ;;  %v7254_v12 = vld [vmem:[#allocation2 + $0x19] sm:$0xff]  ;;  %v15744_v58 = vpack.c.bf16 %v7253_v48, %v7253_v48  ;;  %v7527_v17 = vld [vmem:[#allocation2 + $0xb] sm:$0xff]  ;;  %v7093_v59 = vmax.f32 %v7078_v0, 0.0  ;;  %v15759_v60 = vpack.c.bf16 %v7165_v35, %v7165_v35 }
 0x5a9   : > { %7308 = vst [vmem:[#allocation5 + $0x28] sm:$0xf] %v15743_v38  ;;  %7445 = vst [vmem:[#allocation5 + $0xc] sm:$0xf] %v15743_v38  ;;  %v7528_v30 = vld [vmem:[#allocation2 + $0x13] sm:$0xff]  ;;  %v7072_v51 = vpop.f32.mrb[107].mxu1  ;;  %v15745_v20 = vpack.c.bf16 %v7254_v12, %v7254_v12  ;;  %v15761_v3 = vpack.c.bf16 %v7167_v32, %v7167_v32  ;;  %v15786_v62 = vpack.c.bf16 %v7527_v17, %v7527_v17 }
 0x5aa   : > { %7381 = vst [vmem:[#allocation5 + $0xbc] sm:$0xf] %v15758_v41  ;;  %7518 = vst [vmem:[#allocation5 + $0xa0] sm:$0xf] %v15758_v41  ;;  %v7529_v61 = vld [vmem:[#allocation2 + $0x1b] sm:$0xff]  ;;  %v7596_v63 = vld [vmem:[#allocation2 + $0x12] sm:$0xff]  ;;  %v7073_v4 = vadd.f32 %v7072_v51, %v19647_v42  ;;  %v15787_v2 = vpack.c.bf16 %v7528_v30, %v7528_v30  ;;  %v7170_v10 = vmul.f32 %v7158_v26, %v7093_v59 }
 0x5ab   : > { %7242 = vst [vmem:[#allocation5 + $0x90] sm:$0xf] %v15735_v50  ;;  %7311 = vst [vmem:[#allocation5 + $0x94] sm:$0xf] %v15746_v49  ;;  %v7091_v53 = vmax.f32 %v7070_v18, 0.0  ;;  %v7598_v1 = vld [vmem:[#allocation2 + $0x22] sm:$0xff]  ;;  %v15788_v7 = vpack.c.bf16 %v7529_v61, %v7529_v61  ;;  %v15797_v6 = vpack.c.bf16 %v7596_v63, %v7596_v63  ;;  %v15841_v17 = vpack.c.bf16 %v19667_v23, %v19667_v23 }
 0x5ac   : > { %7448 = vst [vmem:[#allocation5 + $0x78] sm:$0xf] %v15746_v49  ;;  %7240 = vst [vmem:[#allocation5 + $0x48] sm:$0xf] %v15733_v5  ;;  %v7734_v9 = vld [vmem:[#allocation2 + $0x14] sm:$0xff]  ;;  %v7092_v47 = vmax.f32 %v7073_v4, 0.0  ;;  %v15799_v8 = vpack.c.bf16 %v7598_v1, %v7598_v1 }
 0x5ad   : > { %7241 = vst [vmem:[#allocation5 + $0x6c] sm:$0xf] %v15734_v54  ;;  %7309 = vst [vmem:[#allocation5 + $0x4c] sm:$0xf] %v15744_v58  ;;  %v7168_v42 = vmul.f32 %v19652_v27, %v7091_v53  ;;  %v7464_v52 = vld [vmem:[#allocation2 + $0x3a] sm:$0xff]  ;;  %v15819_v14 = vpack.c.bf16 %v7734_v9, %v7734_v9  ;;  %v7187_v22 = vld [vmem:[#allocation2 + $0x28] sm:$0xff] }
 0x5ae   : > { %7446 = vst [vmem:[#allocation5 + $0x30] sm:$0xf] %v15744_v58  ;;  %7310 = vst [vmem:[#allocation5 + $0x70] sm:$0xf] %v15745_v20  ;;  %v7735_v11 = vld [vmem:[#allocation2 + $0x1c] sm:$0xff]  ;;  %v7256_v16 = vld [vmem:[#allocation2 + $0x29] sm:$0xff]  ;;  %v15781_v27 = vpack.c.bf16 %v7464_v52, %v7464_v52  ;;  %v7169_v25 = vmul.f32 %v7153_v19, %v7092_v47  ;;  %v15736_v31 = vpack.c.bf16 %v7187_v22, %v7187_v22 }
 0x5af   : > { %7447 = vst [vmem:[#allocation5 + $0x54] sm:$0xf] %v15745_v20  ;;  %7382 = vst [vmem:[#allocation5 + $0xe0] sm:$0xf] %v15759_v60  ;;  %v7530_v24 = vld [vmem:[#allocation2 + $0x23] sm:$0xff]  ;;  %v15820_v28 = vpack.c.bf16 %v7735_v11, %v7735_v11  ;;  %v15747_v32 = vpack.c.bf16 %v7256_v16, %v7256_v16  ;;  %v15762_v34 = vpack.c.bf16 %v7168_v42, %v7168_v42  ;;  %v7533_v35 = vld [vmem:[#allocation2 + $0x3b] sm:$0xff] }
 0x5b0   : > { %7384 = vst [vmem:[#allocation5 + $0x128] sm:$0xf] %v15761_v3  ;;  %7519 = vst [vmem:[#allocation5 + $0xc4] sm:$0xf] %v15759_v60  ;;  %v17906_v21 = vld [vmem:[%s20954_s1 + $0x548] sm:$0xff]   ;;  %v7190_v33 = vld [vmem:[#allocation2 + $0x40] sm:$0xff]  ;;  %v15789_v13 = vpack.c.bf16 %v7530_v24, %v7530_v24  ;;  %v15792_v41 = vpack.c.bf16 %v7533_v35, %v7533_v35  ;;  %v15784_v45 = vpack.c.bf16 %v7169_v25, %v7169_v25 }
 0x5b1   : > { %7521 = vst [vmem:[#allocation5 + $0x10c] sm:$0xf] %v15761_v3  ;;  %7583 = vst [vmem:[#allocation5 + $0x14] sm:$0xf] %v15786_v62  ;;  %v7259_v36 = vld [vmem:[#allocation2 + $0x41] sm:$0xff]  ;;  %v15739_v38 = vpack.c.bf16 %v7190_v33, %v7190_v33  ;;  %v7188_v0 = vld [vmem:[#allocation2 + $0x30] sm:$0xff] }
 0x5b2   : > { %7584 = vst [vmem:[#allocation5 + $0x38] sm:$0xf] %v15787_v2  ;;  %7721 = vst [vmem:[#allocation5 + $0x1c] sm:$0xf] %v15787_v2  ;;  %v19672_v37 = vld [vmem:[#allocation3 + $0x1d] sm:$0x1]  ;;  %v15750_v39 = vpack.c.bf16 %v7259_v36, %v7259_v36  ;;  %v15737_v48 = vpack.c.bf16 %v7188_v0, %v7188_v0 }
 0x5b3   : > { %7181 = vst [vmem:[#allocation2 + $0x5a] sm:$0x1] %v7170_v10  ;;  %7585 = vst [vmem:[#allocation5 + $0x5c] sm:$0xf] %v15788_v7  ;;  %v17899_v40 = vld [vmem:[#allocation5 + $0x4] ss:$36 sps:$4 sm:$0xff]   ;;  %v15845_v51 = vpack.c.bf16 %v19672_v37, %v19672_v37 }
 0x5b4   : > { %7652 = vst [vmem:[#allocation5 + $0x18] sm:$0xf] %v15797_v6  ;;  %7722 = vst [vmem:[#allocation5 + $0x40] sm:$0xf] %v15788_v7  ;;  %v17901_v29 = vld [vmem:[#allocation5] ss:$36 sps:$4 sm:$0xff]   ;;  %8733 = vmatprep.mubr.bf16.mxu1 %v17899_v40 }
 0x5b5   : > { %7179 = vst [vmem:[#allocation2 + $0x4a] sm:$0xff] %v7168_v42  ;;  %7654 = vst [vmem:[#allocation5 + $0x60] sm:$0xf] %v15799_v8  ;;  %v7189_v43 = vld [vmem:[#allocation2 + $0x38] sm:$0xff]  ;;  %v17907_v46 = vld [vmem:[%s20954_s1 + $0x508] sm:$0xff]   ;;  %8734 = vmatmul.mubr.bf16.vlgmr.msra.gmra.mrb[108].mxu1 %v17901_v29 }
 0x5b6   : > { %7790 = vst [vmem:[#allocation5 + $0x20] sm:$0xf] %v15819_v14  ;;  %7520 = vst [vmem:[#allocation5 + $0xe8] sm:$0xf] %v15781_v27  ;;  %v15738_v50 = vpack.c.bf16 %v7189_v43, %v7189_v43  ;;  %v7257_v49 = vld [vmem:[#allocation2 + $0x31] sm:$0xff]  ;;  %v7258_v18 = vld [vmem:[#allocation2 + $0x39] sm:$0xff]  ;;  %16240 = vmatpush3.bf16.msra.mxu1 %v19665_v57 }
 0x5b7   : > { %7657 = vst [vmem:[#allocation5 + $0xcc] sm:$0xf] %v15781_v27  ;;  %7791 = vst [vmem:[#allocation5 + $0x44] sm:$0xf] %v15820_v28  ;;  %v17903_v55 = vld [vmem:[#allocation5 + $0x4c] ss:$36 sps:$4 sm:$0xff]   ;;  %v15748_v12 = vpack.c.bf16 %v7257_v49, %v7257_v49  ;;  %v15749_v58 = vpack.c.bf16 %v7258_v18, %v7258_v18  ;;  %16241 = vmatprep.subr.bf16.mxu1 %v17906_v21 }
 0x5b8   : > { %7180 = vst [vmem:[#allocation2 + $0x52] sm:$0xff] %v7169_v25  ;;  %7243 = vst [vmem:[#allocation5 + $0xb4] sm:$0xf] %v15736_v31  ;;  %v9224_v5 = vld [vmem:[#allocation5 + $0x70] sm:$0x1]  ;;  %v17910_v54 = vld [vmem:[%s20954_s1 + $0x550] sm:$0xff]   ;;  %8741 = vmatprep.mubr.bf16.mxu1 %v17903_v55 }
 0x5b9   : > { %7312 = vst [vmem:[#allocation5 + $0xb8] sm:$0xf] %v15747_v32  ;;  %7449 = vst [vmem:[#allocation5 + $0x9c] sm:$0xf] %v15747_v32  ;;  %v9225_v30 = vsel %vm18555_vm2, %v15837_v56, %v9224_v5  ;;  %v9250_v59 = vld [vmem:[#allocation5 + $0x74] sm:$0x1] }
 0x5ba   : > { %7385 = vst [vmem:[#allocation5 + $0x14c] sm:$0xf] %v15762_v34  ;;  %7522 = vst [vmem:[#allocation5 + $0x130] sm:$0xf] %v15762_v34  ;;  %v7957_v20 = vld [vmem:[#allocation5 + $0x48] sm:$0xff]  ;;  %v9251_v10 = vsel %vm18555_vm2, %v15841_v17, %v9250_v59  ;;  %16242 = vmatpush3.bf16.msra.mxu1 %v17907_v46  ;;  %v17915_v42 = vld [vmem:[%s20954_s1 + $0x558] sm:$0xff]  }
 0x5bb   : > { %7246 = vst [vmem:[#allocation5 + $0x120] sm:$0xf] %v15739_v38  ;;  %7315 = vst [vmem:[#allocation5 + $0x124] sm:$0xf] %v15750_v39  ;;  %v7962_v60 = vld [vmem:[#allocation5 + $0x6c] sm:$0xff]  ;;  %16243 = vmatprep.subr.bf16.mxu1 %v17910_v54  ;;  %v17918_v31 = vld [vmem:[%s20954_s1 + $0x560] sm:$0xff]  }
 0x5bc   : > { %7452 = vst [vmem:[#allocation5 + $0x108] sm:$0xf] %v15750_v39  ;;  %7586 = vst [vmem:[#allocation5 + $0x80] sm:$0xf] %v15789_v13  ;;  %v7317_v3 = vld [vmem:[#allocation5 + $0x16c] sm:$0x1]  ;;  %v14699_v19 = vcombine.low %v7957_v20, %v7962_v60 }
 0x5bd   : > { %7589 = vst [vmem:[#allocation5 + $0xec] sm:$0xf] %v15792_v41  ;;  %7723 = vst [vmem:[#allocation5 + $0x64] sm:$0xf] %v15789_v13  ;;  %v17911_v61 = vld [vmem:[%s20954_s1 + $0x510] sm:$0xff]   ;;  %v7191_v63 = vld [vmem:[#allocation2 + $0x48] sm:$0xff] }
 0x5be   : > { %7726 = vst [vmem:[#allocation5 + $0xd0] sm:$0xf] %v15792_v41  ;;  %7523 = vst [vmem:[#allocation5 + $0x154] sm:$0xf] %v15784_v45  ;;  %v7260_v26 = vld [vmem:[#allocation2 + $0x49] sm:$0xff]  ;;  %v15740_v44 = vpack.c.bf16 %v7191_v63, %v7191_v63  ;;  %8742 = vmatmul.mubr.bf16.gmra.mrb[112].mxu1 %v14699_v19  ;;  %v17916_v24 = vld [vmem:[%s20954_s1 + $0x518] sm:$0xff]  }
 0x5bf   : > { %7244 = vst [vmem:[#allocation5 + $0xd8] sm:$0xf] %v15737_v48  ;;  %7245 = vst [vmem:[#allocation5 + $0xfc] sm:$0xf] %v15738_v50  ;;  %v7192_v53 = vld [vmem:[#allocation2 + $0x50] sm:$0x1]  ;;  %v15751_v62 = vpack.c.bf16 %v7260_v26, %v7260_v26  ;;  %16244 = vmatpush3.bf16.msra.mxu1 %v17911_v61 }
 0x5c0   : > { %9226 = vst [vmem:[#allocation5 + $0x70] sm:$0x1] %v9225_v30  ;;  %7313 = vst [vmem:[#allocation5 + $0xdc] sm:$0xf] %v15748_v12  ;;  %v7248_v4 = vld [vmem:[#allocation5 + $0x168] sm:$0x1]  ;;  %v15741_v2 = vpack.c.bf16 %v7192_v53, %v7192_v53  ;;  %16245 = vmatprep.subr.bf16.mxu1 %v17915_v42 }
 0x5c1   : > { %7314 = vst [vmem:[#allocation5 + $0x100] sm:$0xf] %v15749_v58  ;;  %7450 = vst [vmem:[#allocation5 + $0xc0] sm:$0xf] %v15748_v12  ;;  %v7261_v1 = vld [vmem:[#allocation2 + $0x51] sm:$0x1] }
 0x5c2   : > { %7451 = vst [vmem:[#allocation5 + $0xe4] sm:$0xf] %v15749_v58  ;;  %v19693_v9 = vld [vmem:[#allocation5 + $0x54] ss:$36 sps:$4 sm:$0xff]   ;;  %v15752_v47 = vpack.c.bf16 %v7261_v1, %v7261_v1  ;;  %9252 = vst [vmem:[#allocation5 + $0x74] sm:$0x1] %v9251_v10  ;;  %v7249_v56 = vsel %vm18555_vm2, %v15741_v2, %v7248_v4 }
 0x5c3   : > { %v9276_v7 = vld [vmem:[#allocation5 + $0x78] sm:$0x1]  ;;  %v7386_v8 = vld [vmem:[#allocation5 + $0x170] sm:$0x1]  ;;  %v7455_v11 = vld [vmem:[#allocation5 + $0x174] sm:$0x1]  ;;  %16246 = vmatpush3.bf16.msra.mxu1 %v17916_v24 }
 0x5c4   : > { %v17908_v6 = vld [vmem:[#allocation5 + $0x94] ss:$36 sps:$4 sm:$0xff]   ;;  %v9277_v52 = vsel %vm18555_vm2, %v15845_v51, %v9276_v7  ;;  %v9282_v14 = vld [vmem:[#allocation3 + $0x1e] sm:$0x1]  ;;  %7247 = vst [vmem:[#allocation5 + $0x144] sm:$0xf] %v15740_v44  ;;  %v7318_v57 = vsel %vm18555_vm2, %v15752_v47, %v7317_v3  ;;  %16247 = vmatprep.subr.bf16.mxu1 %v17918_v31 }
 0x5c5   : > { %7316 = vst [vmem:[#allocation5 + $0x148] sm:$0xf] %v15751_v62  ;;  %9278 = vst [vmem:[#allocation5 + $0x78] sm:$0x1] %v9277_v52  ;;  %v7398_v22 = vld [vmem:[#allocation2 + $0x51] sm:$0xff]  ;;  %8749 = vmatprep.mubr.bf16.mxu1 %v17908_v6  ;;  %v15849_v36 = vpack.c.bf16 %v9282_v14, %v9282_v14  ;;  %v17921_v35 = vld [vmem:[%s20954_s1 + $0x520] sm:$0xff]  }
 0x5c6   : > { %7453 = vst [vmem:[#allocation5 + $0x12c] sm:$0xf] %v15751_v62  ;;  %7250 = vst [vmem:[#allocation5 + $0x168] sm:$0x1] %v7249_v56  ;;  %v7330_v16 = vld [vmem:[#allocation2 + $0x52] sm:$0x1]  ;;  %v15773_v27 = vpack.c.bf16 %v7398_v22, %v7398_v22 }
 0x5c7   : > { %v7399_v23 = vld [vmem:[#allocation2 + $0x59] sm:$0x1]  ;;  %7319 = vst [vmem:[#allocation5 + $0x16c] sm:$0x1] %v7318_v57  ;;  %v15763_v28 = vpack.c.bf16 %v7330_v16, %v7330_v16  ;;  %v9308_v21 = vld [vmem:[#allocation3 + $0x1f] sm:$0x1]  ;;  %16248 = vmatpush3.bf16.msra.mxu1 %v17921_v35 }
 0x5c8   : > { %v15774_v25 = vpack.c.bf16 %v7399_v23, %v7399_v23  ;;  %7454 = vst [vmem:[#allocation5 + $0x150] sm:$0xf] %v15773_v27  ;;  %v9302_v37 = vld [vmem:[#allocation5 + $0x7c] sm:$0x1]  ;;  %v15853_v34 = vpack.c.bf16 %v9308_v21, %v9308_v21  ;;  %v17922_v40 = vld [vmem:[%s20954_s1 + $0x568] sm:$0xff]   ;;  %v7532_v45 = vld [vmem:[#allocation2 + $0x33] sm:$0xff] }
 0x5c9   : > { %v7387_v32 = vsel %vm18555_vm2, %v15763_v28, %v7386_v8  ;;  %v17912_v29 = vld [vmem:[#allocation5 + $0x90] ss:$36 sps:$4 sm:$0xff]   ;;  %v19722_v38 = vld [vmem:[#allocation5 + $0x5c] ss:$36 sps:$4 sm:$0xff]   ;;  %v9303_v39 = vsel %vm18555_vm2, %v15849_v36, %v9302_v37  ;;  %v15791_v49 = vpack.c.bf16 %v7532_v45, %v7532_v45  ;;  %16249 = vmatprep.subr.bf16.mxu1 %v17922_v40  ;;  %v17926_v55 = vld [vmem:[%s20954_s1 + $0x570] sm:$0xff]  }
 0x5ca   : > { %v7456_v33 = vsel %vm18555_vm2, %v15774_v25, %v7455_v11  ;;  %7388 = vst [vmem:[#allocation5 + $0x170] sm:$0x1] %v7387_v32  ;;  %v17913_v13 = vld [vmem:[#allocation5 + $0xdc] ss:$36 sps:$4 sm:$0xff]   ;;  %9304 = vst [vmem:[#allocation5 + $0x7c] sm:$0x1] %v9303_v39  ;;  %8750 = vmatmul.mubr.bf16.gmra.mrb[116].mxu1 %v17912_v29 }
 0x5cb   : > { %7457 = vst [vmem:[#allocation5 + $0x174] sm:$0x1] %v7456_v33  ;;  %v9328_v41 = vld [vmem:[#allocation5 + $0x80] sm:$0x1]  ;;  %v7531_v0 = vld [vmem:[#allocation2 + $0x2b] sm:$0xff]  ;;  %8757 = vmatprep.mubr.bf16.mxu1 %v17913_v13  ;;  %v7536_v54 = vld [vmem:[#allocation2 + $0x53] sm:$0xff] }
 0x5cc   : > { %v9329_v43 = vsel %vm18555_vm2, %v15853_v34, %v9328_v41  ;;  %v15790_v46 = vpack.c.bf16 %v7531_v0, %v7531_v0  ;;  %v7534_v48 = vld [vmem:[#allocation2 + $0x43] sm:$0xff]  ;;  %v7535_v5 = vld [vmem:[#allocation2 + $0x4b] sm:$0xff]  ;;  %7588 = vst [vmem:[#allocation5 + $0xc8] sm:$0xf] %v15791_v49  ;;  %v15795_v58 = vpack.c.bf16 %v7536_v54, %v7536_v54  ;;  %v7468_v17 = vld [vmem:[#allocation2 + $0x5a] sm:$0x1] }
 0x5cd   : > { %v17923_v50 = vld [vmem:[%s20954_s1 + $0x528] sm:$0xff]   ;;  %9330 = vst [vmem:[#allocation5 + $0x80] sm:$0x1] %v9329_v43  ;;  %v15793_v18 = vpack.c.bf16 %v7534_v48, %v7534_v48  ;;  %v15794_v12 = vpack.c.bf16 %v7535_v5, %v7535_v5  ;;  %v7524_v30 = vld [vmem:[#allocation5 + $0x178] sm:$0x1]  ;;  %v15785_v59 = vpack.c.bf16 %v7468_v17, %v7468_v17  ;;  %v17927_v51 = vld [vmem:[%s20954_s1 + $0x530] sm:$0xff]  }
 0x5ce   : > { %7587 = vst [vmem:[#allocation5 + $0xa4] sm:$0xf] %v15790_v46  ;;  %7724 = vst [vmem:[#allocation5 + $0x88] sm:$0xf] %v15790_v46  ;;  %16250 = vmatpush3.bf16.msra.mxu1 %v17923_v50  ;;  %v9360_v20 = vld [vmem:[#allocation3 + $0x23] sm:$0x1] }
 0x5cf   : > { %7590 = vst [vmem:[#allocation5 + $0x110] sm:$0xf] %v15793_v18  ;;  %7725 = vst [vmem:[#allocation5 + $0xac] sm:$0xf] %v15791_v49  ;;  %v17917_v60 = vld [vmem:[#allocation5 + $0xd8] ss:$36 sps:$4 sm:$0xff]   ;;  %16251 = vmatprep.subr.bf16.mxu1 %v17926_v55  ;;  %v7525_v61 = vsel %vm18555_vm2, %v15785_v59, %v7524_v30  ;;  %v15861_v14 = vpack.c.bf16 %v9360_v20, %v9360_v20 }
 0x5d0   : > { %7727 = vst [vmem:[#allocation5 + $0xf4] sm:$0xf] %v15793_v18  ;;  %7591 = vst [vmem:[#allocation5 + $0x134] sm:$0xf] %v15794_v12  ;;  %v17931_v3 = vld [vmem:[%s20954_s1 + $0x578] sm:$0xff]   ;;  %v7599_v63 = vld [vmem:[#allocation2 + $0x2a] sm:$0xff] }
 0x5d1   : > { %7592 = vst [vmem:[#allocation5 + $0x158] sm:$0xf] %v15795_v58  ;;  %7728 = vst [vmem:[#allocation5 + $0x118] sm:$0xf] %v15794_v12  ;;  %v17919_v26 = vld [vmem:[#allocation5 + $0x124] ss:$36 sps:$4 sm:$0xff]   ;;  %v15800_v53 = vpack.c.bf16 %v7599_v63, %v7599_v63 }
 0x5d2   : > { %7729 = vst [vmem:[#allocation5 + $0x13c] sm:$0xf] %v15795_v58  ;;  %7526 = vst [vmem:[#allocation5 + $0x178] sm:$0x1] %v7525_v61  ;;  %v7600_v4 = vld [vmem:[#allocation2 + $0x32] sm:$0xff]  ;;  %8758 = vmatmul.mubr.bf16.gmra.mrb[120].mxu1 %v17917_v60  ;;  %v7602_v2 = vld [vmem:[#allocation2 + $0x42] sm:$0xff] }
 0x5d3   : > { %v9334_v44 = vld [vmem:[#allocation3 + $0x22] sm:$0x1]  ;;  %v15801_v62 = vpack.c.bf16 %v7600_v4, %v7600_v4  ;;  %v7604_v10 = vld [vmem:[#allocation2 + $0x52] sm:$0xff]  ;;  %8765 = vmatprep.mubr.bf16.mxu1 %v17919_v26  ;;  %16252 = vmatpush3.bf16.msra.mxu1 %v17927_v51  ;;  %7655 = vst [vmem:[#allocation5 + $0x84] sm:$0xf] %v15800_v53  ;;  %v9333_v6 = vld [vmem:[#allocation3 + $0x1a] sm:$0xff]  ;;  %v15803_v42 = vpack.c.bf16 %v7602_v2, %v7602_v2 }
 0x5d4   : > { %v7603_v1 = vld [vmem:[#allocation2 + $0x4a] sm:$0xff]  ;;  %v17932_v7 = vld [vmem:[%s20954_s1 + $0x538] sm:$0xff]   ;;  %v15805_v52 = vpack.c.bf16 %v7604_v10, %v7604_v10  ;;  %16253 = vmatprep.subr.bf16.mxu1 %v17931_v3  ;;  %v17934_v8 = vld [vmem:[%s20954_s1 + $0x5c0] sm:$0xff]   ;;  %v15856_v57 = vpack.c.bf16 %v9333_v6, %v9333_v6  ;;  %v15857_v22 = vpack.c.bf16 %v9334_v44, %v9334_v44 }
 0x5d5   : > { %v15804_v47 = vpack.c.bf16 %v7603_v1, %v7603_v1  ;;  %v9359_v11 = vld [vmem:[#allocation3 + $0x1b] sm:$0xff]  ;;  %7656 = vst [vmem:[#allocation5 + $0xa8] sm:$0xf] %v15801_v62  ;;  %v9380_v19 = vld [vmem:[#allocation5 + $0x88] sm:$0x1]  ;;  %v7605_v23 = vld [vmem:[#allocation2 + $0x5a] sm:$0xff] }
 0x5d6   : > { %7658 = vst [vmem:[#allocation5 + $0xf0] sm:$0xf] %v15803_v42  ;;  %7660 = vst [vmem:[#allocation5 + $0x138] sm:$0xf] %v15805_v52  ;;  %v7997_v56 = vld [vmem:[#allocation5 + $0x168] sm:$0x11]  ;;  %v15860_v16 = vpack.c.bf16 %v9359_v11, %v9359_v11  ;;  %v9381_v27 = vsel %vm18555_vm2, %v15861_v14, %v9380_v19  ;;  %v15806_v28 = vpack.c.bf16 %v7605_v23, %v7605_v23 }
 0x5d7   : > { %7659 = vst [vmem:[#allocation5 + $0x114] sm:$0xf] %v15804_v47  ;;  %16254 = vmatpush3.bf16.msra.mxu1 %v17932_v7  ;;  %v17924_v24 = vld [vmem:[#allocation5 + $0x120] ss:$36 sps:$4 sm:$0xff]   ;;  %v14736_v25 = vcombine.high %v7997_v56, %v7997_v56  ;;  %v7738_v32 = vld [vmem:[#allocation2 + $0x34] sm:$0xff]  ;;  %v7739_v41 = vld [vmem:[#allocation2 + $0x3c] sm:$0xff]  ;;  %v14735_v18 = vcombine.low %v7997_v56, %v7997_v56 }
 0x5d8   : > { %16291 = vmatprep.subr.bf16.mxu1 %v17934_v8  ;;  %v7736_v21 = vld [vmem:[#allocation2 + $0x24] sm:$0xff]  ;;  %v7737_v31 = vld [vmem:[#allocation2 + $0x2c] sm:$0xff]  ;;  %7661 = vst [vmem:[#allocation5 + $0x15c] sm:$0xf] %v15806_v28  ;;  %v15823_v35 = vpack.c.bf16 %v7738_v32, %v7738_v32  ;;  %9353 = vst [vmem:[#allocation5 + $0x60] sm:$0xf] %v15856_v57  ;;  %v15824_v45 = vpack.c.bf16 %v7739_v41, %v7739_v41 }
 0x5d9   : > { %v19750_v33 = vld [vmem:[#allocation5 + $0x64] ss:$36 sps:$4 sm:$0xff]   ;;  %v15821_v37 = vpack.c.bf16 %v7736_v21, %v7736_v21  ;;  %v15822_v34 = vpack.c.bf16 %v7737_v31, %v7737_v31  ;;  %v10568_v29 = vld [vmem:[#allocation3 + $0x23] sm:$0x1]  ;;  %v7742_v50 = vld [vmem:[#allocation2 + $0x54] sm:$0xff] }
 0x5da   : > { %8766 = vmatmul.mubr.bf16.gmra.mrb[124].mxu1 %v17924_v24  ;;  %v9354_v36 = vld [vmem:[#allocation5 + $0x84] sm:$0x1]  ;;  %9379 = vst [vmem:[#allocation5 + $0x64] sm:$0xf] %v15860_v16  ;;  %9382 = vst [vmem:[#allocation5 + $0x88] sm:$0x1] %v9381_v27  ;;  %v15897_v49 = vpack.c.bf16 %v10568_v29, %v10568_v29  ;;  %v15827_v55 = vpack.c.bf16 %v7742_v50, %v7742_v50 }
 0x5db   : > { %8773 = vmatprep.mubr.bf16.mxu1 %v14736_v25  ;;  %v9355_v40 = vsel %vm18555_vm2, %v15857_v22, %v9354_v36  ;;  %7792 = vst [vmem:[#allocation5 + $0x68] sm:$0xf] %v15821_v37  ;;  %7793 = vst [vmem:[#allocation5 + $0x8c] sm:$0xf] %v15822_v34  ;;  %v9385_v39 = vld [vmem:[#allocation3 + $0x1c] sm:$0xff]  ;;  %v7741_v43 = vld [vmem:[#allocation2 + $0x4c] sm:$0xff] }
 0x5dc   : > { %9356 = vst [vmem:[#allocation5 + $0x84] sm:$0x1] %v9355_v40  ;;  %7794 = vst [vmem:[#allocation5 + $0xb0] sm:$0xf] %v15823_v35  ;;  %v9386_v13 = vld [vmem:[#allocation3 + $0x24] sm:$0x1]  ;;  %v15826_v48 = vpack.c.bf16 %v7741_v43, %v7741_v43  ;;  %v15864_v12 = vpack.c.bf16 %v9385_v39, %v9385_v39 }
 0x5dd   : > { %v7740_v0 = vld [vmem:[#allocation2 + $0x44] sm:$0xff]  ;;  %v17929_v54 = vld [vmem:[#allocation5 + $0xc] ss:$36 sps:$4 sm:$0xff]   ;;  %v15865_v58 = vpack.c.bf16 %v9386_v13, %v9386_v13  ;;  %7795 = vst [vmem:[#allocation5 + $0xd4] sm:$0xf] %v15824_v45  ;;  %v7963_v7 = vld [vmem:[#allocation5 + $0x74] sm:$0xff] }
 0x5de   : > { %v15825_v46 = vpack.c.bf16 %v7740_v0, %v7740_v0  ;;  %v10542_v5 = vld [vmem:[#allocation3 + $0x22] sm:$0x1]  ;;  %7797 = vst [vmem:[#allocation5 + $0x11c] sm:$0xf] %v15826_v48  ;;  %7798 = vst [vmem:[#allocation5 + $0x140] sm:$0xf] %v15827_v55 }
 0x5df   : > { %v15893_v30 = vpack.c.bf16 %v10542_v5, %v10542_v5  ;;  %v17937_v63 = vld [vmem:[%s20954_s1 + $0x580] sm:$0xff]   ;;  %v17938_v26 = vld [vmem:[%s20954_s1 + $0x5c8] sm:$0xff]   ;;  %v17933_v44 = vld [vmem:[#allocation5 + $0x8] ss:$36 sps:$4 sm:$0xff]  }
 0x5e0   : > { %7796 = vst [vmem:[#allocation5 + $0xf8] sm:$0xf] %v15825_v46  ;;  %v10594_v4 = vld [vmem:[#allocation3 + $0x24] sm:$0x1]  ;;  %v7958_v1 = vld [vmem:[#allocation5 + $0x50] sm:$0xff]  ;;  %v17942_v10 = vld [vmem:[%s20954_s1 + $0x5d0] sm:$0xff]  }
 0x5e1   : > { %v10588_v17 = vld [vmem:[#allocation5 + $0x88] sm:$0x1]  ;;  %v17939_v62 = vld [vmem:[%s20954_s1 + $0x588] sm:$0xff]   ;;  %v15901_v2 = vpack.c.bf16 %v10594_v4, %v10594_v4  ;;  %v14701_v52 = vcombine.low %v7958_v1, %v7963_v7  ;;  %v17947_v8 = vld [vmem:[%s20954_s1 + $0x5d8] sm:$0xff]  }
 0x5e2   : > { %8774 = vmatmul.mubr.bf16.gmra.mrb[128].mxu1 %v14735_v18  ;;  %v10589_v59 = vsel %vm18555_vm2, %v15897_v49, %v10588_v17  ;;  %v19756_v51 = vld [vmem:[#allocation5 + $0x68] ss:$36 sps:$4 sm:$0xff]   ;;  %v17940_v11 = vld [vmem:[#allocation5 + $0x9c] ss:$36 sps:$4 sm:$0xff]   ;;  %v17948_v14 = vld [vmem:[%s20954_s1 + $0x598] sm:$0xff]  }
 0x5e3   : > { %8813 = vmatprep.mubr.bf16.mxu1 %v17929_v54  ;;  %v9406_v20 = vld [vmem:[#allocation5 + $0x8c] sm:$0x1]  ;;  %9405 = vst [vmem:[#allocation5 + $0x68] sm:$0xf] %v15864_v12  ;;  %v10562_v61 = vld [vmem:[#allocation5 + $0x84] sm:$0x1] }
 0x5e4   : > { %v9407_v60 = vsel %vm18555_vm2, %v15865_v58, %v9406_v20  ;;  %v19760_v3 = vld [vmem:[#allocation5 + $0x64] ss:$36 sps:$4 sm:$0x1f]   ;;  %v10563_v53 = vsel %vm18555_vm2, %v15893_v30, %v10562_v61  ;;  %v17950_v19 = vld [vmem:[%s20954_s1 + $0x5e0] sm:$0xff]   ;;  %v17963_v25 = vld [vmem:[%s20954_s1 + $0x5f8] sm:$0xff]  }
 0x5e5   : > { %9408 = vst [vmem:[#allocation5 + $0x8c] sm:$0x1] %v9407_v60  ;;  %10590 = vst [vmem:[#allocation5 + $0x88] sm:$0x1] %v10589_v59  ;;  %v17953_v56 = vld [vmem:[%s20954_s1 + $0x5a0] sm:$0xff]   ;;  %v17954_v22 = vld [vmem:[%s20954_s1 + $0x5e8] sm:$0xff]  }
 0x5e6   : > { %10564 = vst [vmem:[#allocation5 + $0x84] sm:$0x1] %v10563_v53  ;;  %v17944_v57 = vld [vmem:[#allocation5 + $0x98] ss:$36 sps:$4 sm:$0xff]   ;;  %v17945_v16 = vld [vmem:[#allocation5 + $0xe4] ss:$36 sps:$4 sm:$0xff]  }
 0x5e7   : > { %v17955_v23 = vld [vmem:[%s20954_s1 + $0x5a8] sm:$0xff]   ;;  %v17958_v24 = vld [vmem:[%s20954_s1 + $0x5f0] sm:$0xff]   ;;  %v17964_v31 = vld [vmem:[%s20954_s1 + $0x5b8] sm:$0xff]  }
 0x5e8   : > { %v17959_v27 = vld [vmem:[%s20954_s1 + $0x5b0] sm:$0xff]   ;;  %v17949_v28 = vld [vmem:[#allocation5 + $0xe0] ss:$36 sps:$4 sm:$0xff]   ;;  %v17966_v32 = vld [vmem:[%s20954_s1 + $0x640] sm:$0xff]  }
 0x5e9   : > { %v17951_v21 = vld [vmem:[#allocation5 + $0x12c] ss:$36 sps:$4 sm:$0xff]   ;;  %v17961_v40 = vld [vmem:[#allocation5 + $0x14] ss:$36 sps:$4 sm:$0xff]   ;;  %v17970_v13 = vld [vmem:[%s20954_s1 + $0x648] sm:$0xff]  }
 0x5ea   : > { %8814 = vmatmul.mubr.bf16.vlgmr.msra.gmra.mrb[132].mxu1 %v17933_v44  ;;  %v7998_v36 = vld [vmem:[#allocation5 + $0x170] sm:$0x11]  ;;  %v17956_v37 = vld [vmem:[#allocation5 + $0x128] ss:$36 sps:$4 sm:$0xff]   ;;  %v17969_v29 = vld [vmem:[%s20954_s1 + $0x600] sm:$0xff]  }
 0x5eb   : > { %8821 = vmatprep.mubr.bf16.mxu1 %v19693_v9  ;;  %16292 = vmatpush3.bf16.msra.mxu1 %v17937_v63  ;;  %v17943_v9 = vld [vmem:[%s20954_s1 + $0x590] sm:$0xff]   ;;  %v14738_v34 = vcombine.high %v7998_v36, %v7998_v36  ;;  %v14737_v35 = vcombine.low %v7998_v36, %v7998_v36  ;;  %v17965_v39 = vld [vmem:[#allocation5 + $0x10] ss:$36 sps:$4 sm:$0xff]   ;;  %v17971_v41 = vld [vmem:[%s20954_s1 + $0x608] sm:$0xff]  }
 0x5ec   : > { %16293 = vmatprep.subr.bf16.mxu1 %v17938_v26  ;;  %v19777_v6 = vld [vmem:[#allocation5 + $0x68] ss:$36 sps:$4 sm:$0x1f]   ;;  %v7964_v43 = vld [vmem:[#allocation5 + $0x7c] sm:$0xff]  ;;  %v17980_v49 = vld [vmem:[%s20954_s1 + $0x618] sm:$0xff]  }
 0x5ed   : > { %v10614_v42 = vld [vmem:[#allocation5 + $0x8c] sm:$0x1]  ;;  %v7959_v45 = vld [vmem:[#allocation5 + $0x58] sm:$0xff]  ;;  %v17972_v50 = vld [vmem:[#allocation5 + $0xa4] ss:$36 sps:$4 sm:$0xff]  }
 0x5ee   : > { %v10615_v47 = vsel %vm18555_vm2, %v15901_v2, %v10614_v42  ;;  %v17974_v0 = vld [vmem:[%s20954_s1 + $0x650] sm:$0xff]   ;;  %v14703_v48 = vcombine.low %v7959_v45, %v7964_v43  ;;  %v17982_v18 = vld [vmem:[%s20954_s1 + $0x660] sm:$0xff]   ;;  %v17976_v5 = vld [vmem:[#allocation5 + $0xa0] ss:$36 sps:$4 sm:$0xff]  }
 0x5ef   : > { %16294 = vmatpush3.bf16.msra.mxu1 %v17939_v62  ;;  %10616 = vst [vmem:[#allocation5 + $0x8c] sm:$0x1] %v10615_v47  ;;  %v17975_v46 = vld [vmem:[%s20954_s1 + $0x610] sm:$0xff]   ;;  %v17985_v55 = vld [vmem:[%s20954_s1 + $0x620] sm:$0xff]   ;;  %v17986_v54 = vld [vmem:[%s20954_s1 + $0x668] sm:$0xff]  }
 0x5f0   : > { %16295 = vmatprep.subr.bf16.mxu1 %v17942_v10  ;;  %v17977_v12 = vld [vmem:[#allocation5 + $0xec] ss:$36 sps:$4 sm:$0xff]   ;;  %v17987_v58 = vld [vmem:[%s20954_s1 + $0x628] sm:$0xff]   ;;  %v17983_v60 = vld [vmem:[#allocation5 + $0x134] ss:$36 sps:$4 sm:$0xff]  }
 0x5f1   : > { %v17990_v17 = vld [vmem:[%s20954_s1 + $0x670] sm:$0xff]   ;;  %v17995_v20 = vld [vmem:[%s20954_s1 + $0x678] sm:$0xff]   ;;  %v17998_v63 = vld [vmem:[%s20954_s1 + $0x680] sm:$0xff]  }
 0x5f2   : > { %8822 = vmatmul.mubr.bf16.gmra.mrb[136].mxu1 %v14701_v52  ;;  %v17991_v30 = vld [vmem:[%s20954_s1 + $0x630] sm:$0xff]   ;;  %v17996_v61 = vld [vmem:[%s20954_s1 + $0x638] sm:$0xff]   ;;  %v7999_v26 = vld [vmem:[#allocation5 + $0x178] sm:$0x11] }
 0x5f3   : > { %8829 = vmatprep.mubr.bf16.mxu1 %v17940_v11  ;;  %16296 = vmatpush3.bf16.msra.mxu1 %v17943_v9  ;;  %v17981_v59 = vld [vmem:[#allocation5 + $0xe8] ss:$36 sps:$4 sm:$0xff]   ;;  %v17988_v53 = vld [vmem:[#allocation5 + $0x130] ss:$36 sps:$4 sm:$0xff]   ;;  %v14740_v4 = vcombine.high %v7999_v26, %v7999_v26  ;;  %v14739_v44 = vcombine.low %v7999_v26, %v7999_v26  ;;  %v17993_v62 = vld [vmem:[#allocation5 + $0x1c] ss:$36 sps:$4 sm:$0xff]  }
 0x5f4   : > { %16297 = vmatprep.subr.bf16.mxu1 %v17947_v8  ;;  %v17997_v2 = vld [vmem:[#allocation5 + $0x18] ss:$36 sps:$4 sm:$0xff]   ;;  %v18001_v1 = vld [vmem:[%s20954_s1 + $0x688] sm:$0xff]   ;;  %v18004_v10 = vld [vmem:[%s20954_s1 + $0x690] sm:$0xff]  }
 0x5f5   : > { %v7965_v7 = vld [vmem:[#allocation5 + $0x84] sm:$0xff]  ;;  %v18008_v47 = vld [vmem:[%s20954_s1 + $0x698] sm:$0xff]  }
 0x5f6   : > { %v7960_v42 = vld [vmem:[#allocation5 + $0x60] sm:$0xff]  ;;  %v18002_v52 = vld [vmem:[#allocation5 + $0xac] ss:$36 sps:$4 sm:$0xff]  }
 0x5f7   : > { %16298 = vmatpush3.bf16.msra.mxu1 %v17948_v14  ;;  %v14705_v9 = vcombine.low %v7960_v42, %v7965_v7  ;;  %v18005_v8 = vld [vmem:[#allocation5 + $0xa8] ss:$36 sps:$4 sm:$0xff]   ;;  %v18013_v11 = vld [vmem:[%s20954_s1 + $0x6a8] sm:$0xff]   ;;  %v18006_v14 = vld [vmem:[#allocation5 + $0xf4] ss:$36 sps:$4 sm:$0xff]  }
 0x5f8   : > { %16299 = vmatprep.subr.bf16.mxu1 %v17950_v19  ;;  %v18015_v19 = vld [vmem:[%s20954_s1 + $0x6b0] sm:$0xff]  }
 0x5fa   : > { %8830 = vmatmul.mubr.bf16.gmra.mrb[140].mxu1 %v17944_v57  ;;  %v18019_v57 = vld [vmem:[%s20954_s1 + $0x6b8] sm:$0xff]  }
 0x5fb   : > { %8837 = vmatprep.mubr.bf16.mxu1 %v17945_v16  ;;  %16300 = vmatpush3.bf16.msra.mxu1 %v17953_v56  ;;  %v18009_v56 = vld [vmem:[#allocation5 + $0xf0] ss:$36 sps:$4 sm:$0xff]   ;;  %v8000_v16 = vld [vmem:[#allocation5 + $0x180] sm:$0x11] }
 0x5fc   : > { %16301 = vmatprep.subr.bf16.mxu1 %v17954_v22  ;;  %v18011_v22 = vld [vmem:[#allocation5 + $0x13c] ss:$36 sps:$4 sm:$0xff]  }
 0x5ff   : > { %16302 = vmatpush3.bf16.msra.mxu1 %v17955_v23  ;;  %v14742_v23 = vcombine.high %v8000_v16, %v8000_v16 }
 0x600   : > { %16303 = vmatprep.subr.bf16.mxu1 %v17958_v24  ;;  %v18014_v24 = vld [vmem:[#allocation5 + $0x138] ss:$36 sps:$4 sm:$0xff]  }
 0x602   : > { %8838 = vmatmul.mubr.bf16.gmra.mrb[144].mxu1 %v17949_v28  ;;  %v18018_v28 = vld [vmem:[#allocation5 + $0x20] ss:$36 sps:$4 sm:$0xff]  }
 0x603   : > { %8845 = vmatprep.mubr.bf16.mxu1 %v17951_v21  ;;  %16304 = vmatpush3.bf16.msra.mxu1 %v17959_v27  ;;  %v14741_v27 = vcombine.low %v8000_v16, %v8000_v16  ;;  %v18022_v21 = vld [vmem:[#allocation5 + $0xf8] ss:$36 sps:$4 sm:$0xff]  }
 0x604   : > { %16305 = vmatprep.subr.bf16.mxu1 %v17963_v25  ;;  %v18021_v25 = vld [vmem:[#allocation5 + $0xb0] ss:$36 sps:$4 sm:$0xff]  }
 0x607   : > { %16306 = vmatpush3.bf16.msra.mxu1 %v17964_v31  ;;  %v18023_v31 = vld [vmem:[#allocation5 + $0x140] ss:$36 sps:$4 sm:$0xff]  }
 0x608   : > { %16343 = vmatprep.subr.bf16.mxu1 %v17966_v32  ;;  %v18024_v32 = vld [vmem:[#allocation5 + $0x188] ss:$0 sps:$4 sm:$0x11]  }
 0x60a   : > { %8846 = vmatmul.mubr.bf16.gmra.mrb[148].mxu1 %v17956_v37 }
 0x60b   : > { %8853 = vmatprep.mubr.bf16.mxu1 %v14738_v34 }
 0x612   : > { %8854 = vmatmul.mubr.bf16.gmra.mrb[152].mxu1 %v14737_v35 }
 0x613   : > { %8893 = vmatprep.mubr.bf16.mxu1 %v17961_v40 }
 0x61a   : > { %8894 = vmatmul.mubr.bf16.vlgmr.msra.gmra.mrb[156].mxu1 %v17965_v39 }
 0x61b   : > { %8901 = vmatprep.mubr.bf16.mxu1 %v19722_v38  ;;  %16344 = vmatpush3.bf16.msra.mxu1 %v17969_v29  ;;  %v17979_v38 = vld [vmem:[%s20954_s1 + $0x658] sm:$0xff]  }
 0x61c   : > { %16345 = vmatprep.subr.bf16.mxu1 %v17970_v13 }
 0x61f   : > { %16346 = vmatpush3.bf16.msra.mxu1 %v17971_v41 }
 0x620   : > { %16347 = vmatprep.subr.bf16.mxu1 %v17974_v0 }
 0x622   : > { %8902 = vmatmul.mubr.bf16.gmra.mrb[160].mxu1 %v14703_v48 }
 0x623   : > { %8909 = vmatprep.mubr.bf16.mxu1 %v17972_v50  ;;  %16348 = vmatpush3.bf16.msra.mxu1 %v17975_v46 }
 0x624   : > { %16349 = vmatprep.subr.bf16.mxu1 %v17979_v38 }
 0x627   : > { %16350 = vmatpush3.bf16.msra.mxu1 %v17980_v49 }
 0x628   : > { %16351 = vmatprep.subr.bf16.mxu1 %v17982_v18 }
 0x62a   : > { %8910 = vmatmul.mubr.bf16.gmra.mrb[164].mxu1 %v17976_v5 }
 0x62b   : > { %8917 = vmatprep.mubr.bf16.mxu1 %v17977_v12  ;;  %16352 = vmatpush3.bf16.msra.mxu1 %v17985_v55 }
 0x62c   : > { %16353 = vmatprep.subr.bf16.mxu1 %v17986_v54 }
 0x62f   : > { %16354 = vmatpush3.bf16.msra.mxu1 %v17987_v58 }
 0x630   : > { %16355 = vmatprep.subr.bf16.mxu1 %v17990_v17 }
 0x632   : > { %8918 = vmatmul.mubr.bf16.gmra.mrb[168].mxu1 %v17981_v59 }
 0x633   : > { %8925 = vmatprep.mubr.bf16.mxu1 %v17983_v60  ;;  %16356 = vmatpush3.bf16.msra.mxu1 %v17991_v30 }
 0x634   : > { %16357 = vmatprep.subr.bf16.mxu1 %v17995_v20 }
 0x637   : > { %16358 = vmatpush3.bf16.msra.mxu1 %v17996_v61 }
 0x638   : > { %16967 = vmatprep.subr.bf16.mxu1 %v17998_v63 }
 0x63a   : > { %8926 = vmatmul.mubr.bf16.gmra.mrb[172].mxu1 %v17988_v53 }
 0x63b   : > { %8933 = vmatprep.mubr.bf16.mxu1 %v14740_v4 }
 0x642   : > { %8934 = vmatmul.mubr.bf16.gmra.mrb[176].mxu1 %v14739_v44 }
 0x643   : > { %8973 = vmatprep.mubr.bf16.mxu1 %v17993_v62  ;;  %v14689_v62 = vld [vmem:[%s20955_s2 + $0x2] ss:$0 sm:$0xff] }
 0x64a   : > { %8974 = vmatmul.mubr.bf16.vlgmr.msra.gmra.mrb[180].mxu1 %v17997_v2 }
 0x64b   : > { %8981 = vmatprep.mubr.bf16.mxu1 %v19750_v33  ;;  %16968 = vmatpush3.bf16.msra.mxu1 %v17998_v63  ;;  %v18010_v33 = vld [vmem:[%s20954_s1 + $0x6a0] sm:$0xff]  }
 0x64c   : > { %16969 = vmatprep.subr.bf16.mxu1 %v18001_v1 }
 0x64f   : > { %16970 = vmatpush3.bf16.msra.mxu1 %v18001_v1 }
 0x650   : > { %16971 = vmatprep.subr.bf16.mxu1 %v18004_v10 }
 0x652   : > { %8982 = vmatmul.mubr.bf16.gmra.mrb[184].mxu1 %v14705_v9 }
 0x653   : > { %8989 = vmatprep.mubr.bf16.mxu1 %v18002_v52  ;;  %16972 = vmatpush3.bf16.msra.mxu1 %v18004_v10 }
 0x654   : > { %16973 = vmatprep.subr.bf16.mxu1 %v18008_v47 }
 0x657   : > { %16974 = vmatpush3.bf16.msra.mxu1 %v18008_v47 }
 0x658   : > { %16975 = vmatprep.subr.bf16.mxu1 %v18010_v33 }
 0x65a   : > { %8990 = vmatmul.mubr.bf16.gmra.mrb[188].mxu1 %v18005_v8 }
 0x65b   : > { %8997 = vmatprep.mubr.bf16.mxu1 %v18006_v14  ;;  %16976 = vmatpush3.bf16.msra.mxu1 %v18010_v33 }
 0x65c   : > { %16977 = vmatprep.subr.bf16.mxu1 %v18013_v11 }
 0x65f   : > { %16978 = vmatpush3.bf16.msra.mxu1 %v18013_v11 }
 0x660   : > { %16979 = vmatprep.subr.bf16.mxu1 %v18015_v19 }
 0x662   : > { %8998 = vmatmul.mubr.bf16.gmra.mrb[192].mxu1 %v18009_v56 }
 0x663   : > { %9005 = vmatprep.mubr.bf16.mxu1 %v18011_v22  ;;  %16980 = vmatpush3.bf16.msra.mxu1 %v18015_v19 }
 0x664   : > { %16981 = vmatprep.subr.bf16.mxu1 %v18019_v57 }
 0x667   : > { %16982 = vmatpush3.bf16.msra.mxu1 %v18019_v57 }
 0x66a   : > { %9006 = vmatmul.mubr.bf16.gmra.mrb[196].mxu1 %v18014_v24 }
 0x66b   : > { %9013 = vmatprep.mubr.bf16.mxu1 %v14742_v23 }
 0x672   : > { %9014 = vmatmul.mubr.bf16.gmra.mrb[200].mxu1 %v14741_v27 }
 0x673   : > { %16983 = vmatprep.mubr.bf16.mxu1 %v18018_v28 }
 0x67a   : > { %16984 = vmatmul.mubr.bf16.vlgmr.msra.gmra.mrb[204].mxu1 %v19756_v51 }
 0x67b   : > { %16987 = vmatprep.mubr.bf16.mxu1 %v18021_v25 }
 0x682   : > { %16988 = vmatmul.mubr.bf16.gmra.mrb[208].mxu1 %v18022_v21 }
 0x683   : > { %16991 = vmatprep.mubr.bf16.mxu1 %v18023_v31 }
 0x688   : > { %v16203_v36 = vpop.f32.mrb[108].mxu1 }
 0x689   : > { %v16204_v37 = vpop.f32.mrb[109].mxu1 }
 0x68a   : > { %16992 = vmatmul.mubr.bf16.gmra.mrb[212].mxu1 %v18024_v32  ;;  %v16205_v34 = vadd.f32 %v16204_v37, %v16203_v36  ;;  %v16206_v35 = vpop.f32.mrb[110].mxu1 }
 0x68b   : > { %v16207_v40 = vpop.f32.mrb[111].mxu1 }
 0x68c   : > { %v16208_v29 = vadd.f32 %v16207_v40, %v16206_v35  ;;  %v8736_v10 = vadd.f32 %v16205_v34, %v14689_v62 }
 0x68e   : > { %v8739_v47 = vadd.f32 %v16208_v29, %v14689_v62 }
 0x691   : > { %v16209_v39 = vpop.f32.mrb[112].mxu1 }
 0x692   : > { %v16210_v13 = vpop.f32.mrb[113].mxu1 }
 0x693   : > { %v16211_v41 = vadd.f32 %v16210_v13, %v16209_v39  ;;  %v16212_v0 = vpop.f32.mrb[114].mxu1 }
 0x694   : > { %v16213_v43 = vpop.f32.mrb[115].mxu1 }
 0x695   : > { %v16214_v45 = vadd.f32 %v16213_v43, %v16212_v0  ;;  %v8744_v19 = vadd.f32 %v16211_v41, %v14689_v62 }
 0x697   : > { %v8747_v16 = vadd.f32 %v16214_v45, %v14689_v62 }
 0x69d   : > { %v16215_v51 = vpop.f32.mrb[116].mxu1 }
 0x69e   : > { %v16216_v46 = vpop.f32.mrb[117].mxu1 }
 0x69f   : > { %v16217_v48 = vadd.f32 %v16216_v46, %v16215_v51  ;;  %v16218_v38 = vpop.f32.mrb[118].mxu1 }
 0x6a0   : > { %v16219_v50 = vpop.f32.mrb[119].mxu1 }
 0x6a1   : > { %v16220_v49 = vadd.f32 %v16219_v50, %v16218_v38  ;;  %v8752_v21 = vadd.f32 %v16217_v48, %v14689_v62 }
 0x6a3   : > { %v8755_v37 = vadd.f32 %v16220_v49, %v14689_v62 }
 0x6a5   : > { %v16221_v18 = vpop.f32.mrb[120].mxu1 }
 0x6a6   : > { %v16222_v55 = vpop.f32.mrb[121].mxu1 }
 0x6a7   : > { %v16223_v5 = vadd.f32 %v16222_v55, %v16221_v18  ;;  %v16224_v54 = vpop.f32.mrb[122].mxu1 }
 0x6a8   : > { %v16225_v12 = vpop.f32.mrb[123].mxu1 }
 0x6a9   : > { %v16226_v58 = vadd.f32 %v16225_v12, %v16224_v54  ;;  %v8760_v13 = vadd.f32 %v16223_v5, %v14689_v62 }
 0x6ab   : > { %v8763_v45 = vadd.f32 %v16226_v58, %v14689_v62 }
 0x6ad   : > { %v16227_v17 = vpop.f32.mrb[124].mxu1 }
 0x6ae   : > { %v16228_v30 = vpop.f32.mrb[125].mxu1 }
 0x6af   : > { %v16229_v59 = vadd.f32 %v16228_v30, %v16227_v17  ;;  %v16230_v20 = vpop.f32.mrb[126].mxu1 }
 0x6b0   : > { %v16231_v60 = vpop.f32.mrb[127].mxu1 }
 0x6b1   : > { %v16232_v61 = vadd.f32 %v16231_v60, %v16230_v20  ;;  %v8768_v49 = vadd.f32 %v16229_v59, %v14689_v62  ;;  %v18025_v59 = vld [vmem:[%s20954_s1 + $0x700] sm:$0xff]  }
 0x6b2   : > { %16409 = vmatprep.subr.bf16.mxu1 %v18025_v59 }
 0x6b3   : > { %v8771_v12 = vadd.f32 %v16232_v61, %v14689_v62 }
 0x6b5   : > { %v16233_v63 = vpop.f32.mrb[128].mxu1 }
 0x6b6   : > { %v16234_v26 = vpop.f32.mrb[129].mxu1 }
 0x6b7   : > { %v16235_v53 = vadd.f32 %v16234_v26, %v16233_v63  ;;  %v16236_v4 = vpop.f32.mrb[130].mxu1 }
 0x6b8   : > { %v16237_v44 = vpop.f32.mrb[131].mxu1 }
 0x6b9   : > { %v8776_v58 = vadd.f32 %v16235_v53, %v14689_v62  ;;  %v18027_v53 = vld [vmem:[%s20954_s1 + $0x708] sm:$0xff]  }
 0x6bd   : > { %v16255_v2 = vpop.f32.mrb[132].mxu1 }
 0x6be   : > { %v16256_v1 = vpop.f32.mrb[133].mxu1 }
 0x6bf   : > { %v16257_v7 = vadd.f32 %v16256_v1, %v16255_v2  ;;  %v16258_v42 = vpop.f32.mrb[134].mxu1 }
 0x6c0   : > { %v16259_v9 = vpop.f32.mrb[135].mxu1 }
 0x6c1   : > { %v8816_v52 = vadd.f32 %v16257_v7, %v8736_v10  ;;  %v16260_v33 = vadd.f32 %v16259_v9, %v16258_v42  ;;  %v18026_v7 = vld [vmem:[%s20954_s1 + $0x6c0] sm:$0xff]  }
 0x6c2   : > { %16410 = vmatpush3.bf16.msra.mxu1 %v18026_v7 }
 0x6c3   : > { %v19892_v8 = vadd.f32 %v16260_v33, %v8739_v47  ;;  %v18028_v47 = vld [vmem:[%s20954_s1 + $0x6c8] sm:$0xff]   ;;  %16411 = vmatprep.subr.bf16.mxu1 %v18027_v53  ;;  %v18029_v33 = vld [vmem:[%s20954_s1 + $0x710] sm:$0xff]  }
 0x6c5   : > { %v16261_v11 = vpop.f32.mrb[136].mxu1 }
 0x6c6   : > { %v16262_v14 = vpop.f32.mrb[137].mxu1  ;;  %16412 = vmatpush3.bf16.msra.mxu1 %v18028_v47 }
 0x6c7   : > { %v16263_v56 = vadd.f32 %v16262_v14, %v16261_v11  ;;  %v16264_v57 = vpop.f32.mrb[138].mxu1  ;;  %16413 = vmatprep.subr.bf16.mxu1 %v18029_v33 }
 0x6c8   : > { %v16265_v22 = vpop.f32.mrb[139].mxu1 }
 0x6c9   : > { %v19894_v23 = vadd.f32 %v16263_v56, %v8744_v19  ;;  %v16266_v24 = vadd.f32 %v16265_v22, %v16264_v57  ;;  %v18031_v56 = vld [vmem:[%s20954_s1 + $0x718] sm:$0xff]  }
 0x6cb   : > { %v19896_v27 = vadd.f32 %v16266_v24, %v8747_v16 }
 0x6cd   : > { %v16267_v28 = vpop.f32.mrb[140].mxu1 }
 0x6ce   : > { %v16268_v25 = vpop.f32.mrb[141].mxu1 }
 0x6cf   : > { %v16269_v31 = vadd.f32 %v16268_v25, %v16267_v28  ;;  %v16270_v32 = vpop.f32.mrb[142].mxu1  ;;  %v18032_v28 = vld [vmem:[%s20954_s1 + $0x6d8] sm:$0xff]   ;;  %v18033_v25 = vld [vmem:[%s20954_s1 + $0x720] sm:$0xff]  }
 0x6d0   : > { %v16271_v36 = vpop.f32.mrb[143].mxu1 }
 0x6d1   : > { %v19898_v34 = vadd.f32 %v16269_v31, %v8752_v21  ;;  %v16272_v35 = vadd.f32 %v16271_v36, %v16270_v32  ;;  %v18035_v36 = vld [vmem:[%s20954_s1 + $0x728] sm:$0xff]  }
 0x6d3   : > { %v19900_v40 = vadd.f32 %v16272_v35, %v8755_v37 }
 0x6d5   : > { %v16273_v29 = vpop.f32.mrb[144].mxu1 }
 0x6d6   : > { %v16274_v39 = vpop.f32.mrb[145].mxu1 }
 0x6d7   : > { %v16275_v41 = vadd.f32 %v16274_v39, %v16273_v29  ;;  %v16276_v0 = vpop.f32.mrb[146].mxu1 }
 0x6d8   : > { %v16277_v43 = vpop.f32.mrb[147].mxu1 }
 0x6d9   : > { %v19902_v51 = vadd.f32 %v16275_v41, %v8760_v13  ;;  %v16278_v46 = vadd.f32 %v16277_v43, %v16276_v0  ;;  %v18037_v41 = vld [vmem:[%s20954_s1 + $0x730] sm:$0xff]  }
 0x6db   : > { %v19904_v48 = vadd.f32 %v16278_v46, %v8763_v45  ;;  %v18038_v45 = vld [vmem:[%s20954_s1 + $0x6f0] sm:$0xff]   ;;  %v18039_v46 = vld [vmem:[%s20954_s1 + $0x738] sm:$0xff]  }
 0x6dd   : > { %v16279_v38 = vpop.f32.mrb[148].mxu1 }
 0x6de   : > { %v16280_v50 = vpop.f32.mrb[149].mxu1 }
 0x6df   : > { %v16281_v18 = vadd.f32 %v16280_v50, %v16279_v38  ;;  %v16282_v55 = vpop.f32.mrb[150].mxu1 }
 0x6e0   : > { %v16283_v54 = vpop.f32.mrb[151].mxu1 }
 0x6e1   : > { %v19906_v17 = vadd.f32 %v16281_v18, %v8768_v49  ;;  %v16284_v30 = vadd.f32 %v16283_v54, %v16282_v55  ;;  %v18043_v54 = vld [vmem:[%s20954_s1 + $0x780] sm:$0xff]  }
 0x6e3   : > { %v19908_v5 = vadd.f32 %v16284_v30, %v8771_v12 }
 0x6e5   : > { %v16285_v20 = vpop.f32.mrb[152].mxu1 }
 0x6e6   : > { %v16286_v60 = vpop.f32.mrb[153].mxu1 }
 0x6e7   : > { %v16287_v63 = vadd.f32 %v16286_v60, %v16285_v20  ;;  %v16288_v26 = vpop.f32.mrb[154].mxu1 }
 0x6e8   : > { %v16289_v4 = vpop.f32.mrb[155].mxu1 }
 0x6e9   : > { %v19910_v44 = vadd.f32 %v16287_v63, %v8776_v58 }
 0x6ed   : > { %v16307_v2 = vpop.f32.mrb[156].mxu1 }
 0x6ee   : > { %v16308_v1 = vpop.f32.mrb[157].mxu1 }
 0x6ef   : > { %v16309_v61 = vadd.f32 %v16308_v1, %v16307_v2  ;;  %v16310_v10 = vpop.f32.mrb[158].mxu1 }
 0x6f0   : > { %v16311_v62 = vpop.f32.mrb[159].mxu1 }
 0x6f1   : > { %v19921_v42 = vadd.f32 %v16309_v61, %v8816_v52  ;;  %v16312_v9 = vadd.f32 %v16311_v62, %v16310_v10  ;;  %v18030_v52 = vld [vmem:[%s20954_s1 + $0x6d0] sm:$0xff]  }
 0x6f2   : > { %16414 = vmatpush3.bf16.msra.mxu1 %v18030_v52 }
 0x6f3   : > { %v19930_v11 = vadd.f32 %v16312_v9, %v19892_v8  ;;  %16415 = vmatprep.subr.bf16.mxu1 %v18031_v56 }
 0x6f5   : > { %v16313_v14 = vpop.f32.mrb[160].mxu1 }
 0x6f6   : > { %v16314_v19 = vpop.f32.mrb[161].mxu1  ;;  %16416 = vmatpush3.bf16.msra.mxu1 %v18032_v28 }
 0x6f7   : > { %v16315_v57 = vadd.f32 %v16314_v19, %v16313_v14  ;;  %v16316_v22 = vpop.f32.mrb[162].mxu1  ;;  %16417 = vmatprep.subr.bf16.mxu1 %v18033_v25 }
 0x6f8   : > { %v16317_v16 = vpop.f32.mrb[163].mxu1 }
 0x6f9   : > { %v19939_v24 = vadd.f32 %v16315_v57, %v19894_v23  ;;  %v16318_v8 = vadd.f32 %v16317_v16, %v16316_v22  ;;  %v18034_v23 = vld [vmem:[%s20954_s1 + $0x6e0] sm:$0xff]  }
 0x6fa   : > { %16418 = vmatpush3.bf16.msra.mxu1 %v18034_v23 }
 0x6fb   : > { %v19948_v21 = vadd.f32 %v16318_v8, %v19896_v27  ;;  %v18036_v27 = vld [vmem:[%s20954_s1 + $0x6e8] sm:$0xff]   ;;  %16419 = vmatprep.subr.bf16.mxu1 %v18035_v36 }
 0x6fd   : > { %v16319_v31 = vpop.f32.mrb[164].mxu1 }
 0x6fe   : > { %v16320_v32 = vpop.f32.mrb[165].mxu1  ;;  %16420 = vmatpush3.bf16.msra.mxu1 %v18036_v27 }
 0x6ff   : > { %v16321_v37 = vadd.f32 %v16320_v32, %v16319_v31  ;;  %v16322_v35 = vpop.f32.mrb[166].mxu1  ;;  %16421 = vmatprep.subr.bf16.mxu1 %v18037_v41 }
 0x700   : > { %v16323_v29 = vpop.f32.mrb[167].mxu1 }
 0x701   : > { %v8912_v39 = vadd.f32 %v16321_v37, %v19898_v34  ;;  %v16324_v13 = vadd.f32 %v16323_v29, %v16322_v35 }
 0x702   : > { %16422 = vmatpush3.bf16.msra.mxu1 %v18038_v45 }
 0x703   : > { %v8915_v0 = vadd.f32 %v16324_v13, %v19900_v40  ;;  %v18040_v40 = vld [vmem:[%s20954_s1 + $0x6f8] sm:$0xff]   ;;  %16423 = vmatprep.subr.bf16.mxu1 %v18039_v46 }
 0x705   : > { %v16325_v43 = vpop.f32.mrb[168].mxu1 }
 0x706   : > { %v16326_v34 = vpop.f32.mrb[169].mxu1  ;;  %16424 = vmatpush3.bf16.msra.mxu1 %v18040_v40 }
 0x707   : > { %v16327_v38 = vadd.f32 %v16326_v34, %v16325_v43  ;;  %v16328_v50 = vpop.f32.mrb[170].mxu1  ;;  %16437 = vmatprep.subr.bf16.mxu1 %v18043_v54 }
 0x708   : > { %v16329_v49 = vpop.f32.mrb[171].mxu1 }
 0x709   : > { %v8920_v18 = vadd.f32 %v16327_v38, %v19902_v51  ;;  %v16330_v55 = vadd.f32 %v16329_v49, %v16328_v50 }
 0x70b   : > { %v8923_v12 = vadd.f32 %v16330_v55, %v19904_v48 }
 0x70d   : > { %v16331_v30 = vpop.f32.mrb[172].mxu1 }
 0x70e   : > { %v16332_v20 = vpop.f32.mrb[173].mxu1 }
 0x70f   : > { %v16333_v60 = vadd.f32 %v16332_v20, %v16331_v30  ;;  %v16334_v58 = vpop.f32.mrb[174].mxu1 }
 0x710   : > { %v16335_v51 = vpop.f32.mrb[175].mxu1 }
 0x711   : > { %v8928_v63 = vadd.f32 %v16333_v60, %v19906_v17  ;;  %v16336_v26 = vadd.f32 %v16335_v51, %v16334_v58 }
 0x713   : > { %v8931_v4 = vadd.f32 %v16336_v26, %v19908_v5 }
 0x715   : > { %v16337_v2 = vpop.f32.mrb[176].mxu1 }
 0x716   : > { %v16338_v59 = vpop.f32.mrb[177].mxu1 }
 0x717   : > { %v16339_v1 = vadd.f32 %v16338_v59, %v16337_v2  ;;  %v16340_v61 = vpop.f32.mrb[178].mxu1 }
 0x718   : > { %v16341_v10 = vpop.f32.mrb[179].mxu1 }
 0x719   : > { %v8936_v7 = vadd.f32 %v16339_v1, %v19910_v44 }
 0x71d   : > { %v16359_v48 = vpop.f32.mrb[180].mxu1 }
 0x71e   : > { %v16360_v53 = vpop.f32.mrb[181].mxu1 }
 0x71f   : > { %v16361_v62 = vadd.f32 %v16360_v53, %v16359_v48  ;;  %v16362_v9 = vpop.f32.mrb[182].mxu1 }
 0x720   : > { %v16363_v47 = vpop.f32.mrb[183].mxu1 }
 0x721   : > { %v16364_v33 = vadd.f32 %v16363_v47, %v16362_v9  ;;  %v8976_v14 = vadd.f32 %v16361_v62, %v19921_v42 }
 0x723   : > { %v8979_v17 = vadd.f32 %v16364_v33, %v19930_v11 }
 0x725   : > { %v16365_v52 = vpop.f32.mrb[184].mxu1 }
 0x726   : > { %v16366_v19 = vpop.f32.mrb[185].mxu1 }
 0x727   : > { %v16367_v5 = vadd.f32 %v16366_v19, %v16365_v52  ;;  %v16368_v56 = vpop.f32.mrb[186].mxu1 }
 0x728   : > { %v16369_v57 = vpop.f32.mrb[187].mxu1 }
 0x729   : > { %v16370_v22 = vadd.f32 %v16369_v57, %v16368_v56  ;;  %v8984_v16 = vadd.f32 %v16367_v5, %v19939_v24 }
 0x72b   : > { %v8987_v44 = vadd.f32 %v16370_v22, %v19948_v21 }
 0x72d   : > { %v16371_v8 = vpop.f32.mrb[188].mxu1 }
 0x72e   : > { %v16372_v28 = vpop.f32.mrb[189].mxu1 }
 0x72f   : > { %v16373_v25 = vadd.f32 %v16372_v28, %v16371_v8  ;;  %v16374_v31 = vpop.f32.mrb[190].mxu1 }
 0x730   : > { %v16375_v23 = vpop.f32.mrb[191].mxu1 }
 0x731   : > { %v16376_v32 = vadd.f32 %v16375_v23, %v16374_v31  ;;  %v8992_v36 = vadd.f32 %v16373_v25, %v8912_v39 }
 0x733   : > { %v8995_v42 = vadd.f32 %v16376_v32, %v8915_v0 }
 0x735   : > { %v16377_v37 = vpop.f32.mrb[192].mxu1 }
 0x736   : > { %v16378_v11 = vpop.f32.mrb[193].mxu1 }
 0x737   : > { %v16379_v35 = vadd.f32 %v16378_v11, %v16377_v37  ;;  %v16380_v29 = vpop.f32.mrb[194].mxu1 }
 0x738   : > { %v16381_v13 = vpop.f32.mrb[195].mxu1 }
 0x739   : > { %v16382_v27 = vadd.f32 %v16381_v13, %v16380_v29  ;;  %v9000_v41 = vadd.f32 %v16379_v35, %v8920_v18 }
 0x73b   : > { %v9003_v43 = vadd.f32 %v16382_v27, %v8923_v12 }
 0x73d   : > { %v16383_v24 = vpop.f32.mrb[196].mxu1 }
 0x73e   : > { %v16384_v45 = vpop.f32.mrb[197].mxu1 }
 0x73f   : > { %v16385_v21 = vadd.f32 %v16384_v45, %v16383_v24  ;;  %v16386_v34 = vpop.f32.mrb[198].mxu1 }
 0x740   : > { %v16387_v46 = vpop.f32.mrb[199].mxu1 }
 0x741   : > { %v16388_v38 = vadd.f32 %v16387_v46, %v16386_v34  ;;  %v9008_v50 = vadd.f32 %v16385_v21, %v8928_v63 }
 0x743   : > { %v9011_v49 = vadd.f32 %v16388_v38, %v8931_v4 }
 0x745   : > { %v16389_v55 = vpop.f32.mrb[200].mxu1 }
 0x746   : > { %v16390_v39 = vpop.f32.mrb[201].mxu1 }
 0x747   : > { %v16391_v0 = vadd.f32 %v16390_v39, %v16389_v55  ;;  %v16392_v40 = vpop.f32.mrb[202].mxu1 }
 0x748   : > { %v16393_v54 = vpop.f32.mrb[203].mxu1 }
 0x749   : > { %v9016_v30 = vadd.f32 %v16391_v0, %v8936_v7 }
 0x74d   : > { %v16985_v20 = vpop.f32.mrb[204].mxu1 }
 0x74e   : > { %v9064_v60 = vadd.f32 %v16985_v20, %v8984_v16  ;;  %v9055_v18 = vpop.f32.mrb[205].mxu1 }
 0x74f   : > { %v9056_v12 = vadd.f32 %v9055_v18, %v8976_v14  ;;  %v16986_v58 = vpop.f32.mrb[206].mxu1 }
 0x750   : > { %v9103_v51 = vmax.f32 %v9064_v60, 0.0  ;;  %v9067_v63 = vadd.f32 %v16986_v58, %v8987_v44  ;;  %v9058_v26 = vpop.f32.mrb[207].mxu1 }
 0x751   : > { %v9101_v4 = vmax.f32 %v9056_v12, 0.0  ;;  %v9059_v2 = vadd.f32 %v9058_v26, %v8979_v17 }
 0x752   : > { %9114 = vst [vmem:[%s19989_s18 + $0x10] sm:$0xff] %v9103_v51  ;;  %v9104_v59 = vmax.f32 %v9067_v63, 0.0 }
 0x753   : > { %9112 = vst [vmem:[%s19989_s18] sm:$0xff] %v9101_v4  ;;  %v9102_v1 = vmax.f32 %v9059_v2, 0.0 }
 0x754   : > { %9115 = vst [vmem:[%s19989_s18 + $0x18] sm:$0xff] %v9104_v59 }
 0x755   : > { %9113 = vst [vmem:[%s19989_s18 + $0x8] sm:$0xff] %v9102_v1  ;;  %v16989_v61 = vpop.f32.mrb[208].mxu1 }
 0x756   : > { %v9080_v10 = vadd.f32 %v16989_v61, %v9000_v41  ;;  %v9071_v7 = vpop.f32.mrb[209].mxu1 }
 0x757   : > { %v9072_v48 = vadd.f32 %v9071_v7, %v8992_v36  ;;  %v16990_v53 = vpop.f32.mrb[210].mxu1 }
 0x758   : > { %v9107_v62 = vmax.f32 %v9080_v10, 0.0  ;;  %v9083_v9 = vadd.f32 %v16990_v53, %v9003_v43  ;;  %v9074_v47 = vpop.f32.mrb[211].mxu1 }
 0x759   : > { %v9105_v33 = vmax.f32 %v9072_v48, 0.0  ;;  %v9075_v14 = vadd.f32 %v9074_v47, %v8995_v42 }
 0x75a   : > { %v9128_v17 = vld [vmem:[%s19989_s18] ss:$2 sm:$0xf]  ;;  %v14816_v52 = vld [vmem:[%s19989_s18 + $0x1] ss:$2 sm:$0xf] }
 0x75b   : > { %9118 = vst [vmem:[%s19989_s18 + $0x30] sm:$0xff] %v9107_v62  ;;  %9116 = vst [vmem:[%s19989_s18 + $0x20] sm:$0xff] %v9105_v33  ;;  %v9135_v56 = vmax.f32 %v9128_v17, %v14816_v52  ;;  %v9108_v22 = vmax.f32 %v9083_v9, 0.0  ;;  %v9106_v16 = vmax.f32 %v9075_v14, 0.0 }
 0x75c   : > { %v14817_v19 = vld [vmem:[%s19989_s18 + $0x9] ss:$2 sm:$0xf]  ;;  %v14818_v5 = vld [vmem:[%s19989_s18 + $0xa] ss:$2 sm:$0xf] }
 0x75d   : > { %v9136_v57 = vmax.f32 %v14817_v19, %v14818_v5  ;;  %v16993_v44 = vpop.f32.mrb[212].mxu1  ;;  %v14819_v25 = vld [vmem:[%s19989_s18 + $0x12] ss:$2 sm:$0xf]  ;;  %9119 = vst [vmem:[%s19989_s18 + $0x38] sm:$0xff] %v9108_v22  ;;  %9117 = vst [vmem:[%s19989_s18 + $0x28] sm:$0xff] %v9106_v16 }
 0x75e   : > { %v9096_v8 = vadd.f32 %v16993_v44, %v9016_v30  ;;  %v9087_v28 = vpop.f32.mrb[213].mxu1  ;;  %v14820_v36 = vld [vmem:[%s19989_s18 + $0x13] ss:$2 sm:$0xf]  ;;  %v9198_v5 = vld [vmem:[#allocation5 + $0x6c] sm:$0x1] }
 0x75f   : > { %v9137_v31 = vmax.f32 %v9135_v56, %v9136_v57  ;;  %v9088_v23 = vadd.f32 %v9087_v28, %v9008_v50  ;;  %v16994_v32 = vpop.f32.mrb[214].mxu1  ;;  %v9147_v27 = vmax.f32 %v14819_v25, %v14820_v36 }
 0x760   : > { %v9111_v42 = vmax.f32 %v9096_v8, 0.0  ;;  %v9090_v37 = vpop.f32.mrb[215].mxu1 }
 0x761   : > { %9138 = vst [vmem:[#allocation3 + $0x6] sm:$0xf] %v9137_v31  ;;  %v9109_v11 = vmax.f32 %v9088_v23, 0.0  ;;  %v9091_v35 = vadd.f32 %v9090_v37, %v9011_v49 }
 0x762   : > { %v14821_v29 = vld [vmem:[%s19989_s18 + $0x1b] ss:$2 sm:$0xf]  ;;  %v14822_v13 = vld [vmem:[%s19989_s18 + $0x1c] ss:$2 sm:$0xf] }
 0x763   : > { %9122 = vst [vmem:[%s19989_s18 + $0x50] sm:$0x1] %v9111_v42  ;;  %v9148_v41 = vmax.f32 %v14821_v29, %v14822_v13  ;;  %9120 = vst [vmem:[%s19989_s18 + $0x40] sm:$0xff] %v9109_v11  ;;  %v9110_v43 = vmax.f32 %v9091_v35, 0.0 }
 0x764   : > { %v14827_v45 = vld [vmem:[%s19989_s18 + $0x36] ss:$2 sm:$0xf]  ;;  %v14828_v21 = vld [vmem:[%s19989_s18 + $0x37] ss:$2 sm:$0xf] }
 0x765   : > { %v9149_v24 = vmax.f32 %v9147_v27, %v9148_v41  ;;  %9121 = vst [vmem:[%s19989_s18 + $0x48] sm:$0xff] %v9110_v43  ;;  %v14823_v34 = vld [vmem:[%s19989_s18 + $0x24] ss:$2 sm:$0xf]  ;;  %v9171_v12 = vmax.f32 %v14827_v45, %v14828_v21 }
 0x766   : > { %v14824_v46 = vld [vmem:[%s19989_s18 + $0x25] ss:$2 sm:$0xf]  ;;  %v14825_v38 = vld [vmem:[%s19989_s18 + $0x2d] ss:$2 sm:$0xf] }
 0x767   : > { %9150 = vst [vmem:[#allocation3 + $0xb] sm:$0xf] %v9149_v24  ;;  %v14826_v50 = vld [vmem:[%s19989_s18 + $0x2e] ss:$2 sm:$0xf]  ;;  %v9159_v49 = vmax.f32 %v14823_v34, %v14824_v46  ;;  %v18045_v21 = vld [vmem:[%s20954_s1 + $0x740] sm:$0xff]  }
 0x768   : > { %v9160_v55 = vmax.f32 %v14825_v38, %v14826_v50  ;;  %v9175_v39 = vld [vmem:[#allocation3] sm:$0xff]  ;;  %v10516_v34 = vld [vmem:[#allocation3 + $0x1f] sm:$0x1] }
 0x769   : > { %v9201_v0 = vld [vmem:[#allocation3 + $0x1] sm:$0xff]  ;;  %v15830_v20 = vpack.c.bf16 %v9175_v39, %v9175_v39 }
 0x76a   : > { %v9227_v40 = vld [vmem:[#allocation3 + $0x2] sm:$0xff]  ;;  %v14829_v54 = vld [vmem:[%s19989_s18 + $0x3f] ss:$2 sm:$0xf]  ;;  %v15834_v60 = vpack.c.bf16 %v9201_v0, %v9201_v0  ;;  %v9161_v58 = vmax.f32 %v9159_v49, %v9160_v55  ;;  %v10536_v49 = vld [vmem:[#allocation5 + $0x80] sm:$0x1]  ;;  %v15889_v55 = vpack.c.bf16 %v10516_v34, %v10516_v34 }
 0x76b   : > { %v14830_v30 = vld [vmem:[%s19989_s18 + $0x40] ss:$2 sm:$0xf]  ;;  %v15838_v18 = vpack.c.bf16 %v9227_v40, %v9227_v40  ;;  %9195 = vst [vmem:[#allocation5] sm:$0xf] %v15830_v20  ;;  %v18046_v50 = vld [vmem:[%s20954_s1 + $0x788] sm:$0xff]   ;;  %s402_s18 = scalar_lea.vmem %s20962_s9, %s15298_s15 }
 0x76c   : > { %v9172_v51 = vmax.f32 %v14829_v54, %v14830_v30  ;;  %9221 = vst [vmem:[#allocation5 + $0x4] sm:$0xf] %v15834_v60  ;;  %9162 = vst [vmem:[#allocation3 + $0x10] sm:$0xf] %v9161_v58  ;;  %v18047_v0 = vld [vmem:[%s20954_s1 + $0x748] sm:$0xff]   ;;  %v18050_v40 = vld [vmem:[%s20954_s1 + $0x790] sm:$0xff]   ;;  %v10537_v30 = vsel %vm18555_vm2, %v15889_v55, %v10536_v49 }
 0x76d   : > { %9247 = vst [vmem:[#allocation5 + $0x8] sm:$0xf] %v15838_v18  ;;  %v18052_v20 = vld [vmem:[%s20954_s1 + $0x750] sm:$0xff]   ;;  %v18055_v18 = vld [vmem:[%s20954_s1 + $0x798] sm:$0xff]   ;;  %v18109_v49 = vld [vmem:[%s20954_s1 + $0x8c0] sm:$0xff]  }
 0x76e   : > { %v9173_v63 = vmax.f32 %v9171_v12, %v9172_v51  ;;  %v9176_v26 = vld [vmem:[#allocation3 + $0x8] sm:$0xff]  ;;  %v18056_v58 = vld [vmem:[%s20954_s1 + $0x758] sm:$0xff]   ;;  %v18057_v51 = vld [vmem:[%s20954_s1 + $0x7a0] sm:$0xff]  }
 0x76f   : > { %v9253_v4 = vld [vmem:[#allocation3 + $0x5] sm:$0xff]  ;;  %v15831_v59 = vpack.c.bf16 %v9176_v26, %v9176_v26 }
 0x770   : > { %v9279_v2 = vld [vmem:[#allocation3 + $0x6] sm:$0xff]  ;;  %9174 = vst [vmem:[#allocation3 + $0x15] sm:$0xf] %v9173_v63  ;;  %v15842_v1 = vpack.c.bf16 %v9253_v4, %v9253_v4  ;;  %v18058_v63 = vld [vmem:[%s20954_s1 + $0x760] sm:$0xff]  }
 0x771   : > { %v15846_v61 = vpack.c.bf16 %v9279_v2, %v9279_v2  ;;  %v9305_v10 = vld [vmem:[#allocation3 + $0x7] sm:$0xff]  ;;  %9196 = vst [vmem:[#allocation5 + $0x24] sm:$0xf] %v15831_v59 }
 0x772   : > { %v15850_v7 = vpack.c.bf16 %v9305_v10, %v9305_v10  ;;  %9273 = vst [vmem:[#allocation5 + $0xc] sm:$0xf] %v15842_v1  ;;  %v18059_v26 = vld [vmem:[%s20954_s1 + $0x7a8] sm:$0xff]   ;;  %v18061_v2 = vld [vmem:[%s20954_s1 + $0x7b0] sm:$0xff]   ;;  %v18063_v1 = vld [vmem:[%s20954_s1 + $0x7b8] sm:$0xff]  }
 0x773   : > { %9299 = vst [vmem:[#allocation5 + $0x10] sm:$0xf] %v15846_v61  ;;  %v9202_v48 = vld [vmem:[#allocation3 + $0x9] sm:$0xff]  ;;  %v18060_v4 = vld [vmem:[%s20954_s1 + $0x768] sm:$0xff]   ;;  %v18066_v10 = vld [vmem:[%s20954_s1 + $0x800] sm:$0xff]  }
 0x774   : > { %9325 = vst [vmem:[#allocation5 + $0x14] sm:$0xf] %v15850_v7  ;;  %v9228_v53 = vld [vmem:[#allocation3 + $0xa] sm:$0xff]  ;;  %v15835_v9 = vpack.c.bf16 %v9202_v48, %v9202_v48  ;;  %v18069_v7 = vld [vmem:[%s20954_s1 + $0x7c0] sm:$0xff]  }
 0x775   : > { %v9254_v62 = vld [vmem:[#allocation3 + $0xd] sm:$0xff]  ;;  %v15839_v47 = vpack.c.bf16 %v9228_v53, %v9228_v53  ;;  %v18070_v53 = vld [vmem:[%s20954_s1 + $0x808] sm:$0xff]  }
 0x776   : > { %v15843_v33 = vpack.c.bf16 %v9254_v62, %v9254_v62  ;;  %v9357_v14 = vld [vmem:[#allocation3 + $0xb] sm:$0xff]  ;;  %9222 = vst [vmem:[#allocation5 + $0x28] sm:$0xf] %v15835_v9  ;;  %v18071_v9 = vld [vmem:[%s20954_s1 + $0x7c8] sm:$0xff]  }
 0x777   : > { %v9383_v17 = vld [vmem:[#allocation3 + $0xc] sm:$0xff]  ;;  %v9178_v19 = vld [vmem:[#allocation3 + $0x18] sm:$0x1]  ;;  %v15858_v57 = vpack.c.bf16 %v9357_v14, %v9357_v14  ;;  %9248 = vst [vmem:[#allocation5 + $0x2c] sm:$0xf] %v15839_v47 }
 0x778   : > { %v9177_v52 = vld [vmem:[#allocation3 + $0x10] sm:$0xff]  ;;  %v15862_v22 = vpack.c.bf16 %v9383_v17, %v9383_v17  ;;  %v15833_v44 = vpack.c.bf16 %v9178_v19, %v9178_v19  ;;  %9274 = vst [vmem:[#allocation5 + $0x30] sm:$0xf] %v15843_v33  ;;  %9351 = vst [vmem:[#allocation5 + $0x18] sm:$0xf] %v15839_v47  ;;  %v18062_v59 = vld [vmem:[%s20954_s1 + $0x770] sm:$0xff]  }
 0x779   : > { %v9203_v56 = vld [vmem:[#allocation3 + $0x11] sm:$0xff]  ;;  %v15832_v16 = vpack.c.bf16 %v9177_v52, %v9177_v52  ;;  %9377 = vst [vmem:[#allocation5 + $0x1c] sm:$0xf] %v15858_v57  ;;  %v18044_v38 = vld [vmem:[#allocation5] ss:$36 sps:$4 sm:$0xff]   ;;  %v18073_v47 = vld [vmem:[%s20954_s1 + $0x810] sm:$0xff]  }
 0x77a   : > { %v15836_v8 = vpack.c.bf16 %v9203_v56, %v9203_v56  ;;  %v9229_v28 = vld [vmem:[#allocation3 + $0x12] sm:$0xff]  ;;  %9403 = vst [vmem:[#allocation5 + $0x20] sm:$0xf] %v15862_v22  ;;  %v9199_v11 = vsel %vm18555_vm2, %v15833_v44, %v9198_v5  ;;  %v18074_v33 = vld [vmem:[%s20954_s1 + $0x7d0] sm:$0xff]   ;;  %v18081_v57 = vld [vmem:[%s20954_s1 + $0x828] sm:$0xff]  }
 0x77b   : > { %v9255_v25 = vld [vmem:[#allocation3 + $0x15] sm:$0xff]  ;;  %v15840_v23 = vpack.c.bf16 %v9229_v28, %v9229_v28  ;;  %9197 = vst [vmem:[#allocation5 + $0x48] sm:$0xf] %v15832_v16  ;;  %9200 = vst [vmem:[#allocation5 + $0x6c] sm:$0x1] %v9199_v11  ;;  %v18082_v22 = vld [vmem:[%s20954_s1 + $0x7e8] sm:$0xff]  }
 0x77c   : > { %v9280_v31 = vld [vmem:[#allocation3 + $0xe] sm:$0xff]  ;;  %v15844_v32 = vpack.c.bf16 %v9255_v25, %v9255_v25  ;;  %v9281_v37 = vld [vmem:[#allocation3 + $0x16] sm:$0xff]  ;;  %9223 = vst [vmem:[#allocation5 + $0x4c] sm:$0xf] %v15836_v8 }
 0x77d   : > { %v15847_v36 = vpack.c.bf16 %v9280_v31, %v9280_v31  ;;  %v9306_v42 = vld [vmem:[#allocation3 + $0xf] sm:$0xff]  ;;  %v15848_v29 = vpack.c.bf16 %v9281_v37, %v9281_v37  ;;  %v9307_v13 = vld [vmem:[#allocation3 + $0x17] sm:$0xff]  ;;  %9249 = vst [vmem:[#allocation5 + $0x50] sm:$0xf] %v15840_v23  ;;  %9352 = vst [vmem:[#allocation5 + $0x3c] sm:$0xf] %v15840_v23 }
 0x77e   : > { %v15851_v35 = vpack.c.bf16 %v9306_v42, %v9306_v42  ;;  %v9358_v27 = vld [vmem:[#allocation3 + $0x13] sm:$0xff]  ;;  %9275 = vst [vmem:[#allocation5 + $0x54] sm:$0xf] %v15844_v32  ;;  %v15852_v41 = vpack.c.bf16 %v9307_v13, %v9307_v13  ;;  %v18041_v46 = vld [vmem:[#allocation5 + $0x4] ss:$36 sps:$4 sm:$0xff]  }
 0x77f   : > { %9300 = vst [vmem:[#allocation5 + $0x34] sm:$0xf] %v15847_v36  ;;  %v15859_v43 = vpack.c.bf16 %v9358_v27, %v9358_v27  ;;  %v9384_v24 = vld [vmem:[#allocation3 + $0x14] sm:$0xff]  ;;  %9301 = vst [vmem:[#allocation5 + $0x58] sm:$0xf] %v15848_v29  ;;  %10134 = vmatprep.mubr.bf16.mxu1 %v18041_v46  ;;  %v18083_v16 = vld [vmem:[%s20954_s1 + $0x830] sm:$0xff]  }
 0x780   : > { %9326 = vst [vmem:[#allocation5 + $0x38] sm:$0xf] %v15851_v35  ;;  %v15863_v45 = vpack.c.bf16 %v9384_v24, %v9384_v24  ;;  %9327 = vst [vmem:[#allocation5 + $0x5c] sm:$0xf] %v15852_v41  ;;  %10135 = vmatmul.mubr.bf16.vlgmr.msra.gmra.mrb[216].mxu1 %v18044_v38  ;;  %v18053_v12 = vld [vmem:[#allocation5 + $0xc] ss:$36 sps:$4 sm:$0xff]  }
 0x781   : > { %9378 = vst [vmem:[#allocation5 + $0x40] sm:$0xf] %v15859_v43  ;;  %16438 = vmatpush3.bf16.msra.mxu1 %v18045_v21  ;;  %v18064_v61 = vld [vmem:[%s20954_s1 + $0x778] sm:$0xff]   ;;  %v18065_v48 = vld [vmem:[#allocation5 + $0x8] ss:$36 sps:$4 sm:$0xff]   ;;  %v18079_v5 = vld [vmem:[%s20954_s1 + $0x820] sm:$0xff]  }
 0x782   : > { %9404 = vst [vmem:[#allocation5 + $0x44] sm:$0xf] %v15863_v45  ;;  %16439 = vmatprep.subr.bf16.mxu1 %v18046_v50  ;;  %v18051_v60 = vld [vmem:[#allocation5 + $0x48] ss:$36 sps:$4 sm:$0x1f]   ;;  %v18077_v17 = vld [vmem:[%s20954_s1 + $0x818] sm:$0xff]  }
 0x783   : > { %v18048_v39 = vld [vmem:[#allocation5 + $0x4c] ss:$36 sps:$4 sm:$0x1f]   ;;  %v18080_v56 = vld [vmem:[%s20954_s1 + $0x7e0] sm:$0xff]   ;;  %v18092_v32 = vld [vmem:[%s20954_s1 + $0x888] sm:$0xff]  }
 0x784   : > { %10142 = vmatprep.mubr.bf16.mxu1 %v18048_v39  ;;  %v18072_v14 = vld [vmem:[#allocation5 + $0x50] ss:$36 sps:$4 sm:$0x1f]   ;;  %v18084_v44 = vld [vmem:[%s20954_s1 + $0x7f0] sm:$0xff]   ;;  %v18088_v25 = vld [vmem:[%s20954_s1 + $0x880] sm:$0xff]  }
 0x785   : > { %16440 = vmatpush3.bf16.msra.mxu1 %v18047_v0  ;;  %v18067_v62 = vld [vmem:[#allocation5 + $0x54] ss:$36 sps:$4 sm:$0x1f]   ;;  %v18093_v36 = vld [vmem:[%s20954_s1 + $0x848] sm:$0xff]   ;;  %v18094_v42 = vld [vmem:[%s20954_s1 + $0x890] sm:$0xff]  }
 0x786   : > { %16441 = vmatprep.subr.bf16.mxu1 %v18050_v40  ;;  %v18078_v19 = vld [vmem:[%s20954_s1 + $0x7d8] sm:$0xff]   ;;  %v18091_v31 = vld [vmem:[%s20954_s1 + $0x840] sm:$0xff]   ;;  %v18095_v35 = vld [vmem:[%s20954_s1 + $0x850] sm:$0xff]  }
 0x787   : > { %v20032_v54 = vld [vmem:[#allocation5 + $0x5c] ss:$36 sps:$4 sm:$0x1f]   ;;  %v18075_v52 = vld [vmem:[#allocation5 + $0x14] ss:$36 sps:$4 sm:$0xff]   ;;  %v18104_v34 = vld [vmem:[%s20954_s1 + $0x8b0] sm:$0xff]  }
 0x788   : > { %10538 = vst [vmem:[#allocation5 + $0x80] sm:$0x1] %v10537_v30  ;;  %10143 = vmatmul.mubr.bf16.gmra.mrb[220].mxu1 %v18051_v60  ;;  %v18085_v8 = vld [vmem:[%s20954_s1 + $0x838] sm:$0xff]   ;;  %v9565_v37 = vld [vmem:[#allocation5 + $0x58] sm:$0xff]  ;;  %v18102_v45 = vld [vmem:[%s20954_s1 + $0x8a8] sm:$0xff]  }
 0x789   : > { %16442 = vmatpush3.bf16.msra.mxu1 %v18052_v20  ;;  %10183 = vmatprep.mubr.bf16.mxu1 %v18053_v12  ;;  %v18086_v28 = vld [vmem:[%s20954_s1 + $0x7f8] sm:$0xff]   ;;  %v18096_v27 = vld [vmem:[#allocation5 + $0x1c] ss:$36 sps:$4 sm:$0xff]   ;;  %v18105_v46 = vld [vmem:[%s20954_s1 + $0x870] sm:$0xff]  }
 0x78a   : > { %16443 = vmatprep.subr.bf16.mxu1 %v18055_v18  ;;  %v18087_v23 = vld [vmem:[#allocation5 + $0x10] ss:$36 sps:$4 sm:$0xff]   ;;  %v18100_v43 = vld [vmem:[%s20954_s1 + $0x8a0] sm:$0xff]   ;;  %v18103_v21 = vld [vmem:[%s20954_s1 + $0x868] sm:$0xff]  }
 0x78b   : > { %v18098_v13 = vld [vmem:[%s20954_s1 + $0x898] sm:$0xff]   ;;  %v18101_v24 = vld [vmem:[%s20954_s1 + $0x860] sm:$0xff]   ;;  %v18112_v39 = vld [vmem:[%s20954_s1 + $0x8c8] sm:$0xff]  }
 0x78c   : > { %v18099_v41 = vld [vmem:[%s20954_s1 + $0x858] sm:$0xff]   ;;  %v18108_v55 = vld [vmem:[#allocation5 + $0x18] ss:$36 sps:$4 sm:$0xff]   ;;  %v18113_v0 = vld [vmem:[%s20954_s1 + $0x8d0] sm:$0xff]  }
 0x78d   : > { %16444 = vmatpush3.bf16.msra.mxu1 %v18056_v58  ;;  %v18106_v38 = vld [vmem:[%s20954_s1 + $0x8b8] sm:$0xff]   ;;  %v9566_v40 = vld [vmem:[#allocation5 + $0x60] sm:$0xff]  ;;  %v18118_v12 = vld [vmem:[%s20954_s1 + $0x8f0] sm:$0xff]  }
 0x78e   : > { %16445 = vmatprep.subr.bf16.mxu1 %v18057_v51  ;;  %v18107_v50 = vld [vmem:[%s20954_s1 + $0x878] sm:$0xff]   ;;  %v18114_v60 = vld [vmem:[#allocation5 + $0x20] ss:$36 sps:$4 sm:$0xff]   ;;  %v18121_v51 = vld [vmem:[%s20954_s1 + $0x940] sm:$0xff]  }
 0x78f   : > { %v9570_v11 = vld [vmem:[#allocation5 + $0x7c] sm:$0x11]  ;;  %v18115_v20 = vld [vmem:[%s20954_s1 + $0x8d8] sm:$0xff]  }
 0x790   : > { %v14881_v29 = vcombine.low %v9565_v37, %v9570_v11  ;;  %v18117_v18 = vld [vmem:[%s20954_s1 + $0x8e8] sm:$0xff]   ;;  %v18119_v58 = vld [vmem:[%s20954_s1 + $0x8f8] sm:$0xff]   ;;  %v18134_v11 = vld [vmem:[%s20954_s1 + $0x930] sm:$0xff]  }
 0x791   : > { %16446 = vmatpush3.bf16.msra.mxu1 %v18058_v63  ;;  %v18122_v63 = vld [vmem:[%s20954_s1 + $0x900] sm:$0xff]  }
 0x792   : > { %16447 = vmatprep.subr.bf16.mxu1 %v18059_v26 }
 0x795   : > { %16448 = vmatpush3.bf16.msra.mxu1 %v18060_v4 }
 0x796   : > { %16449 = vmatprep.subr.bf16.mxu1 %v18061_v2 }
 0x799   : > { %16450 = vmatpush3.bf16.msra.mxu1 %v18062_v59 }
 0x79a   : > { %16451 = vmatprep.subr.bf16.mxu1 %v18063_v1 }
 0x79d   : > { %16452 = vmatpush3.bf16.msra.mxu1 %v18064_v61 }
 0x79e   : > { %16465 = vmatprep.subr.bf16.mxu1 %v18066_v10 }
 0x7a0   : > { %10184 = vmatmul.mubr.bf16.vlgmr.msra.gmra.mrb[224].mxu1 %v18065_v48 }
 0x7a1   : > { %10191 = vmatprep.mubr.bf16.mxu1 %v18067_v62  ;;  %16466 = vmatpush3.bf16.msra.mxu1 %v18069_v7 }
 0x7a2   : > { %16467 = vmatprep.subr.bf16.mxu1 %v18070_v53 }
 0x7a5   : > { %16468 = vmatpush3.bf16.msra.mxu1 %v18071_v9  ;;  %v18123_v9 = vld [vmem:[%s20954_s1 + $0x948] sm:$0xff]  }
 0x7a6   : > { %16469 = vmatprep.subr.bf16.mxu1 %v18073_v47  ;;  %v18124_v47 = vld [vmem:[%s20954_s1 + $0x908] sm:$0xff]  }
 0x7a8   : > { %10192 = vmatmul.mubr.bf16.gmra.mrb[228].mxu1 %v18072_v14  ;;  %v18126_v14 = vld [vmem:[%s20954_s1 + $0x910] sm:$0xff]  }
 0x7a9   : > { %16470 = vmatpush3.bf16.msra.mxu1 %v18074_v33  ;;  %10232 = vmatprep.mubr.bf16.mxu1 %v18075_v52  ;;  %v18125_v33 = vld [vmem:[%s20954_s1 + $0x950] sm:$0xff]   ;;  %v18128_v52 = vld [vmem:[%s20954_s1 + $0x918] sm:$0xff]  }
 0x7aa   : > { %16471 = vmatprep.subr.bf16.mxu1 %v18077_v17  ;;  %v18127_v17 = vld [vmem:[%s20954_s1 + $0x958] sm:$0xff]  }
 0x7ad   : > { %16472 = vmatpush3.bf16.msra.mxu1 %v18078_v19  ;;  %v18129_v19 = vld [vmem:[%s20954_s1 + $0x960] sm:$0xff]  }
 0x7ae   : > { %16473 = vmatprep.subr.bf16.mxu1 %v18079_v5  ;;  %v18130_v5 = vld [vmem:[%s20954_s1 + $0x920] sm:$0xff]  }
 0x7b1   : > { %16474 = vmatpush3.bf16.msra.mxu1 %v18080_v56  ;;  %v14867_v56 = vld [vmem:[%s20955_s2 + $0x3] ss:$0 sm:$0xff] }
 0x7b2   : > { %16475 = vmatprep.subr.bf16.mxu1 %v18081_v57  ;;  %v18131_v57 = vld [vmem:[%s20954_s1 + $0x968] sm:$0xff]  }
 0x7b5   : > { %16476 = vmatpush3.bf16.msra.mxu1 %v18082_v22 }
 0x7b6   : > { %16477 = vmatprep.subr.bf16.mxu1 %v18083_v16 }
 0x7b9   : > { %16478 = vmatpush3.bf16.msra.mxu1 %v18084_v44 }
 0x7ba   : > { %16479 = vmatprep.subr.bf16.mxu1 %v18085_v8 }
 0x7bd   : > { %16480 = vmatpush3.bf16.msra.mxu1 %v18086_v28 }
 0x7be   : > { %16493 = vmatprep.subr.bf16.mxu1 %v18088_v25  ;;  %v18132_v25 = vld [vmem:[%s20954_s1 + $0x928] sm:$0xff]  }
 0x7c0   : > { %10233 = vmatmul.mubr.bf16.vlgmr.msra.gmra.mrb[232].mxu1 %v18087_v23  ;;  %v18133_v23 = vld [vmem:[%s20954_s1 + $0x970] sm:$0xff]  }
 0x7c1   : > { %10240 = vmatprep.mubr.bf16.mxu1 %v20032_v54  ;;  %16494 = vmatpush3.bf16.msra.mxu1 %v18091_v31  ;;  %v9571_v54 = vld [vmem:[#allocation5 + $0x84] sm:$0x11] }
 0x7c2   : > { %16495 = vmatprep.subr.bf16.mxu1 %v18092_v32  ;;  %v14883_v30 = vcombine.low %v9566_v40, %v9571_v54 }
 0x7c5   : > { %16496 = vmatpush3.bf16.msra.mxu1 %v18093_v36 }
 0x7c6   : > { %16497 = vmatprep.subr.bf16.mxu1 %v18094_v42 }
 0x7c8   : > { %10241 = vmatmul.mubr.bf16.gmra.mrb[236].mxu1 %v14881_v29 }
 0x7c9   : > { %16498 = vmatpush3.bf16.msra.mxu1 %v18095_v35  ;;  %10281 = vmatprep.mubr.bf16.mxu1 %v18096_v27  ;;  %v18135_v35 = vld [vmem:[%s20954_s1 + $0x978] sm:$0xff]  }
 0x7ca   : > { %16499 = vmatprep.subr.bf16.mxu1 %v18098_v13 }
 0x7cd   : > { %16500 = vmatpush3.bf16.msra.mxu1 %v18099_v41 }
 0x7ce   : > { %16501 = vmatprep.subr.bf16.mxu1 %v18100_v43 }
 0x7d1   : > { %16502 = vmatpush3.bf16.msra.mxu1 %v18101_v24  ;;  %v18136_v24 = vld [vmem:[%s20954_s1 + $0x938] sm:$0xff]  }
 0x7d2   : > { %16503 = vmatprep.subr.bf16.mxu1 %v18102_v45 }
 0x7d5   : > { %16504 = vmatpush3.bf16.msra.mxu1 %v18103_v21  ;;  %v18139_v21 = vld [vmem:[%s20954_s1 + $0x9c0] sm:$0xff]  }
 0x7d6   : > { %16505 = vmatprep.subr.bf16.mxu1 %v18104_v34 }
 0x7d9   : > { %16506 = vmatpush3.bf16.msra.mxu1 %v18105_v46 }
 0x7da   : > { %16507 = vmatprep.subr.bf16.mxu1 %v18106_v38 }
 0x7dd   : > { %16508 = vmatpush3.bf16.msra.mxu1 %v18107_v50 }
 0x7de   : > { %16995 = vmatprep.subr.bf16.mxu1 %v18109_v49 }
 0x7e0   : > { %10282 = vmatmul.mubr.bf16.vlgmr.msra.gmra.mrb[240].mxu1 %v18108_v55 }
 0x7e1   : > { %10289 = vmatprep.mubr.bf16.mxu1 %v19760_v3  ;;  %16996 = vmatpush3.bf16.msra.mxu1 %v18109_v49  ;;  %v18116_v3 = vld [vmem:[%s20954_s1 + $0x8e0] sm:$0xff]  }
 0x7e2   : > { %16997 = vmatprep.subr.bf16.mxu1 %v18112_v39 }
 0x7e5   : > { %16998 = vmatpush3.bf16.msra.mxu1 %v18112_v39 }
 0x7e6   : > { %16999 = vmatprep.subr.bf16.mxu1 %v18113_v0 }
 0x7e8   : > { %10290 = vmatmul.mubr.bf16.gmra.mrb[244].mxu1 %v14883_v30 }
 0x7e9   : > { %17000 = vmatpush3.bf16.msra.mxu1 %v18113_v0  ;;  %17011 = vmatprep.mubr.bf16.mxu1 %v18114_v60 }
 0x7ea   : > { %17001 = vmatprep.subr.bf16.mxu1 %v18115_v20 }
 0x7ed   : > { %17002 = vmatpush3.bf16.msra.mxu1 %v18115_v20 }
 0x7ee   : > { %17003 = vmatprep.subr.bf16.mxu1 %v18116_v3 }
 0x7f1   : > { %17004 = vmatpush3.bf16.msra.mxu1 %v18116_v3 }
 0x7f2   : > { %17005 = vmatprep.subr.bf16.mxu1 %v18117_v18 }
 0x7f5   : > { %17006 = vmatpush3.bf16.msra.mxu1 %v18117_v18 }
 0x7f6   : > { %17007 = vmatprep.subr.bf16.mxu1 %v18118_v12 }
 0x7f9   : > { %17008 = vmatpush3.bf16.msra.mxu1 %v18118_v12 }
 0x7fa   : > { %17009 = vmatprep.subr.bf16.mxu1 %v18119_v58 }
 0x7fd   : > { %17010 = vmatpush3.bf16.msra.mxu1 %v18119_v58 }
 0x7fe   : > { %16531 = vmatprep.subr.bf16.mxu1 %v18121_v51 }
 0x800   : > { %17012 = vmatmul.mubr.bf16.vlgmr.msra.gmra.mrb[248].mxu1 %v19777_v6 }
 0x801   : > { %16532 = vmatpush3.bf16.msra.mxu1 %v18122_v63 }
 0x802   : > { %16533 = vmatprep.subr.bf16.mxu1 %v18123_v9 }
 0x805   : > { %16534 = vmatpush3.bf16.msra.mxu1 %v18124_v47 }
 0x806   : > { %16535 = vmatprep.subr.bf16.mxu1 %v18125_v33 }
 0x809   : > { %16536 = vmatpush3.bf16.msra.mxu1 %v18126_v14 }
 0x80a   : > { %16537 = vmatprep.subr.bf16.mxu1 %v18127_v17 }
 0x80d   : > { %16538 = vmatpush3.bf16.msra.mxu1 %v18128_v52  ;;  %v10358_v52 = vpop.permute.xlu1 %10357 }
 0x80e   : > { %16539 = vmatprep.subr.bf16.mxu1 %v18129_v19  ;;  %v10363_v19 = vpop.permute.xlu0 %10362 }
 0x811   : > { %16540 = vmatpush3.bf16.msra.mxu1 %v18130_v5 }
 0x812   : > { %16541 = vmatprep.subr.bf16.mxu1 %v18131_v57 }
 0x815   : > { %16542 = vmatpush3.bf16.msra.mxu1 %v18132_v25  ;;  %v10368_v25 = vpop.permute.xlu1 %10367 }
 0x816   : > { %16543 = vmatprep.subr.bf16.mxu1 %v18133_v23 }
 0x819   : > { %16544 = vmatpush3.bf16.msra.mxu1 %v18134_v11 }
 0x81a   : > { %16545 = vmatprep.subr.bf16.mxu1 %v18135_v35 }
 0x81d   : > { %16546 = vmatpush3.bf16.msra.mxu1 %v18136_v24  ;;  %v10406_v24 = vld [vmem:[#allocation5 + $0x6c] sm:$0x1] }
 0x81e   : > { %16559 = vmatprep.subr.bf16.mxu1 %v18139_v21  ;;  %v10432_v21 = vld [vmem:[#allocation5 + $0x70] sm:$0x1] }
 0x853   : > { %v16425_v26 = vpop.f32.mrb[216].mxu1 }
 0x854   : > { %v16426_v4 = vpop.f32.mrb[217].mxu1 }
 0x855   : > { %v16427_v2 = vadd.f32 %v16426_v4, %v16425_v26  ;;  %v16428_v59 = vpop.f32.mrb[218].mxu1 }
 0x856   : > { %v16429_v1 = vpop.f32.mrb[219].mxu1 }
 0x857   : > { %v16430_v61 = vadd.f32 %v16429_v1, %v16428_v59  ;;  %v10137_v44 = vadd.f32 %v16427_v2, %v14867_v56 }
 0x859   : > { %v10140_v32 = vadd.f32 %v16430_v61, %v14867_v56 }
 0x85b   : > { %v16431_v10 = vpop.f32.mrb[220].mxu1 }
 0x85c   : > { %v16432_v7 = vpop.f32.mrb[221].mxu1 }
 0x85d   : > { %v16433_v48 = vadd.f32 %v16432_v7, %v16431_v10  ;;  %v16434_v6 = vpop.f32.mrb[222].mxu1 }
 0x85e   : > { %v16435_v53 = vpop.f32.mrb[223].mxu1 }
 0x85f   : > { %v16436_v62 = vadd.f32 %v16435_v53, %v16434_v6  ;;  %v10145_v27 = vadd.f32 %v16433_v48, %v14867_v56 }
 0x861   : > { %v10148_v34 = vadd.f32 %v16436_v62, %v14867_v56 }
 0x873   : > { %v16453_v22 = vpop.f32.mrb[224].mxu1 }
 0x874   : > { %v16454_v16 = vpop.f32.mrb[225].mxu1 }
 0x875   : > { %v16455_v8 = vadd.f32 %v16454_v16, %v16453_v22  ;;  %v16456_v28 = vpop.f32.mrb[226].mxu1 }
 0x876   : > { %v16457_v31 = vpop.f32.mrb[227].mxu1 }
 0x877   : > { %v10186_v36 = vadd.f32 %v16455_v8, %v10137_v44  ;;  %v16458_v42 = vadd.f32 %v16457_v31, %v16456_v28 }
 0x879   : > { %v10189_v37 = vadd.f32 %v16458_v42, %v10140_v32  ;;  %v10373_v42 = vpop.permute.xlu0 %10372 }
 0x87b   : > { %v16459_v29 = vpop.f32.mrb[228].mxu1 }
 0x87c   : > { %v16460_v13 = vpop.f32.mrb[229].mxu1 }
 0x87d   : > { %v16461_v41 = vadd.f32 %v16460_v13, %v16459_v29  ;;  %v16462_v43 = vpop.f32.mrb[230].mxu1 }
 0x87e   : > { %v16463_v45 = vpop.f32.mrb[231].mxu1 }
 0x87f   : > { %v10194_v46 = vadd.f32 %v16461_v41, %v10145_v27  ;;  %v16464_v38 = vadd.f32 %v16463_v45, %v16462_v43 }
 0x881   : > { %v10197_v50 = vadd.f32 %v16464_v38, %v10148_v34 }
 0x893   : > { %v16481_v49 = vpop.f32.mrb[232].mxu1 }
 0x894   : > { %v16482_v55 = vpop.f32.mrb[233].mxu1 }
 0x895   : > { %v16483_v39 = vadd.f32 %v16482_v55, %v16481_v49  ;;  %v16484_v0 = vpop.f32.mrb[234].mxu1 }
 0x896   : > { %v16485_v40 = vpop.f32.mrb[235].mxu1 }
 0x897   : > { %v10235_v54 = vadd.f32 %v16483_v39, %v10186_v36  ;;  %v16486_v30 = vadd.f32 %v16485_v40, %v16484_v0  ;;  %v10458_v0 = vld [vmem:[#allocation5 + $0x74] sm:$0x1] }
 0x899   : > { %v10238_v20 = vadd.f32 %v16486_v30, %v10189_v37 }
 0x89b   : > { %v16487_v60 = vpop.f32.mrb[236].mxu1 }
 0x89c   : > { %v16488_v3 = vpop.f32.mrb[237].mxu1 }
 0x89d   : > { %v16489_v18 = vadd.f32 %v16488_v3, %v16487_v60  ;;  %v16490_v12 = vpop.f32.mrb[238].mxu1 }
 0x89e   : > { %v16491_v58 = vpop.f32.mrb[239].mxu1 }
 0x89f   : > { %v10243_v51 = vadd.f32 %v16489_v18, %v10194_v46  ;;  %v16492_v63 = vadd.f32 %v16491_v58, %v16490_v12 }
 0x8a1   : > { %v10246_v26 = vadd.f32 %v16492_v63, %v10197_v50 }
 0x8b3   : > { %v16509_v4 = vpop.f32.mrb[240].mxu1 }
 0x8b4   : > { %v16510_v2 = vpop.f32.mrb[241].mxu1 }
 0x8b5   : > { %v16511_v59 = vadd.f32 %v16510_v2, %v16509_v4  ;;  %v16512_v1 = vpop.f32.mrb[242].mxu1 }
 0x8b6   : > { %v16513_v61 = vpop.f32.mrb[243].mxu1 }
 0x8b7   : > { %v16514_v10 = vadd.f32 %v16513_v61, %v16512_v1  ;;  %v10284_v7 = vadd.f32 %v16511_v59, %v10235_v54 }
 0x8b9   : > { %v10287_v48 = vadd.f32 %v16514_v10, %v10238_v20 }
 0x8bb   : > { %v16515_v6 = vpop.f32.mrb[244].mxu1 }
 0x8bc   : > { %v16516_v53 = vpop.f32.mrb[245].mxu1 }
 0x8bd   : > { %v16517_v62 = vadd.f32 %v16516_v53, %v16515_v6  ;;  %v16518_v9 = vpop.f32.mrb[246].mxu1  ;;  %v10484_v6 = vld [vmem:[#allocation5 + $0x78] sm:$0x1] }
 0x8be   : > { %v16519_v47 = vpop.f32.mrb[247].mxu1 }
 0x8bf   : > { %v16520_v33 = vadd.f32 %v16519_v47, %v16518_v9  ;;  %v10292_v14 = vadd.f32 %v16517_v62, %v10243_v51 }
 0x8c1   : > { %v10295_v17 = vadd.f32 %v16520_v33, %v10246_v26 }
 0x8d3   : > { %v17013_v5 = vpop.f32.mrb[248].mxu1 }
 0x8d4   : > { %v10341_v56 = vadd.f32 %v17013_v5, %v10292_v14  ;;  %v10332_v57 = vpop.f32.mrb[249].mxu1 }
 0x8d5   : > { %v10333_v22 = vadd.f32 %v10332_v57, %v10284_v7  ;;  %v17014_v16 = vpop.f32.mrb[250].mxu1 }
 0x8d6   : > { %v10349_v44 = vmax.f32 %v10341_v56, 0.0  ;;  %v10344_v8 = vadd.f32 %v17014_v16, %v10295_v17  ;;  %v10335_v28 = vpop.f32.mrb[251].mxu1  ;;  %v10510_v16 = vld [vmem:[#allocation5 + $0x7c] sm:$0x1] }
 0x8d7   : > { %v10347_v31 = vmax.f32 %v10333_v22, 0.0  ;;  %v10336_v23 = vadd.f32 %v10335_v28, %v10287_v48 }
 0x8d8   : > { %v10377_v32 = vmul.f32 %v10368_v25, %v10349_v44  ;;  %v10350_v36 = vmax.f32 %v10344_v8, 0.0 }
 0x8d9   : > { %v10375_v37 = vmul.f32 %v10358_v52, %v10347_v31  ;;  %v10348_v11 = vmax.f32 %v10336_v23, 0.0  ;;  %v11604_v52 = vld [vmem:[#allocation4 + $0x9] sm:$0x1] }
 0x8da   : > { %10381 = vst [vmem:[#allocation3 + $0x16] sm:$0xff] %v10377_v32  ;;  %v10378_v35 = vmul.f32 %v10373_v42, %v10350_v36  ;;  %v15884_v29 = vpack.c.bf16 %v10377_v32, %v10377_v32 }
 0x8db   : > { %10379 = vst [vmem:[#allocation3 + $0x6] sm:$0xff] %v10375_v37  ;;  %v10376_v13 = vmul.f32 %v10363_v19, %v10348_v11  ;;  %v15882_v27 = vpack.c.bf16 %v10375_v37, %v10375_v37 }
 0x8dc   : > { %10382 = vst [vmem:[#allocation3 + $0x1e] sm:$0x1] %v10378_v35  ;;  %10509 = vst [vmem:[#allocation5 + $0x58] sm:$0xf] %v15884_v29 }
 0x8dd   : > { %10380 = vst [vmem:[#allocation3 + $0xe] sm:$0xff] %v10376_v13  ;;  %v15883_v41 = vpack.c.bf16 %v10376_v13, %v10376_v13  ;;  %10507 = vst [vmem:[#allocation5 + $0x10] sm:$0xf] %v15882_v27 }
 0x8df   : > { %10508 = vst [vmem:[#allocation5 + $0x34] sm:$0xf] %v15883_v41 }
 0x8e1   : > { %v10386_v43 = vld [vmem:[#allocation3 + $0x18] sm:$0x1]  ;;  %v10412_v45 = vld [vmem:[#allocation3 + $0x19] sm:$0x1]  ;;  %v10438_v34 = vld [vmem:[#allocation3 + $0x1a] sm:$0x1] }
 0x8e2   : > { %v10383_v46 = vld [vmem:[#allocation3] sm:$0xff]  ;;  %v15869_v50 = vpack.c.bf16 %v10386_v43, %v10386_v43  ;;  %v15873_v49 = vpack.c.bf16 %v10412_v45, %v10412_v45  ;;  %v15877_v39 = vpack.c.bf16 %v10438_v34, %v10438_v34  ;;  %v10464_v3 = vld [vmem:[#allocation3 + $0x1d] sm:$0x1]  ;;  %v11618_v45 = vld [vmem:[#allocation4 + $0xa] sm:$0x1] }
 0x8e3   : > { %v10409_v38 = vld [vmem:[#allocation3 + $0x1] sm:$0xff]  ;;  %v15866_v54 = vpack.c.bf16 %v10383_v46, %v10383_v46  ;;  %v15881_v14 = vpack.c.bf16 %v10464_v3, %v10464_v3  ;;  %v10490_v22 = vld [vmem:[#allocation3 + $0x1e] sm:$0x1] }
 0x8e4   : > { %v10435_v55 = vld [vmem:[#allocation3 + $0x2] sm:$0xff]  ;;  %v15870_v30 = vpack.c.bf16 %v10409_v38, %v10409_v38  ;;  %v10385_v51 = vld [vmem:[#allocation3 + $0x10] sm:$0xff]  ;;  %v10407_v63 = vsel %vm18555_vm2, %v15869_v50, %v10406_v24  ;;  %v10433_v26 = vsel %vm18555_vm2, %v15873_v49, %v10432_v21  ;;  %v10459_v48 = vsel %vm18555_vm2, %v15877_v39, %v10458_v0  ;;  %v10541_v37 = vld [vmem:[#allocation3 + $0x1a] sm:$0xff] }
 0x8e5   : > { %v10593_v40 = vld [vmem:[#allocation3 + $0x1c] sm:$0xff]  ;;  %v15874_v20 = vpack.c.bf16 %v10435_v55, %v10435_v55  ;;  %v10461_v60 = vld [vmem:[#allocation3 + $0x5] sm:$0xff]  ;;  %10403 = vst [vmem:[#allocation5] sm:$0xf] %v15866_v54  ;;  %v15868_v1 = vpack.c.bf16 %v10385_v51, %v10385_v51  ;;  %10408 = vst [vmem:[#allocation5 + $0x6c] sm:$0x1] %v10407_v63  ;;  %v10485_v44 = vsel %vm18555_vm2, %v15881_v14, %v10484_v6 }
 0x8e6   : > { %v15900_v18 = vpack.c.bf16 %v10593_v40, %v10593_v40  ;;  %v10384_v12 = vld [vmem:[#allocation3 + $0x8] sm:$0xff]  ;;  %v15878_v4 = vpack.c.bf16 %v10461_v60, %v10461_v60  ;;  %10429 = vst [vmem:[#allocation5 + $0x4] sm:$0xf] %v15870_v30  ;;  %v10411_v61 = vld [vmem:[#allocation3 + $0x11] sm:$0xff]  ;;  %10434 = vst [vmem:[#allocation5 + $0x70] sm:$0x1] %v10433_v26  ;;  %v15885_v28 = vpack.c.bf16 %v10490_v22, %v10490_v22 }
 0x8e7   : > { %v10410_v58 = vld [vmem:[#allocation3 + $0x9] sm:$0xff]  ;;  %v15867_v2 = vpack.c.bf16 %v10384_v12, %v10384_v12  ;;  %10455 = vst [vmem:[#allocation5 + $0x8] sm:$0xf] %v15874_v20  ;;  %v15872_v53 = vpack.c.bf16 %v10411_v61, %v10411_v61  ;;  %v10437_v47 = vld [vmem:[#allocation3 + $0x12] sm:$0xff]  ;;  %10460 = vst [vmem:[#allocation5 + $0x74] sm:$0x1] %v10459_v48  ;;  %v15892_v13 = vpack.c.bf16 %v10541_v37, %v10541_v37 }
 0x8e8   : > { %v15871_v59 = vpack.c.bf16 %v10410_v58, %v10410_v58  ;;  %v10436_v10 = vld [vmem:[#allocation3 + $0xa] sm:$0xff]  ;;  %10613 = vst [vmem:[#allocation5 + $0x68] sm:$0xf] %v15900_v18  ;;  %10481 = vst [vmem:[#allocation5 + $0xc] sm:$0xf] %v15878_v4  ;;  %v10463_v33 = vld [vmem:[#allocation3 + $0x15] sm:$0xff]  ;;  %v15876_v19 = vpack.c.bf16 %v10437_v47, %v10437_v47  ;;  %v10511_v29 = vsel %vm18555_vm2, %v15885_v28, %v10510_v16 }
 0x8e9   : > { %v10462_v7 = vld [vmem:[#allocation3 + $0xd] sm:$0xff]  ;;  %v15875_v62 = vpack.c.bf16 %v10436_v10, %v10436_v10  ;;  %10404 = vst [vmem:[#allocation5 + $0x24] sm:$0xf] %v15867_v2  ;;  %10405 = vst [vmem:[#allocation5 + $0x48] sm:$0xf] %v15868_v1  ;;  %v15880_v5 = vpack.c.bf16 %v10463_v33, %v10463_v33  ;;  %v10515_v25 = vld [vmem:[#allocation3 + $0x17] sm:$0xff]  ;;  %v15905_v24 = vpack.c.bf16 %v11604_v52, %v11604_v52 }
 0x8ea   : > { %v15879_v9 = vpack.c.bf16 %v10462_v7, %v10462_v7  ;;  %v10513_v17 = vld [vmem:[#allocation3 + $0x7] sm:$0xff]  ;;  %10430 = vst [vmem:[#allocation5 + $0x28] sm:$0xf] %v15871_v59  ;;  %v10514_v56 = vld [vmem:[#allocation3 + $0xf] sm:$0xff]  ;;  %10431 = vst [vmem:[#allocation5 + $0x4c] sm:$0xf] %v15872_v53  ;;  %v15888_v32 = vpack.c.bf16 %v10515_v25, %v10515_v25  ;;  %v15907_v54 = vpack.c.bf16 %v11618_v45, %v11618_v45 }
 0x8eb   : > { %v15886_v57 = vpack.c.bf16 %v10513_v17, %v10513_v17  ;;  %10456 = vst [vmem:[#allocation5 + $0x2c] sm:$0xf] %v15875_v62  ;;  %v15887_v8 = vpack.c.bf16 %v10514_v56, %v10514_v56  ;;  %10559 = vst [vmem:[#allocation5 + $0x18] sm:$0xf] %v15875_v62  ;;  %v10565_v31 = vld [vmem:[#allocation3 + $0xb] sm:$0xff]  ;;  %v10566_v23 = vld [vmem:[#allocation3 + $0x13] sm:$0xff] }
 0x8ec   : > { %10482 = vst [vmem:[#allocation5 + $0x30] sm:$0xf] %v15879_v9  ;;  %10457 = vst [vmem:[#allocation5 + $0x50] sm:$0xf] %v15876_v19  ;;  %v15894_v36 = vpack.c.bf16 %v10565_v31, %v10565_v31  ;;  %v15895_v42 = vpack.c.bf16 %v10566_v23, %v10566_v23  ;;  %v10567_v11 = vld [vmem:[#allocation3 + $0x1b] sm:$0xff]  ;;  %v10591_v35 = vld [vmem:[#allocation3 + $0xc] sm:$0xff] }
 0x8ed   : > { %10483 = vst [vmem:[#allocation5 + $0x54] sm:$0xf] %v15880_v5  ;;  %10486 = vst [vmem:[#allocation5 + $0x78] sm:$0x1] %v10485_v44  ;;  %v15896_v27 = vpack.c.bf16 %v10567_v11, %v10567_v11  ;;  %v10592_v41 = vld [vmem:[#allocation3 + $0x14] sm:$0xff]  ;;  %v15898_v43 = vpack.c.bf16 %v10591_v35, %v10591_v35  ;;  %v10761_v49 = vld [vmem:[#allocation5] sm:$0xff] }
 0x8ee   : > { %10533 = vst [vmem:[#allocation5 + $0x14] sm:$0xf] %v15886_v57  ;;  %10560 = vst [vmem:[#allocation5 + $0x3c] sm:$0xf] %v15876_v19  ;;  %v11632_v21 = vld [vmem:[#allocation4 + $0xb] sm:$0x1]  ;;  %v15899_v34 = vpack.c.bf16 %v10592_v41, %v10592_v41 }
 0x8ef   : > { %10534 = vst [vmem:[#allocation5 + $0x38] sm:$0xf] %v15887_v8  ;;  %10512 = vst [vmem:[#allocation5 + $0x7c] sm:$0x1] %v10511_v29  ;;  %v18140_v46 = vld [vmem:[%s20954_s1 + $0x980] sm:$0xff]   ;;  %v18144_v55 = vld [vmem:[%s20954_s1 + $0x9c8] sm:$0xff]   ;;  %v15909_v30 = vpack.c.bf16 %v11632_v21, %v11632_v21 }
 0x8f0   : > { %10535 = vst [vmem:[#allocation5 + $0x5c] sm:$0xf] %v15888_v32  ;;  %10585 = vst [vmem:[#allocation5 + $0x1c] sm:$0xf] %v15894_v36  ;;  %v11646_v38 = vld [vmem:[#allocation4 + $0xc] sm:$0x1] }
 0x8f1   : > { %10586 = vst [vmem:[#allocation5 + $0x40] sm:$0xf] %v15895_v42  ;;  %v11660_v50 = vld [vmem:[#allocation4 + $0xd] sm:$0x1]  ;;  %10561 = vst [vmem:[#allocation5 + $0x60] sm:$0xf] %v15892_v13  ;;  %v15911_v3 = vpack.c.bf16 %v11646_v38, %v11646_v38 }
 0x8f2   : > { %10587 = vst [vmem:[#allocation5 + $0x64] sm:$0xf] %v15896_v27  ;;  %10611 = vst [vmem:[#allocation5 + $0x20] sm:$0xf] %v15898_v43  ;;  %v10766_v39 = vld [vmem:[#allocation5 + $0x24] sm:$0xff]  ;;  %v15913_v4 = vpack.c.bf16 %v11660_v50, %v11660_v50  ;;  %v18151_v52 = vld [vmem:[%s20954_s1 + $0x9d8] sm:$0xff]  }
 0x8f3   : > { %10612 = vst [vmem:[#allocation5 + $0x44] sm:$0xf] %v15899_v34  ;;  %v18137_v0 = vld [vmem:[#allocation5 + $0x4] ss:$36 sps:$4 sm:$0xff]   ;;  %v14995_v60 = vcombine.low %v10761_v49, %v10766_v39  ;;  %v11656_v18 = vld [vmem:[#allocation5 + $0x34] sm:$0x1] }
 0x8f4   : > { %v11614_v40 = vld [vmem:[#allocation5 + $0x28] sm:$0x1]  ;;  %11342 = vmatprep.mubr.bf16.mxu1 %v18137_v0  ;;  %v18143_v12 = vld [vmem:[#allocation5 + $0x4c] ss:$36 sps:$4 sm:$0x1f]   ;;  %v18145_v58 = vld [vmem:[%s20954_s1 + $0x988] sm:$0xff]   ;;  %v11657_v48 = vsel %vm18555_vm2, %v15911_v3, %v11656_v18 }
 0x8f5   : > { %v11615_v20 = vsel %vm18555_vm2, %v15905_v24, %v11614_v40  ;;  %v20267_v51 = vld [vmem:[#allocation5 + $0x8] ss:$36 sps:$4 sm:$0xff]   ;;  %11343 = vmatmul.mubr.bf16.vlgmr.msra.gmra.mrb[252].mxu1 %v14995_v60  ;;  %v11642_v26 = vld [vmem:[#allocation5 + $0x30] sm:$0x1]  ;;  %v11674_v2 = vld [vmem:[#allocation4 + $0xe] sm:$0x1] }
 0x8f6   : > { %11616 = vst [vmem:[#allocation5 + $0x28] sm:$0x1] %v11615_v20  ;;  %v11628_v63 = vld [vmem:[#allocation5 + $0x2c] sm:$0x1]  ;;  %16560 = vmatpush3.bf16.msra.mxu1 %v18140_v46  ;;  %11350 = vmatprep.mubr.bf16.mxu1 %v18143_v12  ;;  %v11643_v1 = vsel %vm18555_vm2, %v15909_v30, %v11642_v26  ;;  %v11688_v61 = vld [vmem:[#allocation4 + $0xf] sm:$0x1]  ;;  %v15915_v53 = vpack.c.bf16 %v11674_v2, %v11674_v2 }
 0x8f7   : > { %v11629_v59 = vsel %vm18555_vm2, %v15907_v54, %v11628_v63  ;;  %16561 = vmatprep.subr.bf16.mxu1 %v18144_v55  ;;  %v18146_v10 = vld [vmem:[%s20954_s1 + $0x9d0] sm:$0xff]   ;;  %11644 = vst [vmem:[#allocation5 + $0x30] sm:$0x1] %v11643_v1  ;;  %v20276_v7 = vld [vmem:[#allocation5 + $0x10] ss:$36 sps:$4 sm:$0xff]   ;;  %v15917_v9 = vpack.c.bf16 %v11688_v61, %v11688_v61  ;;  %v18153_v8 = vld [vmem:[%s20954_s1 + $0x9e0] sm:$0xff]  }
 0x8f8   : > { %11630 = vst [vmem:[#allocation5 + $0x2c] sm:$0x1] %v11629_v59  ;;  %11658 = vst [vmem:[#allocation5 + $0x34] sm:$0x1] %v11657_v48  ;;  %v11670_v6 = vld [vmem:[#allocation5 + $0x38] sm:$0x1] }
 0x8f9   : > { %v11671_v62 = vsel %vm18555_vm2, %v15913_v4, %v11670_v6  ;;  %v11702_v47 = vld [vmem:[#allocation4 + $0x10] sm:$0x1]  ;;  %v18147_v33 = vld [vmem:[%s20954_s1 + $0x990] sm:$0xff]   ;;  %v11684_v19 = vld [vmem:[#allocation5 + $0x3c] sm:$0x1] }
 0x8fa   : > { %16562 = vmatpush3.bf16.msra.mxu1 %v18145_v58  ;;  %11672 = vst [vmem:[#allocation5 + $0x38] sm:$0x1] %v11671_v62  ;;  %v20285_v14 = vld [vmem:[#allocation5 + $0x18] ss:$36 sps:$4 sm:$0xff]   ;;  %v11685_v56 = vsel %vm18555_vm2, %v15915_v53, %v11684_v19  ;;  %v11698_v57 = vld [vmem:[#allocation5 + $0x40] sm:$0x1]  ;;  %v15919_v22 = vpack.c.bf16 %v11702_v47, %v11702_v47 }
 0x8fb   : > { %v18141_v17 = vld [vmem:[#allocation5 + $0x48] ss:$36 sps:$4 sm:$0x1f]   ;;  %16563 = vmatprep.subr.bf16.mxu1 %v18146_v10  ;;  %11686 = vst [vmem:[#allocation5 + $0x3c] sm:$0x1] %v11685_v56  ;;  %v11699_v16 = vsel %vm18555_vm2, %v15917_v9, %v11698_v57  ;;  %v18152_v44 = vld [vmem:[%s20954_s1 + $0x998] sm:$0xff]  }
 0x8fc   : > { %11700 = vst [vmem:[#allocation5 + $0x40] sm:$0x1] %v11699_v16  ;;  %v20300_v28 = vld [vmem:[#allocation5 + $0x20] ss:$36 sps:$4 sm:$0xff]   ;;  %v18154_v23 = vld [vmem:[%s20954_s1 + $0x9a0] sm:$0xff]   ;;  %v18157_v11 = vld [vmem:[%s20954_s1 + $0x9f0] sm:$0xff]  }
 0x8fd   : > { %11351 = vmatmul.mubr.bf16.gmra.mrb[0].mxu1 %v18141_v17  ;;  %v11712_v25 = vld [vmem:[#allocation5 + $0x44] sm:$0x1]  ;;  %v12688_v32 = vld [vmem:[#allocation4 + $0x10] sm:$0x1]  ;;  %v18158_v27 = vld [vmem:[%s20954_s1 + $0x9b0] sm:$0xff]  }
 0x8fe   : > { %v18150_v5 = vld [vmem:[#allocation5 + $0xc] ss:$36 sps:$4 sm:$0xff]   ;;  %16564 = vmatpush3.bf16.msra.mxu1 %v18147_v33  ;;  %v11713_v31 = vsel %vm18555_vm2, %v15919_v22, %v11712_v25  ;;  %v18155_v36 = vld [vmem:[%s20954_s1 + $0x9e8] sm:$0xff]   ;;  %v15937_v42 = vpack.c.bf16 %v12688_v32, %v12688_v32  ;;  %v18161_v24 = vld [vmem:[%s20954_s1 + $0xa40] sm:$0xff]  }
 0x8ff   : > { %11391 = vmatprep.mubr.bf16.mxu1 %v18150_v5  ;;  %16565 = vmatprep.subr.bf16.mxu1 %v18151_v52  ;;  %11714 = vst [vmem:[#allocation5 + $0x44] sm:$0x1] %v11713_v31  ;;  %v18156_v37 = vld [vmem:[%s20954_s1 + $0x9a8] sm:$0xff]   ;;  %v18159_v41 = vld [vmem:[%s20954_s1 + $0x9f8] sm:$0xff]   ;;  %v18165_v45 = vld [vmem:[%s20954_s1 + $0xa00] sm:$0xff]  }
 0x900   : > { %v18160_v43 = vld [vmem:[%s20954_s1 + $0x9b8] sm:$0xff]   ;;  %v18166_v21 = vld [vmem:[%s20954_s1 + $0xa48] sm:$0xff]   ;;  %v18168_v38 = vld [vmem:[%s20954_s1 + $0xa50] sm:$0xff]  }
 0x901   : > { %v18164_v34 = vld [vmem:[#allocation5 + $0x54] ss:$36 sps:$4 sm:$0x1f]   ;;  %v18167_v46 = vld [vmem:[%s20954_s1 + $0xa08] sm:$0xff]   ;;  %v18169_v50 = vld [vmem:[%s20954_s1 + $0xa10] sm:$0xff]  }
 0x902   : > { %16566 = vmatpush3.bf16.msra.mxu1 %v18152_v44  ;;  %v18162_v49 = vld [vmem:[#allocation5 + $0x50] ss:$36 sps:$4 sm:$0x1f]   ;;  %v18175_v40 = vld [vmem:[%s20954_s1 + $0xa60] sm:$0xff]   ;;  %v18177_v30 = vld [vmem:[%s20954_s1 + $0xa68] sm:$0xff]  }
 0x903   : > { %16567 = vmatprep.subr.bf16.mxu1 %v18153_v8  ;;  %v18173_v55 = vld [vmem:[%s20954_s1 + $0xa58] sm:$0xff]   ;;  %v18176_v54 = vld [vmem:[%s20954_s1 + $0xa20] sm:$0xff]   ;;  %v18178_v20 = vld [vmem:[%s20954_s1 + $0xa28] sm:$0xff]  }
 0x904   : > { %v18172_v39 = vld [vmem:[#allocation5 + $0x14] ss:$36 sps:$4 sm:$0xff]   ;;  %v18179_v60 = vld [vmem:[%s20954_s1 + $0xa70] sm:$0xff]   ;;  %v18188_v63 = vld [vmem:[%s20954_s1 + $0xac8] sm:$0xff]  }
 0x905   : > { %v18174_v0 = vld [vmem:[%s20954_s1 + $0xa18] sm:$0xff]   ;;  %v18180_v3 = vld [vmem:[%s20954_s1 + $0xa30] sm:$0xff]   ;;  %v18183_v58 = vld [vmem:[%s20954_s1 + $0xac0] sm:$0xff]  }
 0x906   : > { %16568 = vmatpush3.bf16.msra.mxu1 %v18154_v23  ;;  %v20316_v35 = vld [vmem:[#allocation5 + $0x44] sm:$0x1]  ;;  %v18181_v18 = vld [vmem:[%s20954_s1 + $0xa78] sm:$0xff]   ;;  %v18186_v26 = vld [vmem:[#allocation5 + $0x5c] ss:$36 sps:$4 sm:$0x1f]  }
 0x907   : > { %16569 = vmatprep.subr.bf16.mxu1 %v18155_v36  ;;  %v12698_v29 = vld [vmem:[#allocation5 + $0x44] sm:$0x1]  ;;  %v18182_v12 = vld [vmem:[%s20954_s1 + $0xa38] sm:$0xff]   ;;  %v18190_v2 = vld [vmem:[%s20954_s1 + $0xad0] sm:$0xff]  }
 0x908   : > { %v12699_v13 = vsel %vm18555_vm2, %v15937_v42, %v12698_v29  ;;  %v18189_v4 = vld [vmem:[%s20954_s1 + $0xa88] sm:$0xff]   ;;  %v18191_v59 = vld [vmem:[%s20954_s1 + $0xa90] sm:$0xff]   ;;  %v18184_v1 = vld [vmem:[#allocation5 + $0x58] ss:$36 sps:$4 sm:$0x1f]  }
 0x909   : > { %12700 = vst [vmem:[#allocation5 + $0x44] sm:$0x1] %v12699_v13  ;;  %v18195_v61 = vld [vmem:[%s20954_s1 + $0xad8] sm:$0xff]   ;;  %v18194_v10 = vld [vmem:[#allocation5 + $0x1c] ss:$36 sps:$4 sm:$0xff]   ;;  %v18201_v9 = vld [vmem:[%s20954_s1 + $0xaf0] sm:$0xff]  }
 0x90a   : > { %16570 = vmatpush3.bf16.msra.mxu1 %v18156_v37  ;;  %v18197_v48 = vld [vmem:[%s20954_s1 + $0xae0] sm:$0xff]   ;;  %v18199_v53 = vld [vmem:[%s20954_s1 + $0xae8] sm:$0xff]   ;;  %v18202_v47 = vld [vmem:[%s20954_s1 + $0xab0] sm:$0xff]  }
 0x90b   : > { %16571 = vmatprep.subr.bf16.mxu1 %v18157_v11  ;;  %v18198_v6 = vld [vmem:[%s20954_s1 + $0xaa0] sm:$0xff]   ;;  %v18200_v62 = vld [vmem:[%s20954_s1 + $0xaa8] sm:$0xff]   ;;  %v18203_v33 = vld [vmem:[%s20954_s1 + $0xaf8] sm:$0xff]  }
 0x90c   : > { %v18204_v17 = vld [vmem:[%s20954_s1 + $0xab8] sm:$0xff]   ;;  %v18205_v52 = vld [vmem:[%s20954_s1 + $0xb00] sm:$0xff]   ;;  %v18209_v19 = vld [vmem:[%s20954_s1 + $0xb08] sm:$0xff]  }
 0x90d   : > { %v18208_v5 = vld [vmem:[#allocation5 + $0x64] ss:$36 sps:$4 sm:$0x1f]   ;;  %v18212_v22 = vld [vmem:[%s20954_s1 + $0xb18] sm:$0xff]   ;;  %v18218_v25 = vld [vmem:[%s20954_s1 + $0xc00] sm:$0xff]  }
 0x90e   : > { %16572 = vmatpush3.bf16.msra.mxu1 %v18158_v27  ;;  %v18210_v56 = vld [vmem:[%s20954_s1 + $0xb10] sm:$0xff]   ;;  %v18206_v57 = vld [vmem:[#allocation5 + $0x60] ss:$36 sps:$4 sm:$0x1f]   ;;  %v18216_v8 = vld [vmem:[%s20954_s1 + $0xb38] sm:$0xff]   ;;  %16675 = vmatprep.subr.bf16.mxu0 %v18218_v25 }
 0x90f   : > { %16573 = vmatprep.subr.bf16.mxu1 %v18159_v41  ;;  %v18214_v16 = vld [vmem:[%s20954_s1 + $0xb28] sm:$0xff]   ;;  %v18215_v44 = vld [vmem:[%s20954_s1 + $0xb30] sm:$0xff]   ;;  %v18219_v31 = vld [vmem:[%s20954_s1 + $0xbc0] sm:$0xff]  }
 0x910   : > { %16676 = vmatpush3.bf16.msra.mxu0 %v18219_v31  ;;  %v18220_v23 = vld [vmem:[%s20954_s1 + $0xc08] sm:$0xff]   ;;  %v18222_v36 = vld [vmem:[%s20954_s1 + $0xc10] sm:$0xff]   ;;  %v18224_v37 = vld [vmem:[%s20954_s1 + $0xc18] sm:$0xff]  }
 0x911   : > { %16677 = vmatprep.subr.bf16.mxu0 %v18220_v23  ;;  %v18221_v32 = vld [vmem:[%s20954_s1 + $0xbc8] sm:$0xff]   ;;  %v18223_v42 = vld [vmem:[%s20954_s1 + $0xbd0] sm:$0xff]   ;;  %v18225_v11 = vld [vmem:[%s20954_s1 + $0xbd8] sm:$0xff]  }
 0x912   : > { %16574 = vmatpush3.bf16.msra.mxu1 %v18160_v43  ;;  %v18226_v29 = vld [vmem:[%s20954_s1 + $0xc20] sm:$0xff]   ;;  %v18244_v25 = vld [vmem:[%s20954_s1 + $0xbb0] sm:$0xff]   ;;  %v18247_v23 = vld [vmem:[%s20954_s1 + $0xbb8] sm:$0xff]  }
 0x913   : > { %16587 = vmatprep.subr.bf16.mxu1 %v18161_v24  ;;  %v18227_v13 = vld [vmem:[%s20954_s1 + $0xbe0] sm:$0xff]   ;;  %v18245_v31 = vld [vmem:[%s20954_s1 + $0xb70] sm:$0xff]  }
 0x914   : > { %16678 = vmatpush3.bf16.msra.mxu0 %v18221_v32  ;;  %v18249_v32 = vld [vmem:[%s20954_s1 + $0xb78] sm:$0xff]  }
 0x915   : > { %11392 = vmatmul.mubr.bf16.vlgmr.msra.gmra.mrb[4].mxu1 %v20267_v51  ;;  %v18187_v51 = vld [vmem:[%s20954_s1 + $0xa80] sm:$0xff]   ;;  %16679 = vmatprep.subr.bf16.mxu0 %v18222_v36 }
 0x916   : > { %11399 = vmatprep.mubr.bf16.mxu1 %v18164_v34  ;;  %16588 = vmatpush3.bf16.msra.mxu1 %v18165_v45  ;;  %v18257_v36 = vld [vmem:[%s20954_s1 + $0xc80] sm:$0xff]  }
 0x917   : > { %16589 = vmatprep.subr.bf16.mxu1 %v18166_v21 }
 0x918   : > { %16680 = vmatpush3.bf16.msra.mxu0 %v18223_v42 }
 0x919   : > { %16681 = vmatprep.subr.bf16.mxu0 %v18224_v37 }
 0x91a   : > { %16590 = vmatpush3.bf16.msra.mxu1 %v18167_v46 }
 0x91b   : > { %16591 = vmatprep.subr.bf16.mxu1 %v18168_v38 }
 0x91c   : > { %16682 = vmatpush3.bf16.msra.mxu0 %v18225_v11 }
 0x91d   : > { %11400 = vmatmul.mubr.bf16.gmra.mrb[8].mxu1 %v18162_v49  ;;  %16683 = vmatprep.subr.bf16.mxu0 %v18226_v29 }
 0x91e   : > { %16592 = vmatpush3.bf16.msra.mxu1 %v18169_v50  ;;  %11440 = vmatprep.mubr.bf16.mxu1 %v18172_v39  ;;  %v14994_v39 = vld [vmem:[%s20955_s2 + $0x4] ss:$0 sm:$0xff] }
 0x91f   : > { %16593 = vmatprep.subr.bf16.mxu1 %v18173_v55 }
 0x920   : > { %16684 = vmatpush3.bf16.msra.mxu0 %v18227_v13 }
 0x922   : > { %16594 = vmatpush3.bf16.msra.mxu1 %v18174_v0  ;;  %v18228_v0 = vld [vmem:[%s20954_s1 + $0xb80] sm:$0xff]  }
 0x923   : > { %16595 = vmatprep.subr.bf16.mxu1 %v18175_v40  ;;  %v18229_v40 = vld [vmem:[%s20954_s1 + $0xb40] sm:$0xff]  }
 0x926   : > { %16596 = vmatpush3.bf16.msra.mxu1 %v18176_v54  ;;  %v18230_v54 = vld [vmem:[%s20954_s1 + $0xc28] sm:$0xff]  }
 0x927   : > { %16597 = vmatprep.subr.bf16.mxu1 %v18177_v30  ;;  %16685 = vmatprep.subr.bf16.mxu0 %v18230_v54 }
 0x92a   : > { %16598 = vmatpush3.bf16.msra.mxu1 %v18178_v20  ;;  %v18231_v20 = vld [vmem:[%s20954_s1 + $0xb88] sm:$0xff]  }
 0x92b   : > { %16599 = vmatprep.subr.bf16.mxu1 %v18179_v60  ;;  %v18232_v60 = vld [vmem:[%s20954_s1 + $0xbe8] sm:$0xff]  }
 0x92c   : > { %16686 = vmatpush3.bf16.msra.mxu0 %v18232_v60 }
 0x92e   : > { %16600 = vmatpush3.bf16.msra.mxu1 %v18180_v3 }
 0x92f   : > { %16601 = vmatprep.subr.bf16.mxu1 %v18181_v18 }
 0x932   : > { %16602 = vmatpush3.bf16.msra.mxu1 %v18182_v12 }
 0x933   : > { %16615 = vmatprep.subr.bf16.mxu1 %v18183_v58 }
 0x935   : > { %11441 = vmatmul.mubr.bf16.vlgmr.msra.gmra.mrb[12].mxu1 %v20276_v7  ;;  %v18196_v7 = vld [vmem:[%s20954_s1 + $0xa98] sm:$0xff]  }
 0x936   : > { %11448 = vmatprep.mubr.bf16.mxu1 %v18186_v26  ;;  %16616 = vmatpush3.bf16.msra.mxu1 %v18187_v51  ;;  %v18233_v51 = vld [vmem:[%s20954_s1 + $0xb48] sm:$0xff]   ;;  %v18234_v26 = vld [vmem:[%s20954_s1 + $0xb90] sm:$0xff]  }
 0x937   : > { %16617 = vmatprep.subr.bf16.mxu1 %v18188_v63 }
 0x93a   : > { %16618 = vmatpush3.bf16.msra.mxu1 %v18189_v4  ;;  %v18242_v4 = vld [vmem:[%s20954_s1 + $0xc30] sm:$0xff]  }
 0x93b   : > { %16619 = vmatprep.subr.bf16.mxu1 %v18190_v2  ;;  %16687 = vmatprep.subr.bf16.mxu0 %v18242_v4 }
 0x93d   : > { %11449 = vmatmul.mubr.bf16.gmra.mrb[16].mxu1 %v18184_v1 }
 0x93e   : > { %16620 = vmatpush3.bf16.msra.mxu1 %v18191_v59  ;;  %11489 = vmatprep.mubr.bf16.mxu1 %v18194_v10  ;;  %v18246_v10 = vld [vmem:[%s20954_s1 + $0xc38] sm:$0xff]  }
 0x93f   : > { %16621 = vmatprep.subr.bf16.mxu1 %v18195_v61  ;;  %v18243_v61 = vld [vmem:[%s20954_s1 + $0xbf0] sm:$0xff]  }
 0x940   : > { %16688 = vmatpush3.bf16.msra.mxu0 %v18243_v61 }
 0x941   : > { %16689 = vmatprep.subr.bf16.mxu0 %v18246_v10 }
 0x942   : > { %16622 = vmatpush3.bf16.msra.mxu1 %v18196_v7 }
 0x943   : > { %16623 = vmatprep.subr.bf16.mxu1 %v18197_v48  ;;  %v18235_v48 = vld [vmem:[%s20954_s1 + $0xb50] sm:$0xff]  }
 0x946   : > { %16624 = vmatpush3.bf16.msra.mxu1 %v18198_v6  ;;  %v18248_v6 = vld [vmem:[%s20954_s1 + $0xbf8] sm:$0xff]  }
 0x947   : > { %16625 = vmatprep.subr.bf16.mxu1 %v18199_v53  ;;  %v18236_v53 = vld [vmem:[%s20954_s1 + $0xb98] sm:$0xff]   ;;  %16690 = vmatpush3.bf16.msra.mxu0 %v18248_v6 }
 0x94a   : > { %16626 = vmatpush3.bf16.msra.mxu1 %v18200_v62 }
 0x94b   : > { %16627 = vmatprep.subr.bf16.mxu1 %v18201_v9  ;;  %v18252_v9 = vld [vmem:[%s20954_s1 + $0xd00] sm:$0xff]  }
 0x94c   : > { %16719 = vmatprep.subr.bf16.mxu0 %v18252_v9 }
 0x94e   : > { %16628 = vmatpush3.bf16.msra.mxu1 %v18202_v47 }
 0x94f   : > { %16629 = vmatprep.subr.bf16.mxu1 %v18203_v33 }
 0x952   : > { %16630 = vmatpush3.bf16.msra.mxu1 %v18204_v17 }
 0x953   : > { %17015 = vmatprep.subr.bf16.mxu1 %v18205_v52 }
 0x955   : > { %11490 = vmatmul.mubr.bf16.vlgmr.msra.gmra.mrb[20].mxu1 %v20285_v14  ;;  %v18213_v14 = vld [vmem:[%s20954_s1 + $0xb20] sm:$0xff]  }
 0x956   : > { %11497 = vmatprep.mubr.bf16.mxu1 %v18208_v5  ;;  %17016 = vmatpush3.bf16.msra.mxu1 %v18205_v52 }
 0x957   : > { %17017 = vmatprep.subr.bf16.mxu1 %v18209_v19 }
 0x95a   : > { %17018 = vmatpush3.bf16.msra.mxu1 %v18209_v19  ;;  %v18237_v19 = vld [vmem:[%s20954_s1 + $0xb58] sm:$0xff]  }
 0x95b   : > { %17019 = vmatprep.subr.bf16.mxu1 %v18210_v56 }
 0x95d   : > { %11498 = vmatmul.mubr.bf16.gmra.mrb[24].mxu1 %v18206_v57 }
 0x95e   : > { %17020 = vmatpush3.bf16.msra.mxu1 %v18210_v56  ;;  %17031 = vmatprep.mubr.bf16.mxu1 %v20300_v28  ;;  %v18217_v28 = vld [vmem:[#allocation5 + $0x68] ss:$36 sps:$4 sm:$0x1f]   ;;  %v18238_v56 = vld [vmem:[%s20954_s1 + $0xba0] sm:$0xff]  }
 0x95f   : > { %17021 = vmatprep.subr.bf16.mxu1 %v18212_v22 }
 0x962   : > { %17022 = vmatpush3.bf16.msra.mxu1 %v18212_v22 }
 0x963   : > { %17023 = vmatprep.subr.bf16.mxu1 %v18213_v14 }
 0x966   : > { %17024 = vmatpush3.bf16.msra.mxu1 %v18213_v14 }
 0x967   : > { %17025 = vmatprep.subr.bf16.mxu1 %v18214_v16 }
 0x96a   : > { %17026 = vmatpush3.bf16.msra.mxu1 %v18214_v16 }
 0x96b   : > { %17027 = vmatprep.subr.bf16.mxu1 %v18215_v44 }
 0x96e   : > { %17028 = vmatpush3.bf16.msra.mxu1 %v18215_v44  ;;  %v18239_v44 = vld [vmem:[%s20954_s1 + $0xb60] sm:$0xff]  }
 0x96f   : > { %17029 = vmatprep.subr.bf16.mxu1 %v18216_v8 }
 0x972   : > { %17030 = vmatpush3.bf16.msra.mxu1 %v18216_v8  ;;  %v18240_v8 = vld [vmem:[%s20954_s1 + $0xba8] sm:$0xff]  }
 0x973   : > { %16653 = vmatprep.subr.bf16.mxu1 %v18228_v0 }
 0x975   : > { %17032 = vmatmul.mubr.bf16.vlgmr.msra.gmra.mrb[28].mxu1 %v18217_v28  ;;  %v18241_v28 = vld [vmem:[%s20954_s1 + $0xb68] sm:$0xff]  }
 0x976   : > { %16654 = vmatpush3.bf16.msra.mxu1 %v18229_v40 }
 0x977   : > { %16655 = vmatprep.subr.bf16.mxu1 %v18231_v20 }
 0x97a   : > { %16656 = vmatpush3.bf16.msra.mxu1 %v18233_v51 }
 0x97b   : > { %16657 = vmatprep.subr.bf16.mxu1 %v18234_v26 }
 0x97e   : > { %16658 = vmatpush3.bf16.msra.mxu1 %v18235_v48 }
 0x97f   : > { %16659 = vmatprep.subr.bf16.mxu1 %v18236_v53 }
 0x982   : > { %16660 = vmatpush3.bf16.msra.mxu1 %v18237_v19 }
 0x983   : > { %16661 = vmatprep.subr.bf16.mxu1 %v18238_v56 }
 0x986   : > { %16662 = vmatpush3.bf16.msra.mxu1 %v18239_v44 }
 0x987   : > { %16663 = vmatprep.subr.bf16.mxu1 %v18240_v8 }
 0x98a   : > { %16664 = vmatpush3.bf16.msra.mxu1 %v18241_v28 }
 0x98b   : > { %16665 = vmatprep.subr.bf16.mxu1 %v18244_v25 }
 0x98e   : > { %16666 = vmatpush3.bf16.msra.mxu1 %v18245_v31 }
 0x98f   : > { %16667 = vmatprep.subr.bf16.mxu1 %v18247_v23 }
 0x992   : > { %16668 = vmatpush3.bf16.msra.mxu1 %v18249_v32 }
 0x993   : > { %16697 = vmatprep.subr.bf16.mxu1 %v18257_v36 }
 0x9c8   : > { %v16547_v27 = vpop.f32.mrb[252].mxu1 }
 0x9c9   : > { %v16548_v41 = vpop.f32.mrb[253].mxu1 }
 0x9ca   : > { %v16549_v43 = vadd.f32 %v16548_v41, %v16547_v27  ;;  %v16550_v24 = vpop.f32.mrb[254].mxu1 }
 0x9cb   : > { %v16551_v45 = vpop.f32.mrb[255].mxu1 }
 0x9cc   : > { %v16552_v21 = vadd.f32 %v16551_v45, %v16550_v24  ;;  %v11345_v18 = vadd.f32 %v16549_v43, %v14994_v39 }
 0x9ce   : > { %v11348_v2 = vadd.f32 %v16552_v21, %v14994_v39 }
 0x9d0   : > { %v16553_v34 = vpop.f32.mrb[0].mxu1 }
 0x9d1   : > { %v16554_v46 = vpop.f32.mrb[1].mxu1 }
 0x9d2   : > { %v16555_v38 = vadd.f32 %v16554_v46, %v16553_v34  ;;  %v16556_v50 = vpop.f32.mrb[2].mxu1 }
 0x9d3   : > { %v16557_v49 = vpop.f32.mrb[3].mxu1 }
 0x9d4   : > { %v16558_v55 = vadd.f32 %v16557_v49, %v16556_v50  ;;  %v11353_v33 = vadd.f32 %v16555_v38, %v14994_v39 }
 0x9d6   : > { %v11356_v57 = vadd.f32 %v16558_v55, %v14994_v39 }
 0x9e8   : > { %v16575_v30 = vpop.f32.mrb[4].mxu1 }
 0x9e9   : > { %v16576_v3 = vpop.f32.mrb[5].mxu1 }
 0x9ea   : > { %v16577_v12 = vadd.f32 %v16576_v3, %v16575_v30  ;;  %v16578_v58 = vpop.f32.mrb[6].mxu1 }
 0x9eb   : > { %v16579_v63 = vpop.f32.mrb[7].mxu1 }
 0x9ec   : > { %v11394_v59 = vadd.f32 %v16577_v12, %v11345_v18  ;;  %v16580_v1 = vadd.f32 %v16579_v63, %v16578_v58 }
 0x9ee   : > { %v11397_v7 = vadd.f32 %v16580_v1, %v11348_v2 }
 0x9f0   : > { %v16581_v62 = vpop.f32.mrb[8].mxu1 }
 0x9f1   : > { %v16582_v47 = vpop.f32.mrb[9].mxu1 }
 0x9f2   : > { %v16583_v17 = vadd.f32 %v16582_v47, %v16581_v62  ;;  %v16584_v52 = vpop.f32.mrb[10].mxu1 }
 0x9f3   : > { %v16585_v5 = vpop.f32.mrb[11].mxu1 }
 0x9f4   : > { %v11402_v22 = vadd.f32 %v16583_v17, %v11353_v33  ;;  %v16586_v14 = vadd.f32 %v16585_v5, %v16584_v52 }
 0x9f6   : > { %v11405_v16 = vadd.f32 %v16586_v14, %v11356_v57 }
 0xa08   : > { %v16603_v42 = vpop.f32.mrb[12].mxu1 }
 0xa09   : > { %v16604_v37 = vpop.f32.mrb[13].mxu1 }
 0xa0a   : > { %v16605_v11 = vadd.f32 %v16604_v37, %v16603_v42  ;;  %v16606_v29 = vpop.f32.mrb[14].mxu1 }
 0xa0b   : > { %v16607_v13 = vpop.f32.mrb[15].mxu1 }
 0xa0c   : > { %v11443_v27 = vadd.f32 %v16605_v11, %v11394_v59  ;;  %v16608_v41 = vadd.f32 %v16607_v13, %v16606_v29 }
 0xa0e   : > { %v11446_v43 = vadd.f32 %v16608_v41, %v11397_v7 }
 0xa10   : > { %v16609_v24 = vpop.f32.mrb[16].mxu1 }
 0xa11   : > { %v16610_v45 = vpop.f32.mrb[17].mxu1 }
 0xa12   : > { %v16611_v21 = vadd.f32 %v16610_v45, %v16609_v24  ;;  %v16612_v34 = vpop.f32.mrb[18].mxu1 }
 0xa13   : > { %v16613_v46 = vpop.f32.mrb[19].mxu1 }
 0xa14   : > { %v11451_v38 = vadd.f32 %v16611_v21, %v11402_v22  ;;  %v16614_v50 = vadd.f32 %v16613_v46, %v16612_v34  ;;  %v11600_v34 = vld [vmem:[#allocation5 + $0x24] sm:$0x1] }
 0xa16   : > { %v11454_v49 = vadd.f32 %v16614_v50, %v11405_v16 }
 0xa28   : > { %v16631_v55 = vpop.f32.mrb[20].mxu1 }
 0xa29   : > { %v16632_v39 = vpop.f32.mrb[21].mxu1 }
 0xa2a   : > { %v16633_v0 = vadd.f32 %v16632_v39, %v16631_v55  ;;  %v16634_v40 = vpop.f32.mrb[22].mxu1 }
 0xa2b   : > { %v16635_v54 = vpop.f32.mrb[23].mxu1 }
 0xa2c   : > { %v16636_v30 = vadd.f32 %v16635_v54, %v16634_v40  ;;  %v11492_v20 = vadd.f32 %v16633_v0, %v11443_v27  ;;  %v12660_v0 = vld [vmem:[#allocation4 + $0xe] sm:$0x1]  ;;  %v12674_v40 = vld [vmem:[#allocation4 + $0xf] sm:$0x1]  ;;  %v12646_v54 = vld [vmem:[#allocation4 + $0xd] sm:$0x1] }
 0xa2e   : > { %v11495_v60 = vadd.f32 %v16636_v30, %v11446_v43  ;;  %v15933_v30 = vpack.c.bf16 %v12660_v0, %v12660_v0 }
 0xa30   : > { %v16637_v3 = vpop.f32.mrb[24].mxu1 }
 0xa31   : > { %v16638_v18 = vpop.f32.mrb[25].mxu1 }
 0xa32   : > { %v16639_v12 = vadd.f32 %v16638_v18, %v16637_v3  ;;  %v16640_v58 = vpop.f32.mrb[26].mxu1  ;;  %v12684_v3 = vld [vmem:[#allocation5 + $0x40] sm:$0x1]  ;;  %v12656_v18 = vld [vmem:[#allocation5 + $0x38] sm:$0x1] }
 0xa33   : > { %v16641_v51 = vpop.f32.mrb[27].mxu1 }
 0xa34   : > { %v16642_v63 = vadd.f32 %v16641_v51, %v16640_v58  ;;  %v11500_v26 = vadd.f32 %v16639_v12, %v11451_v38  ;;  %v18258_v58 = vld [vmem:[%s20954_s1 + $0xcc0] sm:$0xff]   ;;  %v15931_v51 = vpack.c.bf16 %v12646_v54, %v12646_v54 }
 0xa35   : > { %v18302_v54 = vld [vmem:[%s20954_s1 + $0xe40] sm:$0xff]  }
 0xa36   : > { %v11503_v4 = vadd.f32 %v16642_v63, %v11454_v49 }
 0xa48   : > { %v17033_v2 = vpop.f32.mrb[28].mxu1 }
 0xa49   : > { %v11549_v59 = vadd.f32 %v17033_v2, %v11500_v26  ;;  %v11540_v1 = vpop.f32.mrb[29].mxu1  ;;  %v18259_v26 = vld [vmem:[%s20954_s1 + $0xc40] sm:$0xff]  }
 0xa4a   : > { %v11541_v61 = vadd.f32 %v11540_v1, %v11492_v20  ;;  %v17034_v10 = vpop.f32.mrb[30].mxu1  ;;  %v12670_v20 = vld [vmem:[#allocation5 + $0x3c] sm:$0x1] }
 0xa4b   : > { %v11557_v7 = vmax.f32 %v11549_v59, 0.0  ;;  %v11552_v48 = vadd.f32 %v17034_v10, %v11503_v4  ;;  %v11543_v6 = vpop.f32.mrb[31].mxu1  ;;  %v18265_v4 = vld [vmem:[%s20954_s1 + $0xd08] sm:$0xff]   ;;  %v12671_v10 = vsel %vm18555_vm2, %v15933_v30, %v12670_v20  ;;  %v18303_v30 = vld [vmem:[%s20954_s1 + $0xd80] sm:$0xff]  }
 0xa4c   : > { %v11555_v53 = vmax.f32 %v11541_v61, 0.0  ;;  %v11544_v62 = vadd.f32 %v11543_v6, %v11495_v60  ;;  %v15935_v60 = vpack.c.bf16 %v12674_v40, %v12674_v40  ;;  %v18266_v59 = vld [vmem:[%s20954_s1 + $0xc88] sm:$0xff]   ;;  %12672 = vst [vmem:[#allocation5 + $0x3c] sm:$0x1] %v12671_v10  ;;  %v12657_v6 = vsel %vm18555_vm2, %v15931_v51, %v12656_v18  ;;  %v18301_v40 = vld [vmem:[%s20954_s1 + $0xdc0] sm:$0xff]   ;;  %v18311_v51 = vld [vmem:[%s20954_s1 + $0xd90] sm:$0xff]  }
 0xa4d   : > { %11561 = vst [vmem:[%s397_s24 + $0x10] sm:$0xff] %v11557_v7  ;;  %v11558_v9 = vmax.f32 %v11552_v48, 0.0  ;;  %v18304_v20 = vld [vmem:[%s20954_s1 + $0xe00] sm:$0xff]   ;;  %v18308_v18 = vld [vmem:[%s20954_s1 + $0xe08] sm:$0xff]  }
 0xa4e   : > { %11559 = vst [vmem:[%s397_s24] sm:$0xff] %v11555_v53  ;;  %v11556_v47 = vmax.f32 %v11544_v62, 0.0  ;;  %v12685_v7 = vsel %vm18555_vm2, %v15935_v60, %v12684_v3  ;;  %v18267_v53 = vld [vmem:[%s20954_s1 + $0xcc8] sm:$0xff]   ;;  %v18319_v10 = vld [vmem:[%s20954_s1 + $0xda0] sm:$0xff]  }
 0xa4f   : > { %11562 = vst [vmem:[%s397_s24 + $0x18] sm:$0x1] %v11558_v9  ;;  %v18269_v9 = vld [vmem:[%s20954_s1 + $0xd10] sm:$0xff]   ;;  %v18306_v60 = vld [vmem:[%s20954_s1 + $0xe48] sm:$0xff]  }
 0xa50   : > { %11560 = vst [vmem:[%s397_s24 + $0x8] sm:$0xff] %v11556_v47  ;;  %v18268_v47 = vld [vmem:[%s20954_s1 + $0xc48] sm:$0xff]  }
 0xa51   : > { %v18307_v3 = vld [vmem:[%s20954_s1 + $0xd88] sm:$0xff]  }
 0xa54   : > { %v15091_v52 = vld [vmem:[%s397_s24 + $0x10] ss:$2 sm:$0x3] }
 0xa55   : > { %v11566_v33 = vld [vmem:[%s397_s24] ss:$2 sm:$0x3]  ;;  %v15085_v17 = vld [vmem:[%s397_s24 + $0x1] ss:$2 sm:$0x3] }
 0xa56   : > { %v15086_v19 = vld [vmem:[%s397_s24 + $0x5] ss:$2 sm:$0x3]  ;;  %v11573_v57 = vmax.f32 %v11566_v33, %v15085_v17  ;;  %v18270_v33 = vld [vmem:[%s20954_s1 + $0xc90] sm:$0xff]  }
 0xa57   : > { %v15087_v5 = vld [vmem:[%s397_s24 + $0x6] ss:$2 sm:$0x3]  ;;  %v15088_v56 = vld [vmem:[%s397_s24 + $0xa] ss:$2 sm:$0x3] }
 0xa58   : > { %v11574_v22 = vmax.f32 %v15086_v19, %v15087_v5  ;;  %v15089_v14 = vld [vmem:[%s397_s24 + $0xb] ss:$2 sm:$0x3]  ;;  %v15090_v16 = vld [vmem:[%s397_s24 + $0xf] ss:$2 sm:$0x3] }
 0xa59   : > { %v11585_v44 = vmax.f32 %v15088_v56, %v15089_v14  ;;  %v11586_v8 = vmax.f32 %v15090_v16, %v15091_v52  ;;  %v18271_v17 = vld [vmem:[%s20954_s1 + $0xcd0] sm:$0xff]   ;;  %v18273_v52 = vld [vmem:[%s20954_s1 + $0xd18] sm:$0xff]   ;;  %v18278_v14 = vld [vmem:[%s20954_s1 + $0xca0] sm:$0xff]  }
 0xa5a   : > { %v11575_v28 = vmax.f32 %v11573_v57, %v11574_v22  ;;  %v18272_v19 = vld [vmem:[%s20954_s1 + $0xc50] sm:$0xff]   ;;  %v18274_v5 = vld [vmem:[%s20954_s1 + $0xc98] sm:$0xff]   ;;  %v18277_v57 = vld [vmem:[%s20954_s1 + $0xd20] sm:$0xff]  }
 0xa5b   : > { %v11587_v25 = vmax.f32 %v11585_v44, %v11586_v8  ;;  %v18275_v56 = vld [vmem:[%s20954_s1 + $0xcd8] sm:$0xff]   ;;  %v18279_v16 = vld [vmem:[%s20954_s1 + $0xce0] sm:$0xff]   ;;  %v18281_v44 = vld [vmem:[%s20954_s1 + $0xd28] sm:$0xff]  }
 0xa5c   : > { %11576 = vst [vmem:[#allocation4 + $0x4] sm:$0x3] %v11575_v28  ;;  %v18276_v22 = vld [vmem:[%s20954_s1 + $0xc58] sm:$0xff]   ;;  %v18280_v8 = vld [vmem:[%s20954_s1 + $0xc60] sm:$0xff]   ;;  %v18282_v28 = vld [vmem:[%s20954_s1 + $0xca8] sm:$0xff]  }
 0xa5d   : > { %11588 = vst [vmem:[#allocation4 + $0x7] sm:$0x3] %v11587_v25  ;;  %v18283_v25 = vld [vmem:[%s20954_s1 + $0xce8] sm:$0xff]  }
 0xa64   : > { %v11701_v31 = vld [vmem:[#allocation4 + $0x8] sm:$0xff]  ;;  %v11589_v11 = vld [vmem:[#allocation4] sm:$0xff] }
 0xa65   : > { %v11617_v23 = vld [vmem:[#allocation4 + $0x2] sm:$0xff]  ;;  %v15918_v36 = vpack.c.bf16 %v11701_v31, %v11701_v31  ;;  %v15902_v27 = vpack.c.bf16 %v11589_v11, %v11589_v11 }
 0xa66   : > { %v11631_v32 = vld [vmem:[#allocation4 + $0x3] sm:$0xff]  ;;  %v15906_v42 = vpack.c.bf16 %v11617_v23, %v11617_v23  ;;  %v18284_v23 = vld [vmem:[%s20954_s1 + $0xc68] sm:$0xff]  }
 0xa67   : > { %v15908_v37 = vpack.c.bf16 %v11631_v32, %v11631_v32  ;;  %v11590_v29 = vld [vmem:[#allocation4 + $0x8] sm:$0x1]  ;;  %11711 = vst [vmem:[#allocation5 + $0x20] sm:$0xf] %v15918_v36  ;;  %11599 = vst [vmem:[#allocation5] sm:$0xf] %v15902_v27 }
 0xa68   : > { %v11603_v13 = vld [vmem:[#allocation4 + $0x1] sm:$0xff]  ;;  %v15903_v41 = vpack.c.bf16 %v11590_v29, %v11590_v29  ;;  %11627 = vst [vmem:[#allocation5 + $0x8] sm:$0xf] %v15906_v42 }
 0xa69   : > { %v15904_v43 = vpack.c.bf16 %v11603_v13, %v11603_v13  ;;  %v11673_v24 = vld [vmem:[#allocation4 + $0x6] sm:$0xff]  ;;  %11641 = vst [vmem:[#allocation5 + $0xc] sm:$0xf] %v15908_v37 }
 0xa6a   : > { %v11687_v45 = vld [vmem:[#allocation4 + $0x7] sm:$0xff]  ;;  %v15914_v46 = vpack.c.bf16 %v11673_v24, %v11673_v24  ;;  %v11601_v55 = vsel %vm18555_vm2, %v15903_v41, %v11600_v34  ;;  %v18293_v24 = vld [vmem:[%s20954_s1 + $0xd40] sm:$0xff]  }
 0xa6b   : > { %v11645_v21 = vld [vmem:[#allocation4 + $0x4] sm:$0xff]  ;;  %v15916_v38 = vpack.c.bf16 %v11687_v45, %v11687_v45  ;;  %11613 = vst [vmem:[#allocation5 + $0x4] sm:$0xf] %v15904_v43  ;;  %11602 = vst [vmem:[#allocation5 + $0x24] sm:$0x1] %v11601_v55  ;;  %v20665_v45 = vld [vmem:[#allocation2] sm:$0xff] }
 0xa6c   : > { %v15910_v50 = vpack.c.bf16 %v11645_v21, %v11645_v21  ;;  %v11659_v49 = vld [vmem:[#allocation4 + $0x5] sm:$0xff]  ;;  %11683 = vst [vmem:[#allocation5 + $0x18] sm:$0xf] %v15914_v46  ;;  %v18294_v21 = vld [vmem:[%s20954_s1 + $0xd48] sm:$0xff]  }
 0xa6d   : > { %v15912_v39 = vpack.c.bf16 %v11659_v49, %v11659_v49  ;;  %11697 = vst [vmem:[#allocation5 + $0x1c] sm:$0xf] %v15916_v38  ;;  %v18285_v31 = vld [vmem:[%s20954_s1 + $0xd30] sm:$0xff]   ;;  %v18289_v42 = vld [vmem:[%s20954_s1 + $0xd38] sm:$0xff]   ;;  %v18297_v38 = vld [vmem:[%s20954_s1 + $0xd60] sm:$0xff]  }
 0xa6e   : > { %11655 = vst [vmem:[#allocation5 + $0x10] sm:$0xf] %v15910_v50  ;;  %v18286_v32 = vld [vmem:[%s20954_s1 + $0xcb0] sm:$0xff]   ;;  %v18290_v11 = vld [vmem:[%s20954_s1 + $0xcb8] sm:$0xff]   ;;  %v18298_v50 = vld [vmem:[%s20954_s1 + $0xd68] sm:$0xff]  }
 0xa6f   : > { %11669 = vst [vmem:[#allocation5 + $0x14] sm:$0xf] %v15912_v39  ;;  %v18256_v63 = vld [vmem:[#allocation5 + $0x8] ss:$36 sps:$4 sm:$0x1f]   ;;  %v18291_v29 = vld [vmem:[%s20954_s1 + $0xcf8] sm:$0xff]  }
 0xa70   : > { %v18250_v12 = vld [vmem:[#allocation5 + $0xc] ss:$36 sps:$4 sm:$0x1f]   ;;  %v11863_v39 = vld [vmem:[#allocation5 + $0x20] sm:$0xf] }
 0xa71   : > { %12425 = vmatprep.mubr.bf16.mxu0 %v18250_v12  ;;  %v18287_v36 = vld [vmem:[%s20954_s1 + $0xcf0] sm:$0xff]   ;;  %v18292_v27 = vld [vmem:[%s20954_s1 + $0xc78] sm:$0xff]   ;;  %v15119_v0 = vcombine.low %v11863_v39, %v20316_v35  ;;  %v18305_v35 = vld [vmem:[%s20954_s1 + $0xdc8] sm:$0xff]  }
 0xa72   : > { %v18253_v2 = vld [vmem:[#allocation5] ss:$36 sps:$4 sm:$0x1f]   ;;  %12426 = vmatmul.mubr.bf16.vlgmr.msra.gmra.mrb[76].mxu0 %v18256_v63  ;;  %v18288_v37 = vld [vmem:[%s20954_s1 + $0xc70] sm:$0xff]   ;;  %v18296_v46 = vld [vmem:[%s20954_s1 + $0xd58] sm:$0xff]  }
 0xa73   : > { %v18255_v1 = vld [vmem:[#allocation5 + $0x4] ss:$36 sps:$4 sm:$0x1f]   ;;  %16720 = vmatpush3.bf16.msra.mxu0 %v18258_v58  ;;  %v18300_v55 = vld [vmem:[%s20954_s1 + $0xd78] sm:$0xff]  }
 0xa74   : > { %v18260_v61 = vld [vmem:[#allocation5 + $0x1c] ss:$36 sps:$4 sm:$0x1f]   ;;  %12384 = vmatprep.mubr.bf16.mxu1 %v18255_v1  ;;  %16721 = vmatprep.subr.bf16.mxu0 %v18265_v4  ;;  %v18295_v34 = vld [vmem:[%s20954_s1 + $0xd50] sm:$0xff]   ;;  %v18314_v4 = vld [vmem:[%s20954_s1 + $0xe58] sm:$0xff]  }
 0xa75   : > { %12686 = vst [vmem:[#allocation5 + $0x40] sm:$0x1] %v12685_v7  ;;  %v20580_v48 = vld [vmem:[#allocation5 + $0x10] ss:$36 sps:$4 sm:$0x1f]   ;;  %12507 = vmatprep.mubr.bf16.mxu0 %v18260_v61  ;;  %12385 = vmatmul.mubr.bf16.vlgmr.msra.gmra.mrb[32].mxu1 %v18253_v2  ;;  %v11862_v13 = vld [vmem:[#allocation5 + $0x18] sm:$0xff] }
 0xa76   : > { %v18264_v62 = vld [vmem:[#allocation5 + $0x14] ss:$36 sps:$4 sm:$0x1f]   ;;  %16698 = vmatpush3.bf16.msra.mxu1 %v18259_v26  ;;  %v18299_v49 = vld [vmem:[%s20954_s1 + $0xd70] sm:$0xff]  }
 0xa77   : > { %12658 = vst [vmem:[#allocation5 + $0x38] sm:$0x1] %v12657_v6  ;;  %12466 = vmatprep.mubr.bf16.mxu1 %v18264_v62  ;;  %16699 = vmatprep.subr.bf16.mxu1 %v18266_v59  ;;  %v18309_v12 = vld [vmem:[%s20954_s1 + $0xdd0] sm:$0xff]   ;;  %v18313_v26 = vld [vmem:[%s20954_s1 + $0xdd8] sm:$0xff]   ;;  %v18317_v1 = vld [vmem:[%s20954_s1 + $0xde0] sm:$0xff]  }
 0xa78   : > { %16722 = vmatpush3.bf16.msra.mxu0 %v18267_v53  ;;  %v18310_v58 = vld [vmem:[%s20954_s1 + $0xe50] sm:$0xff]   ;;  %v18315_v2 = vld [vmem:[%s20954_s1 + $0xd98] sm:$0xff]   ;;  %v18318_v61 = vld [vmem:[%s20954_s1 + $0xe60] sm:$0xff]  }
 0xa79   : > { %16723 = vmatprep.subr.bf16.mxu0 %v18269_v9  ;;  %v18312_v63 = vld [vmem:[%s20954_s1 + $0xe10] sm:$0xff]   ;;  %v18316_v59 = vld [vmem:[%s20954_s1 + $0xe18] sm:$0xff]   ;;  %v18320_v7 = vld [vmem:[%s20954_s1 + $0xe20] sm:$0xff]  }
 0xa7a   : > { %16700 = vmatpush3.bf16.msra.mxu1 %v18268_v47  ;;  %v18322_v6 = vld [vmem:[%s20954_s1 + $0xe68] sm:$0xff]   ;;  %v18325_v9 = vld [vmem:[%s20954_s1 + $0xdf0] sm:$0xff]  }
 0xa7b   : > { %16701 = vmatprep.subr.bf16.mxu1 %v18270_v33  ;;  %v18323_v53 = vld [vmem:[%s20954_s1 + $0xda8] sm:$0xff]   ;;  %v18326_v47 = vld [vmem:[%s20954_s1 + $0xe70] sm:$0xff]  }
 0xa7c   : > { %16724 = vmatpush3.bf16.msra.mxu0 %v18271_v17  ;;  %v11867_v41 = vld [vmem:[#allocation5 + $0x3c] sm:$0x11]  ;;  %v18327_v33 = vld [vmem:[%s20954_s1 + $0xdb0] sm:$0xff]  }
 0xa7d   : > { %16725 = vmatprep.subr.bf16.mxu0 %v18273_v52  ;;  %v15117_v43 = vcombine.low %v11862_v13, %v11867_v41  ;;  %v18324_v62 = vld [vmem:[%s20954_s1 + $0xe28] sm:$0xff]   ;;  %v18328_v17 = vld [vmem:[%s20954_s1 + $0xe30] sm:$0xff]   ;;  %v18329_v52 = vld [vmem:[%s20954_s1 + $0xdf8] sm:$0xff]  }
 0xa7e   : > { %16702 = vmatpush3.bf16.msra.mxu1 %v18272_v19  ;;  %v18330_v19 = vld [vmem:[%s20954_s1 + $0xe78] sm:$0xff]  }
 0xa7f   : > { %16703 = vmatprep.subr.bf16.mxu1 %v18274_v5  ;;  %v18331_v5 = vld [vmem:[%s20954_s1 + $0xdb8] sm:$0xff]  }
 0xa80   : > { %16726 = vmatpush3.bf16.msra.mxu0 %v18275_v56  ;;  %v18332_v56 = vld [vmem:[%s20954_s1 + $0xe38] sm:$0xff]  }
 0xa81   : > { %16727 = vmatprep.subr.bf16.mxu0 %v18277_v57  ;;  %v18339_v57 = vld [vmem:[%s20954_s1 + $0xec0] sm:$0xff]  }
 0xa82   : > { %16704 = vmatpush3.bf16.msra.mxu1 %v18276_v22  ;;  %v18340_v22 = vld [vmem:[%s20954_s1 + $0xf40] sm:$0xff]  }
 0xa83   : > { %16705 = vmatprep.subr.bf16.mxu1 %v18278_v14 }
 0xa84   : > { %16728 = vmatpush3.bf16.msra.mxu0 %v18279_v16 }
 0xa85   : > { %16729 = vmatprep.subr.bf16.mxu0 %v18281_v44 }
 0xa86   : > { %16706 = vmatpush3.bf16.msra.mxu1 %v18280_v8 }
 0xa87   : > { %16707 = vmatprep.subr.bf16.mxu1 %v18282_v28 }
 0xa88   : > { %16730 = vmatpush3.bf16.msra.mxu0 %v18283_v25 }
 0xa89   : > { %16731 = vmatprep.subr.bf16.mxu0 %v18285_v31  ;;  %v15110_v31 = vld [vmem:[%s20955_s2 + $0x5] ss:$0 sm:$0xff] }
 0xa8a   : > { %16708 = vmatpush3.bf16.msra.mxu1 %v18284_v23 }
 0xa8b   : > { %16709 = vmatprep.subr.bf16.mxu1 %v18286_v32 }
 0xa8c   : > { %16732 = vmatpush3.bf16.msra.mxu0 %v18287_v36 }
 0xa8d   : > { %16733 = vmatprep.subr.bf16.mxu0 %v18289_v42 }
 0xa8e   : > { %16710 = vmatpush3.bf16.msra.mxu1 %v18288_v37 }
 0xa8f   : > { %16711 = vmatprep.subr.bf16.mxu1 %v18290_v11 }
 0xa90   : > { %16734 = vmatpush3.bf16.msra.mxu0 %v18291_v29 }
 0xa91   : > { %16750 = vmatprep.subr.bf16.mxu0 %v18301_v40 }
 0xa92   : > { %16712 = vmatpush3.bf16.msra.mxu1 %v18292_v27 }
 0xa93   : > { %12508 = vmatmul.mubr.bf16.vlgmr.msra.gmra.mrb[80].mxu0 %v15117_v43  ;;  %17035 = vmatprep.subr.bf16.mxu1 %v20665_v45 }
 0xa94   : > { %16751 = vmatpush3.bf16.msra.mxu0 %v18303_v30 }
 0xa95   : > { %12467 = vmatmul.mubr.bf16.vlgmr.msra.gmra.mrb[36].mxu1 %v20580_v48  ;;  %16752 = vmatprep.subr.bf16.mxu0 %v18305_v35  ;;  %v18321_v48 = vld [vmem:[%s20954_s1 + $0xde8] sm:$0xff]  }
 0xa96   : > { %17036 = vmatpush3.bf16.msra.mxu1 %v18293_v24  ;;  %17051 = vmatprep.mubr.msk.bf16.mxu1 %vm18400_vm3, %v20665_v45 }
 0xa97   : > { %17037 = vmatprep.subr.bf16.mxu1 %v20665_v45 }
 0xa98   : > { %16753 = vmatpush3.bf16.msra.mxu0 %v18307_v3 }
 0xa99   : > { %16754 = vmatprep.subr.bf16.mxu0 %v18309_v12 }
 0xa9a   : > { %17038 = vmatpush3.bf16.msra.mxu1 %v18294_v21 }
 0xa9b   : > { %17039 = vmatprep.subr.bf16.mxu1 %v20665_v45 }
 0xa9c   : > { %16755 = vmatpush3.bf16.msra.mxu0 %v18311_v51 }
 0xa9d   : > { %16756 = vmatprep.subr.bf16.mxu0 %v18313_v26  ;;  %v12564_v26 = vpop.permute.xlu1 %12563 }
 0xa9e   : > { %17040 = vmatpush3.bf16.msra.mxu1 %v18295_v34 }
 0xa9f   : > { %17041 = vmatprep.subr.bf16.mxu1 %v20665_v45 }
 0xaa0   : > { %16757 = vmatpush3.bf16.msra.mxu0 %v18315_v2 }
 0xaa1   : > { %16758 = vmatprep.subr.bf16.mxu0 %v18317_v1 }
 0xaa2   : > { %17042 = vmatpush3.bf16.msra.mxu1 %v18296_v46 }
 0xaa3   : > { %17043 = vmatprep.subr.bf16.mxu1 %v20665_v45 }
 0xaa4   : > { %16759 = vmatpush3.bf16.msra.mxu0 %v18319_v10 }
 0xaa5   : > { %16760 = vmatprep.subr.bf16.mxu0 %v18321_v48  ;;  %v12586_v48 = vld [vmem:[#allocation5 + $0x24] sm:$0x1] }
 0xaa6   : > { %17044 = vmatpush3.bf16.msra.mxu1 %v18297_v38 }
 0xaa7   : > { %17045 = vmatprep.subr.bf16.mxu1 %v20665_v45 }
 0xaa8   : > { %16761 = vmatpush3.bf16.msra.mxu0 %v18323_v53  ;;  %v12600_v53 = vld [vmem:[#allocation5 + $0x28] sm:$0x1] }
 0xaa9   : > { %16762 = vmatprep.subr.bf16.mxu0 %v18325_v9 }
 0xaaa   : > { %17046 = vmatpush3.bf16.msra.mxu1 %v18298_v50 }
 0xaab   : > { %17047 = vmatprep.subr.bf16.mxu1 %v20665_v45 }
 0xaac   : > { %16763 = vmatpush3.bf16.msra.mxu0 %v18327_v33 }
 0xaad   : > { %16764 = vmatprep.subr.bf16.mxu0 %v18329_v52 }
 0xaae   : > { %17048 = vmatpush3.bf16.msra.mxu1 %v18299_v49 }
 0xaaf   : > { %17049 = vmatprep.subr.bf16.mxu1 %v20665_v45 }
 0xab0   : > { %16765 = vmatpush3.bf16.msra.mxu0 %v18331_v5 }
 0xab1   : > { %16794 = vmatprep.subr.bf16.mxu0 %v18339_v57 }
 0xab2   : > { %17050 = vmatpush3.bf16.msra.mxu1 %v18300_v55 }
 0xab3   : > { %16772 = vmatprep.subr.bf16.mxu1 %v18302_v54 }
 0xab5   : > { %17052 = vmatmul.mubr.bf16.vlgmr.msra.gmra.mrb[40].mxu1 %v15119_v0 }
 0xab6   : > { %16773 = vmatpush3.bf16.msra.mxu1 %v18304_v20 }
 0xab7   : > { %16774 = vmatprep.subr.bf16.mxu1 %v18306_v60 }
 0xaba   : > { %16775 = vmatpush3.bf16.msra.mxu1 %v18308_v18 }
 0xabb   : > { %16776 = vmatprep.subr.bf16.mxu1 %v18310_v58 }
 0xabe   : > { %16777 = vmatpush3.bf16.msra.mxu1 %v18312_v63 }
 0xabf   : > { %16778 = vmatprep.subr.bf16.mxu1 %v18314_v4 }
 0xac2   : > { %16779 = vmatpush3.bf16.msra.mxu1 %v18316_v59  ;;  %v12569_v59 = vpop.permute.xlu0 %12568 }
 0xac3   : > { %16780 = vmatprep.subr.bf16.mxu1 %v18318_v61 }
 0xac6   : > { %16781 = vmatpush3.bf16.msra.mxu1 %v18320_v7 }
 0xac7   : > { %16782 = vmatprep.subr.bf16.mxu1 %v18322_v6 }
 0xaca   : > { %16783 = vmatpush3.bf16.msra.mxu1 %v18324_v62  ;;  %v12614_v62 = vld [vmem:[#allocation5 + $0x2c] sm:$0x1] }
 0xacb   : > { %16784 = vmatprep.subr.bf16.mxu1 %v18326_v47 }
 0xace   : > { %16785 = vmatpush3.bf16.msra.mxu1 %v18328_v17 }
 0xacf   : > { %16786 = vmatprep.subr.bf16.mxu1 %v18330_v19 }
 0xad2   : > { %16787 = vmatpush3.bf16.msra.mxu1 %v18332_v56 }
 0xad3   : > { %16816 = vmatprep.subr.bf16.mxu1 %v18340_v22 }
 0xb45   : > { %v16691_v14 = vpop.f32.mrb[76].mxu0 }
 0xb46   : > { %v16692_v16 = vpop.f32.mrb[77].mxu0 }
 0xb47   : > { %v16693_v44 = vadd.f32 %v16692_v16, %v16691_v14  ;;  %v16694_v8 = vpop.f32.mrb[78].mxu0 }
 0xb48   : > { %v16669_v28 = vpop.f32.mrb[32].mxu1  ;;  %v16695_v25 = vpop.f32.mrb[79].mxu0 }
 0xb49   : > { %v16670_v23 = vpop.f32.mrb[33].mxu1  ;;  %v16696_v32 = vadd.f32 %v16695_v25, %v16694_v8 }
 0xb4a   : > { %v16671_v36 = vadd.f32 %v16670_v23, %v16669_v28  ;;  %v16672_v42 = vpop.f32.mrb[34].mxu1 }
 0xb4b   : > { %v16673_v37 = vpop.f32.mrb[35].mxu1 }
 0xb4c   : > { %v12387_v11 = vadd.f32 %v16671_v36, %v15110_v31  ;;  %v16674_v29 = vadd.f32 %v16673_v37, %v16672_v42  ;;  %v12642_v36 = vld [vmem:[#allocation5 + $0x34] sm:$0x1] }
 0xb4e   : > { %v12390_v13 = vadd.f32 %v16674_v29, %v15110_v31  ;;  %v12428_v27 = vadd.f32 %v16693_v44, %v12387_v11 }
 0xb50   : > { %v12431_v41 = vadd.f32 %v16696_v32, %v12390_v13 }
 0xb66   : > { %v16735_v43 = vpop.f32.mrb[80].mxu0 }
 0xb67   : > { %v16736_v24 = vpop.f32.mrb[81].mxu0 }
 0xb68   : > { %v16737_v21 = vadd.f32 %v16736_v24, %v16735_v43  ;;  %v16738_v34 = vpop.f32.mrb[82].mxu0  ;;  %v16713_v46 = vpop.f32.mrb[36].mxu1  ;;  %v12628_v24 = vld [vmem:[#allocation5 + $0x30] sm:$0x1] }
 0xb69   : > { %v16739_v38 = vpop.f32.mrb[83].mxu0  ;;  %v16714_v50 = vpop.f32.mrb[37].mxu1 }
 0xb6a   : > { %v16740_v49 = vadd.f32 %v16739_v38, %v16738_v34  ;;  %v16715_v55 = vadd.f32 %v16714_v50, %v16713_v46  ;;  %v16716_v39 = vpop.f32.mrb[38].mxu1  ;;  %v18341_v34 = vld [vmem:[%s20954_s1 + $0xe80] sm:$0xff]  }
 0xb6b   : > { %v16717_v0 = vpop.f32.mrb[39].mxu1  ;;  %v18342_v50 = vld [vmem:[%s20954_s1 + $0xf00] sm:$0xff]  }
 0xb6c   : > { %v12469_v40 = vadd.f32 %v16715_v55, %v12428_v27  ;;  %v16718_v54 = vadd.f32 %v16717_v0, %v16716_v39  ;;  %v18349_v55 = vld [vmem:[%s20954_s1 + $0xec8] sm:$0xff]  }
 0xb6e   : > { %v12472_v30 = vadd.f32 %v16718_v54, %v12431_v41  ;;  %v12510_v20 = vadd.f32 %v16737_v21, %v12469_v40  ;;  %v18350_v40 = vld [vmem:[%s20954_s1 + $0xf48] sm:$0xff]  }
 0xb6f   : > { %v18351_v54 = vld [vmem:[%s20954_s1 + $0xe88] sm:$0xff]  }
 0xb70   : > { %v12513_v35 = vadd.f32 %v16740_v49, %v12472_v30  ;;  %v18353_v30 = vld [vmem:[%s20954_s1 + $0xed0] sm:$0xff]  }
 0xb88   : > { %v12550_v60 = vpop.f32.mrb[40].mxu1 }
 0xb89   : > { %v12551_v3 = vadd.f32 %v12550_v60, %v12510_v20  ;;  %v17053_v18 = vpop.f32.mrb[41].mxu1  ;;  %v18352_v20 = vld [vmem:[%s20954_s1 + $0xf08] sm:$0xff]   ;;  %v18355_v60 = vld [vmem:[%s20954_s1 + $0xe90] sm:$0xff]  }
 0xb8a   : > { %v12553_v12 = vpop.f32.mrb[42].mxu1  ;;  %v18356_v18 = vld [vmem:[%s20954_s1 + $0xf10] sm:$0xff]  }
 0xb8b   : > { %v12557_v58 = vmax.f32 %v12551_v3, 0.0  ;;  %v12554_v51 = vadd.f32 %v12553_v12, %v12513_v35  ;;  %v17054_v63 = vpop.f32.mrb[43].mxu1  ;;  %v18354_v35 = vld [vmem:[%s20954_s1 + $0xf50] sm:$0xff]   ;;  %v18357_v3 = vld [vmem:[%s20954_s1 + $0xed8] sm:$0xff]  }
 0xb8c   : > { %v18358_v12 = vld [vmem:[%s20954_s1 + $0xf58] sm:$0xff]  }
 0xb8d   : > { %v12571_v4 = vmul.f32 %v12564_v26, %v12557_v58  ;;  %v12558_v2 = vmax.f32 %v12554_v51, 0.0  ;;  %v18359_v58 = vld [vmem:[%s20954_s1 + $0xe98] sm:$0xff]   ;;  %v18361_v51 = vld [vmem:[%s20954_s1 + $0xee0] sm:$0xff]  }
 0xb8e   : > { %v18360_v63 = vld [vmem:[%s20954_s1 + $0xf18] sm:$0xff]   ;;  %v18362_v26 = vld [vmem:[%s20954_s1 + $0xf60] sm:$0xff]  }
 0xb8f   : > { %12573 = vst [vmem:[#allocation4 + $0x4] sm:$0xff] %v12571_v4  ;;  %v12572_v1 = vmul.f32 %v12569_v59, %v12558_v2  ;;  %v15928_v61 = vpack.c.bf16 %v12571_v4, %v12571_v4  ;;  %v18363_v4 = vld [vmem:[%s20954_s1 + $0xea0] sm:$0xff]   ;;  %v18365_v2 = vld [vmem:[%s20954_s1 + $0xee8] sm:$0xff]  }
 0xb90   : > { %v18364_v59 = vld [vmem:[%s20954_s1 + $0xf20] sm:$0xff]  }
 0xb91   : > { %12574 = vst [vmem:[#allocation4 + $0xc] sm:$0x1] %v12572_v1  ;;  %12641 = vst [vmem:[#allocation5 + $0x10] sm:$0xf] %v15928_v61  ;;  %v18366_v1 = vld [vmem:[%s20954_s1 + $0xf68] sm:$0xff]  }
 0xb92   : > { %v18367_v61 = vld [vmem:[%s20954_s1 + $0xea8] sm:$0xff]  }
 0xb96   : > { %v12575_v10 = vld [vmem:[#allocation4] sm:$0xff]  ;;  %v12576_v7 = vld [vmem:[#allocation4 + $0x8] sm:$0x1]  ;;  %v12590_v33 = vld [vmem:[#allocation4 + $0x9] sm:$0x1] }
 0xb97   : > { %v12589_v6 = vld [vmem:[#allocation4 + $0x1] sm:$0xff]  ;;  %v15920_v9 = vpack.c.bf16 %v12575_v10, %v12575_v10  ;;  %v15921_v47 = vpack.c.bf16 %v12576_v7, %v12576_v7  ;;  %v12604_v19 = vld [vmem:[#allocation4 + $0xa] sm:$0x1]  ;;  %v15923_v22 = vpack.c.bf16 %v12590_v33, %v12590_v33  ;;  %v12618_v13 = vld [vmem:[#allocation4 + $0xb] sm:$0x1] }
 0xb98   : > { %v15922_v17 = vpack.c.bf16 %v12589_v6, %v12589_v6  ;;  %v12603_v52 = vld [vmem:[#allocation4 + $0x2] sm:$0xff]  ;;  %v12632_v5 = vld [vmem:[#allocation4 + $0xc] sm:$0x1]  ;;  %v15925_v16 = vpack.c.bf16 %v12604_v19, %v12604_v19  ;;  %v15927_v41 = vpack.c.bf16 %v12618_v13, %v12618_v13  ;;  %v18368_v7 = vld [vmem:[%s20954_s1 + $0xf28] sm:$0xff]  }
 0xb99   : > { %v12645_v56 = vld [vmem:[#allocation4 + $0x5] sm:$0xff]  ;;  %v15924_v14 = vpack.c.bf16 %v12603_v52, %v12603_v52  ;;  %v15929_v44 = vpack.c.bf16 %v12632_v5, %v12632_v5  ;;  %12585 = vst [vmem:[#allocation5] sm:$0xf] %v15920_v9  ;;  %v12587_v23 = vsel %vm18555_vm2, %v15921_v47, %v12586_v48  ;;  %v12601_v11 = vsel %vm18555_vm2, %v15923_v22, %v12600_v53  ;;  %v18378_v5 = vld [vmem:[%s20954_s1 + $0xf88] sm:$0xff]   ;;  %v18381_v22 = vld [vmem:[%s20954_s1 + $0xfa0] sm:$0xff]  }
 0xb9a   : > { %v12659_v57 = vld [vmem:[#allocation4 + $0x6] sm:$0xff]  ;;  %v15930_v8 = vpack.c.bf16 %v12645_v56, %v12645_v56  ;;  %12599 = vst [vmem:[#allocation5 + $0x4] sm:$0xf] %v15922_v17  ;;  %12588 = vst [vmem:[#allocation5 + $0x24] sm:$0x1] %v12587_v23  ;;  %v12615_v29 = vsel %vm18555_vm2, %v15925_v16, %v12614_v62  ;;  %v12629_v21 = vsel %vm18555_vm2, %v15927_v41, %v12628_v24  ;;  %v18377_v17 = vld [vmem:[%s20954_s1 + $0xf80] sm:$0xff]  }
 0xb9b   : > { %v15932_v28 = vpack.c.bf16 %v12659_v57, %v12659_v57  ;;  %v12673_v25 = vld [vmem:[#allocation4 + $0x7] sm:$0xff]  ;;  %12613 = vst [vmem:[#allocation5 + $0x8] sm:$0xf] %v15924_v14  ;;  %12602 = vst [vmem:[#allocation5 + $0x28] sm:$0x1] %v12601_v11  ;;  %v12643_v43 = vsel %vm18555_vm2, %v15929_v44, %v12642_v36  ;;  %v18382_v14 = vld [vmem:[%s20954_s1 + $0xfa8] sm:$0xff]  }
 0xb9c   : > { %v12687_v31 = vld [vmem:[#allocation4 + $0x8] sm:$0xff]  ;;  %v15934_v42 = vpack.c.bf16 %v12673_v25, %v12673_v25  ;;  %12655 = vst [vmem:[#allocation5 + $0x14] sm:$0xf] %v15930_v8  ;;  %12616 = vst [vmem:[#allocation5 + $0x2c] sm:$0x1] %v12615_v29  ;;  %v18369_v10 = vld [vmem:[%s20954_s1 + $0xef0] sm:$0xff]  }
 0xb9d   : > { %v12617_v32 = vld [vmem:[#allocation4 + $0x3] sm:$0xff]  ;;  %v15936_v37 = vpack.c.bf16 %v12687_v31, %v12687_v31  ;;  %12669 = vst [vmem:[#allocation5 + $0x18] sm:$0xf] %v15932_v28  ;;  %12644 = vst [vmem:[#allocation5 + $0x34] sm:$0x1] %v12643_v43 }
 0xb9e   : > { %v15926_v27 = vpack.c.bf16 %v12617_v32, %v12617_v32  ;;  %12683 = vst [vmem:[#allocation5 + $0x1c] sm:$0xf] %v15934_v42  ;;  %12630 = vst [vmem:[#allocation5 + $0x30] sm:$0x1] %v12629_v21  ;;  %v18370_v48 = vld [vmem:[%s20954_s1 + $0xf70] sm:$0xff]   ;;  %v18373_v53 = vld [vmem:[%s20954_s1 + $0xef8] sm:$0xff]  }
 0xb9f   : > { %12697 = vst [vmem:[#allocation5 + $0x20] sm:$0xf] %v15936_v37  ;;  %v18371_v6 = vld [vmem:[%s20954_s1 + $0xeb0] sm:$0xff]   ;;  %v18374_v9 = vld [vmem:[%s20954_s1 + $0xf78] sm:$0xff]   ;;  %v15210_v25 = vld [vmem:[%s20955_s2 + $0x6] ss:$0 sm:$0xff] }
 0xba0   : > { %12627 = vst [vmem:[#allocation5 + $0xc] sm:$0xf] %v15926_v27  ;;  %v18372_v62 = vld [vmem:[%s20954_s1 + $0xf30] sm:$0xff]   ;;  %v18375_v47 = vld [vmem:[%s20954_s1 + $0xeb8] sm:$0xff]  }
 0xba1   : > { %v18333_v46 = vld [vmem:[#allocation5] ss:$36 sps:$4 sm:$0x1f]   ;;  %v18376_v33 = vld [vmem:[%s20954_s1 + $0xf38] sm:$0xff]   ;;  %v18379_v56 = vld [vmem:[%s20954_s1 + $0xf90] sm:$0xff]  }
 0xba2   : > { %v18335_v38 = vld [vmem:[#allocation5 + $0x4] ss:$36 sps:$4 sm:$0x1f]   ;;  %v18380_v57 = vld [vmem:[%s20954_s1 + $0xf98] sm:$0xff]  }
 0xba3   : > { %13370 = vmatprep.mubr.bf16.mxu0 %v18335_v38  ;;  %v18336_v49 = vld [vmem:[#allocation5 + $0x8] ss:$36 sps:$4 sm:$0x1f]   ;;  %v18345_v15 = vld [vmem:[#allocation5 + $0x14] ss:$36 sps:$4 sm:$0x1f]  }
 0xba4   : > { %13371 = vmatmul.mubr.bf16.vlgmr.msra.gmra.mrb[84].mxu0 %v18333_v46  ;;  %v18343_v52 = vld [vmem:[#allocation5 + $0x10] ss:$36 sps:$4 sm:$0x1f]   ;;  %v18346_v19 = vld [vmem:[#allocation5 + $0x18] ss:$36 sps:$4 sm:$0x1f]  }
 0xba5   : > { %16795 = vmatpush3.bf16.msra.mxu0 %v18341_v34  ;;  %v18348_v0 = vld [vmem:[#allocation5 + $0x1c] ss:$36 sps:$4 sm:$0x1f]   ;;  %13452 = vmatprep.mubr.bf16.mxu0 %v18345_v15  ;;  %v18383_v16 = vld [vmem:[%s20954_s1 + $0xfb0] sm:$0xff]   ;;  %v18384_v44 = vld [vmem:[%s20954_s1 + $0xfb8] sm:$0xff]  }
 0xba6   : > { %16796 = vmatprep.subr.bf16.mxu0 %v18349_v55  ;;  %v18385_v8 = vld [vmem:[#allocation5 + $0x20] ss:$36 sps:$4 sm:$0x1f]  }
 0xba7   : > { %v18338_v39 = vld [vmem:[#allocation5 + $0xc] ss:$36 sps:$4 sm:$0x1f]  }
 0xba8   : > { %13411 = vmatprep.mubr.bf16.mxu1 %v18338_v39 }
 0xba9   : > { %13412 = vmatmul.mubr.bf16.vlgmr.msra.gmra.mrb[44].mxu1 %v18336_v49  ;;  %16797 = vmatpush3.bf16.msra.mxu0 %v18351_v54 }
 0xbaa   : > { %16817 = vmatpush3.bf16.msra.mxu1 %v18342_v50  ;;  %13493 = vmatprep.mubr.bf16.mxu1 %v18348_v0 }
 0xbab   : > { %16818 = vmatprep.subr.bf16.mxu1 %v18350_v40  ;;  %16798 = vmatprep.subr.bf16.mxu0 %v18353_v30 }
 0xbad   : > { %16799 = vmatpush3.bf16.msra.mxu0 %v18355_v60 }
 0xbae   : > { %16819 = vmatpush3.bf16.msra.mxu1 %v18352_v20  ;;  %16800 = vmatprep.subr.bf16.mxu0 %v18357_v3 }
 0xbaf   : > { %16820 = vmatprep.subr.bf16.mxu1 %v18354_v35 }
 0xbb1   : > { %16801 = vmatpush3.bf16.msra.mxu0 %v18359_v58 }
 0xbb2   : > { %16821 = vmatpush3.bf16.msra.mxu1 %v18356_v18  ;;  %16802 = vmatprep.subr.bf16.mxu0 %v18361_v51 }
 0xbb3   : > { %16822 = vmatprep.subr.bf16.mxu1 %v18358_v12 }
 0xbb5   : > { %16803 = vmatpush3.bf16.msra.mxu0 %v18363_v4 }
 0xbb6   : > { %16823 = vmatpush3.bf16.msra.mxu1 %v18360_v63  ;;  %16804 = vmatprep.subr.bf16.mxu0 %v18365_v2 }
 0xbb7   : > { %16824 = vmatprep.subr.bf16.mxu1 %v18362_v26 }
 0xbb9   : > { %16805 = vmatpush3.bf16.msra.mxu0 %v18367_v61 }
 0xbba   : > { %16825 = vmatpush3.bf16.msra.mxu1 %v18364_v59  ;;  %16806 = vmatprep.subr.bf16.mxu0 %v18369_v10 }
 0xbbb   : > { %16826 = vmatprep.subr.bf16.mxu1 %v18366_v1 }
 0xbbd   : > { %16807 = vmatpush3.bf16.msra.mxu0 %v18371_v6 }
 0xbbe   : > { %16827 = vmatpush3.bf16.msra.mxu1 %v18368_v7  ;;  %16808 = vmatprep.subr.bf16.mxu0 %v18373_v53 }
 0xbbf   : > { %16828 = vmatprep.subr.bf16.mxu1 %v18370_v48 }
 0xbc1   : > { %16809 = vmatpush3.bf16.msra.mxu0 %v18375_v47 }
 0xbc2   : > { %16829 = vmatpush3.bf16.msra.mxu1 %v18372_v62  ;;  %17055 = vmatprep.subr.bf16.mxu0 %v20665_v45 }
 0xbc3   : > { %16830 = vmatprep.subr.bf16.mxu1 %v18374_v9 }
 0xbc4   : > { %13453 = vmatmul.mubr.bf16.vlgmr.msra.gmra.mrb[88].mxu0 %v18343_v52 }
 0xbc5   : > { %17056 = vmatpush3.bf16.msra.mxu0 %v18377_v17  ;;  %17071 = vmatprep.mubr.msk.bf16.mxu0 %vm18400_vm3, %v20665_v45 }
 0xbc6   : > { %16831 = vmatpush3.bf16.msra.mxu1 %v18376_v33  ;;  %17057 = vmatprep.subr.bf16.mxu0 %v20665_v45 }
 0xbc9   : > { %13494 = vmatmul.mubr.bf16.vlgmr.msra.gmra.mrb[48].mxu1 %v18346_v19  ;;  %17058 = vmatpush3.bf16.msra.mxu0 %v18378_v5 }
 0xbca   : > { %17059 = vmatprep.subr.bf16.mxu0 %v20665_v45 }
 0xbcd   : > { %17060 = vmatpush3.bf16.msra.mxu0 %v18379_v56 }
 0xbce   : > { %17061 = vmatprep.subr.bf16.mxu0 %v20665_v45 }
 0xbd1   : > { %17062 = vmatpush3.bf16.msra.mxu0 %v18380_v57 }
 0xbd2   : > { %17063 = vmatprep.subr.bf16.mxu0 %v20665_v45 }
 0xbd5   : > { %17064 = vmatpush3.bf16.msra.mxu0 %v18381_v22 }
 0xbd6   : > { %17065 = vmatprep.subr.bf16.mxu0 %v20665_v45 }
 0xbd9   : > { %17066 = vmatpush3.bf16.msra.mxu0 %v18382_v14 }
 0xbda   : > { %17067 = vmatprep.subr.bf16.mxu0 %v20665_v45 }
 0xbdd   : > { %17068 = vmatpush3.bf16.msra.mxu0 %v18383_v16 }
 0xbde   : > { %17069 = vmatprep.subr.bf16.mxu0 %v20665_v45 }
 0xbe1   : > { %17070 = vmatpush3.bf16.msra.mxu0 %v18384_v44 }
 0xbe4   : > { %17072 = vmatmul.mubr.bf16.vlgmr.msra.gmra.mrb[92].mxu0 %v18385_v8 }
 0xc77   : > { %v16766_v28 = vpop.f32.mrb[84].mxu0 }
 0xc78   : > { %v16767_v31 = vpop.f32.mrb[85].mxu0 }
 0xc79   : > { %v16768_v23 = vadd.f32 %v16767_v31, %v16766_v28  ;;  %v16769_v32 = vpop.f32.mrb[86].mxu0 }
 0xc7a   : > { %v16770_v42 = vpop.f32.mrb[87].mxu0 }
 0xc7b   : > { %v13373_v37 = vadd.f32 %v16768_v23, %v15210_v25  ;;  %v16771_v29 = vadd.f32 %v16770_v42, %v16769_v32 }
 0xc7c   : > { %v16788_v36 = vpop.f32.mrb[44].mxu1 }
 0xc7d   : > { %v16789_v11 = vpop.f32.mrb[45].mxu1  ;;  %v13376_v41 = vadd.f32 %v16771_v29, %v15210_v25 }
 0xc7e   : > { %v16790_v13 = vadd.f32 %v16789_v11, %v16788_v36  ;;  %v16791_v27 = vpop.f32.mrb[46].mxu1 }
 0xc7f   : > { %v16792_v45 = vpop.f32.mrb[47].mxu1 }
 0xc80   : > { %v13414_v43 = vadd.f32 %v16790_v13, %v13373_v37  ;;  %v16793_v24 = vadd.f32 %v16792_v45, %v16791_v27 }
 0xc82   : > { %v13417_v21 = vadd.f32 %v16793_v24, %v13376_v41 }
 0xc97   : > { %v16810_v34 = vpop.f32.mrb[88].mxu0 }
 0xc98   : > { %v16811_v46 = vpop.f32.mrb[89].mxu0 }
 0xc99   : > { %v16812_v38 = vadd.f32 %v16811_v46, %v16810_v34  ;;  %v16813_v50 = vpop.f32.mrb[90].mxu0 }
 0xc9a   : > { %v16814_v55 = vpop.f32.mrb[91].mxu0 }
 0xc9b   : > { %v13455_v39 = vadd.f32 %v16812_v38, %v13414_v43  ;;  %v16815_v0 = vadd.f32 %v16814_v55, %v16813_v50 }
 0xc9c   : > { %v16832_v49 = vpop.f32.mrb[48].mxu1 }
 0xc9d   : > { %v16833_v15 = vpop.f32.mrb[49].mxu1  ;;  %v13458_v30 = vadd.f32 %v16815_v0, %v13417_v21 }
 0xc9e   : > { %v16834_v40 = vadd.f32 %v16833_v15, %v16832_v49  ;;  %v16835_v54 = vpop.f32.mrb[50].mxu1 }
 0xc9f   : > { %v16836_v20 = vpop.f32.mrb[51].mxu1 }
 0xca0   : > { %v16837_v35 = vadd.f32 %v16836_v20, %v16835_v54  ;;  %v13496_v60 = vadd.f32 %v16834_v40, %v13455_v39 }
 0xca2   : > { %v13499_v3 = vadd.f32 %v16837_v35, %v13458_v30 }
 0xcb7   : > { %v13536_v18 = vpop.f32.mrb[92].mxu0 }
 0xcb8   : > { %v13537_v12 = vadd.f32 %v13536_v18, %v13496_v60  ;;  %v17073_v58 = vpop.f32.mrb[93].mxu0 }
 0xcb9   : > { %v13539_v51 = vpop.f32.mrb[94].mxu0 }
 0xcba   : > { %v13543_v63 = vmax.f32 %v13537_v12, 0.0  ;;  %v13540_v26 = vadd.f32 %v13539_v51, %v13499_v3  ;;  %v17074_v4 = vpop.f32.mrb[95].mxu0 }
 0xcbc   : > { %13545 = vst [vmem:[%s402_s18] sm:$0xff] %v13543_v63  ;;  %v13544_v2 = vmax.f32 %v13540_v26, 0.0 }
 0xcbe   : > { %13546 = vst [vmem:[%s402_s18 + $0x8] sm:$0x1] %v13544_v2 }
 0xcc3   : > { %v13547_v59 = vld [vmem:[%s402_s18] ss:$2 sm:$0x1]  ;;  %v15292_v1 = vld [vmem:[%s402_s18 + $0x1] ss:$2 sm:$0x1] }
 0xcc4   : > { %v15293_v61 = vld [vmem:[%s402_s18 + $0x3] ss:$2 sm:$0x1]  ;;  %v15294_v10 = vld [vmem:[%s402_s18 + $0x4] ss:$2 sm:$0x1]  ;;  %v13554_v7 = vmax.f32 %v13547_v59, %v15292_v1 }
 0xcc5   : > { %v13555_v48 = vmax.f32 %v15293_v61, %v15294_v10 }
 0xcc7   : > { %v13556_v6 = vmax.f32 %v13554_v7, %v13555_v48 }
 0xcc9   : > { %13557 = vst [vmem:[%s406_s22] sm:$0x1] %v13556_v6 }
 0xcca PF: > { %s21_s13 = sadd.s32 1, %s18396_s13  }
 0xccb   : > { %p18_p4 = scmp.ge.s32.totalorder %s21_s13, 4  }
 0xccd   :  { %20 = sbr.rel (!%p18_p4) target bundleno = 1 (0x1), region = 178 }

</bundles_post_ra>
